<compile_context>
chip_gen: v6e
topology: v6e:2x2x1
jax: 0.10.0
libtpu: 0.0.40
codegen_flags: <defaults>
</compile_context>

<pallas_src>
import functools

import jax
import jax.numpy as jnp
from jax.experimental import pallas as pl
from jax.experimental.pallas import tpu as pltpu
from jax.scipy.linalg import block_diag


CFG = dict(
    vocab_size=100,
    max_position=16,
    type_vocab=2,
    hidden=32,
    num_heads=4,
    num_layers=2,
    intermediate=64,
)

NUM_MODELS = 3
NPAD = 128          # each classifier head padded to a lane-dense 128-wide band
LN_EPS = 1e-12
NEG_INF = -1e9
TRANS_B = (((1,), (1,)), ((), ()))   # dot_general dims for A @ B^T


# ------------------------------ fused kernel -------------------------------

def _fused_hbert_kernel(emb_ref, amask_ref, segavg_ref, rep_ref, unrep_ref,
                        hmask_ref, fold_ref, foldt_ref, clspick_ref,
                        eg_ref, eb_ref,
                        wq_ref, bq_ref, wk_ref, bk_ref, wv_ref, bv_ref,
                        wo_ref, bo_ref, g1_ref, b1_ref,
                        wi_ref, bi_ref, wf_ref, bf_ref, g2_ref, b2_ref,
                        pw_ref, pb_ref, cw_ref, cb_ref,
                        out_ref, *, num_layers, eps):
    # Hoisted shape-only constants (host-built, resident in VMEM).
    seg_avg = segavg_ref[...]     # (Hc, Hc)  per-model-block averaging (1/H)
    rep = rep_ref[...]            # (G*BS, BS) row replication (g, i) <- i
    unrep = unrep_ref[...]        # (BS, G*BS) sum over g
    hmask = hmask_ref[...]        # (G*BS, Hc) keep only group-g columns
    fold = fold_ref[...]          # (Hc, dh)  column c -> lane c % dh
    foldt = foldt_ref[...]        # (dh, Hc)  inverse expansion
    amask = amask_ref[...]        # (G*BS, G*BS) additive attention mask

    def mm(a, b):
        return jnp.dot(a, b, preferred_element_type=jnp.float32)

    def seg_ln(x, g, b):
        # Segment-wise LayerNorm over each model's 32-lane block, done with
        # the block-diagonal averaging matmul (MXU) instead of lane masking.
        mu = mm(x, seg_avg)
        xc = x - mu
        var = mm(xc * xc, seg_avg)
        return xc * jax.lax.rsqrt(var + eps) * g + b

    def fold_heads(rows, w, bias):
        # rows: (G*BS, Hc) row-replicated activations.
        # (rows @ W_blockdiag + b) keeps every model's projection; the group
        # mask + fold matmul then pick exactly head-g's dh columns per row,
        # yielding the folded (G*BS, dh) tensor with no reshape/transpose.
        y = mm(rows, w) + bias
        return mm(y * hmask, fold)

    x = seg_ln(emb_ref[...], eg_ref[...], eb_ref[...])          # (BS, Hc)

    for l in range(num_layers):                                  # unrolled
        x_rep = mm(rep, x)                                       # (G*BS, Hc)

        qf = fold_heads(x_rep, wq_ref[l], bq_ref[l])             # (G*BS, dh)
        kf = fold_heads(x_rep, wk_ref[l], bk_ref[l])
        vf = fold_heads(x_rep, wv_ref[l], bv_ref[l])

        # One wide score matmul for all models x heads x batches.
        s = jax.lax.dot_general(qf, kf, TRANS_B,
                                preferred_element_type=jnp.float32) + amask
        s = s - jnp.max(s, axis=-1, keepdims=True)
        p = jnp.exp(s)
        p = p / jnp.sum(p, axis=-1, keepdims=True)               # exact div
        ctxf = mm(p, vf)                                         # (G*BS, dh)

        # Unfold back to (BS, Hc) with constant matmuls, then output proj.
        ctx = mm(unrep, mm(ctxf, foldt) * hmask)                 # (BS, Hc)
        attn_out = mm(ctx, wo_ref[l]) + bo_ref[l]
        x = seg_ln(x + attn_out, g1_ref[l], b1_ref[l])

        # Feed-forward (block-diagonal per model) + residual + LayerNorm.
        inter = mm(x, wi_ref[l]) + bi_ref[l]
        # TODO(synk): HF BERT default is erf-based GELU; tanh approximation
        # kept here for guaranteed Mosaic lowering.
        inter = jax.nn.gelu(inter, approximate=True)
        ffn = mm(inter, wf_ref[l]) + bf_ref[l]
        x = seg_ln(x + ffn, g2_ref[l], b2_ref[l])

    # Pooler + classifier on CLS rows only (picked via a constant matmul).
    cls = mm(clspick_ref[...], x)                                # (B, Hc)
    pooled = jnp.tanh(mm(cls, pw_ref[...]) + pb_ref[...])
    logits = mm(pooled, cw_ref[...]) + cb_ref[...]               # (B, 3*NPAD)
    out_ref[...] = logits.astype(out_ref.dtype)


# --------------------------- params & packing -------------------------------

def init_bert_params(key, num_labels, cfg=CFG):
    H, I = cfg["hidden"], cfg["intermediate"]
    ks = iter(jax.random.split(key, 64))
    w = lambda shape: 0.02 * jax.random.normal(next(ks), shape, jnp.float32)
    zeros = lambda shape: jnp.zeros(shape, jnp.float32)
    ones = lambda shape: jnp.ones(shape, jnp.float32)

    params = {
        "word_emb": w((cfg["vocab_size"], H)),
        "pos_emb": w((cfg["max_position"], H)),
        "type_emb": w((cfg["type_vocab"], H)),
        "emb_ln_g": ones((H,)), "emb_ln_b": zeros((H,)),
        "layers": [],
        "pooler_w": w((H, H)), "pooler_b": zeros((H,)),
        "cls_w": w((H, num_labels)), "cls_b": zeros((num_labels,)),
    }
    for _ in range(cfg["num_layers"]):
        params["layers"].append({
            "q_w": w((H, H)), "q_b": zeros((H,)),
            "k_w": w((H, H)), "k_b": zeros((H,)),
            "v_w": w((H, H)), "v_b": zeros((H,)),
            "o_w": w((H, H)), "o_b": zeros((H,)),
            "ln1_g": ones((H,)), "ln1_b": zeros((H,)),
            "i_w": w((H, I)), "i_b": zeros((I,)),
            "f_w": w((I, H)), "f_b": zeros((H,)),
            "ln2_g": ones((H,)), "ln2_b": zeros((H,)),
        })
    return params


def pack_params(params_list, cfg=CFG, npad=NPAD):
    """Block-diagonalise the 3 models into one lane-folded parameter set."""
    H, I, nh, L = (cfg["hidden"], cfg["intermediate"], cfg["num_heads"],
                   cfg["num_layers"])
    M = len(params_list)
    Hc = M * H
    dh = H // nh
    scale = 1.0 / (dh ** 0.5)

    def cat_vec(vecs, width):
        return jnp.concatenate(vecs, axis=0).reshape(1, width)

    keys = ["wq", "bq", "wk", "bk", "wv", "bv", "wo", "bo",
            "g1", "b1", "wi", "bi", "wf", "bf", "g2", "b2"]
    layers_w = {k: [] for k in keys}
    for l in range(L):
        lps = [p["layers"][l] for p in params_list]
        # Q weight/bias pre-scaled by 1/sqrt(dh) (free: done on host).
        layers_w["wq"].append(block_diag(*[lp["q_w"] * scale for lp in lps]))
        layers_w["bq"].append(cat_vec([lp["q_b"] * scale for lp in lps], Hc))
        layers_w["wk"].append(block_diag(*[lp["k_w"] for lp in lps]))
        layers_w["bk"].append(cat_vec([lp["k_b"] for lp in lps], Hc))
        layers_w["wv"].append(block_diag(*[lp["v_w"] for lp in lps]))
        layers_w["bv"].append(cat_vec([lp["v_b"] for lp in lps], Hc))
        layers_w["wo"].append(block_diag(*[lp["o_w"] for lp in lps]))
        layers_w["bo"].append(cat_vec([lp["o_b"] for lp in lps], Hc))
        layers_w["g1"].append(cat_vec([lp["ln1_g"] for lp in lps], Hc))
        layers_w["b1"].append(cat_vec([lp["ln1_b"] for lp in lps], Hc))
        layers_w["wi"].append(block_diag(*[lp["i_w"] for lp in lps]))
        layers_w["bi"].append(cat_vec([lp["i_b"] for lp in lps], M * I))
        layers_w["wf"].append(block_diag(*[lp["f_w"] for lp in lps]))
        layers_w["bf"].append(cat_vec([lp["f_b"] for lp in lps], Hc))
        layers_w["g2"].append(cat_vec([lp["ln2_g"] for lp in lps], Hc))
        layers_w["b2"].append(cat_vec([lp["ln2_b"] for lp in lps], Hc))

    packed = {k: jnp.stack(v, axis=0) for k, v in layers_w.items()}

    packed["word_emb"] = jnp.stack([p["word_emb"] for p in params_list], 0)
    packed["pos_emb"] = jnp.stack([p["pos_emb"] for p in params_list], 0)
    packed["type_emb"] = jnp.stack([p["type_emb"] for p in params_list], 0)
    packed["emb_g"] = cat_vec([p["emb_ln_g"] for p in params_list], Hc)
    packed["emb_b"] = cat_vec([p["emb_ln_b"] for p in params_list], Hc)
    packed["pw"] = block_diag(*[p["pooler_w"] for p in params_list])
    packed["pb"] = cat_vec([p["pooler_b"] for p in params_list], Hc)
    packed["cw"] = block_diag(*[
        jnp.pad(p["cls_w"], ((0, 0), (0, npad - p["cls_w"].shape[1])))
        for p in params_list])                                   # (Hc, M*npad)
    packed["cb"] = cat_vec([
        jnp.pad(p["cls_b"], (0, npad - p["cls_b"].shape[0]))
        for p in params_list], M * npad)
    return packed


# -------------------- host-built fold / mask constants ----------------------

def _fold_constants(B, S, cfg=CFG, num_models=NUM_MODELS):
    H, nh = cfg["hidden"], cfg["num_heads"]
    dh = H // nh
    M = num_models
    Hc = M * H
    G = M * nh
    BS = B * S
    f32 = jnp.float32

    rep = jnp.tile(jnp.eye(BS, dtype=f32), (G, 1))               # (G*BS, BS)
    unrep = rep.T                                                # (BS, G*BS)
    rowg = jnp.arange(G * BS) // BS
    colg = jnp.arange(Hc) // dh
    hmask = (rowg[:, None] == colg[None, :]).astype(f32)         # (G*BS, Hc)
    fold = (jnp.arange(Hc)[:, None] % dh
            == jnp.arange(dh)[None, :]).astype(f32)              # (Hc, dh)
    foldt = fold.T                                               # (dh, Hc)
    seg = jnp.arange(Hc) // H
    seg_avg = (seg[:, None] == seg[None, :]).astype(f32) / H     # (Hc, Hc)
    clspick = (jnp.arange(BS)[None, :]
               == (jnp.arange(B) * S)[:, None]).astype(f32)      # (B, BS)
    return rep, unrep, hmask, fold, foldt, seg_avg, clspick


def _build_attn_mask(attention_mask, G):
    """Head-block-diag AND batch-block-diag AND key-padding additive mask."""
    B, S = attention_mask.shape
    BS = B * S
    am = attention_mask.reshape(BS).astype(jnp.float32)
    rowg = jnp.arange(G * BS) // BS
    rowi = jnp.arange(G * BS) % BS
    same_g = rowg[:, None] == rowg[None, :]
    same_b = (rowi[:, None] // S) == (rowi[None, :] // S)
    key_ok = am[rowi][None, :] > 0.5
    allow = jnp.logical_and(jnp.logical_and(same_g, same_b), key_ok)
    return jnp.where(allow, 0.0, NEG_INF).astype(jnp.float32)


# --------------------------------- forward ----------------------------------

def hierarchical_bert_forward(packed, input_ids, attention_mask,
                              num_labels, cfg=CFG):
    B, S = input_ids.shape
    H, nh, L, I = (cfg["hidden"], cfg["num_heads"], cfg["num_layers"],
                   cfg["intermediate"])
    M = NUM_MODELS
    Hc = M * H
    G = M * nh
    dh = H // nh
    BS = B * S

    # Embeddings for all 3 models, lane-concatenated (plain-JAX gather glue).
    # token_type_ids are implicitly all zeros (PyTorch/HF default).
    embs = []
    for m in range(M):
        e = (packed["word_emb"][m][input_ids]
             + packed["pos_emb"][m][:S][None, :, :]
             + packed["type_emb"][m][0][None, None, :])
        embs.append(e)
    emb = jnp.concatenate(embs, axis=-1).reshape(BS, Hc).astype(jnp.float32)

    rep, unrep, hmask, fold, foldt, seg_avg, clspick = _fold_constants(
        B, S, cfg, M)
    amask = _build_attn_mask(attention_mask, G)

    def fs(shape):
        nd = len(shape)
        return pl.BlockSpec(tuple(shape), lambda i, _nd=nd: (0,) * _nd)

    operands = [emb, amask, seg_avg, rep, unrep, hmask, fold, foldt, clspick,
                packed["emb_g"], packed["emb_b"],
                packed["wq"], packed["bq"], packed["wk"], packed["bk"],
                packed["wv"], packed["bv"], packed["wo"], packed["bo"],
                packed["g1"], packed["b1"],
                packed["wi"], packed["bi"], packed["wf"], packed["bf"],
                packed["g2"], packed["b2"],
                packed["pw"], packed["pb"], packed["cw"], packed["cb"]]
    in_specs = [fs(op.shape) for op in operands]

    # Advisory cost estimate so XLA can schedule around the custom call.
    gbs = G * BS
    per_layer_flops = (
        2 * gbs * BS * Hc                       # row replication
        + 3 * (2 * gbs * Hc * Hc + 2 * gbs * Hc * dh)   # q/k/v + fold
        + 2 * gbs * gbs * dh * 2                # scores + PV
        + 2 * gbs * dh * Hc + 2 * BS * gbs * Hc         # unfold
        + 2 * BS * Hc * Hc                      # out proj
        + 4 * 2 * BS * Hc * Hc                  # 2 segment LayerNorms
        + 2 * 2 * BS * Hc * (M * I))            # FFN
    flops = int(L * per_layer_flops + 2 * B * Hc * Hc + 2 * B * Hc * M * NPAD)
    transcendentals = int(L * (gbs * gbs + BS * M * I) + B * Hc)
    bytes_accessed = int(sum(op.size for op in operands) * 4
                         + B * M * NPAD * 4)
    cost = pl.CostEstimate(flops=flops, transcendentals=transcendentals,
                           bytes_accessed=bytes_accessed)

    out = pl.pallas_call(
        functools.partial(_fused_hbert_kernel, num_layers=L, eps=LN_EPS),
        out_shape=jax.ShapeDtypeStruct((B, M * NPAD), jnp.float32),
        grid=(1,),
        in_specs=in_specs,
        out_specs=fs((B, M * NPAD)),
        compiler_params=pltpu.CompilerParams(
            dimension_semantics=("arbitrary",)),
        cost_estimate=cost,
    )(*operands)

    imrad_logits = out[:, 0:num_labels[0]]
    subsection_logits = out[:, NPAD:NPAD + num_labels[1]]
    subsubsection_logits = out[:, 2 * NPAD:2 * NPAD + num_labels[2]]
    return imrad_logits, subsection_logits, subsubsection_logits


# --------------------------- pure-JAX reference ------------------------------

def _bert_ref(p, input_ids, attention_mask, cfg=CFG):
    B, S = input_ids.shape
    H, nh = cfg["hidden"], cfg["num_heads"]
    dh = H // nh

    def ln(v, g, b):
        mu = v.mean(-1, keepdims=True)
        var = ((v - mu) ** 2).mean(-1, keepdims=True)
        return (v - mu) * jax.lax.rsqrt(var + LN_EPS) * g + b

    x = (p["word_emb"][input_ids] + p["pos_emb"][:S][None]
         + p["type_emb"][0][None, None])
    x = ln(x, p["emb_ln_g"], p["emb_ln_b"])
    add_mask = (1.0 - attention_mask.astype(jnp.float32))[:, None, None, :] * NEG_INF
    for lp in p["layers"]:
        q = (x @ lp["q_w"] + lp["q_b"]).reshape(B, S, nh, dh).transpose(0, 2, 1, 3)
        k = (x @ lp["k_w"] + lp["k_b"]).reshape(B, S, nh, dh).transpose(0, 2, 1, 3)
        v = (x @ lp["v_w"] + lp["v_b"]).reshape(B, S, nh, dh).transpose(0, 2, 1, 3)
        s = jnp.einsum("bhqd,bhkd->bhqk", q, k) / (dh ** 0.5) + add_mask
        pr = jax.nn.softmax(s, axis=-1)
        ctx = jnp.einsum("bhqk,bhkd->bhqd", pr, v).transpose(0, 2, 1, 3).reshape(B, S, H)
        x = ln(x + ctx @ lp["o_w"] + lp["o_b"], lp["ln1_g"], lp["ln1_b"])
        inter = jax.nn.gelu(x @ lp["i_w"] + lp["i_b"], approximate=True)
        x = ln(x + inter @ lp["f_w"] + lp["f_b"], lp["ln2_g"], lp["ln2_b"])
    pooled = jnp.tanh(x[:, 0, :] @ p["pooler_w"] + p["pooler_b"])
    return pooled @ p["cls_w"] + p["cls_b"]


# ----------------------------------- main ------------------------------------

if __name__ == "__main__":
    key = jax.random.PRNGKey(0)
    k_ids, k_p1, k_p2, k_p3 = jax.random.split(key, 4)

    B, S = 2, 8
    num_imrad_classes = 5
    num_subsection_classes = 26 + 1
    num_subsubsection_classes = 57 + 1
    num_labels = (num_imrad_classes, num_subsection_classes,
                  num_subsubsection_classes)
    assert max(num_labels) <= NPAD

    input_ids = jax.random.randint(k_ids, (B, S), 0, CFG["vocab_size"],
                                   dtype=jnp.int32)
    attention_mask = jnp.array(
        [[1, 1, 1, 1, 1, 1, 1, 1],
         [1, 1, 1, 1, 1, 1, 0, 0]], dtype=jnp.int32)

    params_list = [
        init_bert_params(k_p1, num_imrad_classes),
        init_bert_params(k_p2, num_subsection_classes),
        init_bert_params(k_p3, num_subsubsection_classes),
    ]
    packed = pack_params(params_list)

    forward = jax.jit(functools.partial(hierarchical_bert_forward,
                                        num_labels=num_labels))
    imrad_logits, sub_logits, subsub_logits = jax.block_until_ready(
        forward(packed, input_ids, attention_mask))

    assert imrad_logits.shape == (B, num_imrad_classes)
    assert sub_logits.shape == (B, num_subsection_classes)
    assert subsub_logits.shape == (B, num_subsubsection_classes)
    assert jnp.all(jnp.isfinite(imrad_logits))
    assert jnp.all(jnp.isfinite(sub_logits))
    assert jnp.all(jnp.isfinite(subsub_logits))

    # Numerical check against a plain-JAX per-model BERT reference.
    refs = [
        _bert_ref(params_list[0], input_ids, attention_mask),
        _bert_ref(params_list[1], input_ids, attention_mask),
        _bert_ref(params_list[2], input_ids, attention_mask),
    ]
    for got, ref in zip((imrad_logits, sub_logits, subsub_logits), refs):
        assert jnp.allclose(got, ref, atol=1e-3, rtol=1e-3)

    print("KERNEL_OK")
</pallas_src>

<mosaic_0001>
module attributes {stable_mosaic.version = 11 : i64} {
  func.func @_fused_hbert_kernel(%arg0: i32, %arg1: memref<16x96xf32, #tpu.memory_space<vmem>>, %arg2: memref<192x192xf32, #tpu.memory_space<vmem>>, %arg3: memref<96x96xf32, #tpu.memory_space<vmem>>, %arg4: memref<192x16xf32, #tpu.memory_space<vmem>>, %arg5: memref<16x192xf32, #tpu.memory_space<vmem>>, %arg6: memref<192x96xf32, #tpu.memory_space<vmem>>, %arg7: memref<96x8xf32, #tpu.memory_space<vmem>>, %arg8: memref<8x96xf32, #tpu.memory_space<vmem>>, %arg9: memref<2x16xf32, #tpu.memory_space<vmem>>, %arg10: memref<1x96xf32, #tpu.memory_space<vmem>>, %arg11: memref<1x96xf32, #tpu.memory_space<vmem>>, %arg12: memref<2x96x96xf32, #tpu.memory_space<vmem>>, %arg13: memref<2x1x96xf32, #tpu.memory_space<vmem>>, %arg14: memref<2x96x96xf32, #tpu.memory_space<vmem>>, %arg15: memref<2x1x96xf32, #tpu.memory_space<vmem>>, %arg16: memref<2x96x96xf32, #tpu.memory_space<vmem>>, %arg17: memref<2x1x96xf32, #tpu.memory_space<vmem>>, %arg18: memref<2x96x96xf32, #tpu.memory_space<vmem>>, %arg19: memref<2x1x96xf32, #tpu.memory_space<vmem>>, %arg20: memref<2x1x96xf32, #tpu.memory_space<vmem>>, %arg21: memref<2x1x96xf32, #tpu.memory_space<vmem>>, %arg22: memref<2x96x192xf32, #tpu.memory_space<vmem>>, %arg23: memref<2x1x192xf32, #tpu.memory_space<vmem>>, %arg24: memref<2x192x96xf32, #tpu.memory_space<vmem>>, %arg25: memref<2x1x96xf32, #tpu.memory_space<vmem>>, %arg26: memref<2x1x96xf32, #tpu.memory_space<vmem>>, %arg27: memref<2x1x96xf32, #tpu.memory_space<vmem>>, %arg28: memref<96x96xf32, #tpu.memory_space<vmem>>, %arg29: memref<1x96xf32, #tpu.memory_space<vmem>>, %arg30: memref<96x384xf32, #tpu.memory_space<vmem>>, %arg31: memref<1x384xf32, #tpu.memory_space<vmem>>, %arg32: memref<2x384xf32, #tpu.memory_space<vmem>>) attributes {dimension_semantics = [#tpu.dimension_semantics<arbitrary>], iteration_bounds = array<i64: 1>, scalar_prefetch = 0 : i64, scratch_operands = 0 : i64, tpu.core_type = #tpu.core_type<tc>, window_params = [{pipeline_mode = #tpu.pipeline_mode<synchronous>, transform_indices = @transform_0, window_bounds = array<i64: 16, 96>}, {pipeline_mode = #tpu.pipeline_mode<synchronous>, transform_indices = @transform_1, window_bounds = array<i64: 192, 192>}, {pipeline_mode = #tpu.pipeline_mode<synchronous>, transform_indices = @transform_2, window_bounds = array<i64: 96, 96>}, {pipeline_mode = #tpu.pipeline_mode<synchronous>, transform_indices = @transform_3, window_bounds = array<i64: 192, 16>}, {pipeline_mode = #tpu.pipeline_mode<synchronous>, transform_indices = @transform_4, window_bounds = array<i64: 16, 192>}, {pipeline_mode = #tpu.pipeline_mode<synchronous>, transform_indices = @transform_5, window_bounds = array<i64: 192, 96>}, {pipeline_mode = #tpu.pipeline_mode<synchronous>, transform_indices = @transform_6, window_bounds = array<i64: 96, 8>}, {pipeline_mode = #tpu.pipeline_mode<synchronous>, transform_indices = @transform_7, window_bounds = array<i64: 8, 96>}, {pipeline_mode = #tpu.pipeline_mode<synchronous>, transform_indices = @transform_8, window_bounds = array<i64: 2, 16>}, {pipeline_mode = #tpu.pipeline_mode<synchronous>, transform_indices = @transform_9, window_bounds = array<i64: 1, 96>}, {pipeline_mode = #tpu.pipeline_mode<synchronous>, transform_indices = @transform_10, window_bounds = array<i64: 1, 96>}, {pipeline_mode = #tpu.pipeline_mode<synchronous>, transform_indices = @transform_11, window_bounds = array<i64: 2, 96, 96>}, {pipeline_mode = #tpu.pipeline_mode<synchronous>, transform_indices = @transform_12, window_bounds = array<i64: 2, 1, 96>}, {pipeline_mode = #tpu.pipeline_mode<synchronous>, transform_indices = @transform_13, window_bounds = array<i64: 2, 96, 96>}, {pipeline_mode = #tpu.pipeline_mode<synchronous>, transform_indices = @transform_14, window_bounds = array<i64: 2, 1, 96>}, {pipeline_mode = #tpu.pipeline_mode<synchronous>, transform_indices = @transform_15, window_bounds = array<i64: 2, 96, 96>}, {pipeline_mode = #tpu.pipeline_mode<synchronous>, transform_indices = @transform_16, window_bounds = array<i64: 2, 1, 96>}, {pipeline_mode = #tpu.pipeline_mode<synchronous>, transform_indices = @transform_17, window_bounds = array<i64: 2, 96, 96>}, {pipeline_mode = #tpu.pipeline_mode<synchronous>, transform_indices = @transform_18, window_bounds = array<i64: 2, 1, 96>}, {pipeline_mode = #tpu.pipeline_mode<synchronous>, transform_indices = @transform_19, window_bounds = array<i64: 2, 1, 96>}, {pipeline_mode = #tpu.pipeline_mode<synchronous>, transform_indices = @transform_20, window_bounds = array<i64: 2, 1, 96>}, {pipeline_mode = #tpu.pipeline_mode<synchronous>, transform_indices = @transform_21, window_bounds = array<i64: 2, 96, 192>}, {pipeline_mode = #tpu.pipeline_mode<synchronous>, transform_indices = @transform_22, window_bounds = array<i64: 2, 1, 192>}, {pipeline_mode = #tpu.pipeline_mode<synchronous>, transform_indices = @transform_23, window_bounds = array<i64: 2, 192, 96>}, {pipeline_mode = #tpu.pipeline_mode<synchronous>, transform_indices = @transform_24, window_bounds = array<i64: 2, 1, 96>}, {pipeline_mode = #tpu.pipeline_mode<synchronous>, transform_indices = @transform_25, window_bounds = array<i64: 2, 1, 96>}, {pipeline_mode = #tpu.pipeline_mode<synchronous>, transform_indices = @transform_26, window_bounds = array<i64: 2, 1, 96>}, {pipeline_mode = #tpu.pipeline_mode<synchronous>, transform_indices = @transform_27, window_bounds = array<i64: 96, 96>}, {pipeline_mode = #tpu.pipeline_mode<synchronous>, transform_indices = @transform_28, window_bounds = array<i64: 1, 96>}, {pipeline_mode = #tpu.pipeline_mode<synchronous>, transform_indices = @transform_29, window_bounds = array<i64: 96, 384>}, {pipeline_mode = #tpu.pipeline_mode<synchronous>, transform_indices = @transform_30, window_bounds = array<i64: 1, 384>}, {pipeline_mode = #tpu.pipeline_mode<synchronous>, transform_indices = @transform_31, window_bounds = array<i64: 2, 384>}]} {
    %c0 = arith.constant 0 : index
    %c0_0 = arith.constant 0 : index
    %0 = vector.load %arg3[%c0, %c0_0] : memref<96x96xf32, #tpu.memory_space<vmem>>, vector<96x96xf32>
    %c0_1 = arith.constant 0 : index
    %c0_2 = arith.constant 0 : index
    %1 = vector.load %arg4[%c0_1, %c0_2] : memref<192x16xf32, #tpu.memory_space<vmem>>, vector<192x16xf32>
    %c0_3 = arith.constant 0 : index
    %c0_4 = arith.constant 0 : index
    %2 = vector.load %arg5[%c0_3, %c0_4] : memref<16x192xf32, #tpu.memory_space<vmem>>, vector<16x192xf32>
    %c0_5 = arith.constant 0 : index
    %c0_6 = arith.constant 0 : index
    %3 = vector.load %arg6[%c0_5, %c0_6] : memref<192x96xf32, #tpu.memory_space<vmem>>, vector<192x96xf32>
    %c0_7 = arith.constant 0 : index
    %c0_8 = arith.constant 0 : index
    %4 = vector.load %arg7[%c0_7, %c0_8] : memref<96x8xf32, #tpu.memory_space<vmem>>, vector<96x8xf32>
    %c0_9 = arith.constant 0 : index
    %c0_10 = arith.constant 0 : index
    %5 = vector.load %arg8[%c0_9, %c0_10] : memref<8x96xf32, #tpu.memory_space<vmem>>, vector<8x96xf32>
    %c0_11 = arith.constant 0 : index
    %c0_12 = arith.constant 0 : index
    %6 = vector.load %arg2[%c0_11, %c0_12] : memref<192x192xf32, #tpu.memory_space<vmem>>, vector<192x192xf32>
    %c0_13 = arith.constant 0 : index
    %c0_14 = arith.constant 0 : index
    %7 = vector.load %arg1[%c0_13, %c0_14] : memref<16x96xf32, #tpu.memory_space<vmem>>, vector<16x96xf32>
    %c0_15 = arith.constant 0 : index
    %c0_16 = arith.constant 0 : index
    %8 = vector.load %arg10[%c0_15, %c0_16] : memref<1x96xf32, #tpu.memory_space<vmem>>, vector<1x96xf32>
    %c0_17 = arith.constant 0 : index
    %c0_18 = arith.constant 0 : index
    %9 = vector.load %arg11[%c0_17, %c0_18] : memref<1x96xf32, #tpu.memory_space<vmem>>, vector<1x96xf32>
    %cst = arith.constant dense<0.000000e+00> : vector<16x96xf32>
    %10 = tpu.matmul %7, %0, %cst {dimension_numbers = #tpu.dot_dimension_numbers<[1], [0], [0], [1], [0, 0, 1, 1], [], []>} : vector<16x96xf32>, vector<96x96xf32>, vector<16x96xf32> -> vector<16x96xf32>
    %11 = arith.subf %7, %10 : vector<16x96xf32>
    %12 = arith.mulf %11, %11 : vector<16x96xf32>
    %cst_19 = arith.constant dense<0.000000e+00> : vector<16x96xf32>
    %13 = tpu.matmul %12, %0, %cst_19 {dimension_numbers = #tpu.dot_dimension_numbers<[1], [0], [0], [1], [0, 0, 1, 1], [], []>} : vector<16x96xf32>, vector<96x96xf32>, vector<16x96xf32> -> vector<16x96xf32>
    %cst_20 = arith.constant 9.99999996E-13 : f32
    %14 = vector.broadcast %cst_20 : f32 to vector<16x96xf32>
    %15 = arith.addf %13, %14 : vector<16x96xf32>
    %16 = math.rsqrt %15 : vector<16x96xf32>
    %17 = arith.mulf %11, %16 : vector<16x96xf32>
    %18 = vector.broadcast %8 : vector<1x96xf32> to vector<16x96xf32>
    %19 = arith.mulf %17, %18 : vector<16x96xf32>
    %20 = vector.broadcast %9 : vector<1x96xf32> to vector<16x96xf32>
    %21 = arith.addf %19, %20 : vector<16x96xf32>
    %cst_21 = arith.constant dense<0.000000e+00> : vector<192x96xf32>
    %22 = tpu.matmul %1, %21, %cst_21 {dimension_numbers = #tpu.dot_dimension_numbers<[1], [0], [0], [1], [0, 0, 1, 1], [], []>} : vector<192x16xf32>, vector<16x96xf32>, vector<192x96xf32> -> vector<192x96xf32>
    %c0_22 = arith.constant 0 : index
    %c0_23 = arith.constant 0 : index
    %c0_24 = arith.constant 0 : index
    %23 = vector.load %arg12[%c0_22, %c0_23, %c0_24] : memref<2x96x96xf32, #tpu.memory_space<vmem>>, vector<1x96x96xf32>
    %24 = vector.shape_cast %23 : vector<1x96x96xf32> to vector<96x96xf32>
    %c0_25 = arith.constant 0 : index
    %c0_26 = arith.constant 0 : index
    %c0_27 = arith.constant 0 : index
    %25 = vector.load %arg13[%c0_25, %c0_26, %c0_27] : memref<2x1x96xf32, #tpu.memory_space<vmem>>, vector<1x1x96xf32>
    %26 = vector.shape_cast %25 : vector<1x1x96xf32> to vector<1x96xf32>
    %cst_28 = arith.constant dense<0.000000e+00> : vector<192x96xf32>
    %27 = tpu.matmul %22, %24, %cst_28 {dimension_numbers = #tpu.dot_dimension_numbers<[1], [0], [0], [1], [0, 0, 1, 1], [], []>} : vector<192x96xf32>, vector<96x96xf32>, vector<192x96xf32> -> vector<192x96xf32>
    %28 = vector.broadcast %26 : vector<1x96xf32> to vector<192x96xf32>
    %29 = arith.addf %27, %28 : vector<192x96xf32>
    %30 = arith.mulf %29, %3 : vector<192x96xf32>
    %cst_29 = arith.constant dense<0.000000e+00> : vector<192x8xf32>
    %31 = tpu.matmul %30, %4, %cst_29 {dimension_numbers = #tpu.dot_dimension_numbers<[1], [0], [0], [1], [0, 0, 1, 1], [], []>} : vector<192x96xf32>, vector<96x8xf32>, vector<192x8xf32> -> vector<192x8xf32>
    %c0_30 = arith.constant 0 : index
    %c0_31 = arith.constant 0 : index
    %c0_32 = arith.constant 0 : index
    %32 = vector.load %arg14[%c0_30, %c0_31, %c0_32] : memref<2x96x96xf32, #tpu.memory_space<vmem>>, vector<1x96x96xf32>
    %33 = vector.shape_cast %32 : vector<1x96x96xf32> to vector<96x96xf32>
    %c0_33 = arith.constant 0 : index
    %c0_34 = arith.constant 0 : index
    %c0_35 = arith.constant 0 : index
    %34 = vector.load %arg15[%c0_33, %c0_34, %c0_35] : memref<2x1x96xf32, #tpu.memory_space<vmem>>, vector<1x1x96xf32>
    %35 = vector.shape_cast %34 : vector<1x1x96xf32> to vector<1x96xf32>
    %cst_36 = arith.constant dense<0.000000e+00> : vector<192x96xf32>
    %36 = tpu.matmul %22, %33, %cst_36 {dimension_numbers = #tpu.dot_dimension_numbers<[1], [0], [0], [1], [0, 0, 1, 1], [], []>} : vector<192x96xf32>, vector<96x96xf32>, vector<192x96xf32> -> vector<192x96xf32>
    %37 = vector.broadcast %35 : vector<1x96xf32> to vector<192x96xf32>
    %38 = arith.addf %36, %37 : vector<192x96xf32>
    %39 = arith.mulf %38, %3 : vector<192x96xf32>
    %cst_37 = arith.constant dense<0.000000e+00> : vector<192x8xf32>
    %40 = tpu.matmul %39, %4, %cst_37 {dimension_numbers = #tpu.dot_dimension_numbers<[1], [0], [0], [1], [0, 0, 1, 1], [], []>} : vector<192x96xf32>, vector<96x8xf32>, vector<192x8xf32> -> vector<192x8xf32>
    %c0_38 = arith.constant 0 : index
    %c0_39 = arith.constant 0 : index
    %c0_40 = arith.constant 0 : index
    %41 = vector.load %arg16[%c0_38, %c0_39, %c0_40] : memref<2x96x96xf32, #tpu.memory_space<vmem>>, vector<1x96x96xf32>
    %42 = vector.shape_cast %41 : vector<1x96x96xf32> to vector<96x96xf32>
    %c0_41 = arith.constant 0 : index
    %c0_42 = arith.constant 0 : index
    %c0_43 = arith.constant 0 : index
    %43 = vector.load %arg17[%c0_41, %c0_42, %c0_43] : memref<2x1x96xf32, #tpu.memory_space<vmem>>, vector<1x1x96xf32>
    %44 = vector.shape_cast %43 : vector<1x1x96xf32> to vector<1x96xf32>
    %cst_44 = arith.constant dense<0.000000e+00> : vector<192x96xf32>
    %45 = tpu.matmul %22, %42, %cst_44 {dimension_numbers = #tpu.dot_dimension_numbers<[1], [0], [0], [1], [0, 0, 1, 1], [], []>} : vector<192x96xf32>, vector<96x96xf32>, vector<192x96xf32> -> vector<192x96xf32>
    %46 = vector.broadcast %44 : vector<1x96xf32> to vector<192x96xf32>
    %47 = arith.addf %45, %46 : vector<192x96xf32>
    %48 = arith.mulf %47, %3 : vector<192x96xf32>
    %cst_45 = arith.constant dense<0.000000e+00> : vector<192x8xf32>
    %49 = tpu.matmul %48, %4, %cst_45 {dimension_numbers = #tpu.dot_dimension_numbers<[1], [0], [0], [1], [0, 0, 1, 1], [], []>} : vector<192x96xf32>, vector<96x8xf32>, vector<192x8xf32> -> vector<192x8xf32>
    %cst_46 = arith.constant dense<0.000000e+00> : vector<192x192xf32>
    %50 = tpu.matmul %31, %40, %cst_46 {dimension_numbers = #tpu.dot_dimension_numbers<[1], [1], [0], [0], [0, 0, 1, 0], [], []>} : vector<192x8xf32>, vector<192x8xf32>, vector<192x192xf32> -> vector<192x192xf32>
    %51 = arith.addf %50, %6 : vector<192x192xf32>
    %cst_47 = arith.constant dense<0xFF800000> : vector<192xf32>
    %52 = vector.multi_reduction <maximumf>, %51, %cst_47 [1] : vector<192x192xf32> to vector<192xf32>
    %53 = vector.shape_cast %52 : vector<192xf32> to vector<192x1xf32>
    %54 = vector.broadcast %53 : vector<192x1xf32> to vector<192x192xf32>
    %55 = arith.subf %51, %54 : vector<192x192xf32>
    %56 = math.exp %55 : vector<192x192xf32>
    %cst_48 = arith.constant dense<0.000000e+00> : vector<192xf32>
    %57 = vector.multi_reduction <add>, %56, %cst_48 [1] : vector<192x192xf32> to vector<192xf32>
    %58 = vector.shape_cast %57 : vector<192xf32> to vector<192x1xf32>
    %59 = vector.broadcast %58 : vector<192x1xf32> to vector<192x192xf32>
    %60 = arith.divf %56, %59 : vector<192x192xf32>
    %cst_49 = arith.constant dense<0.000000e+00> : vector<192x8xf32>
    %61 = tpu.matmul %60, %49, %cst_49 {dimension_numbers = #tpu.dot_dimension_numbers<[1], [0], [0], [1], [0, 0, 1, 1], [], []>} : vector<192x192xf32>, vector<192x8xf32>, vector<192x8xf32> -> vector<192x8xf32>
    %cst_50 = arith.constant dense<0.000000e+00> : vector<192x96xf32>
    %62 = tpu.matmul %61, %5, %cst_50 {dimension_numbers = #tpu.dot_dimension_numbers<[1], [0], [0], [1], [0, 0, 1, 1], [], []>} : vector<192x8xf32>, vector<8x96xf32>, vector<192x96xf32> -> vector<192x96xf32>
    %63 = arith.mulf %62, %3 : vector<192x96xf32>
    %cst_51 = arith.constant dense<0.000000e+00> : vector<16x96xf32>
    %64 = tpu.matmul %2, %63, %cst_51 {dimension_numbers = #tpu.dot_dimension_numbers<[1], [0], [0], [1], [0, 0, 1, 1], [], []>} : vector<16x192xf32>, vector<192x96xf32>, vector<16x96xf32> -> vector<16x96xf32>
    %c0_52 = arith.constant 0 : index
    %c0_53 = arith.constant 0 : index
    %c0_54 = arith.constant 0 : index
    %65 = vector.load %arg18[%c0_52, %c0_53, %c0_54] : memref<2x96x96xf32, #tpu.memory_space<vmem>>, vector<1x96x96xf32>
    %66 = vector.shape_cast %65 : vector<1x96x96xf32> to vector<96x96xf32>
    %cst_55 = arith.constant dense<0.000000e+00> : vector<16x96xf32>
    %67 = tpu.matmul %64, %66, %cst_55 {dimension_numbers = #tpu.dot_dimension_numbers<[1], [0], [0], [1], [0, 0, 1, 1], [], []>} : vector<16x96xf32>, vector<96x96xf32>, vector<16x96xf32> -> vector<16x96xf32>
    %c0_56 = arith.constant 0 : index
    %c0_57 = arith.constant 0 : index
    %c0_58 = arith.constant 0 : index
    %68 = vector.load %arg19[%c0_56, %c0_57, %c0_58] : memref<2x1x96xf32, #tpu.memory_space<vmem>>, vector<1x1x96xf32>
    %69 = vector.shape_cast %68 : vector<1x1x96xf32> to vector<1x96xf32>
    %70 = vector.broadcast %69 : vector<1x96xf32> to vector<16x96xf32>
    %71 = arith.addf %67, %70 : vector<16x96xf32>
    %72 = arith.addf %21, %71 : vector<16x96xf32>
    %c0_59 = arith.constant 0 : index
    %c0_60 = arith.constant 0 : index
    %c0_61 = arith.constant 0 : index
    %73 = vector.load %arg20[%c0_59, %c0_60, %c0_61] : memref<2x1x96xf32, #tpu.memory_space<vmem>>, vector<1x1x96xf32>
    %74 = vector.shape_cast %73 : vector<1x1x96xf32> to vector<1x96xf32>
    %c0_62 = arith.constant 0 : index
    %c0_63 = arith.constant 0 : index
    %c0_64 = arith.constant 0 : index
    %75 = vector.load %arg21[%c0_62, %c0_63, %c0_64] : memref<2x1x96xf32, #tpu.memory_space<vmem>>, vector<1x1x96xf32>
    %76 = vector.shape_cast %75 : vector<1x1x96xf32> to vector<1x96xf32>
    %cst_65 = arith.constant dense<0.000000e+00> : vector<16x96xf32>
    %77 = tpu.matmul %72, %0, %cst_65 {dimension_numbers = #tpu.dot_dimension_numbers<[1], [0], [0], [1], [0, 0, 1, 1], [], []>} : vector<16x96xf32>, vector<96x96xf32>, vector<16x96xf32> -> vector<16x96xf32>
    %78 = arith.subf %72, %77 : vector<16x96xf32>
    %79 = arith.mulf %78, %78 : vector<16x96xf32>
    %cst_66 = arith.constant dense<0.000000e+00> : vector<16x96xf32>
    %80 = tpu.matmul %79, %0, %cst_66 {dimension_numbers = #tpu.dot_dimension_numbers<[1], [0], [0], [1], [0, 0, 1, 1], [], []>} : vector<16x96xf32>, vector<96x96xf32>, vector<16x96xf32> -> vector<16x96xf32>
    %cst_67 = arith.constant 9.99999996E-13 : f32
    %81 = vector.broadcast %cst_67 : f32 to vector<16x96xf32>
    %82 = arith.addf %80, %81 : vector<16x96xf32>
    %83 = math.rsqrt %82 : vector<16x96xf32>
    %84 = arith.mulf %78, %83 : vector<16x96xf32>
    %85 = vector.broadcast %74 : vector<1x96xf32> to vector<16x96xf32>
    %86 = arith.mulf %84, %85 : vector<16x96xf32>
    %87 = vector.broadcast %76 : vector<1x96xf32> to vector<16x96xf32>
    %88 = arith.addf %86, %87 : vector<16x96xf32>
    %c0_68 = arith.constant 0 : index
    %c0_69 = arith.constant 0 : index
    %c0_70 = arith.constant 0 : index
    %89 = vector.load %arg22[%c0_68, %c0_69, %c0_70] : memref<2x96x192xf32, #tpu.memory_space<vmem>>, vector<1x96x192xf32>
    %90 = vector.shape_cast %89 : vector<1x96x192xf32> to vector<96x192xf32>
    %cst_71 = arith.constant dense<0.000000e+00> : vector<16x192xf32>
    %91 = tpu.matmul %88, %90, %cst_71 {dimension_numbers = #tpu.dot_dimension_numbers<[1], [0], [0], [1], [0, 0, 1, 1], [], []>} : vector<16x96xf32>, vector<96x192xf32>, vector<16x192xf32> -> vector<16x192xf32>
    %c0_72 = arith.constant 0 : index
    %c0_73 = arith.constant 0 : index
    %c0_74 = arith.constant 0 : index
    %92 = vector.load %arg23[%c0_72, %c0_73, %c0_74] : memref<2x1x192xf32, #tpu.memory_space<vmem>>, vector<1x1x192xf32>
    %93 = vector.shape_cast %92 : vector<1x1x192xf32> to vector<1x192xf32>
    %94 = vector.broadcast %93 : vector<1x192xf32> to vector<16x192xf32>
    %95 = arith.addf %91, %94 : vector<16x192xf32>
    %96 = arith.mulf %95, %95 : vector<16x192xf32>
    %97 = arith.mulf %95, %96 : vector<16x192xf32>
    %cst_75 = arith.constant 4.471500e-02 : f32
    %98 = vector.broadcast %cst_75 : f32 to vector<16x192xf32>
    %99 = arith.mulf %98, %97 : vector<16x192xf32>
    %100 = arith.addf %95, %99 : vector<16x192xf32>
    %cst_76 = arith.constant 0.797884583 : f32
    %101 = vector.broadcast %cst_76 : f32 to vector<16x192xf32>
    %102 = arith.mulf %101, %100 : vector<16x192xf32>
    %103 = math.tanh %102 : vector<16x192xf32>
    %cst_77 = arith.constant 1.000000e+00 : f32
    %104 = vector.broadcast %cst_77 : f32 to vector<16x192xf32>
    %105 = arith.addf %104, %103 : vector<16x192xf32>
    %cst_78 = arith.constant 5.000000e-01 : f32
    %106 = vector.broadcast %cst_78 : f32 to vector<16x192xf32>
    %107 = arith.mulf %106, %105 : vector<16x192xf32>
    %108 = arith.mulf %95, %107 : vector<16x192xf32>
    %c0_79 = arith.constant 0 : index
    %c0_80 = arith.constant 0 : index
    %c0_81 = arith.constant 0 : index
    %109 = vector.load %arg24[%c0_79, %c0_80, %c0_81] : memref<2x192x96xf32, #tpu.memory_space<vmem>>, vector<1x192x96xf32>
    %110 = vector.shape_cast %109 : vector<1x192x96xf32> to vector<192x96xf32>
    %cst_82 = arith.constant dense<0.000000e+00> : vector<16x96xf32>
    %111 = tpu.matmul %108, %110, %cst_82 {dimension_numbers = #tpu.dot_dimension_numbers<[1], [0], [0], [1], [0, 0, 1, 1], [], []>} : vector<16x192xf32>, vector<192x96xf32>, vector<16x96xf32> -> vector<16x96xf32>
    %c0_83 = arith.constant 0 : index
    %c0_84 = arith.constant 0 : index
    %c0_85 = arith.constant 0 : index
    %112 = vector.load %arg25[%c0_83, %c0_84, %c0_85] : memref<2x1x96xf32, #tpu.memory_space<vmem>>, vector<1x1x96xf32>
    %113 = vector.shape_cast %112 : vector<1x1x96xf32> to vector<1x96xf32>
    %114 = vector.broadcast %113 : vector<1x96xf32> to vector<16x96xf32>
    %115 = arith.addf %111, %114 : vector<16x96xf32>
    %116 = arith.addf %88, %115 : vector<16x96xf32>
    %c0_86 = arith.constant 0 : index
    %c0_87 = arith.constant 0 : index
    %c0_88 = arith.constant 0 : index
    %117 = vector.load %arg26[%c0_86, %c0_87, %c0_88] : memref<2x1x96xf32, #tpu.memory_space<vmem>>, vector<1x1x96xf32>
    %118 = vector.shape_cast %117 : vector<1x1x96xf32> to vector<1x96xf32>
    %c0_89 = arith.constant 0 : index
    %c0_90 = arith.constant 0 : index
    %c0_91 = arith.constant 0 : index
    %119 = vector.load %arg27[%c0_89, %c0_90, %c0_91] : memref<2x1x96xf32, #tpu.memory_space<vmem>>, vector<1x1x96xf32>
    %120 = vector.shape_cast %119 : vector<1x1x96xf32> to vector<1x96xf32>
    %cst_92 = arith.constant dense<0.000000e+00> : vector<16x96xf32>
    %121 = tpu.matmul %116, %0, %cst_92 {dimension_numbers = #tpu.dot_dimension_numbers<[1], [0], [0], [1], [0, 0, 1, 1], [], []>} : vector<16x96xf32>, vector<96x96xf32>, vector<16x96xf32> -> vector<16x96xf32>
    %122 = arith.subf %116, %121 : vector<16x96xf32>
    %123 = arith.mulf %122, %122 : vector<16x96xf32>
    %cst_93 = arith.constant dense<0.000000e+00> : vector<16x96xf32>
    %124 = tpu.matmul %123, %0, %cst_93 {dimension_numbers = #tpu.dot_dimension_numbers<[1], [0], [0], [1], [0, 0, 1, 1], [], []>} : vector<16x96xf32>, vector<96x96xf32>, vector<16x96xf32> -> vector<16x96xf32>
    %cst_94 = arith.constant 9.99999996E-13 : f32
    %125 = vector.broadcast %cst_94 : f32 to vector<16x96xf32>
    %126 = arith.addf %124, %125 : vector<16x96xf32>
    %127 = math.rsqrt %126 : vector<16x96xf32>
    %128 = arith.mulf %122, %127 : vector<16x96xf32>
    %129 = vector.broadcast %118 : vector<1x96xf32> to vector<16x96xf32>
    %130 = arith.mulf %128, %129 : vector<16x96xf32>
    %131 = vector.broadcast %120 : vector<1x96xf32> to vector<16x96xf32>
    %132 = arith.addf %130, %131 : vector<16x96xf32>
    %cst_95 = arith.constant dense<0.000000e+00> : vector<192x96xf32>
    %133 = tpu.matmul %1, %132, %cst_95 {dimension_numbers = #tpu.dot_dimension_numbers<[1], [0], [0], [1], [0, 0, 1, 1], [], []>} : vector<192x16xf32>, vector<16x96xf32>, vector<192x96xf32> -> vector<192x96xf32>
    %c1 = arith.constant 1 : index
    %c0_96 = arith.constant 0 : index
    %c0_97 = arith.constant 0 : index
    %134 = vector.load %arg12[%c1, %c0_96, %c0_97] : memref<2x96x96xf32, #tpu.memory_space<vmem>>, vector<1x96x96xf32>
    %135 = vector.shape_cast %134 : vector<1x96x96xf32> to vector<96x96xf32>
    %c1_98 = arith.constant 1 : index
    %c0_99 = arith.constant 0 : index
    %c0_100 = arith.constant 0 : index
    %136 = vector.load %arg13[%c1_98, %c0_99, %c0_100] : memref<2x1x96xf32, #tpu.memory_space<vmem>>, vector<1x1x96xf32>
    %137 = vector.shape_cast %136 : vector<1x1x96xf32> to vector<1x96xf32>
    %cst_101 = arith.constant dense<0.000000e+00> : vector<192x96xf32>
    %138 = tpu.matmul %133, %135, %cst_101 {dimension_numbers = #tpu.dot_dimension_numbers<[1], [0], [0], [1], [0, 0, 1, 1], [], []>} : vector<192x96xf32>, vector<96x96xf32>, vector<192x96xf32> -> vector<192x96xf32>
    %139 = vector.broadcast %137 : vector<1x96xf32> to vector<192x96xf32>
    %140 = arith.addf %138, %139 : vector<192x96xf32>
    %141 = arith.mulf %140, %3 : vector<192x96xf32>
    %cst_102 = arith.constant dense<0.000000e+00> : vector<192x8xf32>
    %142 = tpu.matmul %141, %4, %cst_102 {dimension_numbers = #tpu.dot_dimension_numbers<[1], [0], [0], [1], [0, 0, 1, 1], [], []>} : vector<192x96xf32>, vector<96x8xf32>, vector<192x8xf32> -> vector<192x8xf32>
    %c1_103 = arith.constant 1 : index
    %c0_104 = arith.constant 0 : index
    %c0_105 = arith.constant 0 : index
    %143 = vector.load %arg14[%c1_103, %c0_104, %c0_105] : memref<2x96x96xf32, #tpu.memory_space<vmem>>, vector<1x96x96xf32>
    %144 = vector.shape_cast %143 : vector<1x96x96xf32> to vector<96x96xf32>
    %c1_106 = arith.constant 1 : index
    %c0_107 = arith.constant 0 : index
    %c0_108 = arith.constant 0 : index
    %145 = vector.load %arg15[%c1_106, %c0_107, %c0_108] : memref<2x1x96xf32, #tpu.memory_space<vmem>>, vector<1x1x96xf32>
    %146 = vector.shape_cast %145 : vector<1x1x96xf32> to vector<1x96xf32>
    %cst_109 = arith.constant dense<0.000000e+00> : vector<192x96xf32>
    %147 = tpu.matmul %133, %144, %cst_109 {dimension_numbers = #tpu.dot_dimension_numbers<[1], [0], [0], [1], [0, 0, 1, 1], [], []>} : vector<192x96xf32>, vector<96x96xf32>, vector<192x96xf32> -> vector<192x96xf32>
    %148 = vector.broadcast %146 : vector<1x96xf32> to vector<192x96xf32>
    %149 = arith.addf %147, %148 : vector<192x96xf32>
    %150 = arith.mulf %149, %3 : vector<192x96xf32>
    %cst_110 = arith.constant dense<0.000000e+00> : vector<192x8xf32>
    %151 = tpu.matmul %150, %4, %cst_110 {dimension_numbers = #tpu.dot_dimension_numbers<[1], [0], [0], [1], [0, 0, 1, 1], [], []>} : vector<192x96xf32>, vector<96x8xf32>, vector<192x8xf32> -> vector<192x8xf32>
    %c1_111 = arith.constant 1 : index
    %c0_112 = arith.constant 0 : index
    %c0_113 = arith.constant 0 : index
    %152 = vector.load %arg16[%c1_111, %c0_112, %c0_113] : memref<2x96x96xf32, #tpu.memory_space<vmem>>, vector<1x96x96xf32>
    %153 = vector.shape_cast %152 : vector<1x96x96xf32> to vector<96x96xf32>
    %c1_114 = arith.constant 1 : index
    %c0_115 = arith.constant 0 : index
    %c0_116 = arith.constant 0 : index
    %154 = vector.load %arg17[%c1_114, %c0_115, %c0_116] : memref<2x1x96xf32, #tpu.memory_space<vmem>>, vector<1x1x96xf32>
    %155 = vector.shape_cast %154 : vector<1x1x96xf32> to vector<1x96xf32>
    %cst_117 = arith.constant dense<0.000000e+00> : vector<192x96xf32>
    %156 = tpu.matmul %133, %153, %cst_117 {dimension_numbers = #tpu.dot_dimension_numbers<[1], [0], [0], [1], [0, 0, 1, 1], [], []>} : vector<192x96xf32>, vector<96x96xf32>, vector<192x96xf32> -> vector<192x96xf32>
    %157 = vector.broadcast %155 : vector<1x96xf32> to vector<192x96xf32>
    %158 = arith.addf %156, %157 : vector<192x96xf32>
    %159 = arith.mulf %158, %3 : vector<192x96xf32>
    %cst_118 = arith.constant dense<0.000000e+00> : vector<192x8xf32>
    %160 = tpu.matmul %159, %4, %cst_118 {dimension_numbers = #tpu.dot_dimension_numbers<[1], [0], [0], [1], [0, 0, 1, 1], [], []>} : vector<192x96xf32>, vector<96x8xf32>, vector<192x8xf32> -> vector<192x8xf32>
    %cst_119 = arith.constant dense<0.000000e+00> : vector<192x192xf32>
    %161 = tpu.matmul %142, %151, %cst_119 {dimension_numbers = #tpu.dot_dimension_numbers<[1], [1], [0], [0], [0, 0, 1, 0], [], []>} : vector<192x8xf32>, vector<192x8xf32>, vector<192x192xf32> -> vector<192x192xf32>
    %162 = arith.addf %161, %6 : vector<192x192xf32>
    %cst_120 = arith.constant dense<0xFF800000> : vector<192xf32>
    %163 = vector.multi_reduction <maximumf>, %162, %cst_120 [1] : vector<192x192xf32> to vector<192xf32>
    %164 = vector.shape_cast %163 : vector<192xf32> to vector<192x1xf32>
    %165 = vector.broadcast %164 : vector<192x1xf32> to vector<192x192xf32>
    %166 = arith.subf %162, %165 : vector<192x192xf32>
    %167 = math.exp %166 : vector<192x192xf32>
    %cst_121 = arith.constant dense<0.000000e+00> : vector<192xf32>
    %168 = vector.multi_reduction <add>, %167, %cst_121 [1] : vector<192x192xf32> to vector<192xf32>
    %169 = vector.shape_cast %168 : vector<192xf32> to vector<192x1xf32>
    %170 = vector.broadcast %169 : vector<192x1xf32> to vector<192x192xf32>
    %171 = arith.divf %167, %170 : vector<192x192xf32>
    %cst_122 = arith.constant dense<0.000000e+00> : vector<192x8xf32>
    %172 = tpu.matmul %171, %160, %cst_122 {dimension_numbers = #tpu.dot_dimension_numbers<[1], [0], [0], [1], [0, 0, 1, 1], [], []>} : vector<192x192xf32>, vector<192x8xf32>, vector<192x8xf32> -> vector<192x8xf32>
    %cst_123 = arith.constant dense<0.000000e+00> : vector<192x96xf32>
    %173 = tpu.matmul %172, %5, %cst_123 {dimension_numbers = #tpu.dot_dimension_numbers<[1], [0], [0], [1], [0, 0, 1, 1], [], []>} : vector<192x8xf32>, vector<8x96xf32>, vector<192x96xf32> -> vector<192x96xf32>
    %174 = arith.mulf %173, %3 : vector<192x96xf32>
    %cst_124 = arith.constant dense<0.000000e+00> : vector<16x96xf32>
    %175 = tpu.matmul %2, %174, %cst_124 {dimension_numbers = #tpu.dot_dimension_numbers<[1], [0], [0], [1], [0, 0, 1, 1], [], []>} : vector<16x192xf32>, vector<192x96xf32>, vector<16x96xf32> -> vector<16x96xf32>
    %c1_125 = arith.constant 1 : index
    %c0_126 = arith.constant 0 : index
    %c0_127 = arith.constant 0 : index
    %176 = vector.load %arg18[%c1_125, %c0_126, %c0_127] : memref<2x96x96xf32, #tpu.memory_space<vmem>>, vector<1x96x96xf32>
    %177 = vector.shape_cast %176 : vector<1x96x96xf32> to vector<96x96xf32>
    %cst_128 = arith.constant dense<0.000000e+00> : vector<16x96xf32>
    %178 = tpu.matmul %175, %177, %cst_128 {dimension_numbers = #tpu.dot_dimension_numbers<[1], [0], [0], [1], [0, 0, 1, 1], [], []>} : vector<16x96xf32>, vector<96x96xf32>, vector<16x96xf32> -> vector<16x96xf32>
    %c1_129 = arith.constant 1 : index
    %c0_130 = arith.constant 0 : index
    %c0_131 = arith.constant 0 : index
    %179 = vector.load %arg19[%c1_129, %c0_130, %c0_131] : memref<2x1x96xf32, #tpu.memory_space<vmem>>, vector<1x1x96xf32>
    %180 = vector.shape_cast %179 : vector<1x1x96xf32> to vector<1x96xf32>
    %181 = vector.broadcast %180 : vector<1x96xf32> to vector<16x96xf32>
    %182 = arith.addf %178, %181 : vector<16x96xf32>
    %183 = arith.addf %132, %182 : vector<16x96xf32>
    %c1_132 = arith.constant 1 : index
    %c0_133 = arith.constant 0 : index
    %c0_134 = arith.constant 0 : index
    %184 = vector.load %arg20[%c1_132, %c0_133, %c0_134] : memref<2x1x96xf32, #tpu.memory_space<vmem>>, vector<1x1x96xf32>
    %185 = vector.shape_cast %184 : vector<1x1x96xf32> to vector<1x96xf32>
    %c1_135 = arith.constant 1 : index
    %c0_136 = arith.constant 0 : index
    %c0_137 = arith.constant 0 : index
    %186 = vector.load %arg21[%c1_135, %c0_136, %c0_137] : memref<2x1x96xf32, #tpu.memory_space<vmem>>, vector<1x1x96xf32>
    %187 = vector.shape_cast %186 : vector<1x1x96xf32> to vector<1x96xf32>
    %cst_138 = arith.constant dense<0.000000e+00> : vector<16x96xf32>
    %188 = tpu.matmul %183, %0, %cst_138 {dimension_numbers = #tpu.dot_dimension_numbers<[1], [0], [0], [1], [0, 0, 1, 1], [], []>} : vector<16x96xf32>, vector<96x96xf32>, vector<16x96xf32> -> vector<16x96xf32>
    %189 = arith.subf %183, %188 : vector<16x96xf32>
    %190 = arith.mulf %189, %189 : vector<16x96xf32>
    %cst_139 = arith.constant dense<0.000000e+00> : vector<16x96xf32>
    %191 = tpu.matmul %190, %0, %cst_139 {dimension_numbers = #tpu.dot_dimension_numbers<[1], [0], [0], [1], [0, 0, 1, 1], [], []>} : vector<16x96xf32>, vector<96x96xf32>, vector<16x96xf32> -> vector<16x96xf32>
    %cst_140 = arith.constant 9.99999996E-13 : f32
    %192 = vector.broadcast %cst_140 : f32 to vector<16x96xf32>
    %193 = arith.addf %191, %192 : vector<16x96xf32>
    %194 = math.rsqrt %193 : vector<16x96xf32>
    %195 = arith.mulf %189, %194 : vector<16x96xf32>
    %196 = vector.broadcast %185 : vector<1x96xf32> to vector<16x96xf32>
    %197 = arith.mulf %195, %196 : vector<16x96xf32>
    %198 = vector.broadcast %187 : vector<1x96xf32> to vector<16x96xf32>
    %199 = arith.addf %197, %198 : vector<16x96xf32>
    %c1_141 = arith.constant 1 : index
    %c0_142 = arith.constant 0 : index
    %c0_143 = arith.constant 0 : index
    %200 = vector.load %arg22[%c1_141, %c0_142, %c0_143] : memref<2x96x192xf32, #tpu.memory_space<vmem>>, vector<1x96x192xf32>
    %201 = vector.shape_cast %200 : vector<1x96x192xf32> to vector<96x192xf32>
    %cst_144 = arith.constant dense<0.000000e+00> : vector<16x192xf32>
    %202 = tpu.matmul %199, %201, %cst_144 {dimension_numbers = #tpu.dot_dimension_numbers<[1], [0], [0], [1], [0, 0, 1, 1], [], []>} : vector<16x96xf32>, vector<96x192xf32>, vector<16x192xf32> -> vector<16x192xf32>
    %c1_145 = arith.constant 1 : index
    %c0_146 = arith.constant 0 : index
    %c0_147 = arith.constant 0 : index
    %203 = vector.load %arg23[%c1_145, %c0_146, %c0_147] : memref<2x1x192xf32, #tpu.memory_space<vmem>>, vector<1x1x192xf32>
    %204 = vector.shape_cast %203 : vector<1x1x192xf32> to vector<1x192xf32>
    %205 = vector.broadcast %204 : vector<1x192xf32> to vector<16x192xf32>
    %206 = arith.addf %202, %205 : vector<16x192xf32>
    %207 = arith.mulf %206, %206 : vector<16x192xf32>
    %208 = arith.mulf %206, %207 : vector<16x192xf32>
    %cst_148 = arith.constant 4.471500e-02 : f32
    %209 = vector.broadcast %cst_148 : f32 to vector<16x192xf32>
    %210 = arith.mulf %209, %208 : vector<16x192xf32>
    %211 = arith.addf %206, %210 : vector<16x192xf32>
    %cst_149 = arith.constant 0.797884583 : f32
    %212 = vector.broadcast %cst_149 : f32 to vector<16x192xf32>
    %213 = arith.mulf %212, %211 : vector<16x192xf32>
    %214 = math.tanh %213 : vector<16x192xf32>
    %cst_150 = arith.constant 1.000000e+00 : f32
    %215 = vector.broadcast %cst_150 : f32 to vector<16x192xf32>
    %216 = arith.addf %215, %214 : vector<16x192xf32>
    %cst_151 = arith.constant 5.000000e-01 : f32
    %217 = vector.broadcast %cst_151 : f32 to vector<16x192xf32>
    %218 = arith.mulf %217, %216 : vector<16x192xf32>
    %219 = arith.mulf %206, %218 : vector<16x192xf32>
    %c1_152 = arith.constant 1 : index
    %c0_153 = arith.constant 0 : index
    %c0_154 = arith.constant 0 : index
    %220 = vector.load %arg24[%c1_152, %c0_153, %c0_154] : memref<2x192x96xf32, #tpu.memory_space<vmem>>, vector<1x192x96xf32>
    %221 = vector.shape_cast %220 : vector<1x192x96xf32> to vector<192x96xf32>
    %cst_155 = arith.constant dense<0.000000e+00> : vector<16x96xf32>
    %222 = tpu.matmul %219, %221, %cst_155 {dimension_numbers = #tpu.dot_dimension_numbers<[1], [0], [0], [1], [0, 0, 1, 1], [], []>} : vector<16x192xf32>, vector<192x96xf32>, vector<16x96xf32> -> vector<16x96xf32>
    %c1_156 = arith.constant 1 : index
    %c0_157 = arith.constant 0 : index
    %c0_158 = arith.constant 0 : index
    %223 = vector.load %arg25[%c1_156, %c0_157, %c0_158] : memref<2x1x96xf32, #tpu.memory_space<vmem>>, vector<1x1x96xf32>
    %224 = vector.shape_cast %223 : vector<1x1x96xf32> to vector<1x96xf32>
    %225 = vector.broadcast %224 : vector<1x96xf32> to vector<16x96xf32>
    %226 = arith.addf %222, %225 : vector<16x96xf32>
    %227 = arith.addf %199, %226 : vector<16x96xf32>
    %c1_159 = arith.constant 1 : index
    %c0_160 = arith.constant 0 : index
    %c0_161 = arith.constant 0 : index
    %228 = vector.load %arg26[%c1_159, %c0_160, %c0_161] : memref<2x1x96xf32, #tpu.memory_space<vmem>>, vector<1x1x96xf32>
    %229 = vector.shape_cast %228 : vector<1x1x96xf32> to vector<1x96xf32>
    %c1_162 = arith.constant 1 : index
    %c0_163 = arith.constant 0 : index
    %c0_164 = arith.constant 0 : index
    %230 = vector.load %arg27[%c1_162, %c0_163, %c0_164] : memref<2x1x96xf32, #tpu.memory_space<vmem>>, vector<1x1x96xf32>
    %231 = vector.shape_cast %230 : vector<1x1x96xf32> to vector<1x96xf32>
    %cst_165 = arith.constant dense<0.000000e+00> : vector<16x96xf32>
    %232 = tpu.matmul %227, %0, %cst_165 {dimension_numbers = #tpu.dot_dimension_numbers<[1], [0], [0], [1], [0, 0, 1, 1], [], []>} : vector<16x96xf32>, vector<96x96xf32>, vector<16x96xf32> -> vector<16x96xf32>
    %233 = arith.subf %227, %232 : vector<16x96xf32>
    %234 = arith.mulf %233, %233 : vector<16x96xf32>
    %cst_166 = arith.constant dense<0.000000e+00> : vector<16x96xf32>
    %235 = tpu.matmul %234, %0, %cst_166 {dimension_numbers = #tpu.dot_dimension_numbers<[1], [0], [0], [1], [0, 0, 1, 1], [], []>} : vector<16x96xf32>, vector<96x96xf32>, vector<16x96xf32> -> vector<16x96xf32>
    %cst_167 = arith.constant 9.99999996E-13 : f32
    %236 = vector.broadcast %cst_167 : f32 to vector<16x96xf32>
    %237 = arith.addf %235, %236 : vector<16x96xf32>
    %238 = math.rsqrt %237 : vector<16x96xf32>
    %239 = arith.mulf %233, %238 : vector<16x96xf32>
    %240 = vector.broadcast %229 : vector<1x96xf32> to vector<16x96xf32>
    %241 = arith.mulf %239, %240 : vector<16x96xf32>
    %242 = vector.broadcast %231 : vector<1x96xf32> to vector<16x96xf32>
    %243 = arith.addf %241, %242 : vector<16x96xf32>
    %c0_168 = arith.constant 0 : index
    %c0_169 = arith.constant 0 : index
    %244 = vector.load %arg9[%c0_168, %c0_169] : memref<2x16xf32, #tpu.memory_space<vmem>>, vector<2x16xf32>
    %cst_170 = arith.constant dense<0.000000e+00> : vector<2x96xf32>
    %245 = tpu.matmul %244, %243, %cst_170 {dimension_numbers = #tpu.dot_dimension_numbers<[1], [0], [0], [1], [0, 0, 1, 1], [], []>} : vector<2x16xf32>, vector<16x96xf32>, vector<2x96xf32> -> vector<2x96xf32>
    %c0_171 = arith.constant 0 : index
    %c0_172 = arith.constant 0 : index
    %246 = vector.load %arg28[%c0_171, %c0_172] : memref<96x96xf32, #tpu.memory_space<vmem>>, vector<96x96xf32>
    %cst_173 = arith.constant dense<0.000000e+00> : vector<2x96xf32>
    %247 = tpu.matmul %245, %246, %cst_173 {dimension_numbers = #tpu.dot_dimension_numbers<[1], [0], [0], [1], [0, 0, 1, 1], [], []>} : vector<2x96xf32>, vector<96x96xf32>, vector<2x96xf32> -> vector<2x96xf32>
    %c0_174 = arith.constant 0 : index
    %c0_175 = arith.constant 0 : index
    %248 = vector.load %arg29[%c0_174, %c0_175] : memref<1x96xf32, #tpu.memory_space<vmem>>, vector<1x96xf32>
    %249 = vector.broadcast %248 : vector<1x96xf32> to vector<2x96xf32>
    %250 = arith.addf %247, %249 : vector<2x96xf32>
    %251 = math.tanh %250 : vector<2x96xf32>
    %c0_176 = arith.constant 0 : index
    %c0_177 = arith.constant 0 : index
    %252 = vector.load %arg30[%c0_176, %c0_177] : memref<96x384xf32, #tpu.memory_space<vmem>>, vector<96x384xf32>
    %cst_178 = arith.constant dense<0.000000e+00> : vector<2x384xf32>
    %253 = tpu.matmul %251, %252, %cst_178 {dimension_numbers = #tpu.dot_dimension_numbers<[1], [0], [0], [1], [0, 0, 1, 1], [], []>} : vector<2x96xf32>, vector<96x384xf32>, vector<2x384xf32> -> vector<2x384xf32>
    %c0_179 = arith.constant 0 : index
    %c0_180 = arith.constant 0 : index
    %254 = vector.load %arg31[%c0_179, %c0_180] : memref<1x384xf32, #tpu.memory_space<vmem>>, vector<1x384xf32>
    %255 = vector.broadcast %254 : vector<1x384xf32> to vector<2x384xf32>
    %256 = arith.addf %253, %255 : vector<2x384xf32>
    %c0_181 = arith.constant 0 : index
    %c0_182 = arith.constant 0 : index
    %257 = vector.load %arg32[%c0_181, %c0_182] : memref<2x384xf32, #tpu.memory_space<vmem>>, vector<2x384xf32>
    tpu.vector_store %arg32[%c0_181, %c0_182], %256 {strides = array<i32>} : memref<2x384xf32, #tpu.memory_space<vmem>>, vector<2x384xf32>,
    return
  }
  func.func @transform_0(%arg0: i32) -> (i32, i32) {
    %c0_i32 = arith.constant 0 : i32
    %c0_i32_0 = arith.constant 0 : i32
    %c0_i32_1 = arith.constant 0 : i32
    return %c0_i32, %c0_i32_0 : i32, i32
  }
  func.func @transform_1(%arg0: i32) -> (i32, i32) {
    %c0_i32 = arith.constant 0 : i32
    %c0_i32_0 = arith.constant 0 : i32
    %c0_i32_1 = arith.constant 0 : i32
    return %c0_i32, %c0_i32_0 : i32, i32
  }
  func.func @transform_2(%arg0: i32) -> (i32, i32) {
    %c0_i32 = arith.constant 0 : i32
    %c0_i32_0 = arith.constant 0 : i32
    %c0_i32_1 = arith.constant 0 : i32
    return %c0_i32, %c0_i32_0 : i32, i32
  }
  func.func @transform_3(%arg0: i32) -> (i32, i32) {
    %c0_i32 = arith.constant 0 : i32
    %c0_i32_0 = arith.constant 0 : i32
    %c0_i32_1 = arith.constant 0 : i32
    return %c0_i32, %c0_i32_0 : i32, i32
  }
  func.func @transform_4(%arg0: i32) -> (i32, i32) {
    %c0_i32 = arith.constant 0 : i32
    %c0_i32_0 = arith.constant 0 : i32
    %c0_i32_1 = arith.constant 0 : i32
    return %c0_i32, %c0_i32_0 : i32, i32
  }
  func.func @transform_5(%arg0: i32) -> (i32, i32) {
    %c0_i32 = arith.constant 0 : i32
    %c0_i32_0 = arith.constant 0 : i32
    %c0_i32_1 = arith.constant 0 : i32
    return %c0_i32, %c0_i32_0 : i32, i32
  }
  func.func @transform_6(%arg0: i32) -> (i32, i32) {
    %c0_i32 = arith.constant 0 : i32
    %c0_i32_0 = arith.constant 0 : i32
    %c0_i32_1 = arith.constant 0 : i32
    return %c0_i32, %c0_i32_0 : i32, i32
  }
  func.func @transform_7(%arg0: i32) -> (i32, i32) {
    %c0_i32 = arith.constant 0 : i32
    %c0_i32_0 = arith.constant 0 : i32
    %c0_i32_1 = arith.constant 0 : i32
    return %c0_i32, %c0_i32_0 : i32, i32
  }
  func.func @transform_8(%arg0: i32) -> (i32, i32) {
    %c0_i32 = arith.constant 0 : i32
    %c0_i32_0 = arith.constant 0 : i32
    %c0_i32_1 = arith.constant 0 : i32
    return %c0_i32, %c0_i32_0 : i32, i32
  }
  func.func @transform_9(%arg0: i32) -> (i32, i32) {
    %c0_i32 = arith.constant 0 : i32
    %c0_i32_0 = arith.constant 0 : i32
    %c0_i32_1 = arith.constant 0 : i32
    return %c0_i32, %c0_i32_0 : i32, i32
  }
  func.func @transform_10(%arg0: i32) -> (i32, i32) {
    %c0_i32 = arith.constant 0 : i32
    %c0_i32_0 = arith.constant 0 : i32
    %c0_i32_1 = arith.constant 0 : i32
    return %c0_i32, %c0_i32_0 : i32, i32
  }
  func.func @transform_11(%arg0: i32) -> (i32, i32, i32) {
    %c0_i32 = arith.constant 0 : i32
    %c0_i32_0 = arith.constant 0 : i32
    %c0_i32_1 = arith.constant 0 : i32
    %c0_i32_2 = arith.constant 0 : i32
    return %c0_i32, %c0_i32_0, %c0_i32_1 : i32, i32, i32
  }
  func.func @transform_12(%arg0: i32) -> (i32, i32, i32) {
    %c0_i32 = arith.constant 0 : i32
    %c0_i32_0 = arith.constant 0 : i32
    %c0_i32_1 = arith.constant 0 : i32
    %c0_i32_2 = arith.constant 0 : i32
    return %c0_i32, %c0_i32_0, %c0_i32_1 : i32, i32, i32
  }
  func.func @transform_13(%arg0: i32) -> (i32, i32, i32) {
    %c0_i32 = arith.constant 0 : i32
    %c0_i32_0 = arith.constant 0 : i32
    %c0_i32_1 = arith.constant 0 : i32
    %c0_i32_2 = arith.constant 0 : i32
    return %c0_i32, %c0_i32_0, %c0_i32_1 : i32, i32, i32
  }
  func.func @transform_14(%arg0: i32) -> (i32, i32, i32) {
    %c0_i32 = arith.constant 0 : i32
    %c0_i32_0 = arith.constant 0 : i32
    %c0_i32_1 = arith.constant 0 : i32
    %c0_i32_2 = arith.constant 0 : i32
    return %c0_i32, %c0_i32_0, %c0_i32_1 : i32, i32, i32
  }
  func.func @transform_15(%arg0: i32) -> (i32, i32, i32) {
    %c0_i32 = arith.constant 0 : i32
    %c0_i32_0 = arith.constant 0 : i32
    %c0_i32_1 = arith.constant 0 : i32
    %c0_i32_2 = arith.constant 0 : i32
    return %c0_i32, %c0_i32_0, %c0_i32_1 : i32, i32, i32
  }
  func.func @transform_16(%arg0: i32) -> (i32, i32, i32) {
    %c0_i32 = arith.constant 0 : i32
    %c0_i32_0 = arith.constant 0 : i32
    %c0_i32_1 = arith.constant 0 : i32
    %c0_i32_2 = arith.constant 0 : i32
    return %c0_i32, %c0_i32_0, %c0_i32_1 : i32, i32, i32
  }
  func.func @transform_17(%arg0: i32) -> (i32, i32, i32) {
    %c0_i32 = arith.constant 0 : i32
    %c0_i32_0 = arith.constant 0 : i32
    %c0_i32_1 = arith.constant 0 : i32
    %c0_i32_2 = arith.constant 0 : i32
    return %c0_i32, %c0_i32_0, %c0_i32_1 : i32, i32, i32
  }
  func.func @transform_18(%arg0: i32) -> (i32, i32, i32) {
    %c0_i32 = arith.constant 0 : i32
    %c0_i32_0 = arith.constant 0 : i32
    %c0_i32_1 = arith.constant 0 : i32
    %c0_i32_2 = arith.constant 0 : i32
    return %c0_i32, %c0_i32_0, %c0_i32_1 : i32, i32, i32
  }
  func.func @transform_19(%arg0: i32) -> (i32, i32, i32) {
    %c0_i32 = arith.constant 0 : i32
    %c0_i32_0 = arith.constant 0 : i32
    %c0_i32_1 = arith.constant 0 : i32
    %c0_i32_2 = arith.constant 0 : i32
    return %c0_i32, %c0_i32_0, %c0_i32_1 : i32, i32, i32
  }
  func.func @transform_20(%arg0: i32) -> (i32, i32, i32) {
    %c0_i32 = arith.constant 0 : i32
    %c0_i32_0 = arith.constant 0 : i32
    %c0_i32_1 = arith.constant 0 : i32
    %c0_i32_2 = arith.constant 0 : i32
    return %c0_i32, %c0_i32_0, %c0_i32_1 : i32, i32, i32
  }
  func.func @transform_21(%arg0: i32) -> (i32, i32, i32) {
    %c0_i32 = arith.constant 0 : i32
    %c0_i32_0 = arith.constant 0 : i32
    %c0_i32_1 = arith.constant 0 : i32
    %c0_i32_2 = arith.constant 0 : i32
    return %c0_i32, %c0_i32_0, %c0_i32_1 : i32, i32, i32
  }
  func.func @transform_22(%arg0: i32) -> (i32, i32, i32) {
    %c0_i32 = arith.constant 0 : i32
    %c0_i32_0 = arith.constant 0 : i32
    %c0_i32_1 = arith.constant 0 : i32
    %c0_i32_2 = arith.constant 0 : i32
    return %c0_i32, %c0_i32_0, %c0_i32_1 : i32, i32, i32
  }
  func.func @transform_23(%arg0: i32) -> (i32, i32, i32) {
    %c0_i32 = arith.constant 0 : i32
    %c0_i32_0 = arith.constant 0 : i32
    %c0_i32_1 = arith.constant 0 : i32
    %c0_i32_2 = arith.constant 0 : i32
    return %c0_i32, %c0_i32_0, %c0_i32_1 : i32, i32, i32
  }
  func.func @transform_24(%arg0: i32) -> (i32, i32, i32) {
    %c0_i32 = arith.constant 0 : i32
    %c0_i32_0 = arith.constant 0 : i32
    %c0_i32_1 = arith.constant 0 : i32
    %c0_i32_2 = arith.constant 0 : i32
    return %c0_i32, %c0_i32_0, %c0_i32_1 : i32, i32, i32
  }
  func.func @transform_25(%arg0: i32) -> (i32, i32, i32) {
    %c0_i32 = arith.constant 0 : i32
    %c0_i32_0 = arith.constant 0 : i32
    %c0_i32_1 = arith.constant 0 : i32
    %c0_i32_2 = arith.constant 0 : i32
    return %c0_i32, %c0_i32_0, %c0_i32_1 : i32, i32, i32
  }
  func.func @transform_26(%arg0: i32) -> (i32, i32, i32) {
    %c0_i32 = arith.constant 0 : i32
    %c0_i32_0 = arith.constant 0 : i32
    %c0_i32_1 = arith.constant 0 : i32
    %c0_i32_2 = arith.constant 0 : i32
    return %c0_i32, %c0_i32_0, %c0_i32_1 : i32, i32, i32
  }
  func.func @transform_27(%arg0: i32) -> (i32, i32) {
    %c0_i32 = arith.constant 0 : i32
    %c0_i32_0 = arith.constant 0 : i32
    %c0_i32_1 = arith.constant 0 : i32
    return %c0_i32, %c0_i32_0 : i32, i32
  }
  func.func @transform_28(%arg0: i32) -> (i32, i32) {
    %c0_i32 = arith.constant 0 : i32
    %c0_i32_0 = arith.constant 0 : i32
    %c0_i32_1 = arith.constant 0 : i32
    return %c0_i32, %c0_i32_0 : i32, i32
  }
  func.func @transform_29(%arg0: i32) -> (i32, i32) {
    %c0_i32 = arith.constant 0 : i32
    %c0_i32_0 = arith.constant 0 : i32
    %c0_i32_1 = arith.constant 0 : i32
    return %c0_i32, %c0_i32_0 : i32, i32
  }
  func.func @transform_30(%arg0: i32) -> (i32, i32) {
    %c0_i32 = arith.constant 0 : i32
    %c0_i32_0 = arith.constant 0 : i32
    %c0_i32_1 = arith.constant 0 : i32
    return %c0_i32, %c0_i32_0 : i32, i32
  }
  func.func @transform_31(%arg0: i32) -> (i32, i32) {
    %c0_i32 = arith.constant 0 : i32
    %c0_i32_0 = arith.constant 0 : i32
    %c0_i32_1 = arith.constant 0 : i32
    return %c0_i32, %c0_i32_0 : i32, i32
  }
}

</mosaic_0001>

<bundles_post_ra>
// kernel: tile.9
= control target key start
LH: loop header
LB: loop body
LE: loop exit
PB: predicated region body
PF: predicated region fallthrough
CT: control target
= control target key end

     0   :  { %vm65_vm0 = vcmask 1043458   ;;  %vm70_vm1 = vcmask 1045508   ;;  %vm75_vm2 = vcmask 1047558   ;;  %s105_s6 = smov 3  ;;  %s108_s7 = smov 12  ;;  %vm4_vm3 = vcmask 1047556   ;;  %s1114_s0 = inlined_call_operand.vmem [shape: f32[12,16,16], index: 0, kind: input, shape index: {}]   ;;  %s1115_s1 = inlined_call_operand.vmem [shape: f32[192,16], index: 1, kind: output, shape index: {}]  }
   0x1   :  { %v542_v0 = vld [vmem:[%s1114_s0 + $0x6] ss:$16 sm:%s105_s6]   ;;  %s113_s12 = smov 48  ;;  %s118_s13 = smov 192  ;;  %vm6_vm4 = vcmask 130048   ;;  %vm79_vm5 = vcmask 1048448  }
   0x2   :  { %v543_v1 = vld [vmem:[%s1114_s0 + $0x6] ss:$16 sm:%s108_s7]   ;;  %s60_s18 = smov 3  ;;  %s63_s21 = smov 12  ;;  %vm124_vm6 = vcmask 917248   ;;  %vm169_vm7 = vcmask 786048  }
   0x3   :  { %v111_v2 = vsel %vm65_vm0, %v543_v1, %v542_v0  ;;  %v544_v3 = vld [vmem:[%s1114_s0 + $0x6] ss:$16 sm:%s113_s12]   ;;  %v533_v6 = vld [vmem:[%s1114_s0 + $0x7] ss:$16 sm:%s60_s18]   ;;  %s68_s22 = smov 48  ;;  %s73_s27 = smov 192 }
   0x4   :  { %v545_v4 = vld [vmem:[%s1114_s0 + $0x6] ss:$16 sm:%s118_s13]   ;;  %v116_v5 = vsel %vm70_vm1, %v544_v3, %v111_v2  ;;  %v534_v8 = vld [vmem:[%s1114_s0 + $0x7] ss:$16 sm:%s63_s21]   ;;  %s633_s28 = smov 96   ;;  %s127_s2 = smov 3 }
   0x5   :  { %v121_v7 = vsel %vm75_vm2, %v545_v4, %v116_v5  ;;  %v535_v9 = vld [vmem:[%s1114_s0 + $0x7] ss:$16 sm:%s68_s22]   ;;  %v66_v10 = vsel %vm65_vm0, %v534_v8, %v533_v6  ;;  %s130_s3 = smov 12  ;;  %v546_v13 = vld [vmem:[%s1114_s0 + $0x86] ss:$16 sm:%s127_s2]   ;;  %s135_s8 = smov 48 }
   0x6   :  { %122 = vrot.lane.b32.xlu1 %v121_v7, %s633_s28  ;;  %v536_v11 = vld [vmem:[%s1114_s0 + $0x7] ss:$16 sm:%s73_s27]   ;;  %v71_v12 = vsel %vm70_vm1, %v535_v9, %v66_v10  ;;  %s140_s9 = smov 192  ;;  %s82_s14 = smov 3  ;;  %vm214_vm8 = vcmask 654848   ;;  %vm259_vm9 = vcmask 523648  }
   0x7   :  { %v547_v14 = vld [vmem:[%s1114_s0 + $0x86] ss:$16 sm:%s130_s3]   ;;  %v76_v15 = vsel %vm75_vm2, %v536_v11, %v71_v12  ;;  %s85_s15 = smov 12  ;;  %s634_s16 = smov 112   ;;  %v537_v20 = vld [vmem:[%s1114_s0 + $0x87] ss:$16 sm:%s82_s14]  }
   0x8   :  { %v133_v16 = vsel %vm65_vm0, %v547_v14, %v546_v13  ;;  %v548_v17 = vld [vmem:[%s1114_s0 + $0x86] ss:$16 sm:%s135_s8]   ;;  %77 = vrot.lane.b32.xlu0 %v76_v15, %s634_s16  ;;  %s90_s19 = smov 48  ;;  %s95_s20 = smov 192  ;;  %vm350_vm10 = vcmask 392448   ;;  %vm441_vm11 = vcmask 261248  }
   0x9   :  { %v549_v18 = vld [vmem:[%s1114_s0 + $0x86] ss:$16 sm:%s140_s9]   ;;  %v138_v19 = vsel %vm70_vm1, %v548_v17, %v133_v16  ;;  %v538_v22 = vld [vmem:[%s1114_s0 + $0x87] ss:$16 sm:%s85_s15]   ;;  %s172_s25 = smov 3  ;;  %s180_s29 = smov 48 }
   0xa   :  { %v143_v21 = vsel %vm75_vm2, %v549_v18, %v138_v19  ;;  %v539_v23 = vld [vmem:[%s1114_s0 + $0x87] ss:$16 sm:%s90_s19]   ;;  %v88_v24 = vsel %vm65_vm0, %v538_v22, %v537_v20  ;;  %v555_v27 = vld [vmem:[%s1114_s0 + $0x85] ss:$16 sm:%s172_s25]   ;;  %s185_s5 = smov 192  ;;  %s150_s6 = smov 3 }
   0xb   :  { %144 = vrot.lane.b32.xlu1 %v143_v21, %s633_s28  ;;  %v540_v25 = vld [vmem:[%s1114_s0 + $0x87] ss:$16 sm:%s95_s20]   ;;  %s175_s28 = smov 12  ;;  %v93_v26 = vsel %vm70_vm1, %v539_v23, %v88_v24  ;;  %s153_s11 = smov 12 }
   0xc   :  { %v556_v28 = vld [vmem:[%s1114_s0 + $0x85] ss:$16 sm:%s175_s28]   ;;  %v98_v29 = vsel %vm75_vm2, %v540_v25, %v93_v26  ;;  %s158_s12 = smov 48  ;;  %s163_s15 = smov 192 }
   0xd   :  { %v178_v30 = vsel %vm65_vm0, %v556_v28, %v555_v27  ;;  %v557_v31 = vld [vmem:[%s1114_s0 + $0x85] ss:$16 sm:%s180_s29]   ;;  %99 = vrot.lane.b32.xlu0 %v98_v29, %s634_s16  ;;  %s217_s20 = smov 3  ;;  %s220_s21 = smov 12 }
   0xe   :  { %v558_v32 = vld [vmem:[%s1114_s0 + $0x85] ss:$16 sm:%s185_s5]   ;;  %v183_v33 = vsel %vm70_vm1, %v557_v31, %v178_v30  ;;  %s635_s22 = smov 80   ;;  %s225_s25 = smov 48  ;;  %v564_v41 = vld [vmem:[%s1114_s0 + $0x84] ss:$16 sm:%s217_s20]  }
   0xf   :  { %v551_v34 = vld [vmem:[%s1114_s0 + $0x5] ss:$16 sm:%s150_s6]   ;;  %v188_v35 = vsel %vm75_vm2, %v558_v32, %v183_v33  ;;  %s230_s26 = smov 192  ;;  %v565_v42 = vld [vmem:[%s1114_s0 + $0x84] ss:$16 sm:%s220_s21]   ;;  %s195_s2 = smov 3 }
  0x10   :  { %v552_v36 = vld [vmem:[%s1114_s0 + $0x5] ss:$16 sm:%s153_s11]   ;;  %189 = vrot.lane.b32.xlu1 %v188_v35, %s635_s22  ;;  %s198_s3 = smov 12  ;;  %v223_v44 = vsel %vm65_vm0, %v565_v42, %v564_v41  ;;  %s203_s8 = smov 48 }
  0x11   :  { %v553_v37 = vld [vmem:[%s1114_s0 + $0x5] ss:$16 sm:%s158_s12]   ;;  %v156_v38 = vsel %vm65_vm0, %v552_v36, %v551_v34  ;;  %v566_v45 = vld [vmem:[%s1114_s0 + $0x84] ss:$16 sm:%s225_s25]   ;;  %s208_s9 = smov 192  ;;  %s262_s12 = smov 3 }
  0x12   :  { %v554_v39 = vld [vmem:[%s1114_s0 + $0x5] ss:$16 sm:%s163_s15]   ;;  %v161_v40 = vsel %vm70_vm1, %v553_v37, %v156_v38  ;;  %v567_v46 = vld [vmem:[%s1114_s0 + $0x84] ss:$16 sm:%s230_s26]   ;;  %v228_v47 = vsel %vm70_vm1, %v566_v45, %v223_v44  ;;  %s265_s17 = smov 12  ;;  %s270_s18 = smov 48 }
  0x13   :  { %v166_v43 = vsel %vm75_vm2, %v554_v39, %v161_v40  ;;  %v560_v48 = vld [vmem:[%s1114_s0 + $0x4] ss:$16 sm:%s195_s2]   ;;  %v233_v49 = vsel %vm75_vm2, %v567_v46, %v228_v47  ;;  %s636_s19 = smov 64   ;;  %s240_s23 = smov 3  ;;  %v573_v55 = vld [vmem:[%s1114_s0 + $0xb] ss:$16 sm:%s262_s12]  }
  0x14   :  { %167 = vrot.lane.b32.xlu0 %v166_v43, %s635_s22  ;;  %v561_v50 = vld [vmem:[%s1114_s0 + $0x4] ss:$16 sm:%s198_s3]   ;;  %234 = vrot.lane.b32.xlu1 %v233_v49, %s636_s19  ;;  %s275_s22 = smov 192  ;;  %s243_s28 = smov 12 }
  0x15   :  { %v562_v51 = vld [vmem:[%s1114_s0 + $0x4] ss:$16 sm:%s203_s8]   ;;  %v201_v52 = vsel %vm65_vm0, %v561_v50, %v560_v48  ;;  %v574_v56 = vld [vmem:[%s1114_s0 + $0xb] ss:$16 sm:%s265_s17]   ;;  %s248_s29 = smov 48  ;;  %s253_s5 = smov 192 }
  0x16   :  { %v563_v53 = vld [vmem:[%s1114_s0 + $0x4] ss:$16 sm:%s208_s9]   ;;  %v206_v54 = vsel %vm70_vm1, %v562_v51, %v201_v52  ;;  %v268_v58 = vsel %vm65_vm0, %v574_v56, %v573_v55  ;;  %v575_v59 = vld [vmem:[%s1114_s0 + $0xb] ss:$16 sm:%s270_s18]   ;;  %s308_s8 = smov 3  ;;  %s311_s9 = smov 12 }
  0x17   :  { %v211_v57 = vsel %vm75_vm2, %v563_v53, %v206_v54  ;;  %v576_v60 = vld [vmem:[%s1114_s0 + $0xb] ss:$16 sm:%s275_s22]   ;;  %v273_v61 = vsel %vm70_vm1, %v575_v59, %v268_v58  ;;  %v569_v62 = vld [vmem:[%s1114_s0 + $0x3] ss:$16 sm:%s240_s23]   ;;  %s316_s14 = smov 48  ;;  %s321_s15 = smov 192 }
  0x18   :  { %212 = vrot.lane.b32.xlu0 %v211_v57, %s636_s19  ;;  %v278_v63 = vsel %vm75_vm2, %v576_v60, %v273_v61  ;;  %v570_v0 = vld [vmem:[%s1114_s0 + $0x3] ss:$16 sm:%s243_s28]   ;;  %s637_s16 = smov 48   ;;  %s285_s19 = smov 3 }
  0x19   :  { %v571_v1 = vld [vmem:[%s1114_s0 + $0x3] ss:$16 sm:%s248_s29]   ;;  %279 = vrot.lane.b32.xlu1 %v278_v63, %s637_s16  ;;  %v246_v2 = vsel %vm65_vm0, %v570_v0, %v569_v62  ;;  %s288_s24 = smov 12  ;;  %s293_s25 = smov 48 }
  0x1a   :  { %v572_v3 = vld [vmem:[%s1114_s0 + $0x3] ss:$16 sm:%s253_s5]   ;;  %v251_v4 = vsel %vm70_vm1, %v571_v1, %v246_v2  ;;  %v583_v5 = vld [vmem:[%s1114_s0 + $0x8b] ss:$16 sm:%s308_s8]   ;;  %s298_s30 = smov 192  ;;  %s353_s4 = smov 3 }
  0x1b   :  { %v584_v6 = vld [vmem:[%s1114_s0 + $0x8b] ss:$16 sm:%s311_s9]   ;;  %v256_v7 = vsel %vm75_vm2, %v572_v3, %v251_v4  ;;  %v578_v12 = vld [vmem:[%s1114_s0 + $0x83] ss:$16 sm:%s285_s19]   ;;  %s356_s5 = smov 12  ;;  %s361_s10 = smov 48 }
  0x1c   :  { %v314_v8 = vsel %vm65_vm0, %v584_v6, %v583_v5  ;;  %v585_v9 = vld [vmem:[%s1114_s0 + $0x8b] ss:$16 sm:%s316_s14]   ;;  %257 = vrot.lane.b32.xlu0 %v256_v7, %s637_s16  ;;  %s366_s11 = smov 192  ;;  %s331_s14 = smov 3 }
  0x1d   :  { %v586_v10 = vld [vmem:[%s1114_s0 + $0x8b] ss:$16 sm:%s321_s15]   ;;  %v319_v11 = vsel %vm70_vm1, %v585_v9, %v314_v8  ;;  %v579_v14 = vld [vmem:[%s1114_s0 + $0x83] ss:$16 sm:%s288_s24]   ;;  %s334_s20 = smov 12  ;;  %s339_s21 = smov 48 }
  0x1e   :  { %v324_v13 = vsel %vm75_vm2, %v586_v10, %v319_v11  ;;  %v580_v15 = vld [vmem:[%s1114_s0 + $0x83] ss:$16 sm:%s293_s25]   ;;  %v291_v16 = vsel %vm65_vm0, %v579_v14, %v578_v12  ;;  %v592_v19 = vld [vmem:[%s1114_s0 + $0xa] ss:$16 sm:%s353_s4]   ;;  %s344_s26 = smov 192  ;;  %s399_s28 = smov 3 }
  0x1f   :  { %325 = vrot.lane.b32.xlu1 %v324_v13, %s637_s16  ;;  %v581_v17 = vld [vmem:[%s1114_s0 + $0x83] ss:$16 sm:%s298_s30]   ;;  %v296_v18 = vsel %vm70_vm1, %v580_v15, %v291_v16  ;;  %s402_s29 = smov 12  ;;  %s412_s6 = smov 192 }
  0x20   :  { %v593_v20 = vld [vmem:[%s1114_s0 + $0xa] ss:$16 sm:%s356_s5]   ;;  %v301_v21 = vsel %vm75_vm2, %v581_v17, %v296_v18  ;;  %v588_v26 = vld [vmem:[%s1114_s0 + $0x2] ss:$16 sm:%s331_s14]   ;;  %s407_s5 = smov 48  ;;  %s638_s7 = smov 32  }
  0x21   :  { %v359_v22 = vsel %vm65_vm0, %v593_v20, %v592_v19  ;;  %v594_v23 = vld [vmem:[%s1114_s0 + $0xa] ss:$16 sm:%s361_s10]   ;;  %302 = vrot.lane.b32.xlu0 %v301_v21, %s637_s16  ;;  %s376_s10 = smov 3  ;;  %s379_s15 = smov 12 }
  0x22   :  { %v595_v24 = vld [vmem:[%s1114_s0 + $0xa] ss:$16 sm:%s366_s11]   ;;  %v364_v25 = vsel %vm70_vm1, %v594_v23, %v359_v22  ;;  %v589_v28 = vld [vmem:[%s1114_s0 + $0x2] ss:$16 sm:%s334_s20]   ;;  %s384_s17 = smov 48  ;;  %s389_s22 = smov 192 }
  0x23   :  { %v369_v27 = vsel %vm75_vm2, %v595_v24, %v364_v25  ;;  %v590_v29 = vld [vmem:[%s1114_s0 + $0x2] ss:$16 sm:%s339_s21]   ;;  %v337_v30 = vsel %vm65_vm0, %v589_v28, %v588_v26  ;;  %v602_v33 = vld [vmem:[%s1114_s0 + $0x8a] ss:$16 sm:%s399_s28]   ;;  %s444_s25 = smov 3  ;;  %s452_s30 = smov 48 }
  0x24   :  { %370 = vrot.lane.b32.xlu1 %v369_v27, %s638_s7  ;;  %v591_v31 = vld [vmem:[%s1114_s0 + $0x2] ss:$16 sm:%s344_s26]   ;;  %v342_v32 = vsel %vm70_vm1, %v590_v29, %v337_v30  ;;  %s447_s26 = smov 12  ;;  %s457_s2 = smov 192 }
  0x25   :  { %v603_v34 = vld [vmem:[%s1114_s0 + $0x8a] ss:$16 sm:%s402_s29]   ;;  %v347_v35 = vsel %vm75_vm2, %v591_v31, %v342_v32  ;;  %v597_v40 = vld [vmem:[%s1114_s0 + $0x82] ss:$16 sm:%s376_s10]   ;;  %s425_s11 = smov 12  ;;  %s430_s12 = smov 48 }
  0x26   :  { %v405_v36 = vsel %vm65_vm0, %v603_v34, %v602_v33  ;;  %v604_v37 = vld [vmem:[%s1114_s0 + $0x8a] ss:$16 sm:%s407_s5]   ;;  %348 = vrot.lane.b32.xlu0 %v347_v35, %s638_s7  ;;  %s422_s5 = smov 3  ;;  %s435_s18 = smov 192 }
  0x27   :  { %v605_v38 = vld [vmem:[%s1114_s0 + $0x8a] ss:$16 sm:%s412_s6]   ;;  %v410_v39 = vsel %vm70_vm1, %v604_v37, %v405_v36  ;;  %v598_v42 = vld [vmem:[%s1114_s0 + $0x82] ss:$16 sm:%s379_s15]   ;;  %s490_s19 = smov 3  ;;  %s493_s21 = smov 12 }
  0x28   :  { %v415_v41 = vsel %vm75_vm2, %v605_v38, %v410_v39  ;;  %v599_v43 = vld [vmem:[%s1114_s0 + $0x82] ss:$16 sm:%s384_s17]   ;;  %v382_v44 = vsel %vm65_vm0, %v598_v42, %v597_v40  ;;  %v611_v47 = vld [vmem:[%s1114_s0 + $0x9] ss:$16 sm:%s444_s25]   ;;  %s498_s27 = smov 48  ;;  %s503_s28 = smov 192 }
  0x29   :  { %416 = vrot.lane.b32.xlu1 %v415_v41, %s638_s7  ;;  %v600_v45 = vld [vmem:[%s1114_s0 + $0x82] ss:$16 sm:%s389_s22]   ;;  %v387_v46 = vsel %vm70_vm1, %v599_v43, %v382_v44  ;;  %v521_v55 = vld [vmem:[%s1114_s0 + $0x80] ss:$8 sm:$0xf]   ;;  %s639_s29 = smov 16  }
  0x2a   :  { %v612_v48 = vld [vmem:[%s1114_s0 + $0x9] ss:$16 sm:%s447_s26]   ;;  %v392_v49 = vsel %vm75_vm2, %v600_v45, %v387_v46  ;;  %v607_v54 = vld [vmem:[%s1114_s0 + $0x1] ss:$16 sm:%s422_s5]   ;;  %s467_s3 = smov 3 }
  0x2b   :  { %v450_v50 = vsel %vm65_vm0, %v612_v48, %v611_v47  ;;  %v613_v51 = vld [vmem:[%s1114_s0 + $0x9] ss:$16 sm:%s452_s30]   ;;  %393 = vrot.lane.b32.xlu0 %v392_v49, %s638_s7  ;;  %v522_v61 = vld [vmem:[%s1114_s0 + $0x80] ss:$8 sm:$0xf0]  }
  0x2c   :  { %v614_v52 = vld [vmem:[%s1114_s0 + $0x9] ss:$16 sm:%s457_s2]   ;;  %v455_v53 = vsel %vm70_vm1, %v613_v51, %v450_v50  ;;  %v608_v57 = vld [vmem:[%s1114_s0 + $0x1] ss:$16 sm:%s425_s11]   ;;  %s470_s11 = smov 12  ;;  %v34_v1 = vsel %vm4_vm3, %v522_v61, %v521_v55 }
  0x2d   :  { %v460_v56 = vsel %vm75_vm2, %v614_v52, %v455_v53  ;;  %v609_v58 = vld [vmem:[%s1114_s0 + $0x1] ss:$16 sm:%s430_s12]   ;;  %v428_v59 = vsel %vm65_vm0, %v608_v57, %v607_v54  ;;  %v621_v63 = vld [vmem:[%s1114_s0 + $0x89] ss:$16 sm:%s490_s19]   ;;  %s475_s12 = smov 48 }
  0x2e   :  { %461 = vrot.lane.b32.xlu1 %v460_v56, %s639_s29  ;;  %v610_v60 = vld [vmem:[%s1114_s0 + $0x1] ss:$16 sm:%s435_s18]   ;;  %v433_v62 = vsel %vm70_vm1, %v609_v58, %v428_v59  ;;  %s480_s18 = smov 192  ;;  %523 = vst.msk [vmem:[%s1115_s1 + $0x10] ss:$8 sm:$0x3] %vm6_vm4, %v34_v1  }
  0x2f   :  { %v622_v0 = vld [vmem:[%s1114_s0 + $0x89] ss:$16 sm:%s493_s21]   ;;  %v438_v2 = vsel %vm75_vm2, %v610_v60, %v433_v62  ;;  %524 = vst.msk [vmem:[%s1115_s1 + $0x1] ss:$8 sm:$0xc] %vm6_vm4, %v34_v1  }
  0x30   :  { %v496_v3 = vsel %vm65_vm0, %v622_v0, %v621_v63  ;;  %v623_v4 = vld [vmem:[%s1114_s0 + $0x89] ss:$16 sm:%s498_s27]   ;;  %525 = vst.msk [vmem:[%s1115_s1 - $0xe] ss:$8 sm:$0x30] %vm6_vm4, %v34_v1   ;;  %439 = vrot.lane.b32.xlu0 %v438_v2, %s639_s29 }
  0x31   :  { %v624_v5 = vld [vmem:[%s1114_s0 + $0x89] ss:$16 sm:%s503_s28]   ;;  %526 = vst.msk [vmem:[%s1115_s1 - $0x1d] ss:$8 sm:$0xc0] %vm6_vm4, %v34_v1   ;;  %v501_v6 = vsel %vm70_vm1, %v623_v4, %v496_v3 }
  0x32   :  { %v616_v7 = vld [vmem:[%s1114_s0 + $0x81] ss:$16 sm:%s467_s3]   ;;  %v527_v8 = vld [vmem:[%s1114_s0 + $0xc0] ss:$8 sm:$0xf]   ;;  %v506_v9 = vsel %vm75_vm2, %v624_v5, %v501_v6 }
  0x33   :  { %v617_v10 = vld [vmem:[%s1114_s0 + $0x81] ss:$16 sm:%s470_s11]   ;;  %507 = vrot.lane.b32.xlu1 %v506_v9, %s639_s29  ;;  %v528_v14 = vld [vmem:[%s1114_s0 + $0xc0] ss:$8 sm:$0xf0]  }
  0x34   :  { %v618_v11 = vld [vmem:[%s1114_s0 + $0x81] ss:$16 sm:%s475_s12]   ;;  %v473_v12 = vsel %vm65_vm0, %v617_v10, %v616_v7  ;;  %v49_v16 = vsel %vm4_vm3, %v528_v14, %v527_v8  ;;  %v2_v17 = vld [vmem:[%s1114_s0] ss:$8 sm:$0xf]  }
  0x35   :  { %v619_v13 = vld [vmem:[%s1114_s0 + $0x81] ss:$16 sm:%s480_s18]   ;;  %v478_v15 = vsel %vm70_vm1, %v618_v11, %v473_v12  ;;  %v3_v18 = vld [vmem:[%s1114_s0] ss:$8 sm:$0xf0]  }
  0x36   :  { %v483_v19 = vsel %vm75_vm2, %v619_v13, %v478_v15  ;;  %529 = vst.msk [vmem:[%s1115_s1 + $0x14] ss:$8 sm:$0x3] %vm6_vm4, %v49_v16   ;;  %530 = vst.msk [vmem:[%s1115_s1 + $0x5] ss:$8 sm:$0xc] %vm6_vm4, %v49_v16   ;;  %v5_v20 = vsel %vm4_vm3, %v3_v18, %v2_v17 }
  0x37   :  { %531 = vst.msk [vmem:[%s1115_s1 - $0xa] ss:$8 sm:$0x30] %vm6_vm4, %v49_v16   ;;  %532 = vst.msk [vmem:[%s1115_s1 - $0x19] ss:$8 sm:$0xc0] %vm6_vm4, %v49_v16   ;;  %484 = vrot.lane.b32.xlu0 %v483_v19, %s639_s29 }
  0x38   :  { %v515_v21 = vld [vmem:[%s1114_s0 + $0x40] ss:$8 sm:$0xf]   ;;  %7 = vst.msk [vmem:[%s1115_s1] ss:$8 sm:$0x3] %vm6_vm4, %v5_v20  }
  0x39   :  { %v516_v22 = vld [vmem:[%s1114_s0 + $0x40] ss:$8 sm:$0xf0]   ;;  %512 = vst.msk [vmem:[%s1115_s1 - $0xf] ss:$8 sm:$0xc] %vm6_vm4, %v5_v20  }
  0x3a   :  { %513 = vst.msk [vmem:[%s1115_s1 - $0x1e] ss:$8 sm:$0x30] %vm6_vm4, %v5_v20   ;;  %514 = vst.msk [vmem:[%s1115_s1 - $0x2d] ss:$8 sm:$0xc0] %vm6_vm4, %v5_v20   ;;  %v19_v23 = vsel %vm4_vm3, %v516_v22, %v515_v21 }
  0x3b   :  { %517 = vst.msk [vmem:[%s1115_s1 + $0x4] ss:$8 sm:$0x3] %vm6_vm4, %v19_v23   ;;  %518 = vst.msk [vmem:[%s1115_s1 - $0xb] ss:$8 sm:$0xc] %vm6_vm4, %v19_v23  }
  0x3c   :  { %519 = vst.msk [vmem:[%s1115_s1 - $0x1a] ss:$8 sm:$0x30] %vm6_vm4, %v19_v23   ;;  %520 = vst.msk [vmem:[%s1115_s1 - $0x29] ss:$8 sm:$0xc0] %vm6_vm4, %v19_v23  }
  0x78   :  { %v123_v24 = vpop.permute.xlu1 %122  }
  0x7a   :  { %v78_v25 = vpop.permute.xlu0 %77  }
  0x7b   :  { %80 = vst.msk [vmem:[%s1115_s1] sm:$0xff] %vm79_vm5, %v78_v25  }
  0x7c   :  { %125 = vst.msk [vmem:[%s1115_s1] sm:$0xff] %vm124_vm6, %v123_v24  }
  0x7d   :  { %v145_v26 = vpop.permute.xlu1 %144  }
  0x7f   :  { %v100_v27 = vpop.permute.xlu0 %99  }
  0x80   :  { %541 = vst.msk [vmem:[%s1115_s1 + $0x10] sm:$0xff] %vm79_vm5, %v100_v27  }
  0x81   :  { %550 = vst.msk [vmem:[%s1115_s1 + $0x10] sm:$0xff] %vm124_vm6, %v145_v26  }
  0x82   :  { %v190_v28 = vpop.permute.xlu1 %189  }
  0x83   :  { %559 = vst.msk [vmem:[%s1115_s1 + $0x10] sm:$0xff] %vm169_vm7, %v190_v28  }
  0x86   :  { %v168_v29 = vpop.permute.xlu0 %167   ;;  %v235_v30 = vpop.permute.xlu1 %234  }
  0x87   :  { %170 = vst.msk [vmem:[%s1115_s1] sm:$0xff] %vm169_vm7, %v168_v29  }
  0x88   :  { %568 = vst.msk [vmem:[%s1115_s1 + $0x10] sm:$0xff] %vm214_vm8, %v235_v30  }
  0x8a   :  { %v213_v31 = vpop.permute.xlu0 %212  }
  0x8b   :  { %215 = vst.msk [vmem:[%s1115_s1] sm:$0xff] %vm214_vm8, %v213_v31   ;;  %v280_v32 = vpop.permute.xlu1 %279  }
  0x8c   :  { %577 = vst.msk [vmem:[%s1115_s1 + $0x8] sm:$0xff] %vm259_vm9, %v280_v32  }
  0x8e   :  { %v258_v33 = vpop.permute.xlu0 %257  }
  0x8f   :  { %260 = vst.msk [vmem:[%s1115_s1] sm:$0xff] %vm259_vm9, %v258_v33  }
  0x91   :  { %v326_v34 = vpop.permute.xlu1 %325  }
  0x92   :  { %587 = vst.msk [vmem:[%s1115_s1 + $0x18] sm:$0xff] %vm259_vm9, %v326_v34  }
  0x93   :  { %v303_v35 = vpop.permute.xlu0 %302  }
  0x94   :  { %582 = vst.msk [vmem:[%s1115_s1 + $0x10] sm:$0xff] %vm259_vm9, %v303_v35  }
  0x96   :  { %v371_v36 = vpop.permute.xlu1 %370  }
  0x97   :  { %596 = vst.msk [vmem:[%s1115_s1 + $0x8] sm:$0xff] %vm350_vm10, %v371_v36  }
  0x98   :  { %v349_v37 = vpop.permute.xlu0 %348  }
  0x99   :  { %351 = vst.msk [vmem:[%s1115_s1] sm:$0xff] %vm350_vm10, %v349_v37  }
  0x9b   :  { %v417_v38 = vpop.permute.xlu1 %416  }
  0x9c   :  { %606 = vst.msk [vmem:[%s1115_s1 + $0x18] sm:$0xff] %vm350_vm10, %v417_v38  }
  0x9d   :  { %v394_v39 = vpop.permute.xlu0 %393  }
  0x9e   :  { %601 = vst.msk [vmem:[%s1115_s1 + $0x10] sm:$0xff] %vm350_vm10, %v394_v39  }
  0xa0   :  { %v462_v40 = vpop.permute.xlu1 %461  }
  0xa1   :  { %615 = vst.msk [vmem:[%s1115_s1 + $0x8] sm:$0xff] %vm441_vm11, %v462_v40  }
  0xa2   :  { %v440_v41 = vpop.permute.xlu0 %439  }
  0xa3   :  { %442 = vst.msk [vmem:[%s1115_s1] sm:$0xff] %vm441_vm11, %v440_v41  }
  0xa5   :  { %v508_v42 = vpop.permute.xlu1 %507  }
  0xa6   :  { %625 = vst.msk [vmem:[%s1115_s1 + $0x18] sm:$0xff] %vm441_vm11, %v508_v42  }
  0xa9   :  { %v485_v43 = vpop.permute.xlu0 %484  }
  0xaa   :  { %620 = vst.msk [vmem:[%s1115_s1 + $0x10] sm:$0xff] %vm441_vm11, %v485_v43  }

// kernel: hierarchical_bert_forward.1
= control target key start
LH: loop header
LB: loop body
LE: loop exit
PB: predicated region body
PF: predicated region fallthrough
CT: control target
= control target key end

     0   :  { %s11879_s3 = smov 2   ;;  %vm259_vm0 = vcmask 785408   ;;  %s11880_s10 = smov 3   ;;  %vm446_vm1 = vcmask 130048   ;;  %vm2231_vm2 = vcmask 64512   ;;  %vm2585_vm3 = vcmask 523264   ;;  %s15757_s0 = inlined_call_operand.smem [shape: u32[32], index: -1, kind: input, shape index: {}] }
   0x1   :  { %s11921_s6 = sld [smem:[%s15757_s0 + %s11879_s3]]   ;;  %s11881_s14 = smov 9   ;;  %vm11905_vm4 = vmmov 0  }
   0x2   :  { %s11926_s9 = sld [smem:[%s15757_s0]]   ;;  %s11882_s18 = smov 10  }
   0x3   :  { %s11949_s13 = sld [smem:[%s15757_s0 + %s11880_s10]]   ;;  %s11883_s22 = smov 11  }
   0x4   :  { %s8606_s17 = sld [smem:[%s15757_s0 + %s11881_s14]]   ;;  %s11884_s26 = smov 13  }
   0x5   :  { %s8607_s21 = sld [smem:[%s15757_s0 + %s11882_s18]]   ;;  %s11885_s30 = smov 15  }
   0x6   :  { %s11964_s25 = sld [smem:[%s15757_s0 + %s11883_s22]]   ;;  %s11886_s4 = smov 6  }
   0x7   :  { %v141_v0 = vld [vmem:[%s11921_s6 + $0x58] sm:$0xff]  ;;  %v140_v1 = vld [vmem:[%s11921_s6 + $0x50] sm:$0xff]  ;;  %v139_v2 = vld [vmem:[%s11921_s6 + $0x48] sm:$0xff]  ;;  %s12037_s29 = sld [smem:[%s15757_s0 + %s11884_s26]]   ;;  %s11888_s14 = smov 5  }
   0x8   :  { %10055 = vmatprep.subr.mxu0 %v141_v0  ;;  %10082 = vmatprep.subr.mxu1 %v141_v0  ;;  %v138_v3 = vld [vmem:[%s11921_s6 + $0x40] sm:$0xff]  ;;  %v137_v5 = vld [vmem:[%s11921_s6 + $0x38] sm:$0xff]  ;;  %v136_v6 = vld [vmem:[%s11921_s6 + $0x30] sm:$0xff]  ;;  %s12094_s3 = sld [smem:[%s15757_s0 + %s11885_s30]]   ;;  %s11889_s18 = smov 14  }
   0x9   :  { %10056 = vmatpush3.msra.mxu0 %v141_v0  ;;  %10083 = vmatpush3.msra.mxu1 %v141_v0  ;;  %v255_v4 = vld [vmem:[%s11926_s9] sm:$0xff]  ;;  %v135_v7 = vld [vmem:[%s11921_s6 + $0x28] sm:$0xff]  ;;  %v133_v9 = vld [vmem:[%s11921_s6 + $0x18] sm:$0xff]  ;;  %s12100_s8 = sld [smem:[%s15757_s0 + %s11886_s4]]   ;;  %s11890_s22 = smov 16  }
   0xa   :  { %10057 = vmatprep.subr.mxu0 %v140_v1  ;;  %10084 = vmatprep.subr.mxu1 %v140_v1  ;;  %v134_v8 = vld [vmem:[%s11921_s6 + $0x20] sm:$0xff]  ;;  %v132_v10 = vld [vmem:[%s11921_s6 + $0x10] sm:$0xff]  ;;  %v131_v11 = vld [vmem:[%s11921_s6 + $0x8] sm:$0xff]  ;;  %s12596_s26 = sld [smem:[%s15757_s0 + %s11890_s22]]   ;;  %s11892_s27 = smov 1  }
   0xb   :  { %10058 = vmatpush3.msra.mxu0 %v140_v1  ;;  %10085 = vmatpush3.msra.mxu1 %v140_v1  ;;  %v130_v12 = vld [vmem:[%s11921_s6] sm:$0xff]  ;;  %v256_v13 = vld [vmem:[%s11926_s9 + $0x8] sm:$0xff]  ;;  %v144_v38 = vld [vmem:[%s11949_s13 + $0x10] sm:$0xff]  ;;  %s11887_s9 = smov 12   ;;  %s12931_s1 = sld [smem:[%s15757_s0 + %s11892_s27]]  }
   0xc   :  { %10059 = vmatprep.subr.mxu0 %v139_v2  ;;  %10079 = vmatprep.mubr.msk.f32.mxu0 %vm259_vm0, %v255_v4  ;;  %v142_v20 = vld [vmem:[%s11949_s13] sm:$0xff]  ;;  %v143_v36 = vld [vmem:[%s11949_s13 + $0x8] sm:$0xff]  ;;  %v156_v39 = vld [vmem:[%s11949_s13 + $0x70] sm:$0xff]  ;;  %s12329_s12 = sld [smem:[%s15757_s0 + %s11887_s9]]   ;;  %s11893_s2 = smov 7  }
   0xd   :  { %10060 = vmatpush3.msra.mxu0 %v139_v2  ;;  %10086 = vmatprep.subr.mxu1 %v139_v2  ;;  %v154_v21 = vld [vmem:[%s11949_s13 + $0x60] sm:$0xff]  ;;  %v155_v37 = vld [vmem:[%s11949_s13 + $0x68] sm:$0xff]  ;;  %v715_v40 = vld [vmem:[%s11964_s25 + $0x58] sm:$0xff]  ;;  %s13368_s7 = sld [smem:[%s15757_s0 + %s11893_s2]]   ;;  %s11894_s9 = smov 4  }
   0xe   :  { %10061 = vmatprep.subr.mxu0 %v138_v3  ;;  %10087 = vmatpush3.msra.mxu1 %v139_v2  ;;  %v8633_v27 = vld [vmem:[%s8606_s17] ss:$0 sm:$0xff]  ;;  %v145_v41 = vld [vmem:[%s11949_s13 + $0x18] sm:$0xff]  ;;  %v714_v45 = vld [vmem:[%s11964_s25 + $0x50] sm:$0xff]  ;;  %s12334_s17 = sld [smem:[%s15757_s0 + %s11888_s14]]   ;;  %s11895_s15 = smov 17  }
   0xf   :  { %10062 = vmatpush3.msra.mxu0 %v138_v3  ;;  %10088 = vmatprep.subr.mxu1 %v138_v3  ;;  %v8634_v30 = vld [vmem:[%s8607_s21] ss:$0 sm:$0xff]  ;;  %v157_v42 = vld [vmem:[%s11949_s13 + $0x78] sm:$0xff]  ;;  %v147_v46 = vld [vmem:[%s11949_s13 + $0x28] sm:$0xff]  ;;  %s12481_s21 = sld [smem:[%s15757_s0 + %s11889_s18]]   ;;  %s11896_s20 = smov 18  }
  0x10   :  { %10063 = vmatprep.subr.mxu0 %v137_v5  ;;  %10089 = vmatpush3.msra.mxu1 %v138_v3  ;;  %v146_v43 = vld [vmem:[%s11949_s13 + $0x20] sm:$0xff]  ;;  %v159_v47 = vld [vmem:[%s11949_s13 + $0x88] sm:$0xff]  ;;  %v148_v48 = vld [vmem:[%s11949_s13 + $0x30] sm:$0xff]  ;;  %s13530_s14 = sld [smem:[%s15757_s0 + %s11894_s9]]   ;;  %s11897_s27 = smov 21  }
  0x11   :  { %10064 = vmatpush3.msra.mxu0 %v137_v5  ;;  %10090 = vmatprep.subr.mxu1 %v137_v5  ;;  %v158_v44 = vld [vmem:[%s11949_s13 + $0x80] sm:$0xff]  ;;  %v160_v49 = vld [vmem:[%s11949_s13 + $0x90] sm:$0xff]  ;;  %v713_v50 = vld [vmem:[%s11964_s25 + $0x48] sm:$0xff]  ;;  %s13591_s19 = sld [smem:[%s15757_s0 + %s11895_s15]]   ;;  %s11898_s4 = smov 23  }
  0x12   :  { %10065 = vmatprep.subr.mxu0 %v136_v6  ;;  %10091 = vmatpush3.msra.mxu1 %v137_v5  ;;  %v149_v51 = vld [vmem:[%s11949_s13 + $0x38] sm:$0xff]  ;;  %v150_v53 = vld [vmem:[%s11949_s13 + $0x40] sm:$0xff]  ;;  %v151_v56 = vld [vmem:[%s11949_s13 + $0x48] sm:$0xff]  ;;  %s13650_s24 = sld [smem:[%s15757_s0 + %s11896_s20]]   ;;  %s11899_s11 = smov 19  }
  0x13   :  { %10066 = vmatpush3.msra.mxu0 %v136_v6  ;;  %10092 = vmatprep.subr.mxu1 %v136_v6  ;;  %v161_v52 = vld [vmem:[%s11949_s13 + $0x98] sm:$0xff]  ;;  %v162_v54 = vld [vmem:[%s11949_s13 + $0xa0] sm:$0xff]  ;;  %v163_v57 = vld [vmem:[%s11949_s13 + $0xa8] sm:$0xff]  ;;  %s13671_s2 = sld [smem:[%s15757_s0 + %s11897_s27]]   ;;  %s11900_s20 = smov 20  }
  0x14   :  { %10067 = vmatprep.subr.mxu0 %v135_v7  ;;  %10093 = vmatpush3.msra.mxu1 %v136_v6  ;;  %v712_v55 = vld [vmem:[%s11964_s25 + $0x40] sm:$0xff]  ;;  %v152_v58 = vld [vmem:[%s11949_s13 + $0x50] sm:$0xff]  ;;  %v711_v60 = vld [vmem:[%s11964_s25 + $0x38] sm:$0xff]  ;;  %s13701_s10 = sld [smem:[%s15757_s0 + %s11898_s4]]   ;;  %s11901_s28 = smov 22  }
  0x15   :  { %10068 = vmatpush3.msra.mxu0 %v135_v7  ;;  %10094 = vmatprep.subr.mxu1 %v135_v7  ;;  %v164_v59 = vld [vmem:[%s11949_s13 + $0xb0] sm:$0xff]  ;;  %v153_v61 = vld [vmem:[%s11949_s13 + $0x58] sm:$0xff]  ;;  %v709_v0 = vld [vmem:[%s11964_s25 + $0x28] sm:$0xff]  ;;  %s13718_s18 = sld [smem:[%s15757_s0 + %s11899_s11]]   ;;  %s11902_s9 = smov 24  }
  0x16   :  { %10069 = vmatprep.subr.mxu0 %v134_v8  ;;  %10095 = vmatpush3.msra.mxu1 %v135_v7  ;;  %v165_v62 = vld [vmem:[%s11949_s13 + $0xb8] sm:$0xff]  ;;  %v710_v63 = vld [vmem:[%s11964_s25 + $0x30] sm:$0xff]  ;;  %v708_v1 = vld [vmem:[%s11964_s25 + $0x20] sm:$0xff]  ;;  %s13723_s27 = sld [smem:[%s15757_s0 + %s11900_s20]]   ;;  %s11903_s20 = smov 25  }
  0x17   :  { %10070 = vmatpush3.msra.mxu0 %v134_v8  ;;  %10096 = vmatprep.subr.mxu1 %v134_v8  ;;  %v707_v2 = vld [vmem:[%s11964_s25 + $0x18] sm:$0xff]  ;;  %v706_v3 = vld [vmem:[%s11964_s25 + $0x10] sm:$0xff]  ;;  %v704_v5 = vld [vmem:[%s11964_s25] sm:$0xff]  ;;  %s13803_s5 = sld [smem:[%s15757_s0 + %s11901_s28]]   ;;  %s11904_s30 = smov 26  }
  0x18   :  { %10071 = vmatprep.subr.mxu0 %v133_v9  ;;  %10097 = vmatpush3.msra.mxu1 %v134_v8  ;;  %v1272_v6 = vld [vmem:[%s12037_s29 + $0x58] sm:$0xff]  ;;  %s13821_s16 = sld [smem:[%s15757_s0 + %s11902_s9]]   ;;  %s11912_s15 = smov 31  }
  0x19   :  { %10072 = vmatpush3.msra.mxu0 %v133_v9  ;;  %10098 = vmatprep.subr.mxu1 %v133_v9  ;;  %s13857_s28 = sld [smem:[%s15757_s0 + %s11903_s20]]  }
  0x1a   :  { %10073 = vmatprep.subr.mxu0 %v132_v10  ;;  %10099 = vmatpush3.msra.mxu1 %v133_v9  ;;  %s13862_s11 = sld [smem:[%s15757_s0 + %s11904_s30]]  }
  0x1b   :  { %10074 = vmatpush3.msra.mxu0 %v132_v10  ;;  %10100 = vmatprep.subr.mxu1 %v132_v10  ;;  %s8628_s22 = sld [smem:[%s15757_s0 + %s11912_s15]]  }
  0x1c   :  { %10075 = vmatprep.subr.mxu0 %v131_v11  ;;  %10101 = vmatpush3.msra.mxu1 %v132_v10 }
  0x1d   :  { %10076 = vmatpush3.msra.mxu0 %v131_v11  ;;  %10102 = vmatprep.subr.mxu1 %v131_v11 }
  0x1e   :  { %10077 = vmatprep.subr.mxu0 %v130_v12  ;;  %10103 = vmatpush3.msra.mxu1 %v131_v11  ;;  %v1271_v11 = vld [vmem:[%s12037_s29 + $0x50] sm:$0xff] }
  0x1f   :  { %10078 = vmatpush3.msra.mxu0 %v130_v12  ;;  %10104 = vmatprep.subr.mxu1 %v130_v12 }
  0x20   :  { %10080 = vmatmul.mubr.msk.f32.vlgmr.msra.gmra.mxu0 %vm259_vm0, %v256_v13  ;;  %10105 = vmatpush3.msra.mxu1 %v130_v12 }
  0x21   :  { %10113 = vmatprep.mubr.msk.f32.mxu0 %vm446_vm1, %v142_v20 }
  0xe0   :  { %v10081_v14 = vpop.f32.mrf.mxu0 }
  0xe1   :  { %v342_v15 = vsub.f32 %v256_v13, %v10081_v14  ;;  %v1270_v13 = vld [vmem:[%s12037_s29 + $0x48] sm:$0xff] }
  0xe2   :  { %v332_v16 = vpop.f32.mrf.mxu0 }
  0xe3   :  { %v341_v17 = vsub.f32 %v255_v4, %v332_v16  ;;  %v344_v19 = vmul.f32 %v342_v15, %v342_v15  ;;  %v705_v4 = vld [vmem:[%s11964_s25 + $0x8] sm:$0xff]  ;;  %v1269_v16 = vld [vmem:[%s12037_s29 + $0x40] sm:$0xff] }
  0xe5   :  { %v343_v18 = vmul.f32 %v341_v17, %v341_v17 }
  0xe7   :  { %10106 = vmatprep.mubr.msk.f32.mxu1 %vm259_vm0, %v343_v18  ;;  %v1268_v18 = vld [vmem:[%s12037_s29 + $0x38] sm:$0xff] }
  0xe8   :  { %10107 = vmatmul.mubr.msk.f32.vlgmr.msra.gmra.mxu1 %vm259_vm0, %v344_v19 }
  0xe9   :  { %10131 = vmatprep.mubr.msk.f32.mxu1 %vm446_vm1, %v154_v21  ;;  %v1267_v21 = vld [vmem:[%s12037_s29 + $0x30] sm:$0xff] }
 0x1a8   :  { %v10108_v22 = vpop.f32.mrf.mxu1 }
 0x1a9   :  { %v423_v23 = vadd.f32 1e-12, %v10108_v22 }
 0x1aa   :  { %v417_v24 = vpop.f32.mrf.mxu1 }
 0x1ab   :  { %11354 = vrsqrt.f32 %v423_v23  ;;  %v418_v25 = vadd.f32 1e-12, %v417_v24  ;;  %v1266_v23 = vld [vmem:[%s12037_s29 + $0x28] sm:$0xff] }
 0x1ad   :  { %11356 = vrsqrt.f32 %v418_v25 }
 0x1b8   :  { %v11355_v26 = vpop.eup %11354 }
 0x1b9   :  { %v429_v28 = vmul.f32 %v11355_v26, %v342_v15  ;;  %v1265_v26 = vld [vmem:[%s12037_s29 + $0x20] sm:$0xff] }
 0x1ba   :  { %v11357_v29 = vpop.eup %11356 }
 0x1bb   :  { %v437_v31 = vmul.f32 %v8633_v27, %v429_v28  ;;  %v428_v32 = vmul.f32 %v11357_v29, %v341_v17  ;;  %v1264_v28 = vld [vmem:[%s12037_s29 + $0x18] sm:$0xff] }
 0x1bd   :  { %v11966_v33 = vadd.f32 %v8634_v30, %v437_v31  ;;  %v436_v34 = vmul.f32 %v8633_v27, %v428_v32  ;;  %v1263_v31 = vld [vmem:[%s12037_s29 + $0x10] sm:$0xff] }
 0x1bf   :  { %10109 = vmatprep.subr.mxu0 %v11966_v33  ;;  %11316 = vmatprep.subr.mxu1 %v11966_v33  ;;  %v11970_v35 = vadd.f32 %v8634_v30, %v436_v34  ;;  %v1262_v34 = vld [vmem:[%s12037_s29 + $0x8] sm:$0xff] }
 0x1c0   :  { %10110 = vmatpush3.msra.mxu0 %v11966_v33  ;;  %11318 = vmatpush3.msra.mxu1 %v11966_v33 }
 0x1c1   :  { %10111 = vmatprep.subr.mxu0 %v11970_v35  ;;  %11317 = vmatprep.subr.mxu1 %v11970_v35 }
 0x1c2   :  { %10112 = vmatpush3.msra.mxu0 %v11970_v35  ;;  %11319 = vmatpush3.msra.mxu1 %v11970_v35 }
 0x1c3   :  { %10114 = vmatmul.mubr.msk.f32.vlgmr.msra.gmra.mxu0 %vm446_vm1, %v143_v36  ;;  %10132 = vmatmul.mubr.msk.f32.vlgmr.msra.gmra.mxu1 %vm446_vm1, %v155_v37 }
 0x1c4   :  { %10116 = vmatprep.mubr.msk.f32.mxu0 %vm446_vm1, %v144_v38  ;;  %10134 = vmatprep.mubr.msk.f32.mxu1 %vm446_vm1, %v156_v39  ;;  %v1261_v38 = vld [vmem:[%s12037_s29] sm:$0xff]  ;;  %v12122_v39 = vld [vmem:[%s12100_s8 + $0x58] sm:$0xff] }
 0x1c5   :  { %10149 = vmatprep.subr.mxu1 %v715_v40  ;;  %10209 = vmatprep.subr.mxu0 %v12122_v39 }
 0x1c6   :  { %10150 = vmatpush3.msra.mxu1 %v715_v40  ;;  %v1757_v40 = vld [vmem:[%s12094_s3 + $0x58] sm:$0xff]  ;;  %10210 = vmatpush3.msra.mxu0 %v12122_v39 }
 0x1c7   :  { %10117 = vmatmul.mubr.msk.f32.gmra.mxu0 %vm446_vm1, %v145_v41  ;;  %10135 = vmatmul.mubr.msk.f32.gmra.mxu1 %vm446_vm1, %v157_v42  ;;  %v12133_v42 = vld [vmem:[%s12100_s8 + $0x50] sm:$0xff] }
 0x1c8   :  { %10119 = vmatprep.mubr.msk.f32.mxu0 %vm446_vm1, %v146_v43  ;;  %10137 = vmatprep.mubr.msk.f32.mxu1 %vm446_vm1, %v158_v44  ;;  %v12139_v43 = vld [vmem:[%s12100_s8 + $0x48] sm:$0xff] }
 0x1c9   :  { %10151 = vmatprep.subr.mxu1 %v714_v45  ;;  %10211 = vmatprep.subr.mxu0 %v12133_v42 }
 0x1ca   :  { %10152 = vmatpush3.msra.mxu1 %v714_v45  ;;  %10212 = vmatpush3.msra.mxu0 %v12133_v42  ;;  %v12148_v45 = vld [vmem:[%s12100_s8 + $0x40] sm:$0xff] }
 0x1cb   :  { %10120 = vmatmul.mubr.msk.f32.gmra.mxu0 %vm446_vm1, %v147_v46  ;;  %10138 = vmatmul.mubr.msk.f32.gmra.mxu1 %vm446_vm1, %v159_v47  ;;  %v12155_v46 = vld [vmem:[%s12100_s8 + $0x38] sm:$0xff] }
 0x1cc   :  { %10122 = vmatprep.mubr.msk.f32.mxu0 %vm446_vm1, %v148_v48  ;;  %10140 = vmatprep.mubr.msk.f32.mxu1 %vm446_vm1, %v160_v49  ;;  %v12164_v48 = vld [vmem:[%s12100_s8 + $0x30] sm:$0xff]  ;;  %v12171_v49 = vld [vmem:[%s12100_s8 + $0x28] sm:$0xff] }
 0x1cd   :  { %10153 = vmatprep.subr.mxu1 %v713_v50  ;;  %10213 = vmatprep.subr.mxu0 %v12139_v43 }
 0x1ce   :  { %10154 = vmatpush3.msra.mxu1 %v713_v50  ;;  %10214 = vmatpush3.msra.mxu0 %v12139_v43 }
 0x1cf   :  { %10123 = vmatmul.mubr.msk.f32.gmra.mxu0 %vm446_vm1, %v149_v51  ;;  %10141 = vmatmul.mubr.msk.f32.gmra.mxu1 %vm446_vm1, %v161_v52  ;;  %v12180_v51 = vld [vmem:[%s12100_s8 + $0x20] sm:$0xff] }
 0x1d0   :  { %10125 = vmatprep.mubr.msk.f32.mxu0 %vm446_vm1, %v150_v53  ;;  %10143 = vmatprep.mubr.msk.f32.mxu1 %vm446_vm1, %v162_v54  ;;  %v1756_v53 = vld [vmem:[%s12094_s3 + $0x50] sm:$0xff]  ;;  %v1755_v54 = vld [vmem:[%s12094_s3 + $0x48] sm:$0xff] }
 0x1d1   :  { %10155 = vmatprep.subr.mxu1 %v712_v55  ;;  %10215 = vmatprep.subr.mxu0 %v12148_v45 }
 0x1d2   :  { %10156 = vmatpush3.msra.mxu1 %v712_v55  ;;  %10216 = vmatpush3.msra.mxu0 %v12148_v45  ;;  %v1754_v55 = vld [vmem:[%s12094_s3 + $0x40] sm:$0xff] }
 0x1d3   :  { %10126 = vmatmul.mubr.msk.f32.gmra.mxu0 %vm446_vm1, %v151_v56  ;;  %10144 = vmatmul.mubr.msk.f32.gmra.mxu1 %vm446_vm1, %v163_v57  ;;  %v1753_v56 = vld [vmem:[%s12094_s3 + $0x38] sm:$0xff]  ;;  %v1752_v57 = vld [vmem:[%s12094_s3 + $0x30] sm:$0xff] }
 0x1d4   :  { %10128 = vmatprep.mubr.msk.f32.mxu0 %vm446_vm1, %v152_v58  ;;  %10146 = vmatprep.mubr.msk.f32.mxu1 %vm446_vm1, %v164_v59  ;;  %v1751_v58 = vld [vmem:[%s12094_s3 + $0x28] sm:$0xff]  ;;  %v1750_v59 = vld [vmem:[%s12094_s3 + $0x20] sm:$0xff] }
 0x1d5   :  { %10157 = vmatprep.subr.mxu1 %v711_v60  ;;  %10217 = vmatprep.subr.mxu0 %v12155_v46 }
 0x1d6   :  { %10158 = vmatpush3.msra.mxu1 %v711_v60  ;;  %10218 = vmatpush3.msra.mxu0 %v12155_v46  ;;  %v1749_v60 = vld [vmem:[%s12094_s3 + $0x18] sm:$0xff] }
 0x1d7   :  { %10129 = vmatmul.mubr.msk.f32.gmra.mxu0 %vm446_vm1, %v153_v61  ;;  %10147 = vmatmul.mubr.msk.f32.gmra.mxu1 %vm446_vm1, %v165_v62  ;;  %v1748_v61 = vld [vmem:[%s12094_s3 + $0x10] sm:$0xff]  ;;  %v12226_v62 = vld [vmem:[%s12100_s8 + $0x18] sm:$0xff] }
 0x1d8   :  { %10159 = vmatprep.subr.mxu1 %v710_v63  ;;  %10219 = vmatprep.subr.mxu0 %v12164_v48 }
 0x1d9   :  { %10160 = vmatpush3.msra.mxu1 %v710_v63  ;;  %10220 = vmatpush3.msra.mxu0 %v12164_v48  ;;  %v1747_v63 = vld [vmem:[%s12094_s3 + $0x8] sm:$0xff] }
 0x1da   :  { %10161 = vmatprep.subr.mxu1 %v709_v0  ;;  %10221 = vmatprep.subr.mxu0 %v12171_v49 }
 0x1db   :  { %10162 = vmatpush3.msra.mxu1 %v709_v0  ;;  %10222 = vmatpush3.msra.mxu0 %v12171_v49  ;;  %v1746_v0 = vld [vmem:[%s12094_s3] sm:$0xff] }
 0x1dc   :  { %10163 = vmatprep.subr.mxu1 %v708_v1  ;;  %10223 = vmatprep.subr.mxu0 %v12180_v51 }
 0x1dd   :  { %10164 = vmatpush3.msra.mxu1 %v708_v1  ;;  %10224 = vmatpush3.msra.mxu0 %v12180_v51  ;;  %v12237_v1 = vld [vmem:[%s12100_s8 + $0x10] sm:$0xff] }
 0x1de   :  { %10165 = vmatprep.subr.mxu1 %v707_v2  ;;  %10225 = vmatprep.subr.mxu0 %v12226_v62 }
 0x1df   :  { %10166 = vmatpush3.msra.mxu1 %v707_v2  ;;  %10226 = vmatpush3.msra.mxu0 %v12226_v62  ;;  %v12244_v2 = vld [vmem:[%s12100_s8 + $0x8] sm:$0xff] }
 0x1e0   :  { %10167 = vmatprep.subr.mxu1 %v706_v3  ;;  %10227 = vmatprep.subr.mxu0 %v12237_v1 }
 0x1e1   :  { %10168 = vmatpush3.msra.mxu1 %v706_v3  ;;  %10228 = vmatpush3.msra.mxu0 %v12237_v1  ;;  %v12249_v3 = vld [vmem:[%s12100_s8] sm:$0xff] }
 0x1e2   :  { %10169 = vmatprep.subr.mxu1 %v705_v4  ;;  %10229 = vmatprep.subr.mxu0 %v12244_v2 }
 0x1e3   :  { %10170 = vmatpush3.msra.mxu1 %v705_v4  ;;  %10230 = vmatpush3.msra.mxu0 %v12244_v2  ;;  %v12337_v4 = vld [vmem:[%s12329_s12] ss:$0 sm:$0xff] }
 0x1e4   :  { %10171 = vmatprep.subr.mxu1 %v704_v5  ;;  %10231 = vmatprep.subr.mxu0 %v12249_v3 }
 0x1e5   :  { %10172 = vmatpush3.msra.mxu1 %v704_v5  ;;  %10232 = vmatpush3.msra.mxu0 %v12249_v3 }
 0x1e6   :  { %10269 = vmatprep.subr.mxu1 %v1272_v6  ;;  %10329 = vmatprep.subr.mxu0 %v12122_v39 }
 0x283   :  { %v12040_v7 = vpop.f32.mrf.mxu0  ;;  %v12042_v8 = vpop.f32.mrf.mxu1 }
 0x285   :  { %v12044_v9 = vpop.f32.mrf.mxu0  ;;  %v12046_v10 = vpop.f32.mrf.mxu1 }
 0x286   :  { %10173 = vmatprep.mubr.msk.f32.mxu1 %vm259_vm0, %v12044_v9 }
 0x287   :  { %v12051_v12 = vpop.f32.mrf.mxu0  ;;  %10174 = vmatmul.mubr.msk.f32.vlgmr.msra.gmra.mxu1 %vm259_vm0, %v12040_v7  ;;  %v12058_v15 = vpop.f32.mrf.mxu1 }
 0x288   :  { %10270 = vmatpush3.msra.mxu1 %v1272_v6 }
 0x289   :  { %v12056_v14 = vpop.f32.mrf.mxu0  ;;  %10271 = vmatprep.subr.mxu1 %v1271_v11  ;;  %v12070_v20 = vpop.f32.mrf.mxu1 }
 0x28a   :  { %10176 = vmatprep.mubr.msk.f32.mxu1 %vm259_vm0, %v12056_v14  ;;  %10272 = vmatpush3.msra.mxu1 %v1271_v11 }
 0x28b   :  { %v12063_v17 = vpop.f32.mrf.mxu0  ;;  %10177 = vmatmul.mubr.msk.f32.gmra.mxu1 %vm259_vm0, %v12051_v12  ;;  %10273 = vmatprep.subr.mxu1 %v1270_v13  ;;  %v12082_v25 = vpop.f32.mrf.mxu1 }
 0x28c   :  { %10274 = vmatpush3.msra.mxu1 %v1270_v13 }
 0x28d   :  { %v12068_v19 = vpop.f32.mrf.mxu0  ;;  %10275 = vmatprep.subr.mxu1 %v1269_v16  ;;  %v12104_v30 = vpop.f32.mrf.mxu1 }
 0x28e   :  { %10179 = vmatprep.mubr.msk.f32.mxu1 %vm259_vm0, %v12068_v19  ;;  %10276 = vmatpush3.msra.mxu1 %v1269_v16 }
 0x28f   :  { %v12075_v22 = vpop.f32.mrf.mxu0  ;;  %10180 = vmatmul.mubr.msk.f32.gmra.mxu1 %vm259_vm0, %v12063_v17  ;;  %10277 = vmatprep.subr.mxu1 %v1268_v18  ;;  %v12116_v37 = vpop.f32.mrf.mxu1 }
 0x290   :  { %10278 = vmatpush3.msra.mxu1 %v1268_v18 }
 0x291   :  { %v12080_v24 = vpop.f32.mrf.mxu0  ;;  %10279 = vmatprep.subr.mxu1 %v1267_v21  ;;  %v12129_v41 = vpop.f32.mrf.mxu1 }
 0x292   :  { %10182 = vmatprep.mubr.msk.f32.mxu1 %vm259_vm0, %v12080_v24  ;;  %10280 = vmatpush3.msra.mxu1 %v1267_v21 }
 0x293   :  { %v12087_v27 = vpop.f32.mrf.mxu0  ;;  %10183 = vmatmul.mubr.msk.f32.gmra.mxu1 %vm259_vm0, %v12075_v22  ;;  %10281 = vmatprep.subr.mxu1 %v1266_v23  ;;  %v12144_v44 = vpop.f32.mrf.mxu1 }
 0x294   :  { %10282 = vmatpush3.msra.mxu1 %v1266_v23  ;;  %v12364_v23 = vld [vmem:[%s12334_s17 + $0x20] sm:$0xff] }
 0x295   :  { %v12102_v29 = vpop.f32.mrf.mxu0  ;;  %10283 = vmatprep.subr.mxu1 %v1265_v26  ;;  %v12160_v47 = vpop.f32.mrf.mxu1 }
 0x296   :  { %10185 = vmatprep.mubr.msk.f32.mxu1 %vm259_vm0, %v12102_v29  ;;  %10284 = vmatpush3.msra.mxu1 %v1265_v26 }
 0x297   :  { %v12109_v32 = vpop.f32.mrf.mxu0  ;;  %10186 = vmatmul.mubr.msk.f32.gmra.mxu1 %vm259_vm0, %v12087_v27  ;;  %10285 = vmatprep.subr.mxu1 %v1264_v28  ;;  %v12176_v50 = vpop.f32.mrf.mxu1 }
 0x298   :  { %10286 = vmatpush3.msra.mxu1 %v1264_v28 }
 0x299   :  { %v12114_v36 = vpop.f32.mrf.mxu0  ;;  %10287 = vmatprep.subr.mxu1 %v1263_v31  ;;  %v12189_v52 = vpop.f32.mrf.mxu1 }
 0x29a   :  { %10188 = vmatprep.mubr.msk.f32.mxu1 %vm259_vm0, %v12114_v36  ;;  %10288 = vmatpush3.msra.mxu1 %v1263_v31  ;;  %v12380_v31 = vld [vmem:[%s12334_s17 + $0x30] sm:$0xff] }
 0x29b   :  { %10189 = vmatmul.mubr.msk.f32.gmra.mxu1 %vm259_vm0, %v12109_v32  ;;  %10289 = vmatprep.subr.mxu1 %v1262_v34 }
 0x29c   :  { %10191 = vmatprep.mubr.msk.f32.mxu1 %vm259_vm0, %v12046_v10  ;;  %10290 = vmatpush3.msra.mxu1 %v1262_v34  ;;  %v12384_v34 = vld [vmem:[%s12334_s17 + $0x38] sm:$0xff] }
 0x29d   :  { %10291 = vmatprep.subr.mxu1 %v1261_v38 }
 0x29e   :  { %10292 = vmatpush3.msra.mxu1 %v1261_v38 }
 0x29f   :  { %10192 = vmatmul.mubr.msk.f32.gmra.mxu1 %vm259_vm0, %v12042_v8  ;;  %10389 = vmatprep.subr.mxu1 %v1757_v40 }
 0x2a0   :  { %10194 = vmatprep.mubr.msk.f32.mxu1 %vm259_vm0, %v12070_v20 }
 0x2a3   :  { %10195 = vmatmul.mubr.msk.f32.gmra.mxu1 %vm259_vm0, %v12058_v15 }
 0x2a4   :  { %10197 = vmatprep.mubr.msk.f32.mxu1 %vm259_vm0, %v12104_v30 }
 0x2a7   :  { %10198 = vmatmul.mubr.msk.f32.gmra.mxu1 %vm259_vm0, %v12082_v25 }
 0x2a8   :  { %10200 = vmatprep.mubr.msk.f32.mxu1 %vm259_vm0, %v12129_v41 }
 0x2ab   :  { %10201 = vmatmul.mubr.msk.f32.gmra.mxu1 %vm259_vm0, %v12116_v37 }
 0x2ac   :  { %10203 = vmatprep.mubr.msk.f32.mxu1 %vm259_vm0, %v12160_v47 }
 0x2af   :  { %10204 = vmatmul.mubr.msk.f32.gmra.mxu1 %vm259_vm0, %v12144_v44 }
 0x2b0   :  { %10206 = vmatprep.mubr.msk.f32.mxu1 %vm259_vm0, %v12189_v52 }
 0x2b3   :  { %10207 = vmatmul.mubr.msk.f32.gmra.mxu1 %vm259_vm0, %v12176_v50 }
 0x2b4   :  { %10293 = vmatprep.mubr.msk.f32.mxu1 %vm259_vm0, %v12044_v9 }
 0x2b7   :  { %10294 = vmatmul.mubr.msk.f32.vlgmr.msra.gmra.mxu1 %vm259_vm0, %v12040_v7 }
 0x2b8   :  { %10296 = vmatprep.mubr.msk.f32.mxu1 %vm259_vm0, %v12056_v14  ;;  %10390 = vmatpush3.msra.mxu1 %v1757_v40 }
 0x2b9   :  { %10391 = vmatprep.subr.mxu1 %v1756_v53 }
 0x2ba   :  { %10392 = vmatpush3.msra.mxu1 %v1756_v53 }
 0x2bb   :  { %10297 = vmatmul.mubr.msk.f32.gmra.mxu1 %vm259_vm0, %v12051_v12  ;;  %10393 = vmatprep.subr.mxu1 %v1755_v54 }
 0x2bc   :  { %10299 = vmatprep.mubr.msk.f32.mxu1 %vm259_vm0, %v12068_v19  ;;  %10394 = vmatpush3.msra.mxu1 %v1755_v54 }
 0x2bd   :  { %10395 = vmatprep.subr.mxu1 %v1754_v55 }
 0x2be   :  { %10396 = vmatpush3.msra.mxu1 %v1754_v55 }
 0x2bf   :  { %10300 = vmatmul.mubr.msk.f32.gmra.mxu1 %vm259_vm0, %v12063_v17  ;;  %10397 = vmatprep.subr.mxu1 %v1753_v56 }
 0x2c0   :  { %10302 = vmatprep.mubr.msk.f32.mxu1 %vm259_vm0, %v12080_v24  ;;  %10398 = vmatpush3.msra.mxu1 %v1753_v56 }
 0x2c1   :  { %10399 = vmatprep.subr.mxu1 %v1752_v57 }
 0x2c2   :  { %10400 = vmatpush3.msra.mxu1 %v1752_v57  ;;  %v12412_v57 = vld [vmem:[%s12334_s17 + $0x50] sm:$0xff] }
 0x2c3   :  { %10303 = vmatmul.mubr.msk.f32.gmra.mxu1 %vm259_vm0, %v12075_v22  ;;  %10401 = vmatprep.subr.mxu1 %v1751_v58 }
 0x2c4   :  { %10305 = vmatprep.mubr.msk.f32.mxu1 %vm259_vm0, %v12102_v29  ;;  %10402 = vmatpush3.msra.mxu1 %v1751_v58 }
 0x2c5   :  { %10403 = vmatprep.subr.mxu1 %v1750_v59 }
 0x2c6   :  { %10404 = vmatpush3.msra.mxu1 %v1750_v59  ;;  %v12416_v59 = vld [vmem:[%s12334_s17 + $0x58] sm:$0xff] }
 0x2c7   :  { %10306 = vmatmul.mubr.msk.f32.gmra.mxu1 %vm259_vm0, %v12087_v27  ;;  %10405 = vmatprep.subr.mxu1 %v1749_v60 }
 0x2c8   :  { %10308 = vmatprep.mubr.msk.f32.mxu1 %vm259_vm0, %v12114_v36  ;;  %10406 = vmatpush3.msra.mxu1 %v1749_v60 }
 0x2c9   :  { %10407 = vmatprep.subr.mxu1 %v1748_v61 }
 0x2ca   :  { %10408 = vmatpush3.msra.mxu1 %v1748_v61 }
 0x2cb   :  { %10309 = vmatmul.mubr.msk.f32.gmra.mxu1 %vm259_vm0, %v12109_v32  ;;  %10409 = vmatprep.subr.mxu1 %v1747_v63 }
 0x2cc   :  { %10311 = vmatprep.mubr.msk.f32.mxu1 %vm259_vm0, %v12046_v10  ;;  %10410 = vmatpush3.msra.mxu1 %v1747_v63 }
 0x2cd   :  { %10411 = vmatprep.subr.mxu1 %v1746_v0 }
 0x2ce   :  { %10412 = vmatpush3.msra.mxu1 %v1746_v0 }
 0x2cf   :  { %10312 = vmatmul.mubr.msk.f32.gmra.mxu1 %vm259_vm0, %v12042_v8 }
 0x2d0   :  { %10314 = vmatprep.mubr.msk.f32.mxu1 %vm259_vm0, %v12070_v20 }
 0x2d3   :  { %10315 = vmatmul.mubr.msk.f32.gmra.mxu1 %vm259_vm0, %v12058_v15 }
 0x2d4   :  { %10317 = vmatprep.mubr.msk.f32.mxu1 %vm259_vm0, %v12104_v30 }
 0x2d7   :  { %10318 = vmatmul.mubr.msk.f32.gmra.mxu1 %vm259_vm0, %v12082_v25 }
 0x2d8   :  { %10320 = vmatprep.mubr.msk.f32.mxu1 %vm259_vm0, %v12129_v41 }
 0x2db   :  { %10321 = vmatmul.mubr.msk.f32.gmra.mxu1 %vm259_vm0, %v12116_v37 }
 0x2dc   :  { %10323 = vmatprep.mubr.msk.f32.mxu1 %vm259_vm0, %v12160_v47 }
 0x2df   :  { %10324 = vmatmul.mubr.msk.f32.gmra.mxu1 %vm259_vm0, %v12144_v44 }
 0x2e0   :  { %10326 = vmatprep.mubr.msk.f32.mxu1 %vm259_vm0, %v12189_v52 }
 0x2e3   :  { %10327 = vmatmul.mubr.msk.f32.gmra.mxu1 %vm259_vm0, %v12176_v50 }
 0x2e4   :  { %10413 = vmatprep.mubr.msk.f32.mxu1 %vm259_vm0, %v12044_v9  ;;  %v12344_v9 = vld [vmem:[%s12334_s17 + $0x8] sm:$0xff] }
 0x2e7   :  { %10414 = vmatmul.mubr.msk.f32.vlgmr.msra.gmra.mxu1 %vm259_vm0, %v12040_v7  ;;  %v12341_v7 = vld [vmem:[%s12334_s17] sm:$0xff] }
 0x2e8   :  { %10416 = vmatprep.mubr.msk.f32.mxu1 %vm259_vm0, %v12056_v14 }
 0x2eb   :  { %10417 = vmatmul.mubr.msk.f32.gmra.mxu1 %vm259_vm0, %v12051_v12 }
 0x2ec   :  { %10419 = vmatprep.mubr.msk.f32.mxu1 %vm259_vm0, %v12068_v19 }
 0x2ef   :  { %10420 = vmatmul.mubr.msk.f32.gmra.mxu1 %vm259_vm0, %v12063_v17  ;;  %v12354_v17 = vld [vmem:[%s12334_s17 + $0x18] sm:$0xff] }
 0x2f0   :  { %10422 = vmatprep.mubr.msk.f32.mxu1 %vm259_vm0, %v12080_v24 }
 0x2f3   :  { %10423 = vmatmul.mubr.msk.f32.gmra.mxu1 %vm259_vm0, %v12075_v22 }
 0x2f4   :  { %10425 = vmatprep.mubr.msk.f32.mxu1 %vm259_vm0, %v12102_v29 }
 0x2f7   :  { %10426 = vmatmul.mubr.msk.f32.gmra.mxu1 %vm259_vm0, %v12087_v27 }
 0x2f8   :  { %10428 = vmatprep.mubr.msk.f32.mxu1 %vm259_vm0, %v12114_v36 }
 0x2fb   :  { %10429 = vmatmul.mubr.msk.f32.gmra.mxu1 %vm259_vm0, %v12109_v32 }
 0x2fc   :  { %10431 = vmatprep.mubr.msk.f32.mxu1 %vm259_vm0, %v12046_v10 }
 0x2ff   :  { %10432 = vmatmul.mubr.msk.f32.gmra.mxu1 %vm259_vm0, %v12042_v8 }
 0x300   :  { %10434 = vmatprep.mubr.msk.f32.mxu1 %vm259_vm0, %v12070_v20 }
 0x303   :  { %10435 = vmatmul.mubr.msk.f32.gmra.mxu1 %vm259_vm0, %v12058_v15  ;;  %v12351_v15 = vld [vmem:[%s12334_s17 + $0x10] sm:$0xff] }
 0x304   :  { %10437 = vmatprep.mubr.msk.f32.mxu1 %vm259_vm0, %v12104_v30 }
 0x307   :  { %10438 = vmatmul.mubr.msk.f32.gmra.mxu1 %vm259_vm0, %v12082_v25  ;;  %v12368_v25 = vld [vmem:[%s12334_s17 + $0x28] sm:$0xff] }
 0x308   :  { %10440 = vmatprep.mubr.msk.f32.mxu1 %vm259_vm0, %v12129_v41 }
 0x30b   :  { %10441 = vmatmul.mubr.msk.f32.gmra.mxu1 %vm259_vm0, %v12116_v37 }
 0x30c   :  { %10443 = vmatprep.mubr.msk.f32.mxu1 %vm259_vm0, %v12160_v47 }
 0x30f   :  { %10444 = vmatmul.mubr.msk.f32.gmra.mxu1 %vm259_vm0, %v12144_v44  ;;  %v12396_v44 = vld [vmem:[%s12334_s17 + $0x40] sm:$0xff] }
 0x310   :  { %10446 = vmatprep.mubr.msk.f32.mxu1 %vm259_vm0, %v12189_v52 }
 0x313   :  { %10447 = vmatmul.mubr.msk.f32.gmra.mxu1 %vm259_vm0, %v12176_v50  ;;  %v12400_v50 = vld [vmem:[%s12334_s17 + $0x48] sm:$0xff] }
 0x347   :  { %v10175_v5 = vpop.f32.mrf.mxu1 }
 0x348   :  { %v867_v6 = vadd.f32 %v10175_v5, %v12337_v4 }
 0x349   :  { %v861_v8 = vpop.f32.mrf.mxu1 }
 0x34a   :  { %v862_v10 = vadd.f32 %v12337_v4, %v861_v8  ;;  %v981_v13 = vmul.f32 %v867_v6, %v12344_v9  ;;  %v12428_v6 = vld [vmem:[%s12334_s17 + $0x60] sm:$0xff] }
 0x34b   :  { %v10178_v11 = vpop.f32.mrf.mxu1 }
 0x34c   :  { %v980_v12 = vmul.f32 %v862_v10, %v12341_v7  ;;  %v877_v14 = vadd.f32 %v10178_v11, %v12337_v4  ;;  %v12432_v10 = vld [vmem:[%s12334_s17 + $0x68] sm:$0xff] }
 0x34d   :  { %v871_v16 = vpop.f32.mrf.mxu1 }
 0x34e   :  { %v872_v18 = vadd.f32 %v12337_v4, %v871_v16  ;;  %10233 = vmatprep.mubr.msk.f32.mxu0 %vm259_vm0, %v980_v12  ;;  %v983_v21 = vmul.f32 %v877_v14, %v12354_v17 }
 0x34f   :  { %v10181_v19 = vpop.f32.mrf.mxu1  ;;  %10234 = vmatmul.mubr.msk.f32.vlgmr.msra.gmra.mxu0 %vm259_vm0, %v981_v13 }
 0x350   :  { %v982_v20 = vmul.f32 %v872_v18, %v12351_v15  ;;  %10330 = vmatpush3.msra.mxu0 %v12122_v39  ;;  %v887_v22 = vadd.f32 %v10181_v19, %v12337_v4  ;;  %v12444_v18 = vld [vmem:[%s12334_s17 + $0x70] sm:$0xff] }
 0x351   :  { %v881_v24 = vpop.f32.mrf.mxu1  ;;  %10331 = vmatprep.subr.mxu0 %v12133_v42 }
 0x352   :  { %v882_v26 = vadd.f32 %v12337_v4, %v881_v24  ;;  %10236 = vmatprep.mubr.msk.f32.mxu0 %vm259_vm0, %v982_v20  ;;  %10332 = vmatpush3.msra.mxu0 %v12133_v42  ;;  %v985_v29 = vmul.f32 %v887_v22, %v12368_v25  ;;  %v12448_v20 = vld [vmem:[%s12334_s17 + $0x78] sm:$0xff] }
 0x353   :  { %v10184_v27 = vpop.f32.mrf.mxu1  ;;  %10237 = vmatmul.mubr.msk.f32.gmra.mxu0 %vm259_vm0, %v983_v21  ;;  %10333 = vmatprep.subr.mxu0 %v12139_v43 }
 0x354   :  { %v984_v28 = vmul.f32 %v882_v26, %v12364_v23  ;;  %10334 = vmatpush3.msra.mxu0 %v12139_v43  ;;  %v897_v30 = vadd.f32 %v10184_v27, %v12337_v4 }
 0x355   :  { %v891_v32 = vpop.f32.mrf.mxu1  ;;  %10335 = vmatprep.subr.mxu0 %v12148_v45 }
 0x356   :  { %v892_v36 = vadd.f32 %v12337_v4, %v891_v32  ;;  %10239 = vmatprep.mubr.msk.f32.mxu0 %vm259_vm0, %v984_v28  ;;  %10336 = vmatpush3.msra.mxu0 %v12148_v45  ;;  %v987_v40 = vmul.f32 %v897_v30, %v12384_v34  ;;  %v12459_v28 = vld [vmem:[%s12334_s17 + $0x80] sm:$0xff]  ;;  %v12462_v30 = vld [vmem:[%s12334_s17 + $0x88] sm:$0xff] }
 0x357   :  { %v10187_v37 = vpop.f32.mrf.mxu1  ;;  %10240 = vmatmul.mubr.msk.f32.gmra.mxu0 %vm259_vm0, %v985_v29  ;;  %10337 = vmatprep.subr.mxu0 %v12155_v46 }
 0x358   :  { %v986_v38 = vmul.f32 %v892_v36, %v12380_v31  ;;  %10338 = vmatpush3.msra.mxu0 %v12155_v46  ;;  %v907_v41 = vadd.f32 %v10187_v37, %v12337_v4 }
 0x359   :  { %v901_v47 = vpop.f32.mrf.mxu1  ;;  %10339 = vmatprep.subr.mxu0 %v12164_v48 }
 0x35a   :  { %v902_v52 = vadd.f32 %v12337_v4, %v901_v47  ;;  %10242 = vmatprep.mubr.msk.f32.mxu0 %vm259_vm0, %v986_v38  ;;  %10340 = vmatpush3.msra.mxu0 %v12164_v48  ;;  %v989_v55 = vmul.f32 %v907_v41, %v12400_v50  ;;  %v12471_v41 = vld [vmem:[%s12334_s17 + $0x90] sm:$0xff] }
 0x35b   :  { %v10190_v53 = vpop.f32.mrf.mxu1  ;;  %10243 = vmatmul.mubr.msk.f32.gmra.mxu0 %vm259_vm0, %v987_v40  ;;  %10341 = vmatprep.subr.mxu0 %v12171_v49 }
 0x35c   :  { %v988_v54 = vmul.f32 %v902_v52, %v12396_v44  ;;  %10342 = vmatpush3.msra.mxu0 %v12171_v49  ;;  %v917_v56 = vadd.f32 %v10190_v53, %v12337_v4  ;;  %v12474_v52 = vld [vmem:[%s12334_s17 + $0x98] sm:$0xff] }
 0x35d   :  { %v911_v58 = vpop.f32.mrf.mxu1  ;;  %10343 = vmatprep.subr.mxu0 %v12180_v51 }
 0x35e   :  { %v912_v60 = vadd.f32 %v12337_v4, %v911_v58  ;;  %10245 = vmatprep.mubr.msk.f32.mxu0 %vm259_vm0, %v988_v54  ;;  %10344 = vmatpush3.msra.mxu0 %v12180_v51  ;;  %v991_v0 = vmul.f32 %v917_v56, %v12416_v59 }
 0x35f   :  { %v10193_v61 = vpop.f32.mrf.mxu1  ;;  %10246 = vmatmul.mubr.msk.f32.gmra.mxu0 %vm259_vm0, %v989_v55  ;;  %10345 = vmatprep.subr.mxu0 %v12226_v62 }
 0x360   :  { %v990_v63 = vmul.f32 %v912_v60, %v12412_v57  ;;  %10346 = vmatpush3.msra.mxu0 %v12226_v62  ;;  %v927_v5 = vadd.f32 %v10193_v61, %v12337_v4  ;;  %v12488_v60 = vld [vmem:[%s12334_s17 + $0xa0] sm:$0xff] }
 0x361   :  { %v921_v8 = vpop.f32.mrf.mxu1  ;;  %10347 = vmatprep.subr.mxu0 %v12237_v1 }
 0x362   :  { %v922_v11 = vadd.f32 %v12337_v4, %v921_v8  ;;  %10248 = vmatprep.mubr.msk.f32.mxu0 %vm259_vm0, %v990_v63  ;;  %10348 = vmatpush3.msra.mxu0 %v12237_v1  ;;  %v993_v14 = vmul.f32 %v927_v5, %v12432_v10  ;;  %v12491_v63 = vld [vmem:[%s12334_s17 + $0xa8] sm:$0xff] }
 0x363   :  { %v10196_v12 = vpop.f32.mrf.mxu1  ;;  %10249 = vmatmul.mubr.msk.f32.gmra.mxu0 %vm259_vm0, %v991_v0  ;;  %10349 = vmatprep.subr.mxu0 %v12244_v2 }
 0x364   :  { %v992_v13 = vmul.f32 %v922_v11, %v12428_v6  ;;  %10350 = vmatpush3.msra.mxu0 %v12244_v2  ;;  %v937_v16 = vadd.f32 %v10196_v12, %v12337_v4 }
 0x365   :  { %v931_v19 = vpop.f32.mrf.mxu1  ;;  %10351 = vmatprep.subr.mxu0 %v12249_v3 }
 0x366   :  { %v932_v21 = vadd.f32 %v12337_v4, %v931_v19  ;;  %10251 = vmatprep.mubr.msk.f32.mxu0 %vm259_vm0, %v992_v13  ;;  %10352 = vmatpush3.msra.mxu0 %v12249_v3  ;;  %v995_v26 = vmul.f32 %v937_v16, %v12448_v20  ;;  %v12500_v13 = vld [vmem:[%s12334_s17 + $0xb0] sm:$0xff]  ;;  %v12503_v16 = vld [vmem:[%s12334_s17 + $0xb8] sm:$0xff] }
 0x367   :  { %v10199_v22 = vpop.f32.mrf.mxu1  ;;  %10252 = vmatmul.mubr.msk.f32.gmra.mxu0 %vm259_vm0, %v993_v14  ;;  %10449 = vmatprep.subr.mxu0 %v12122_v39 }
 0x368   :  { %v994_v24 = vmul.f32 %v932_v21, %v12444_v18  ;;  %v947_v27 = vadd.f32 %v10199_v22, %v12337_v4  ;;  %v12508_v21 = vld [vmem:[%s12481_s21] ss:$0 sm:$0xff] }
 0x369   :  { %v941_v29 = vpop.f32.mrf.mxu1 }
 0x36a   :  { %v942_v32 = vadd.f32 %v12337_v4, %v941_v29  ;;  %10254 = vmatprep.mubr.msk.f32.mxu0 %vm259_vm0, %v994_v24  ;;  %v997_v38 = vmul.f32 %v947_v27, %v12462_v30 }
 0x36b   :  { %v10202_v36 = vpop.f32.mrf.mxu1  ;;  %10255 = vmatmul.mubr.msk.f32.gmra.mxu0 %vm259_vm0, %v995_v26 }
 0x36c   :  { %v996_v37 = vmul.f32 %v942_v32, %v12459_v28  ;;  %v957_v40 = vadd.f32 %v10202_v36, %v12337_v4 }
 0x36d   :  { %v951_v47 = vpop.f32.mrf.mxu1 }
 0x36e   :  { %v952_v53 = vadd.f32 %v12337_v4, %v951_v47  ;;  %10257 = vmatprep.mubr.msk.f32.mxu0 %vm259_vm0, %v996_v37  ;;  %v999_v56 = vmul.f32 %v957_v40, %v12474_v52 }
 0x36f   :  { %v10205_v54 = vpop.f32.mrf.mxu1  ;;  %10258 = vmatmul.mubr.msk.f32.gmra.mxu0 %vm259_vm0, %v997_v38 }
 0x370   :  { %v998_v55 = vmul.f32 %v952_v53, %v12471_v41  ;;  %v967_v58 = vadd.f32 %v10205_v54, %v12337_v4 }
 0x371   :  { %v961_v61 = vpop.f32.mrf.mxu1 }
 0x372   :  { %v962_v0 = vadd.f32 %v12337_v4, %v961_v61  ;;  %10260 = vmatprep.mubr.msk.f32.mxu0 %vm259_vm0, %v998_v55  ;;  %v1001_v11 = vmul.f32 %v967_v58, %v12491_v63 }
 0x373   :  { %v10208_v5 = vpop.f32.mrf.mxu1  ;;  %10261 = vmatmul.mubr.msk.f32.gmra.mxu0 %vm259_vm0, %v999_v56 }
 0x374   :  { %v1000_v8 = vmul.f32 %v962_v0, %v12488_v60  ;;  %v977_v12 = vadd.f32 %v10208_v5, %v12337_v4 }
 0x375   :  { %v971_v14 = vpop.f32.mrf.mxu1 }
 0x376   :  { %v972_v19 = vadd.f32 %v12337_v4, %v971_v14  ;;  %10263 = vmatprep.mubr.msk.f32.mxu0 %vm259_vm0, %v1000_v8  ;;  %v1003_v26 = vmul.f32 %v977_v12, %v12503_v16 }
 0x377   :  { %10264 = vmatmul.mubr.msk.f32.gmra.mxu0 %vm259_vm0, %v1001_v11  ;;  %v10295_v22 = vpop.f32.mrf.mxu1 }
 0x378   :  { %v1002_v24 = vmul.f32 %v972_v19, %v12500_v13  ;;  %v1352_v27 = vadd.f32 %v10295_v22, %v12508_v21 }
 0x379   :  { %v1346_v29 = vpop.f32.mrf.mxu1 }
 0x37a   :  { %v1347_v32 = vadd.f32 %v12508_v21, %v1346_v29  ;;  %10266 = vmatprep.mubr.msk.f32.mxu0 %vm259_vm0, %v1002_v24  ;;  %v1466_v37 = vmul.f32 %v1352_v27, %v12344_v9 }
 0x37b   :  { %10267 = vmatmul.mubr.msk.f32.gmra.mxu0 %vm259_vm0, %v1003_v26  ;;  %v10298_v4 = vpop.f32.mrf.mxu1 }
 0x37c   :  { %v1465_v36 = vmul.f32 %v1347_v32, %v12341_v7  ;;  %v1362_v38 = vadd.f32 %v10298_v4, %v12508_v21 }
 0x37d   :  { %v1356_v40 = vpop.f32.mrf.mxu1 }
 0x37e   :  { %v1357_v47 = vadd.f32 %v12508_v21, %v1356_v40  ;;  %10353 = vmatprep.mubr.msk.f32.mxu0 %vm259_vm0, %v1465_v36  ;;  %v1468_v55 = vmul.f32 %v1362_v38, %v12354_v17 }
 0x37f   :  { %v10301_v53 = vpop.f32.mrf.mxu1  ;;  %10354 = vmatmul.mubr.msk.f32.vlgmr.msra.gmra.mxu0 %vm259_vm0, %v1466_v37 }
 0x380   :  { %v1467_v54 = vmul.f32 %v1357_v47, %v12351_v15  ;;  %10450 = vmatpush3.msra.mxu0 %v12122_v39  ;;  %v1372_v56 = vadd.f32 %v10301_v53, %v12508_v21 }
 0x381   :  { %v1366_v58 = vpop.f32.mrf.mxu1  ;;  %10451 = vmatprep.subr.mxu0 %v12133_v42 }
 0x382   :  { %v1367_v61 = vadd.f32 %v12508_v21, %v1366_v58  ;;  %10356 = vmatprep.mubr.msk.f32.mxu0 %vm259_vm0, %v1467_v54  ;;  %10452 = vmatpush3.msra.mxu0 %v12133_v42  ;;  %v1470_v5 = vmul.f32 %v1372_v56, %v12368_v25 }
 0x383   :  { %v10304_v0 = vpop.f32.mrf.mxu1  ;;  %10357 = vmatmul.mubr.msk.f32.gmra.mxu0 %vm259_vm0, %v1468_v55  ;;  %10453 = vmatprep.subr.mxu0 %v12139_v43 }
 0x384   :  { %v1469_v39 = vmul.f32 %v1367_v61, %v12364_v23  ;;  %10454 = vmatpush3.msra.mxu0 %v12139_v43  ;;  %v1382_v8 = vadd.f32 %v10304_v0, %v12508_v21 }
 0x385   :  { %v1376_v11 = vpop.f32.mrf.mxu1  ;;  %10455 = vmatprep.subr.mxu0 %v12148_v45 }
 0x386   :  { %v1377_v12 = vadd.f32 %v12508_v21, %v1376_v11  ;;  %10359 = vmatprep.mubr.msk.f32.mxu0 %vm259_vm0, %v1469_v39  ;;  %10456 = vmatpush3.msra.mxu0 %v12148_v45  ;;  %v1472_v14 = vmul.f32 %v1382_v8, %v12384_v34 }
 0x387   :  { %v10307_v42 = vpop.f32.mrf.mxu1  ;;  %10360 = vmatmul.mubr.msk.f32.gmra.mxu0 %vm259_vm0, %v1470_v5  ;;  %10457 = vmatprep.subr.mxu0 %v12155_v46 }
 0x388   :  { %v1471_v43 = vmul.f32 %v1377_v12, %v12380_v31  ;;  %10458 = vmatpush3.msra.mxu0 %v12155_v46  ;;  %v1392_v19 = vadd.f32 %v10307_v42, %v12508_v21 }
 0x389   :  { %v1386_v22 = vpop.f32.mrf.mxu1  ;;  %10459 = vmatprep.subr.mxu0 %v12164_v48 }
 0x38a   :  { %v1387_v24 = vadd.f32 %v12508_v21, %v1386_v22  ;;  %10362 = vmatprep.mubr.msk.f32.mxu0 %vm259_vm0, %v1471_v43  ;;  %10460 = vmatpush3.msra.mxu0 %v12164_v48  ;;  %v1474_v26 = vmul.f32 %v1392_v19, %v12400_v50 }
 0x38b   :  { %v10310_v45 = vpop.f32.mrf.mxu1  ;;  %10363 = vmatmul.mubr.msk.f32.gmra.mxu0 %vm259_vm0, %v1472_v14  ;;  %10461 = vmatprep.subr.mxu0 %v12171_v49 }
 0x38c   :  { %v1473_v46 = vmul.f32 %v1387_v24, %v12396_v44  ;;  %10462 = vmatpush3.msra.mxu0 %v12171_v49  ;;  %v1402_v27 = vadd.f32 %v10310_v45, %v12508_v21 }
 0x38d   :  { %v1396_v29 = vpop.f32.mrf.mxu1  ;;  %10463 = vmatprep.subr.mxu0 %v12180_v51 }
 0x38e   :  { %v1397_v32 = vadd.f32 %v12508_v21, %v1396_v29  ;;  %10365 = vmatprep.mubr.msk.f32.mxu0 %vm259_vm0, %v1473_v46  ;;  %10464 = vmatpush3.msra.mxu0 %v12180_v51  ;;  %v1476_v4 = vmul.f32 %v1402_v27, %v12416_v59 }
 0x38f   :  { %v10313_v48 = vpop.f32.mrf.mxu1  ;;  %10366 = vmatmul.mubr.msk.f32.gmra.mxu0 %vm259_vm0, %v1474_v26  ;;  %10465 = vmatprep.subr.mxu0 %v12226_v62 }
 0x390   :  { %v1475_v49 = vmul.f32 %v1397_v32, %v12412_v57  ;;  %10466 = vmatpush3.msra.mxu0 %v12226_v62  ;;  %v1412_v36 = vadd.f32 %v10313_v48, %v12508_v21  ;;  %v12611_v32 = vld [vmem:[%s12596_s26] ss:$0 sm:$0xff] }
 0x391   :  { %v1406_v37 = vpop.f32.mrf.mxu1  ;;  %10467 = vmatprep.subr.mxu0 %v12237_v1 }
 0x392   :  { %v1407_v38 = vadd.f32 %v12508_v21, %v1406_v37  ;;  %10368 = vmatprep.mubr.msk.f32.mxu0 %vm259_vm0, %v1475_v49  ;;  %10468 = vmatpush3.msra.mxu0 %v12237_v1  ;;  %v1478_v40 = vmul.f32 %v1412_v36, %v12432_v10 }
 0x393   :  { %v10316_v51 = vpop.f32.mrf.mxu1  ;;  %10369 = vmatmul.mubr.msk.f32.gmra.mxu0 %vm259_vm0, %v1476_v4  ;;  %10469 = vmatprep.subr.mxu0 %v12244_v2 }
 0x394   :  { %v1477_v62 = vmul.f32 %v1407_v38, %v12428_v6  ;;  %10470 = vmatpush3.msra.mxu0 %v12244_v2  ;;  %v1422_v47 = vadd.f32 %v10316_v51, %v12508_v21 }
 0x395   :  { %v1416_v53 = vpop.f32.mrf.mxu1  ;;  %10471 = vmatprep.subr.mxu0 %v12249_v3 }
 0x396   :  { %v1417_v54 = vadd.f32 %v12508_v21, %v1416_v53  ;;  %10371 = vmatprep.mubr.msk.f32.mxu0 %vm259_vm0, %v1477_v62  ;;  %10472 = vmatpush3.msra.mxu0 %v12249_v3  ;;  %v1480_v2 = vmul.f32 %v1422_v47, %v12448_v20 }
 0x397   :  { %v10319_v1 = vpop.f32.mrf.mxu1  ;;  %10372 = vmatmul.mubr.msk.f32.gmra.mxu0 %vm259_vm0, %v1478_v40 }
 0x398   :  { %v1479_v55 = vmul.f32 %v1417_v54, %v12444_v18  ;;  %v1432_v56 = vadd.f32 %v10319_v1, %v12508_v21 }
 0x399   :  { %v1426_v58 = vpop.f32.mrf.mxu1 }
 0x39a   :  { %v1427_v61 = vadd.f32 %v12508_v21, %v1426_v58  ;;  %10374 = vmatprep.mubr.msk.f32.mxu0 %vm259_vm0, %v1479_v55  ;;  %v1482_v3 = vmul.f32 %v1432_v56, %v12462_v30 }
 0x39b   :  { %v10322_v0 = vpop.f32.mrf.mxu1  ;;  %10375 = vmatmul.mubr.msk.f32.gmra.mxu0 %vm259_vm0, %v1480_v2 }
 0x39c   :  { %v1481_v39 = vmul.f32 %v1427_v61, %v12459_v28  ;;  %v1442_v5 = vadd.f32 %v10322_v0, %v12508_v21 }
 0x39d   :  { %v1436_v8 = vpop.f32.mrf.mxu1 }
 0x39e   :  { %v1437_v11 = vadd.f32 %v12508_v21, %v1436_v8  ;;  %10377 = vmatprep.mubr.msk.f32.mxu0 %vm259_vm0, %v1481_v39  ;;  %v1484_v43 = vmul.f32 %v1442_v5, %v12474_v52 }
 0x39f   :  { %v10325_v12 = vpop.f32.mrf.mxu1  ;;  %10378 = vmatmul.mubr.msk.f32.gmra.mxu0 %vm259_vm0, %v1482_v3 }
 0x3a0   :  { %v1483_v42 = vmul.f32 %v1437_v11, %v12471_v41  ;;  %v1452_v14 = vadd.f32 %v10325_v12, %v12508_v21 }
 0x3a1   :  { %v1446_v19 = vpop.f32.mrf.mxu1 }
 0x3a2   :  { %v1447_v22 = vadd.f32 %v12508_v21, %v1446_v19  ;;  %10380 = vmatprep.mubr.msk.f32.mxu0 %vm259_vm0, %v1483_v42  ;;  %v1486_v46 = vmul.f32 %v1452_v14, %v12491_v63 }
 0x3a3   :  { %v10328_v24 = vpop.f32.mrf.mxu1  ;;  %10381 = vmatmul.mubr.msk.f32.gmra.mxu0 %vm259_vm0, %v1484_v43 }
 0x3a4   :  { %v1485_v45 = vmul.f32 %v1447_v22, %v12488_v60  ;;  %v1462_v26 = vadd.f32 %v10328_v24, %v12508_v21 }
 0x3a5   :  { %v1456_v27 = vpop.f32.mrf.mxu1 }
 0x3a6   :  { %v1457_v29 = vadd.f32 %v12508_v21, %v1456_v27  ;;  %10383 = vmatprep.mubr.msk.f32.mxu0 %vm259_vm0, %v1485_v45  ;;  %v1488_v4 = vmul.f32 %v1462_v26, %v12503_v16 }
 0x3a7   :  { %10384 = vmatmul.mubr.msk.f32.gmra.mxu0 %vm259_vm0, %v1486_v46  ;;  %v10415_v48 = vpop.f32.mrf.mxu1 }
 0x3a8   :  { %v1487_v49 = vmul.f32 %v1457_v29, %v12500_v13  ;;  %v1837_v36 = vadd.f32 %v10415_v48, %v12611_v32 }
 0x3a9   :  { %v1831_v37 = vpop.f32.mrf.mxu1 }
 0x3aa   :  { %v1832_v38 = vadd.f32 %v12611_v32, %v1831_v37  ;;  %10386 = vmatprep.mubr.msk.f32.mxu0 %vm259_vm0, %v1487_v49  ;;  %v1951_v62 = vmul.f32 %v1837_v36, %v12344_v9 }
 0x3ab   :  { %10387 = vmatmul.mubr.msk.f32.gmra.mxu0 %vm259_vm0, %v1488_v4  ;;  %v10418_v21 = vpop.f32.mrf.mxu1 }
 0x3ac   :  { %v1950_v51 = vmul.f32 %v1832_v38, %v12341_v7  ;;  %v1847_v40 = vadd.f32 %v10418_v21, %v12611_v32 }
 0x3ad   :  { %v1841_v47 = vpop.f32.mrf.mxu1 }
 0x3ae   :  { %v1842_v53 = vadd.f32 %v12611_v32, %v1841_v47  ;;  %10473 = vmatprep.mubr.msk.f32.mxu0 %vm259_vm0, %v1950_v51  ;;  %v1953_v55 = vmul.f32 %v1847_v40, %v12354_v17 }
 0x3af   :  { %v10421_v54 = vpop.f32.mrf.mxu1  ;;  %10474 = vmatmul.mubr.msk.f32.vlgmr.msra.gmra.mxu0 %vm259_vm0, %v1951_v62 }
 0x3b0   :  { %v1952_v1 = vmul.f32 %v1842_v53, %v12351_v15  ;;  %v1857_v2 = vadd.f32 %v10421_v54, %v12611_v32 }
 0x3b1   :  { %v1851_v56 = vpop.f32.mrf.mxu1 }
 0x3b2   :  { %v1852_v7 = vadd.f32 %v12611_v32, %v1851_v56  ;;  %10476 = vmatprep.mubr.msk.f32.mxu0 %vm259_vm0, %v1952_v1  ;;  %v1955_v61 = vmul.f32 %v1857_v2, %v12368_v25 }
 0x3b3   :  { %v10424_v9 = vpop.f32.mrf.mxu1  ;;  %10477 = vmatmul.mubr.msk.f32.gmra.mxu0 %vm259_vm0, %v1953_v55 }
 0x3b4   :  { %v1954_v58 = vmul.f32 %v1852_v7, %v12364_v23  ;;  %v1867_v0 = vadd.f32 %v10424_v9, %v12611_v32 }
 0x3b5   :  { %v1861_v39 = vpop.f32.mrf.mxu1 }
 0x3b6   :  { %v1862_v15 = vadd.f32 %v12611_v32, %v1861_v39  ;;  %10479 = vmatprep.mubr.msk.f32.mxu0 %vm259_vm0, %v1954_v58  ;;  %v1957_v5 = vmul.f32 %v1867_v0, %v12384_v34 }
 0x3b7   :  { %v10427_v17 = vpop.f32.mrf.mxu1  ;;  %10480 = vmatmul.mubr.msk.f32.gmra.mxu0 %vm259_vm0, %v1955_v61 }
 0x3b8   :  { %v1956_v3 = vmul.f32 %v1862_v15, %v12380_v31  ;;  %v1877_v8 = vadd.f32 %v10427_v17, %v12611_v32 }
 0x3b9   :  { %v1871_v11 = vpop.f32.mrf.mxu1 }
 0x3ba   :  { %v1872_v23 = vadd.f32 %v12611_v32, %v1871_v11  ;;  %10482 = vmatprep.mubr.msk.f32.mxu0 %vm259_vm0, %v1956_v3  ;;  %v1959_v42 = vmul.f32 %v1877_v8, %v12400_v50 }
 0x3bb   :  { %v10430_v25 = vpop.f32.mrf.mxu1  ;;  %10483 = vmatmul.mubr.msk.f32.gmra.mxu0 %vm259_vm0, %v1957_v5 }
 0x3bc   :  { %v1958_v12 = vmul.f32 %v1872_v23, %v12396_v44  ;;  %v1887_v43 = vadd.f32 %v10430_v25, %v12611_v32 }
 0x3bd   :  { %v1881_v14 = vpop.f32.mrf.mxu1 }
 0x3be   :  { %v1882_v31 = vadd.f32 %v12611_v32, %v1881_v14  ;;  %10485 = vmatprep.mubr.msk.f32.mxu0 %vm259_vm0, %v1958_v12  ;;  %v1961_v22 = vmul.f32 %v1887_v43, %v12416_v59 }
 0x3bf   :  { %v10433_v34 = vpop.f32.mrf.mxu1  ;;  %10486 = vmatmul.mubr.msk.f32.gmra.mxu0 %vm259_vm0, %v1959_v42 }
 0x3c0   :  { %v1960_v19 = vmul.f32 %v1882_v31, %v12412_v57  ;;  %v1897_v24 = vadd.f32 %v10433_v34, %v12611_v32 }
 0x3c1   :  { %v1891_v45 = vpop.f32.mrf.mxu1 }
 0x3c2   :  { %v1892_v44 = vadd.f32 %v12611_v32, %v1891_v45  ;;  %10488 = vmatprep.mubr.msk.f32.mxu0 %vm259_vm0, %v1960_v19  ;;  %v1963_v26 = vmul.f32 %v1897_v24, %v12432_v10 }
 0x3c3   :  { %v10436_v50 = vpop.f32.mrf.mxu1  ;;  %10489 = vmatmul.mubr.msk.f32.gmra.mxu0 %vm259_vm0, %v1961_v22 }
 0x3c4   :  { %v1962_v46 = vmul.f32 %v1892_v44, %v12428_v6  ;;  %v1907_v27 = vadd.f32 %v10436_v50, %v12611_v32 }
 0x3c5   :  { %v1901_v29 = vpop.f32.mrf.mxu1 }
 0x3c6   :  { %v1902_v57 = vadd.f32 %v12611_v32, %v1901_v29  ;;  %10491 = vmatprep.mubr.msk.f32.mxu0 %vm259_vm0, %v1962_v46  ;;  %v1965_v49 = vmul.f32 %v1907_v27, %v12448_v20 }
 0x3c7   :  { %v10439_v59 = vpop.f32.mrf.mxu1  ;;  %10492 = vmatmul.mubr.msk.f32.gmra.mxu0 %vm259_vm0, %v1963_v26 }
 0x3c8   :  { %v1964_v48 = vmul.f32 %v1902_v57, %v12444_v18  ;;  %v1917_v4 = vadd.f32 %v10439_v59, %v12611_v32 }
 0x3c9   :  { %v1911_v36 = vpop.f32.mrf.mxu1 }
 0x3ca   :  { %v1912_v6 = vadd.f32 %v12611_v32, %v1911_v36  ;;  %10494 = vmatprep.mubr.msk.f32.mxu0 %vm259_vm0, %v1964_v48  ;;  %v1967_v38 = vmul.f32 %v1917_v4, %v12462_v30 }
 0x3cb   :  { %v10442_v10 = vpop.f32.mrf.mxu1  ;;  %10495 = vmatmul.mubr.msk.f32.gmra.mxu0 %vm259_vm0, %v1965_v49 }
 0x3cc   :  { %v1966_v37 = vmul.f32 %v1912_v6, %v12459_v28  ;;  %v1927_v21 = vadd.f32 %v10442_v10, %v12611_v32 }
 0x3cd   :  { %v1921_v51 = vpop.f32.mrf.mxu1 }
 0x3ce   :  { %v1922_v18 = vadd.f32 %v12611_v32, %v1921_v51  ;;  %10497 = vmatprep.mubr.msk.f32.mxu0 %vm259_vm0, %v1966_v37  ;;  %v1969_v40 = vmul.f32 %v1927_v21, %v12474_v52 }
 0x3cf   :  { %v10445_v20 = vpop.f32.mrf.mxu1  ;;  %10498 = vmatmul.mubr.msk.f32.gmra.mxu0 %vm259_vm0, %v1967_v38 }
 0x3d0   :  { %v1968_v62 = vmul.f32 %v1922_v18, %v12471_v41  ;;  %v1937_v47 = vadd.f32 %v10445_v20, %v12611_v32 }
 0x3d1   :  { %v1931_v53 = vpop.f32.mrf.mxu1 }
 0x3d2   :  { %v1932_v28 = vadd.f32 %v12611_v32, %v1931_v53  ;;  %10500 = vmatprep.mubr.msk.f32.mxu0 %vm259_vm0, %v1968_v62  ;;  %v1971_v1 = vmul.f32 %v1937_v47, %v12491_v63 }
 0x3d3   :  { %v10448_v30 = vpop.f32.mrf.mxu1  ;;  %10501 = vmatmul.mubr.msk.f32.gmra.mxu0 %vm259_vm0, %v1969_v40 }
 0x3d4   :  { %v1970_v54 = vmul.f32 %v1932_v28, %v12488_v60  ;;  %v1947_v55 = vadd.f32 %v10448_v30, %v12611_v32  ;;  %v15758_v60 = vmov 0.0  }
 0x3d5   :  { %v1941_v2 = vpop.f32.mrf.mxu1  ;;  %2376 = vmatprep.subr.mxu1 %v15758_v60  ;;  %3066 = vmatprep.subr.mxu0 %v15758_v60 }
 0x3d6   :  { %v1942_v41 = vadd.f32 %v12611_v32, %v1941_v2  ;;  %10503 = vmatprep.mubr.msk.f32.mxu0 %vm259_vm0, %v1970_v54  ;;  %v1973_v56 = vmul.f32 %v1947_v55, %v12503_v16  ;;  %2440 = vmatprep.mubr.f32.mxu1 %v15758_v60 }
 0x3d7   :  { %10504 = vmatmul.mubr.msk.f32.gmra.mxu0 %vm259_vm0, %v1971_v1 }
 0x3d8   :  { %v1972_v52 = vmul.f32 %v1942_v41, %v12500_v13 }
 0x3da   :  { %10506 = vmatprep.mubr.msk.f32.mxu0 %vm259_vm0, %v1972_v52 }
 0x3db   :  { %10507 = vmatmul.mubr.msk.f32.gmra.mxu0 %vm259_vm0, %v1973_v56 }
 0x40f   :  { %v12693_v63 = vpop.f32.mrf.mxu0 }
 0x411   :  { %v12695_v32 = vpop.f32.mrf.mxu0 }
 0x413   :  { %v12697_v7 = vpop.f32.mrf.mxu0 }
 0x415   :  { %v12699_v13 = vpop.f32.mrf.mxu0 }
 0x417   :  { %v12701_v16 = vpop.f32.mrf.mxu0 }
 0x419   :  { %v12703_v9 = vpop.f32.mrf.mxu0 }
 0x41b   :  { %v12705_v58 = vpop.f32.mrf.mxu0 }
 0x41d   :  { %v12707_v61 = vpop.f32.mrf.mxu0 }
 0x41f   :  { %v12709_v0 = vpop.f32.mrf.mxu0 }
 0x421   :  { %v12711_v39 = vpop.f32.mrf.mxu0 }
 0x423   :  { %v12713_v15 = vpop.f32.mrf.mxu0 }
 0x425   :  { %v12715_v17 = vpop.f32.mrf.mxu0 }
 0x427   :  { %v12717_v3 = vpop.f32.mrf.mxu0 }
 0x429   :  { %v12719_v5 = vpop.f32.mrf.mxu0 }
 0x42b   :  { %v12721_v8 = vpop.f32.mrf.mxu0 }
 0x42d   :  { %v12723_v11 = vpop.f32.mrf.mxu0 }
 0x42f   :  { %v12725_v23 = vpop.f32.mrf.mxu0 }
 0x431   :  { %v12727_v25 = vpop.f32.mrf.mxu0 }
 0x433   :  { %v12729_v12 = vpop.f32.mrf.mxu0 }
 0x435   :  { %v12731_v42 = vpop.f32.mrf.mxu0 }
 0x437   :  { %v12733_v43 = vpop.f32.mrf.mxu0 }
 0x439   :  { %v12735_v14 = vpop.f32.mrf.mxu0 }
 0x43b   :  { %v12737_v31 = vpop.f32.mrf.mxu0 }
 0x43d   :  { %v12739_v34 = vpop.f32.mrf.mxu0 }
 0x43f   :  { %v12741_v19 = vpop.f32.mrf.mxu0 }
 0x441   :  { %v12743_v22 = vpop.f32.mrf.mxu0 }
 0x443   :  { %v10358_v24 = vpop.f32.mrf.mxu0 }
 0x445   :  { %v12745_v45 = vpop.f32.mrf.mxu0 }
 0x447   :  { %v10361_v44 = vpop.f32.mrf.mxu0 }
 0x449   :  { %v1647_v50 = vpop.f32.mrf.mxu0 }
 0x44b   :  { %v10364_v46 = vpop.f32.mrf.mxu0 }
 0x44d   :  { %v1657_v26 = vpop.f32.mrf.mxu0 }
 0x44f   :  { %v10367_v27 = vpop.f32.mrf.mxu0 }
 0x451   :  { %v1667_v29 = vpop.f32.mrf.mxu0 }
 0x453   :  { %v10370_v57 = vpop.f32.mrf.mxu0 }
 0x455   :  { %v1677_v59 = vpop.f32.mrf.mxu0 }
 0x457   :  { %v10373_v48 = vpop.f32.mrf.mxu0 }
 0x459   :  { %v1687_v49 = vpop.f32.mrf.mxu0 }
 0x45b   :  { %v10376_v4 = vpop.f32.mrf.mxu0 }
 0x45c   :  { %8806 = vmatpush1.xpose.msk.msra.mxu1 %vm2231_vm2, %v10376_v4 }
 0x45d   :  { %v1697_v36 = vpop.f32.mrf.mxu0  ;;  %2378 = vmatprep.subr.mxu1 %v15758_v60 }
 0x45f   :  { %v12749_v6 = vpop.f32.mrf.mxu0 }
 0x460   :  { %8807 = vmatpush1.xpose.msk.msra.mxu1 %vm2231_vm2, %v1697_v36 }
 0x461   :  { %v12752_v10 = vpop.f32.mrf.mxu0  ;;  %2380 = vmatprep.subr.mxu1 %v15758_v60 }
 0x463   :  { %v12755_v37 = vpop.f32.mrf.mxu0 }
 0x464   :  { %8808 = vmatpush1.xpose.msk.msra.mxu1 %vm2231_vm2, %v10373_v48 }
 0x465   :  { %v12758_v38 = vpop.f32.mrf.mxu0  ;;  %2382 = vmatprep.subr.mxu1 %v15758_v60 }
 0x467   :  { %v12761_v21 = vpop.f32.mrf.mxu0 }
 0x468   :  { %8809 = vmatpush1.xpose.msk.msra.mxu1 %vm2231_vm2, %v1687_v49 }
 0x469   :  { %v12764_v51 = vpop.f32.mrf.mxu0  ;;  %2384 = vmatprep.subr.mxu1 %v15758_v60 }
 0x46b   :  { %v10388_v18 = vpop.f32.mrf.mxu0 }
 0x46c   :  { %8810 = vmatpush1.xpose.msk.msra.mxu1 %vm2231_vm2, %v10370_v57 }
 0x46d   :  { %v12768_v20 = vpop.f32.mrf.mxu0  ;;  %2386 = vmatprep.subr.mxu1 %v15758_v60 }
 0x46f   :  { %v12771_v62 = vpop.f32.mrf.mxu0 }
 0x470   :  { %8811 = vmatpush1.xpose.msk.msra.mxu1 %vm2231_vm2, %v1677_v59  ;;  %v213_v59 = vld [vmem:[%s12931_s1 + $0x30] sm:$0xff] }
 0x471   :  { %v12774_v40 = vpop.f32.mrf.mxu0  ;;  %2388 = vmatprep.subr.mxu1 %v15758_v60 }
 0x473   :  { %v12777_v47 = vpop.f32.mrf.mxu0 }
 0x474   :  { %8812 = vmatpush1.xpose.msk.msra.mxu1 %vm2231_vm2, %v10367_v27 }
 0x475   :  { %v12780_v53 = vpop.f32.mrf.mxu0  ;;  %2390 = vmatprep.subr.mxu1 %v15758_v60 }
 0x477   :  { %v10481_v28 = vpop.f32.mrf.mxu0 }
 0x478   :  { %8813 = vmatpush1.xpose.msk.msra.mxu1 %vm2231_vm2, %v1667_v29 }
 0x479   :  { %v2132_v30 = vpop.f32.mrf.mxu0  ;;  %2392 = vmatprep.subr.mxu1 %v15758_v60 }
 0x47b   :  { %v10484_v54 = vpop.f32.mrf.mxu0 }
 0x47c   :  { %8814 = vmatpush1.xpose.msk.msra.mxu1 %vm2231_vm2, %v10364_v46 }
 0x47d   :  { %v2142_v1 = vpop.f32.mrf.mxu0  ;;  %2394 = vmatprep.subr.mxu1 %v15758_v60 }
 0x47f   :  { %v10487_v55 = vpop.f32.mrf.mxu0 }
 0x480   :  { %8815 = vmatpush1.xpose.msk.msra.mxu1 %vm2231_vm2, %v1657_v26 }
 0x481   :  { %v2152_v2 = vpop.f32.mrf.mxu0  ;;  %2396 = vmatprep.subr.mxu1 %v15758_v60 }
 0x483   :  { %v10490_v41 = vpop.f32.mrf.mxu0 }
 0x484   :  { %8816 = vmatpush1.xpose.msk.msra.mxu1 %vm2231_vm2, %v10361_v44 }
 0x485   :  { %v2162_v52 = vpop.f32.mrf.mxu0  ;;  %2398 = vmatprep.subr.mxu1 %v15758_v60 }
 0x487   :  { %v10493_v56 = vpop.f32.mrf.mxu0 }
 0x488   :  { %8817 = vmatpush1.xpose.msk.msra.mxu1 %vm2231_vm2, %v1647_v50 }
 0x489   :  { %v2172_v27 = vpop.f32.mrf.mxu0  ;;  %2400 = vmatprep.subr.mxu1 %v15758_v60 }
 0x48b   :  { %v10496_v46 = vpop.f32.mrf.mxu0 }
 0x48c   :  { %8818 = vmatpush1.xpose.msk.msra.mxu1 %vm2231_vm2, %v10358_v24  ;;  %3067 = vmatpush1.msra.mxu0 %v10496_v46 }
 0x48d   :  { %v2182_v26 = vpop.f32.mrf.mxu0  ;;  %3068 = vmatprep.subr.mxu0 %v15758_v60  ;;  %2402 = vmatprep.subr.mxu1 %v15758_v60 }
 0x48e   :  { %3069 = vmatpush1.msra.mxu0 %v2182_v26 }
 0x48f   :  { %3070 = vmatprep.subr.mxu0 %v15758_v60  ;;  %v12799_v44 = vpop.f32.mrf.mxu0 }
 0x490   :  { %8819 = vmatpush1.xpose.msk.msra.mxu1 %vm2231_vm2, %v12745_v45  ;;  %3071 = vmatpush1.msra.mxu0 %v10493_v56 }
 0x491   :  { %3072 = vmatprep.subr.mxu0 %v15758_v60  ;;  %2404 = vmatprep.subr.mxu1 %v15758_v60  ;;  %v2192_v24 = vpop.f32.mrf.mxu0 }
 0x492   :  { %3073 = vmatpush1.msra.mxu0 %v2172_v27 }
 0x493   :  { %3074 = vmatprep.subr.mxu0 %v15758_v60  ;;  %v10502_v45 = vpop.f32.mrf.mxu0 }
 0x494   :  { %8820 = vmatpush1.xpose.msk.msra.mxu1 %vm2231_vm2, %v12741_v19  ;;  %3075 = vmatpush1.msra.mxu0 %v10490_v41  ;;  %v220_v41 = vld [vmem:[%s12931_s1 + $0x68] sm:$0xff] }
 0x495   :  { %3076 = vmatprep.subr.mxu0 %v15758_v60  ;;  %2406 = vmatprep.subr.mxu1 %v15758_v60  ;;  %v2202_v19 = vpop.f32.mrf.mxu0 }
 0x496   :  { %3077 = vmatpush1.msra.mxu0 %v2162_v52  ;;  %v219_v52 = vld [vmem:[%s12931_s1 + $0x60] sm:$0xff] }
 0x497   :  { %3078 = vmatprep.subr.mxu0 %v15758_v60 }
 0x498   :  { %8821 = vmatpush1.xpose.msk.msra.mxu1 %vm2231_vm2, %v12743_v22  ;;  %3079 = vmatpush1.msra.mxu0 %v10487_v55  ;;  %v10505_v22 = vpop.f32.mrf.mxu0 }
 0x499   :  { %3080 = vmatprep.subr.mxu0 %v15758_v60  ;;  %2424 = vmatprep.subr.mxu1 %v15758_v60 }
 0x49a   :  { %3081 = vmatpush1.msra.mxu0 %v2152_v2  ;;  %v2212_v50 = vpop.f32.mrf.mxu0 }
 0x49b   :  { %3082 = vmatprep.subr.mxu0 %v15758_v60 }
 0x49c   :  { %8822 = vmatpush2.xpose.msk.msra.mxu1 %vm2231_vm2, %v10388_v18  ;;  %3083 = vmatpush1.msra.mxu0 %v10484_v54  ;;  %v10508_v29 = vpop.f32.mrf.mxu0 }
 0x49d   :  { %3084 = vmatprep.subr.mxu0 %v15758_v60  ;;  %2426 = vmatprep.subr.mxu1 %v15758_v60 }
 0x49e   :  { %3085 = vmatpush1.msra.mxu0 %v2142_v1  ;;  %v2222_v57 = vpop.f32.mrf.mxu0 }
 0x49f   :  { %3086 = vmatprep.subr.mxu0 %v15758_v60 }
 0x4a0   :  { %8823 = vmatpush2.xpose.msk.msra.mxu1 %vm2231_vm2, %v12768_v20  ;;  %3087 = vmatpush1.msra.mxu0 %v10481_v28 }
 0x4a1   :  { %3088 = vmatprep.subr.mxu0 %v15758_v60  ;;  %2428 = vmatprep.subr.mxu1 %v15758_v60 }
 0x4a2   :  { %3089 = vmatpush1.msra.mxu0 %v2132_v30 }
 0x4a3   :  { %3090 = vmatprep.subr.mxu0 %v15758_v60 }
 0x4a4   :  { %8824 = vmatpush2.xpose.msk.msra.mxu1 %vm2231_vm2, %v12761_v21  ;;  %3091 = vmatpush1.msra.mxu0 %v12777_v47  ;;  %v218_v47 = vld [vmem:[%s12931_s1 + $0x58] sm:$0xff] }
 0x4a5   :  { %3092 = vmatprep.subr.mxu0 %v15758_v60  ;;  %2430 = vmatprep.subr.mxu1 %v15758_v60 }
 0x4a6   :  { %3093 = vmatpush1.msra.mxu0 %v12780_v53  ;;  %v217_v53 = vld [vmem:[%s12931_s1 + $0x50] sm:$0xff] }
 0x4a7   :  { %3094 = vmatprep.subr.mxu0 %v15758_v60 }
 0x4a8   :  { %8825 = vmatpush2.xpose.msk.msra.mxu1 %vm2231_vm2, %v12764_v51  ;;  %3095 = vmatpush1.msra.mxu0 %v12771_v62 }
 0x4a9   :  { %3096 = vmatprep.subr.mxu0 %v15758_v60  ;;  %2432 = vmatprep.subr.mxu1 %v15758_v60 }
 0x4aa   :  { %3097 = vmatpush1.msra.mxu0 %v12774_v40 }
 0x4ab   :  { %3114 = vmatprep.subr.mxu0 %v15758_v60 }
 0x4ac   :  { %8826 = vmatpush2.xpose.msk.msra.mxu1 %vm2231_vm2, %v12755_v37  ;;  %3115 = vmatpush2.msra.mxu0 %v10508_v29  ;;  %v216_v37 = vld [vmem:[%s12931_s1 + $0x48] sm:$0xff] }
 0x4ad   :  { %3116 = vmatprep.subr.mxu0 %v15758_v60  ;;  %2434 = vmatprep.subr.mxu1 %v15758_v60 }
 0x4ae   :  { %3117 = vmatpush2.msra.mxu0 %v2222_v57 }
 0x4af   :  { %3118 = vmatprep.subr.mxu0 %v15758_v60 }
 0x4b0   :  { %8827 = vmatpush2.xpose.msk.msra.mxu1 %vm2231_vm2, %v12758_v38  ;;  %3119 = vmatpush2.msra.mxu0 %v10505_v22  ;;  %v215_v38 = vld [vmem:[%s12931_s1 + $0x40] sm:$0xff] }
 0x4b1   :  { %3120 = vmatprep.subr.mxu0 %v15758_v60  ;;  %2436 = vmatprep.subr.mxu1 %v15758_v60 }
 0x4b2   :  { %3121 = vmatpush2.msra.mxu0 %v2212_v50 }
 0x4b3   :  { %3122 = vmatprep.subr.mxu0 %v15758_v60 }
 0x4b4   :  { %8828 = vmatpush2.xpose.msk.msra.mxu1 %vm2231_vm2, %v12749_v6  ;;  %3123 = vmatpush2.msra.mxu0 %v10502_v45  ;;  %v222_v45 = vld [vmem:[%s12931_s1 + $0x78] sm:$0xff] }
 0x4b5   :  { %3124 = vmatprep.subr.mxu0 %v15758_v60  ;;  %2438 = vmatprep.subr.mxu1 %v15758_v60 }
 0x4b6   :  { %3125 = vmatpush2.msra.mxu0 %v2202_v19  ;;  %v221_v19 = vld [vmem:[%s12931_s1 + $0x70] sm:$0xff] }
 0x4b7   :  { %3126 = vmatprep.subr.mxu0 %v15758_v60 }
 0x4b8   :  { %8829 = vmatpush2.xpose.msk.msra.mxu1 %vm2231_vm2, %v12752_v10  ;;  %3127 = vmatpush2.msra.mxu0 %v12799_v44 }
 0x4b9   :  { %3128 = vmatprep.subr.mxu0 %v15758_v60  ;;  %3538 = vmatprep.subr.mxu1 %v15758_v60 }
 0x4ba   :  { %3129 = vmatpush2.msra.mxu0 %v2192_v24 }
 0x4bb   :  { %8830 = vmatmul.mubr.msk.f32.vlgmr.msra.gmra.mxu1 %vm2231_vm2, %v12695_v32  ;;  %v208_v32 = vld [vmem:[%s12931_s1 + $0x8] sm:$0xff] }
 0x4bc   :  { %2446 = vmatprep.mubr.f32.mxu1 %v15758_v60 }
 0x4bf   :  { %8831 = vmatmul.mubr.msk.f32.gmra.mxu1 %vm2231_vm2, %v12693_v63 }
 0x4c0   :  { %2452 = vmatprep.mubr.f32.mxu1 %v15758_v60 }
 0x4c3   :  { %8832 = vmatmul.mubr.msk.f32.gmra.mxu1 %vm2231_vm2, %v12699_v13 }
 0x4c4   :  { %2458 = vmatprep.mubr.f32.mxu1 %v15758_v60 }
 0x4c7   :  { %8833 = vmatmul.mubr.msk.f32.gmra.mxu1 %vm2231_vm2, %v12697_v7  ;;  %v207_v7 = vld [vmem:[%s12931_s1] sm:$0xff] }
 0x4c8   :  { %2464 = vmatprep.mubr.f32.mxu1 %v15758_v60 }
 0x4cb   :  { %8834 = vmatmul.mubr.msk.f32.gmra.mxu1 %vm2231_vm2, %v12703_v9 }
 0x4cc   :  { %2470 = vmatprep.mubr.f32.mxu1 %v15758_v60 }
 0x4cf   :  { %8835 = vmatmul.mubr.msk.f32.gmra.mxu1 %vm2231_vm2, %v12701_v16 }
 0x4d0   :  { %2476 = vmatprep.mubr.f32.mxu1 %v15758_v60 }
 0x4d3   :  { %8836 = vmatmul.mubr.msk.f32.gmra.mxu1 %vm2231_vm2, %v12707_v61  ;;  %v210_v61 = vld [vmem:[%s12931_s1 + $0x18] sm:$0xff] }
 0x4d4   :  { %2482 = vmatprep.mubr.f32.mxu1 %v15758_v60 }
 0x4d7   :  { %8837 = vmatmul.mubr.msk.f32.gmra.mxu1 %vm2231_vm2, %v12705_v58 }
 0x4d8   :  { %2488 = vmatprep.mubr.f32.mxu1 %v15758_v60 }
 0x4db   :  { %8838 = vmatmul.mubr.msk.f32.gmra.mxu1 %vm2231_vm2, %v12711_v39 }
 0x4dc   :  { %2494 = vmatprep.mubr.f32.mxu1 %v15758_v60 }
 0x4df   :  { %8839 = vmatmul.mubr.msk.f32.gmra.mxu1 %vm2231_vm2, %v12709_v0  ;;  %v209_v0 = vld [vmem:[%s12931_s1 + $0x10] sm:$0xff] }
 0x4e0   :  { %2500 = vmatprep.mubr.f32.mxu1 %v15758_v60 }
 0x4e3   :  { %8840 = vmatmul.mubr.msk.f32.gmra.mxu1 %vm2231_vm2, %v12715_v17 }
 0x4e4   :  { %2506 = vmatprep.mubr.f32.mxu1 %v15758_v60 }
 0x4e7   :  { %8841 = vmatmul.mubr.msk.f32.gmra.mxu1 %vm2231_vm2, %v12713_v15 }
 0x4e8   :  { %2512 = vmatprep.mubr.f32.mxu1 %v15758_v60 }
 0x4eb   :  { %8842 = vmatmul.mubr.msk.f32.gmra.mxu1 %vm2231_vm2, %v12719_v5 }
 0x4ec   :  { %2518 = vmatprep.mubr.f32.mxu1 %v15758_v60 }
 0x4ef   :  { %8843 = vmatmul.mubr.msk.f32.gmra.mxu1 %vm2231_vm2, %v12717_v3 }
 0x4f0   :  { %2524 = vmatprep.mubr.f32.mxu1 %v15758_v60 }
 0x4f3   :  { %8844 = vmatmul.mubr.msk.f32.gmra.mxu1 %vm2231_vm2, %v12723_v11  ;;  %v212_v11 = vld [vmem:[%s12931_s1 + $0x28] sm:$0xff] }
 0x4f4   :  { %2530 = vmatprep.mubr.f32.mxu1 %v15758_v60 }
 0x4f7   :  { %8845 = vmatmul.mubr.msk.f32.gmra.mxu1 %vm2231_vm2, %v12721_v8 }
 0x4f8   :  { %2536 = vmatprep.mubr.f32.mxu1 %v15758_v60 }
 0x4fb   :  { %8846 = vmatmul.mubr.msk.f32.gmra.mxu1 %vm2231_vm2, %v12727_v25 }
 0x4fc   :  { %2542 = vmatprep.mubr.f32.mxu1 %v15758_v60 }
 0x4ff   :  { %8847 = vmatmul.mubr.msk.f32.gmra.mxu1 %vm2231_vm2, %v12725_v23  ;;  %v211_v23 = vld [vmem:[%s12931_s1 + $0x20] sm:$0xff] }
 0x500   :  { %2548 = vmatprep.mubr.f32.mxu1 %v15758_v60 }
 0x503   :  { %8848 = vmatmul.mubr.msk.f32.gmra.mxu1 %vm2231_vm2, %v12731_v42 }
 0x504   :  { %2554 = vmatprep.mubr.f32.mxu1 %v15758_v60 }
 0x507   :  { %8849 = vmatmul.mubr.msk.f32.gmra.mxu1 %vm2231_vm2, %v12729_v12 }
 0x508   :  { %2560 = vmatprep.mubr.f32.mxu1 %v15758_v60 }
 0x50b   :  { %8850 = vmatmul.mubr.msk.f32.gmra.mxu1 %vm2231_vm2, %v12735_v14 }
 0x50c   :  { %2566 = vmatprep.mubr.f32.mxu1 %v15758_v60 }
 0x50f   :  { %8851 = vmatmul.mubr.msk.f32.gmra.mxu1 %vm2231_vm2, %v12733_v43 }
 0x510   :  { %2572 = vmatprep.mubr.f32.mxu1 %v15758_v60 }
 0x513   :  { %8852 = vmatmul.mubr.msk.f32.gmra.mxu1 %vm2231_vm2, %v12739_v34  ;;  %v214_v34 = vld [vmem:[%s12931_s1 + $0x38] sm:$0xff] }
 0x514   :  { %2578 = vmatprep.mubr.f32.mxu1 %v15758_v60 }
 0x517   :  { %8853 = vmatmul.mubr.msk.f32.gmra.mxu1 %vm2231_vm2, %v12737_v31 }
 0x57b   :  { %v2442_v63 = vpop.f32.mrf.mxu1 }
 0x57c   :  { %v12937_v9 = vadd.f32 %v2442_v63, %v207_v7  ;;  %v224_v7 = vld [vmem:[%s12931_s1 + $0x88] sm:$0xff] }
 0x57d   :  { %v2444_v13 = vpop.f32.mrf.mxu1 }
 0x57e   :  { %v12935_v16 = vadd.f32 %v2444_v13, %v208_v32  ;;  %v223_v13 = vld [vmem:[%s12931_s1 + $0x80] sm:$0xff] }
 0x57f   :  { %v2448_v58 = vpop.f32.mrf.mxu1 }
 0x580   :  { %v2586_v39 = vsel %vm2585_vm3, %v12935_v16, -inf  ;;  %v12946_v5 = vadd.f32 %v2448_v58, %v209_v0 }
 0x581   :  { %v2450_v15 = vpop.f32.mrf.mxu1  ;;  %v2587_v17 = vmax.f32 %v12937_v9, %v2586_v39 }
 0x582   :  { %v12944_v3 = vadd.f32 %v2450_v15, %v210_v61 }
 0x583   :  { %v2454_v8 = vpop.f32.mrf.mxu1  ;;  %2588 = vmax.xlane.f32.xlu0 %v2587_v17 }
 0x584   :  { %v2590_v25 = vsel %vm2585_vm3, %v12944_v3, -inf  ;;  %v12955_v14 = vadd.f32 %v2454_v8, %v211_v23  ;;  %v226_v8 = vld [vmem:[%s12931_s1 + $0x98] sm:$0xff] }
 0x585   :  { %v2456_v12 = vpop.f32.mrf.mxu1  ;;  %v2591_v42 = vmax.f32 %v12946_v5, %v2590_v25 }
 0x586   :  { %v12953_v43 = vadd.f32 %v2456_v12, %v212_v11  ;;  %v225_v11 = vld [vmem:[%s12931_s1 + $0x90] sm:$0xff] }
 0x587   :  { %v2460_v31 = vpop.f32.mrf.mxu1  ;;  %2592 = vmax.xlane.f32.xlu0 %v2591_v42 }
 0x588   :  { %v2594_v48 = vsel %vm2585_vm3, %v12953_v43, -inf  ;;  %v12964_v6 = vadd.f32 %v2460_v31, %v213_v59  ;;  %v228_v59 = vld [vmem:[%s12931_s1 + $0xa8] sm:$0xff] }
 0x589   :  { %v2462_v49 = vpop.f32.mrf.mxu1  ;;  %v2595_v4 = vmax.f32 %v12955_v14, %v2594_v48  ;;  %v227_v48 = vld [vmem:[%s12931_s1 + $0xa0] sm:$0xff] }
 0x58a   :  { %v12962_v36 = vadd.f32 %v2462_v49, %v214_v34 }
 0x58b   :  { %v2466_v10 = vpop.f32.mrf.mxu1  ;;  %2596 = vmax.xlane.f32.xlu1 %v2595_v4 }
 0x58c   :  { %v2598_v21 = vsel %vm2585_vm3, %v12962_v36, -inf  ;;  %v12973_v62 = vadd.f32 %v2466_v10, %v215_v38 }
 0x58d   :  { %v2468_v51 = vpop.f32.mrf.mxu1  ;;  %v2599_v18 = vmax.f32 %v12964_v6, %v2598_v21 }
 0x58e   :  { %v12971_v20 = vadd.f32 %v2468_v51, %v216_v37  ;;  %v230_v51 = vld [vmem:[%s12931_s1 + $0xb8] sm:$0xff] }
 0x58f   :  { %v2472_v40 = vpop.f32.mrf.mxu1  ;;  %2600 = vmax.xlane.f32.xlu1 %v2599_v18  ;;  %v229_v18 = vld [vmem:[%s12931_s1 + $0xb0] sm:$0xff] }
 0x590   :  { %v2602_v28 = vsel %vm2585_vm3, %v12971_v20, -inf  ;;  %v12982_v55 = vadd.f32 %v2472_v40, %v217_v53 }
 0x591   :  { %v2474_v30 = vpop.f32.mrf.mxu1  ;;  %v2603_v54 = vmax.f32 %v12973_v62, %v2602_v28 }
 0x592   :  { %v12980_v1 = vadd.f32 %v2474_v30, %v218_v47 }
 0x593   :  { %v2478_v2 = vpop.f32.mrf.mxu1  ;;  %2604 = vmax.xlane.f32.xlu0 %v2603_v54 }
 0x594   :  { %v2606_v56 = vsel %vm2585_vm3, %v12980_v1, -inf  ;;  %v12991_v44 = vadd.f32 %v2478_v2, %v219_v52  ;;  %v232_v2 = vld [vmem:[%s12931_s1 + $0xc8] sm:$0xff] }
 0x595   :  { %v2480_v27 = vpop.f32.mrf.mxu1  ;;  %v2607_v46 = vmax.f32 %v12982_v55, %v2606_v56 }
 0x596   :  { %v12989_v26 = vadd.f32 %v2480_v27, %v220_v41  ;;  %v231_v41 = vld [vmem:[%s12931_s1 + $0xc0] sm:$0xff] }
 0x597   :  { %v2484_v24 = vpop.f32.mrf.mxu1  ;;  %2608 = vmax.xlane.f32.xlu1 %v2607_v46 }
 0x598   :  { %v2610_v22 = vsel %vm2585_vm3, %v12989_v26, -inf  ;;  %v13000_v63 = vadd.f32 %v2484_v24, %v221_v19  ;;  %v234_v19 = vld [vmem:[%s12931_s1 + $0xd8] sm:$0xff] }
 0x599   :  { %v2486_v50 = vpop.f32.mrf.mxu1  ;;  %v2611_v29 = vmax.f32 %v12991_v44, %v2610_v22  ;;  %v233_v22 = vld [vmem:[%s12931_s1 + $0xd0] sm:$0xff] }
 0x59a   :  { %v12998_v57 = vadd.f32 %v2486_v50, %v222_v45 }
 0x59b   :  { %v2490_v32 = vpop.f32.mrf.mxu1  ;;  %2612 = vmax.xlane.f32.xlu0 %v2611_v29 }
 0x59c   :  { %v2614_v58 = vsel %vm2585_vm3, %v12998_v57, -inf  ;;  %v13009_v15 = vadd.f32 %v2490_v32, %v223_v13 }
 0x59d   :  { %v2492_v61 = vpop.f32.mrf.mxu1  ;;  %v2615_v0 = vmax.f32 %v13000_v63, %v2614_v58 }
 0x59e   :  { %v13007_v39 = vadd.f32 %v2492_v61, %v224_v7  ;;  %v236_v61 = vld [vmem:[%s12931_s1 + $0xe8] sm:$0xff] }
 0x59f   :  { %v2496_v17 = vpop.f32.mrf.mxu1  ;;  %2616 = vmax.xlane.f32.xlu1 %v2615_v0  ;;  %v235_v0 = vld [vmem:[%s12931_s1 + $0xe0] sm:$0xff] }
 0x5a0   :  { %v2618_v23 = vsel %vm2585_vm3, %v13007_v39, -inf  ;;  %v13018_v31 = vadd.f32 %v2496_v17, %v225_v11 }
 0x5a1   :  { %v2498_v25 = vpop.f32.mrf.mxu1  ;;  %v2619_v12 = vmax.f32 %v13009_v15, %v2618_v23 }
 0x5a2   :  { %v13016_v42 = vadd.f32 %v2498_v25, %v226_v8 }
 0x5a3   :  { %v2502_v34 = vpop.f32.mrf.mxu1  ;;  %2620 = vmax.xlane.f32.xlu0 %v2619_v12 }
 0x5a4   :  { %v2622_v49 = vsel %vm2585_vm3, %v13016_v42, -inf  ;;  %v13027_v38 = vadd.f32 %v2502_v34, %v227_v48  ;;  %v238_v34 = vld [vmem:[%s12931_s1 + $0xf8] sm:$0xff] }
 0x5a5   :  { %v2504_v4 = vpop.f32.mrf.mxu1  ;;  %v2623_v10 = vmax.f32 %v13018_v31, %v2622_v49 }
 0x5a6   :  { %v13025_v37 = vadd.f32 %v2504_v4, %v228_v59  ;;  %v237_v59 = vld [vmem:[%s12931_s1 + $0xf0] sm:$0xff] }
 0x5a7   :  { %v2508_v21 = vpop.f32.mrf.mxu1  ;;  %2624 = vmax.xlane.f32.xlu1 %v2623_v10 }
 0x5a8   :  { %v2626_v40 = vsel %vm2585_vm3, %v13025_v37, -inf  ;;  %v13036_v30 = vadd.f32 %v2508_v21, %v229_v18  ;;  %v240_v18 = vld [vmem:[%s12931_s1 + $0x108] sm:$0xff] }
 0x5a9   :  { %v2510_v47 = vpop.f32.mrf.mxu1  ;;  %v2627_v53 = vmax.f32 %v13027_v38, %v2626_v40  ;;  %v239_v40 = vld [vmem:[%s12931_s1 + $0x100] sm:$0xff] }
 0x5aa   :  { %v13034_v28 = vadd.f32 %v2510_v47, %v230_v51 }
 0x5ab   :  { %v2514_v54 = vpop.f32.mrf.mxu1  ;;  %2628 = vmax.xlane.f32.xlu0 %v2627_v53 }
 0x5ac   :  { %v2630_v52 = vsel %vm2585_vm3, %v13034_v28, -inf  ;;  %v13045_v24 = vadd.f32 %v2514_v54, %v231_v41 }
 0x5ad   :  { %v2516_v56 = vpop.f32.mrf.mxu1  ;;  %v2631_v27 = vmax.f32 %v13036_v30, %v2630_v52 }
 0x5ae   :  { %v13043_v46 = vadd.f32 %v2516_v56, %v232_v2  ;;  %v242_v56 = vld [vmem:[%s12931_s1 + $0x118] sm:$0xff] }
 0x5af   :  { %v2520_v45 = vpop.f32.mrf.mxu1  ;;  %2632 = vmax.xlane.f32.xlu1 %v2631_v27  ;;  %v241_v27 = vld [vmem:[%s12931_s1 + $0x110] sm:$0xff] }
 0x5b0   :  { %v2634_v50 = vsel %vm2585_vm3, %v13043_v46, -inf  ;;  %v13054_v13 = vadd.f32 %v2520_v45, %v233_v22 }
 0x5b1   :  { %v2522_v29 = vpop.f32.mrf.mxu1  ;;  %v2635_v32 = vmax.f32 %v13045_v24, %v2634_v50 }
 0x5b2   :  { %v13052_v7 = vadd.f32 %v2522_v29, %v234_v19 }
 0x5b3   :  { %v2526_v58 = vpop.f32.mrf.mxu1  ;;  %2636 = vmax.xlane.f32.xlu0 %v2635_v32 }
 0x5b4   :  { %v2638_v17 = vsel %vm2585_vm3, %v13052_v7, -inf  ;;  %v13063_v25 = vadd.f32 %v2526_v58, %v235_v0  ;;  %v244_v58 = vld [vmem:[%s12931_s1 + $0x128] sm:$0xff] }
 0x5b5   :  { %v2528_v8 = vpop.f32.mrf.mxu1  ;;  %v2639_v11 = vmax.f32 %v13054_v13, %v2638_v17 }
 0x5b6   :  { %v13061_v23 = vadd.f32 %v2528_v8, %v236_v61  ;;  %v243_v61 = vld [vmem:[%s12931_s1 + $0x120] sm:$0xff] }
 0x5b7   :  { %v2532_v12 = vpop.f32.mrf.mxu1  ;;  %2640 = vmax.xlane.f32.xlu1 %v2639_v11 }
 0x5b8   :  { %v2642_v48 = vsel %vm2585_vm3, %v13061_v23, -inf  ;;  %v13072_v21 = vadd.f32 %v2532_v12, %v237_v59  ;;  %v246_v59 = vld [vmem:[%s12931_s1 + $0x138] sm:$0xff] }
 0x5b9   :  { %v2534_v49 = vpop.f32.mrf.mxu1  ;;  %v2643_v4 = vmax.f32 %v13063_v25, %v2642_v48  ;;  %v245_v48 = vld [vmem:[%s12931_s1 + $0x130] sm:$0xff] }
 0x5ba   :  { %v13070_v10 = vadd.f32 %v2534_v49, %v238_v34 }
 0x5bb   :  { %v2538_v51 = vpop.f32.mrf.mxu1  ;;  %2644 = vmax.xlane.f32.xlu0 %v2643_v4 }
 0x5bc   :  { %v2646_v47 = vsel %vm2585_vm3, %v13070_v10, -inf  ;;  %v13081_v41 = vadd.f32 %v2538_v51, %v239_v40 }
 0x5bd   :  { %v2540_v53 = vpop.f32.mrf.mxu1  ;;  %v2647_v54 = vmax.f32 %v13072_v21, %v2646_v47 }
 0x5be   :  { %v13079_v2 = vadd.f32 %v2540_v53, %v240_v18  ;;  %v248_v53 = vld [vmem:[%s12931_s1 + $0x148] sm:$0xff] }
 0x5bf   :  { %v2544_v52 = vpop.f32.mrf.mxu1  ;;  %2648 = vmax.xlane.f32.xlu1 %v2647_v54  ;;  %v247_v54 = vld [vmem:[%s12931_s1 + $0x140] sm:$0xff] }
 0x5c0   :  { %v2650_v45 = vsel %vm2585_vm3, %v13079_v2, -inf  ;;  %v13090_v29 = vadd.f32 %v2544_v52, %v241_v27 }
 0x5c1   :  { %v2546_v19 = vpop.f32.mrf.mxu1  ;;  %v2651_v22 = vmax.f32 %v13081_v41, %v2650_v45 }
 0x5c2   :  { %v13088_v50 = vadd.f32 %v2546_v19, %v242_v56 }
 0x5c3   :  { %v2550_v32 = vpop.f32.mrf.mxu1  ;;  %2652 = vmax.xlane.f32.xlu0 %v2651_v22 }
 0x5c4   :  { %v2654_v0 = vsel %vm2585_vm3, %v13088_v50, -inf  ;;  %v13099_v12 = vadd.f32 %v2550_v32, %v243_v61  ;;  %v250_v32 = vld [vmem:[%s12931_s1 + $0x158] sm:$0xff] }
 0x5c5   :  { %v2552_v17 = vpop.f32.mrf.mxu1  ;;  %v2655_v8 = vmax.f32 %v13090_v29, %v2654_v0 }
 0x5c6   :  { %v13097_v11 = vadd.f32 %v2552_v17, %v244_v58  ;;  %v249_v58 = vld [vmem:[%s12931_s1 + $0x150] sm:$0xff] }
 0x5c7   :  { %v2556_v34 = vpop.f32.mrf.mxu1  ;;  %2656 = vmax.xlane.f32.xlu1 %v2655_v8 }
 0x5c8   :  { %v2658_v49 = vsel %vm2585_vm3, %v13097_v11, -inf  ;;  %v13108_v40 = vadd.f32 %v2556_v34, %v245_v48  ;;  %v252_v48 = vld [vmem:[%s12931_s1 + $0x168] sm:$0xff] }
 0x5c9   :  { %v2558_v4 = vpop.f32.mrf.mxu1  ;;  %v2659_v51 = vmax.f32 %v13099_v12, %v2658_v49  ;;  %v251_v49 = vld [vmem:[%s12931_s1 + $0x160] sm:$0xff] }
 0x5ca   :  { %v13106_v18 = vadd.f32 %v2558_v4, %v246_v59 }
 0x5cb   :  { %v2562_v47 = vpop.f32.mrf.mxu1  ;;  %2660 = vmax.xlane.f32.xlu0 %v2659_v51 }
 0x5cc   :  { %v2662_v52 = vsel %vm2585_vm3, %v13106_v18, -inf  ;;  %v13117_v19 = vadd.f32 %v2562_v47, %v247_v54 }
 0x5cd   :  { %v2564_v56 = vpop.f32.mrf.mxu1  ;;  %v2663_v27 = vmax.f32 %v13108_v40, %v2662_v52 }
 0x5ce   :  { %v13115_v45 = vadd.f32 %v2564_v56, %v248_v53  ;;  %v254_v56 = vld [vmem:[%s12931_s1 + $0x178] sm:$0xff] }
 0x5cf   :  { %v2568_v22 = vpop.f32.mrf.mxu1  ;;  %2664 = vmax.xlane.f32.xlu1 %v2663_v27  ;;  %v253_v27 = vld [vmem:[%s12931_s1 + $0x170] sm:$0xff] }
 0x5d0   :  { %v2666_v61 = vsel %vm2585_vm3, %v13115_v45, -inf  ;;  %v13126_v34 = vadd.f32 %v2568_v22, %v249_v58 }
 0x5d1   :  { %v2570_v0 = vpop.f32.mrf.mxu1  ;;  %v2667_v17 = vmax.f32 %v13117_v19, %v2666_v61 }
 0x5d2   :  { %v13124_v8 = vadd.f32 %v2570_v0, %v250_v32 }
 0x5d3   :  { %v2574_v59 = vpop.f32.mrf.mxu1  ;;  %2668 = vmax.xlane.f32.xlu0 %v2667_v17 }
 0x5d4   :  { %v2670_v4 = vsel %vm2585_vm3, %v13124_v8, -inf  ;;  %v13135_v54 = vadd.f32 %v2574_v59, %v251_v49 }
 0x5d5   :  { %v2576_v51 = vpop.f32.mrf.mxu1  ;;  %v2671_v47 = vmax.f32 %v13126_v34, %v2670_v4 }
 0x5d6   :  { %v13133_v53 = vadd.f32 %v2576_v51, %v252_v48 }
 0x5d7   :  { %v2580_v52 = vpop.f32.mrf.mxu1  ;;  %2672 = vmax.xlane.f32.xlu1 %v2671_v47 }
 0x5d8   :  { %v2674_v22 = vsel %vm2585_vm3, %v13133_v53, -inf  ;;  %v13144_v0 = vadd.f32 %v2580_v52, %v253_v27 }
 0x5d9   :  { %v2582_v32 = vpop.f32.mrf.mxu1  ;;  %v2675_v58 = vmax.f32 %v13135_v54, %v2674_v22 }
 0x5da   :  { %v13142_v61 = vadd.f32 %v2582_v32, %v254_v56 }
 0x5db   :  { %2676 = vmax.xlane.f32.xlu0 %v2675_v58 }
 0x5dc   :  { %v2678_v17 = vsel %vm2585_vm3, %v13142_v61, -inf }
 0x5dd   :  { %v2679_v59 = vmax.f32 %v13144_v0, %v2678_v17 }
 0x5df   :  { %2680 = vmax.xlane.f32.xlu0 %v2679_v59 }
 0x60c   :  { %v2589_v48 = vpop.xlane.xlu0 %2588 }
 0x60d   :  { %v2682_v49 = vsub.f32 %v12937_v9, %v2589_v48  ;;  %v2683_v4 = vsub.f32 %v12935_v16, %v2589_v48 }
 0x60f   :  { %v2730_v51 = vmul.f32 1.442695, %v2682_v49  ;;  %v2732_v47 = vmul.f32 1.442695, %v2683_v4 }
 0x610   :  { %v2593_v60 = vpop.xlane.xlu0 %2592 }
 0x611   :  { %11358 = vpow2.f32 %v2730_v51  ;;  %v2684_v56 = vsub.f32 %v12946_v5, %v2593_v60  ;;  %v2685_v52 = vsub.f32 %v12944_v3, %v2593_v60 }
 0x612   :  { %11360 = vpow2.f32 %v2732_v47 }
 0x613   :  { %v2734_v27 = vmul.f32 1.442695, %v2684_v56  ;;  %v2736_v22 = vmul.f32 1.442695, %v2685_v52 }
 0x614   :  { %v2597_v32 = vpop.xlane.xlu1 %2596 }
 0x615   :  { %11362 = vpow2.f32 %v2734_v27  ;;  %v2686_v58 = vsub.f32 %v12955_v14, %v2597_v32  ;;  %v2687_v17 = vsub.f32 %v12953_v43, %v2597_v32 }
 0x616   :  { %11364 = vpow2.f32 %v2736_v22 }
 0x617   :  { %v2738_v9 = vmul.f32 1.442695, %v2686_v58  ;;  %v2740_v16 = vmul.f32 1.442695, %v2687_v17 }
 0x618   :  { %v2601_v59 = vpop.xlane.xlu1 %2600 }
 0x619   :  { %11366 = vpow2.f32 %v2738_v9  ;;  %v2688_v48 = vsub.f32 %v12964_v6, %v2601_v59  ;;  %v2689_v5 = vsub.f32 %v12962_v36, %v2601_v59 }
 0x61a   :  { %11368 = vpow2.f32 %v2740_v16 }
 0x61b   :  { %v2742_v60 = vmul.f32 1.442695, %v2688_v48  ;;  %v2744_v3 = vmul.f32 1.442695, %v2689_v5 }
 0x61c   :  { %v2605_v49 = vpop.xlane.xlu0 %2604 }
 0x61d   :  { %11370 = vpow2.f32 %v2742_v60  ;;  %v2690_v4 = vsub.f32 %v12973_v62, %v2605_v49  ;;  %v2691_v14 = vsub.f32 %v12971_v20, %v2605_v49 }
 0x61e   :  { %v13159_v51 = vpop.eup %11358  ;;  %11372 = vpow2.f32 %v2744_v3 }
 0x61f   :  { %v13161_v43 = vpop.eup %11360  ;;  %v2746_v47 = vmul.f32 1.442695, %v2690_v4  ;;  %v2748_v56 = vmul.f32 1.442695, %v2691_v14 }
 0x620   :  { %v2609_v52 = vpop.xlane.xlu1 %2608  ;;  %v2826_v36 = vsel %vm2585_vm3, %v13161_v43, 0.0 }
 0x621   :  { %11374 = vpow2.f32 %v2746_v47  ;;  %v2692_v6 = vsub.f32 %v12982_v55, %v2609_v52  ;;  %v2693_v27 = vsub.f32 %v12980_v1, %v2609_v52  ;;  %v2827_v62 = vadd.f32 %v13159_v51, %v2826_v36 }
 0x622   :  { %v13168_v22 = vpop.eup %11362  ;;  %11376 = vpow2.f32 %v2748_v56 }
 0x623   :  { %v13170_v20 = vpop.eup %11364  ;;  %v2750_v32 = vmul.f32 1.442695, %v2692_v6  ;;  %v2752_v58 = vmul.f32 1.442695, %v2693_v27  ;;  %2828 = vadd.xlane.f32.xlu1 %v2827_v62 }
 0x624   :  { %v2613_v17 = vpop.xlane.xlu0 %2612  ;;  %v2830_v9 = vsel %vm2585_vm3, %v13170_v20, 0.0 }
 0x625   :  { %11378 = vpow2.f32 %v2750_v32  ;;  %v2694_v16 = vsub.f32 %v12991_v44, %v2613_v17  ;;  %v2695_v55 = vsub.f32 %v12989_v26, %v2613_v17  ;;  %v2831_v1 = vadd.f32 %v13168_v22, %v2830_v9 }
 0x626   :  { %v13177_v59 = vpop.eup %11366  ;;  %11380 = vpow2.f32 %v2752_v58 }
 0x627   :  { %v13179_v48 = vpop.eup %11368  ;;  %v2754_v5 = vmul.f32 1.442695, %v2694_v16  ;;  %v2756_v60 = vmul.f32 1.442695, %v2695_v55  ;;  %2832 = vadd.xlane.f32.xlu1 %v2831_v1 }
 0x628   :  { %v2617_v3 = vpop.xlane.xlu1 %2616  ;;  %v2834_v49 = vsel %vm2585_vm3, %v13179_v48, 0.0 }
 0x629   :  { %11382 = vpow2.f32 %v2754_v5  ;;  %v2696_v4 = vsub.f32 %v13000_v63, %v2617_v3  ;;  %v2697_v44 = vsub.f32 %v12998_v57, %v2617_v3  ;;  %v2835_v26 = vadd.f32 %v13177_v59, %v2834_v49 }
 0x62a   :  { %v13186_v14 = vpop.eup %11370  ;;  %11384 = vpow2.f32 %v2756_v60 }
 0x62b   :  { %v13188_v47 = vpop.eup %11372  ;;  %v2758_v56 = vmul.f32 1.442695, %v2696_v4  ;;  %v2760_v52 = vmul.f32 1.442695, %v2697_v44  ;;  %2836 = vadd.xlane.f32.xlu0 %v2835_v26 }
 0x62c   :  { %v2621_v36 = vpop.xlane.xlu0 %2620  ;;  %v2838_v6 = vsel %vm2585_vm3, %v13188_v47, 0.0 }
 0x62d   :  { %11386 = vpow2.f32 %v2758_v56  ;;  %v2698_v27 = vsub.f32 %v13009_v15, %v2621_v36  ;;  %v2699_v63 = vsub.f32 %v13007_v39, %v2621_v36  ;;  %v2839_v57 = vadd.f32 %v13186_v14, %v2838_v6 }
 0x62e   :  { %v13195_v62 = vpop.eup %11374  ;;  %11388 = vpow2.f32 %v2760_v52 }
 0x62f   :  { %v13197_v32 = vpop.eup %11376  ;;  %v2762_v58 = vmul.f32 1.442695, %v2698_v27  ;;  %v2764_v17 = vmul.f32 1.442695, %v2699_v63  ;;  %2840 = vadd.xlane.f32.xlu1 %v2839_v57 }
 0x630   :  { %v2625_v9 = vpop.xlane.xlu1 %2624  ;;  %v2842_v16 = vsel %vm2585_vm3, %v13197_v32, 0.0 }
 0x631   :  { %11390 = vpow2.f32 %v2762_v58  ;;  %v2700_v55 = vsub.f32 %v13018_v31, %v2625_v9  ;;  %v2701_v15 = vsub.f32 %v13016_v42, %v2625_v9  ;;  %v2843_v39 = vadd.f32 %v13195_v62, %v2842_v16 }
 0x632   :  { %v13204_v1 = vpop.eup %11378  ;;  %11392 = vpow2.f32 %v2764_v17 }
 0x633   :  { %v13206_v5 = vpop.eup %11380  ;;  %v2766_v60 = vmul.f32 1.442695, %v2700_v55  ;;  %v2768_v3 = vmul.f32 1.442695, %v2701_v15  ;;  %2844 = vadd.xlane.f32.xlu0 %v2843_v39 }
 0x634   :  { %v2629_v49 = vpop.xlane.xlu0 %2628  ;;  %v2846_v4 = vsel %vm2585_vm3, %v13206_v5, 0.0 }
 0x635   :  { %11394 = vpow2.f32 %v2766_v60  ;;  %v2702_v44 = vsub.f32 %v13027_v38, %v2629_v49  ;;  %v2703_v31 = vsub.f32 %v13025_v37, %v2629_v49  ;;  %v2847_v42 = vadd.f32 %v13204_v1, %v2846_v4 }
 0x636   :  { %v13213_v26 = vpop.eup %11382  ;;  %11396 = vpow2.f32 %v2768_v3 }
 0x637   :  { %v13215_v56 = vpop.eup %11384  ;;  %v2770_v52 = vmul.f32 1.442695, %v2702_v44  ;;  %v2772_v36 = vmul.f32 1.442695, %v2703_v31  ;;  %2848 = vadd.xlane.f32.xlu1 %v2847_v42 }
 0x638   :  { %v2633_v6 = vpop.xlane.xlu1 %2632  ;;  %v2850_v27 = vsel %vm2585_vm3, %v13215_v56, 0.0 }
 0x639   :  { %11398 = vpow2.f32 %v2770_v52  ;;  %v2704_v63 = vsub.f32 %v13036_v30, %v2633_v6  ;;  %v2705_v38 = vsub.f32 %v13034_v28, %v2633_v6  ;;  %v2851_v37 = vadd.f32 %v13213_v26, %v2850_v27 }
 0x63a   :  { %v13222_v57 = vpop.eup %11386  ;;  %11400 = vpow2.f32 %v2772_v36 }
 0x63b   :  { %v13224_v58 = vpop.eup %11388  ;;  %v2774_v17 = vmul.f32 1.442695, %v2704_v63  ;;  %v2776_v9 = vmul.f32 1.442695, %v2705_v38  ;;  %2852 = vadd.xlane.f32.xlu0 %v2851_v37 }
 0x63c   :  { %v2637_v16 = vpop.xlane.xlu0 %2636  ;;  %v2854_v55 = vsel %vm2585_vm3, %v13224_v58, 0.0 }
 0x63d   :  { %11402 = vpow2.f32 %v2774_v17  ;;  %v2706_v15 = vsub.f32 %v13045_v24, %v2637_v16  ;;  %v2707_v30 = vsub.f32 %v13043_v46, %v2637_v16  ;;  %v2855_v28 = vadd.f32 %v13222_v57, %v2854_v55 }
 0x63e   :  { %v13231_v39 = vpop.eup %11390  ;;  %11404 = vpow2.f32 %v2776_v9 }
 0x63f   :  { %v13233_v60 = vpop.eup %11392  ;;  %v2778_v3 = vmul.f32 1.442695, %v2706_v15  ;;  %v2780_v49 = vmul.f32 1.442695, %v2707_v30  ;;  %2856 = vadd.xlane.f32.xlu1 %v2855_v28 }
 0x640   :  { %v2641_v4 = vpop.xlane.xlu1 %2640  ;;  %v2858_v44 = vsel %vm2585_vm3, %v13233_v60, 0.0 }
 0x641   :  { %11406 = vpow2.f32 %v2778_v3  ;;  %v2708_v31 = vsub.f32 %v13054_v13, %v2641_v4  ;;  %v2709_v24 = vsub.f32 %v13052_v7, %v2641_v4  ;;  %v2859_v46 = vadd.f32 %v13231_v39, %v2858_v44 }
 0x642   :  { %v13240_v42 = vpop.eup %11394  ;;  %11408 = vpow2.f32 %v2780_v49 }
 0x643   :  { %v13242_v52 = vpop.eup %11396  ;;  %v2782_v36 = vmul.f32 1.442695, %v2708_v31  ;;  %v2784_v6 = vmul.f32 1.442695, %v2709_v24  ;;  %2860 = vadd.xlane.f32.xlu0 %v2859_v46 }
 0x644   :  { %v2645_v27 = vpop.xlane.xlu0 %2644  ;;  %v2862_v63 = vsel %vm2585_vm3, %v13242_v52, 0.0 }
 0x645   :  { %11410 = vpow2.f32 %v2782_v36  ;;  %v2710_v38 = vsub.f32 %v13063_v25, %v2645_v27  ;;  %v2711_v13 = vsub.f32 %v13061_v23, %v2645_v27  ;;  %v2863_v7 = vadd.f32 %v13240_v42, %v2862_v63 }
 0x646   :  { %v13249_v37 = vpop.eup %11398  ;;  %11412 = vpow2.f32 %v2784_v6 }
 0x647   :  { %v13251_v17 = vpop.eup %11400  ;;  %v2786_v9 = vmul.f32 1.442695, %v2710_v38  ;;  %v2788_v16 = vmul.f32 1.442695, %v2711_v13  ;;  %2864 = vadd.xlane.f32.xlu1 %v2863_v7 }
 0x648   :  { %v2649_v55 = vpop.xlane.xlu1 %2648  ;;  %v2866_v15 = vsel %vm2585_vm3, %v13251_v17, 0.0 }
 0x649   :  { %11414 = vpow2.f32 %v2786_v9  ;;  %v2712_v30 = vsub.f32 %v13072_v21, %v2649_v55  ;;  %v2713_v25 = vsub.f32 %v13070_v10, %v2649_v55  ;;  %v2867_v23 = vadd.f32 %v13249_v37, %v2866_v15 }
 0x64a   :  { %v13258_v28 = vpop.eup %11402  ;;  %11416 = vpow2.f32 %v2788_v16 }
 0x64b   :  { %v13260_v3 = vpop.eup %11404  ;;  %v2790_v49 = vmul.f32 1.442695, %v2712_v30  ;;  %v2792_v4 = vmul.f32 1.442695, %v2713_v25  ;;  %2868 = vadd.xlane.f32.xlu0 %v2867_v23 }
 0x64c   :  { %v2653_v44 = vpop.xlane.xlu0 %2652  ;;  %v2870_v31 = vsel %vm2585_vm3, %v13260_v3, 0.0 }
 0x64d   :  { %11418 = vpow2.f32 %v2790_v49  ;;  %v2714_v24 = vsub.f32 %v13081_v41, %v2653_v44  ;;  %v2715_v21 = vsub.f32 %v13079_v2, %v2653_v44  ;;  %v2871_v10 = vadd.f32 %v13258_v28, %v2870_v31 }
 0x64e   :  { %v13267_v46 = vpop.eup %11406  ;;  %11420 = vpow2.f32 %v2792_v4 }
 0x64f   :  { %v13269_v36 = vpop.eup %11408  ;;  %v2794_v6 = vmul.f32 1.442695, %v2714_v24  ;;  %v2796_v27 = vmul.f32 1.442695, %v2715_v21  ;;  %2872 = vadd.xlane.f32.xlu1 %v2871_v10 }
 0x650   :  { %v2657_v63 = vpop.xlane.xlu1 %2656  ;;  %v2874_v38 = vsel %vm2585_vm3, %v13269_v36, 0.0 }
 0x651   :  { %11422 = vpow2.f32 %v2794_v6  ;;  %v2716_v13 = vsub.f32 %v13090_v29, %v2657_v63  ;;  %v2717_v41 = vsub.f32 %v13088_v50, %v2657_v63  ;;  %v2875_v2 = vadd.f32 %v13267_v46, %v2874_v38 }
 0x652   :  { %v13276_v7 = vpop.eup %11410  ;;  %11424 = vpow2.f32 %v2796_v27 }
 0x653   :  { %v13278_v9 = vpop.eup %11412  ;;  %v2798_v16 = vmul.f32 1.442695, %v2716_v13  ;;  %v2800_v55 = vmul.f32 1.442695, %v2717_v41  ;;  %2876 = vadd.xlane.f32.xlu0 %v2875_v2 }
 0x654   :  { %v2661_v15 = vpop.xlane.xlu0 %2660  ;;  %v2878_v30 = vsel %vm2585_vm3, %v13278_v9, 0.0 }
 0x655   :  { %11426 = vpow2.f32 %v2798_v16  ;;  %v2718_v25 = vsub.f32 %v13099_v12, %v2661_v15  ;;  %v2719_v29 = vsub.f32 %v13097_v11, %v2661_v15  ;;  %v2879_v50 = vadd.f32 %v13276_v7, %v2878_v30 }
 0x656   :  { %v13285_v23 = vpop.eup %11414  ;;  %11428 = vpow2.f32 %v2800_v55 }
 0x657   :  { %v13287_v49 = vpop.eup %11416  ;;  %v2802_v4 = vmul.f32 1.442695, %v2718_v25  ;;  %v2804_v44 = vmul.f32 1.442695, %v2719_v29  ;;  %2880 = vadd.xlane.f32.xlu1 %v2879_v50 }
 0x658   :  { %v2665_v31 = vpop.xlane.xlu1 %2664  ;;  %v2882_v24 = vsel %vm2585_vm3, %v13287_v49, 0.0 }
 0x659   :  { %11430 = vpow2.f32 %v2802_v4  ;;  %v2720_v21 = vsub.f32 %v13108_v40, %v2665_v31  ;;  %v2721_v12 = vsub.f32 %v13106_v18, %v2665_v31  ;;  %v2883_v11 = vadd.f32 %v13285_v23, %v2882_v24 }
 0x65a   :  { %v13294_v10 = vpop.eup %11418  ;;  %11432 = vpow2.f32 %v2804_v44 }
 0x65b   :  { %v13296_v6 = vpop.eup %11420  ;;  %v2806_v27 = vmul.f32 1.442695, %v2720_v21  ;;  %v2808_v63 = vmul.f32 1.442695, %v2721_v12  ;;  %2884 = vadd.xlane.f32.xlu0 %v2883_v11 }
 0x65c   :  { %v2669_v38 = vpop.xlane.xlu0 %2668  ;;  %v2886_v13 = vsel %vm2585_vm3, %v13296_v6, 0.0 }
 0x65d   :  { %11434 = vpow2.f32 %v2806_v27  ;;  %v2722_v41 = vsub.f32 %v13117_v19, %v2669_v38  ;;  %v2723_v40 = vsub.f32 %v13115_v45, %v2669_v38  ;;  %v2887_v18 = vadd.f32 %v13294_v10, %v2886_v13 }
 0x65e   :  { %v13303_v2 = vpop.eup %11422  ;;  %11436 = vpow2.f32 %v2808_v63 }
 0x65f   :  { %v13305_v16 = vpop.eup %11424  ;;  %v2810_v55 = vmul.f32 1.442695, %v2722_v41  ;;  %v2812_v15 = vmul.f32 1.442695, %v2723_v40  ;;  %2888 = vadd.xlane.f32.xlu1 %v2887_v18 }
 0x660   :  { %v2673_v30 = vpop.xlane.xlu1 %2672  ;;  %v2890_v25 = vsel %vm2585_vm3, %v13305_v16, 0.0 }
 0x661   :  { %11438 = vpow2.f32 %v2810_v55  ;;  %v2724_v29 = vsub.f32 %v13126_v34, %v2673_v30  ;;  %v2725_v19 = vsub.f32 %v13124_v8, %v2673_v30  ;;  %v2891_v45 = vadd.f32 %v13303_v2, %v2890_v25 }
 0x662   :  { %v13312_v50 = vpop.eup %11426  ;;  %11440 = vpow2.f32 %v2812_v15 }
 0x663   :  { %v13314_v4 = vpop.eup %11428  ;;  %v2814_v44 = vmul.f32 1.442695, %v2724_v29  ;;  %v2816_v31 = vmul.f32 1.442695, %v2725_v19  ;;  %2892 = vadd.xlane.f32.xlu0 %v2891_v45 }
 0x664   :  { %v2677_v24 = vpop.xlane.xlu0 %2676  ;;  %v2894_v21 = vsel %vm2585_vm3, %v13314_v4, 0.0 }
 0x665   :  { %11442 = vpow2.f32 %v2814_v44  ;;  %v2726_v12 = vsub.f32 %v13135_v54, %v2677_v24  ;;  %v2727_v34 = vsub.f32 %v13133_v53, %v2677_v24  ;;  %v2895_v8 = vadd.f32 %v13312_v50, %v2894_v21 }
 0x666   :  { %v13321_v11 = vpop.eup %11430  ;;  %11444 = vpow2.f32 %v2816_v31 }
 0x667   :  { %v13323_v27 = vpop.eup %11432  ;;  %v2818_v63 = vmul.f32 1.442695, %v2726_v12  ;;  %v2820_v38 = vmul.f32 1.442695, %v2727_v34  ;;  %2896 = vadd.xlane.f32.xlu1 %v2895_v8 }
 0x668   :  { %v2681_v13 = vpop.xlane.xlu0 %2680  ;;  %v2898_v41 = vsel %vm2585_vm3, %v13323_v27, 0.0 }
 0x669   :  { %11446 = vpow2.f32 %v2818_v63  ;;  %v2728_v40 = vsub.f32 %v13144_v0, %v2681_v13  ;;  %v2729_v54 = vsub.f32 %v13142_v61, %v2681_v13  ;;  %v2899_v53 = vadd.f32 %v13321_v11, %v2898_v41 }
 0x66a   :  { %v13330_v18 = vpop.eup %11434  ;;  %11448 = vpow2.f32 %v2820_v38 }
 0x66b   :  { %v13332_v55 = vpop.eup %11436  ;;  %v2822_v15 = vmul.f32 1.442695, %v2728_v40  ;;  %v2824_v30 = vmul.f32 1.442695, %v2729_v54  ;;  %2900 = vadd.xlane.f32.xlu0 %v2899_v53  ;;  %v206_v54 = vld [vmem:[%s13368_s7] sm:$0xff] }
 0x66c   :  { %v2902_v25 = vsel %vm2585_vm3, %v13332_v55, 0.0  ;;  %10509 = vmatprep.subr.mxu0 %v206_v54 }
 0x66d   :  { %11450 = vpow2.f32 %v2822_v15  ;;  %v2903_v29 = vadd.f32 %v13330_v18, %v2902_v25 }
 0x66e   :  { %v13337_v19 = vpop.eup %11438  ;;  %11452 = vpow2.f32 %v2824_v30 }
 0x66f   :  { %v13339_v61 = vpop.eup %11440  ;;  %2904 = vadd.xlane.f32.xlu1 %v2903_v29 }
 0x670   :  { %v2906_v0 = vsel %vm2585_vm3, %v13339_v61, 0.0 }
 0x671   :  { %v2907_v45 = vadd.f32 %v13337_v19, %v2906_v0 }
 0x672   :  { %v13344_v44 = vpop.eup %11442 }
 0x673   :  { %v13346_v31 = vpop.eup %11444  ;;  %2908 = vadd.xlane.f32.xlu0 %v2907_v45 }
 0x674   :  { %v2910_v24 = vsel %vm2585_vm3, %v13346_v31, 0.0 }
 0x675   :  { %v2911_v21 = vadd.f32 %v13344_v44, %v2910_v24 }
 0x676   :  { %v13351_v12 = vpop.eup %11446 }
 0x677   :  { %v13353_v34 = vpop.eup %11448  ;;  %2912 = vadd.xlane.f32.xlu1 %v2911_v21 }
 0x678   :  { %v2914_v8 = vsel %vm2585_vm3, %v13353_v34, 0.0 }
 0x679   :  { %v2915_v63 = vadd.f32 %v13351_v12, %v2914_v8 }
 0x67a   :  { %v13358_v38 = vpop.eup %11450 }
 0x67b   :  { %v13360_v13 = vpop.eup %11452  ;;  %2916 = vadd.xlane.f32.xlu0 %v2915_v63 }
 0x67c   :  { %v2918_v41 = vsel %vm2585_vm3, %v13360_v13, 0.0 }
 0x67d   :  { %v2919_v40 = vadd.f32 %v13358_v38, %v2918_v41 }
 0x67f   :  { %2920 = vadd.xlane.f32.xlu1 %v2919_v40  ;;  %v13377_v40 = vld [vmem:[%s11921_s6 + $0x58] sm:$0xff] }
 0x6ac   :  { %v2829_v53 = vpop.xlane.xlu1 %2828 }
 0x6ad   :  { %11454 = vrcp.f32 %v2829_v53 }
 0x6b0   :  { %v2833_v15 = vpop.xlane.xlu1 %2832 }
 0x6b1   :  { %11456 = vrcp.f32 %v2833_v15 }
 0x6b4   :  { %v2837_v30 = vpop.xlane.xlu0 %2836 }
 0x6b5   :  { %11458 = vrcp.f32 %v2837_v30 }
 0x6b8   :  { %v2841_v25 = vpop.xlane.xlu1 %2840 }
 0x6b9   :  { %11460 = vrcp.f32 %v2841_v25 }
 0x6ba   :  { %v11455_v29 = vpop.eup %11454 }
 0x6bb   :  { %v2924_v0 = vmul.f32 %v11455_v29, %v13161_v43  ;;  %v2923_v45 = vmul.f32 %v11455_v29, %v13159_v51 }
 0x6bc   :  { %v2845_v24 = vpop.xlane.xlu0 %2844 }
 0x6bd   :  { %11462 = vrcp.f32 %v2845_v24  ;;  %8854 = vmatprep.mubr.msk.f32.mxu0 %vm2585_vm3, %v2924_v0 }
 0x6be   :  { %v11457_v21 = vpop.eup %11456  ;;  %3131 = vmatmul.mubr.f32.vlgmr.msra.gmra.mxu0 %v2923_v45 }
 0x6bf   :  { %v2927_v8 = vmul.f32 %v11457_v21, %v13170_v20  ;;  %v2926_v63 = vmul.f32 %v11457_v21, %v13168_v22  ;;  %10510 = vmatpush3.msra.mxu0 %v206_v54 }
 0x6c0   :  { %v2849_v41 = vpop.xlane.xlu1 %2848  ;;  %10574 = vmatprep.subr.mxu0 %v13377_v40 }
 0x6c1   :  { %11464 = vrcp.f32 %v2849_v41  ;;  %8855 = vmatprep.mubr.msk.f32.mxu0 %vm2585_vm3, %v2927_v8 }
 0x6c2   :  { %v11459_v51 = vpop.eup %11458  ;;  %3136 = vmatmul.mubr.f32.gmra.mxu0 %v2926_v63 }
 0x6c3   :  { %v2930_v43 = vmul.f32 %v11459_v51, %v13179_v48  ;;  %v2929_v53 = vmul.f32 %v11459_v51, %v13177_v59 }
 0x6c4   :  { %v2853_v15 = vpop.xlane.xlu0 %2852 }
 0x6c5   :  { %11466 = vrcp.f32 %v2853_v15  ;;  %8856 = vmatprep.mubr.msk.f32.mxu0 %vm2585_vm3, %v2930_v43 }
 0x6c6   :  { %v11461_v22 = vpop.eup %11460  ;;  %3141 = vmatmul.mubr.f32.gmra.mxu0 %v2929_v53 }
 0x6c7   :  { %v2933_v20 = vmul.f32 %v11461_v22, %v13188_v47  ;;  %v2932_v54 = vmul.f32 %v11461_v22, %v13186_v14 }
 0x6c8   :  { %v2857_v30 = vpop.xlane.xlu1 %2856 }
 0x6c9   :  { %11468 = vrcp.f32 %v2857_v30  ;;  %8857 = vmatprep.mubr.msk.f32.mxu0 %vm2585_vm3, %v2933_v20 }
 0x6ca   :  { %v11463_v25 = vpop.eup %11462  ;;  %3146 = vmatmul.mubr.f32.gmra.mxu0 %v2932_v54 }
 0x6cb   :  { %v2936_v48 = vmul.f32 %v11463_v25, %v13197_v32  ;;  %v2935_v59 = vmul.f32 %v11463_v25, %v13195_v62 }
 0x6cc   :  { %v2861_v29 = vpop.xlane.xlu0 %2860 }
 0x6cd   :  { %11470 = vrcp.f32 %v2861_v29  ;;  %8858 = vmatprep.mubr.msk.f32.mxu0 %vm2585_vm3, %v2936_v48 }
 0x6ce   :  { %v11465_v0 = vpop.eup %11464  ;;  %3151 = vmatmul.mubr.f32.gmra.mxu0 %v2935_v59 }
 0x6cf   :  { %v2939_v47 = vmul.f32 %v11465_v0, %v13206_v5  ;;  %v2938_v14 = vmul.f32 %v11465_v0, %v13204_v1 }
 0x6d0   :  { %v2865_v45 = vpop.xlane.xlu1 %2864 }
 0x6d1   :  { %11472 = vrcp.f32 %v2865_v45  ;;  %8859 = vmatprep.mubr.msk.f32.mxu0 %vm2585_vm3, %v2939_v47 }
 0x6d2   :  { %v11467_v24 = vpop.eup %11466  ;;  %3156 = vmatmul.mubr.f32.gmra.mxu0 %v2938_v14 }
 0x6d3   :  { %v2942_v32 = vmul.f32 %v11467_v24, %v13215_v56  ;;  %v2941_v62 = vmul.f32 %v11467_v24, %v13213_v26 }
 0x6d4   :  { %v2869_v21 = vpop.xlane.xlu0 %2868 }
 0x6d5   :  { %11474 = vrcp.f32 %v2869_v21  ;;  %8860 = vmatprep.mubr.msk.f32.mxu0 %vm2585_vm3, %v2942_v32 }
 0x6d6   :  { %v11469_v8 = vpop.eup %11468  ;;  %3161 = vmatmul.mubr.f32.gmra.mxu0 %v2941_v62 }
 0x6d7   :  { %v2945_v5 = vmul.f32 %v11469_v8, %v13224_v58  ;;  %v2944_v1 = vmul.f32 %v11469_v8, %v13222_v57 }
 0x6d8   :  { %v2873_v63 = vpop.xlane.xlu1 %2872 }
 0x6d9   :  { %11476 = vrcp.f32 %v2873_v63  ;;  %8861 = vmatprep.mubr.msk.f32.mxu0 %vm2585_vm3, %v2945_v5 }
 0x6da   :  { %v11471_v41 = vpop.eup %11470  ;;  %3166 = vmatmul.mubr.f32.gmra.mxu0 %v2944_v1 }
 0x6db   :  { %v2948_v56 = vmul.f32 %v11471_v41, %v13233_v60  ;;  %v2947_v26 = vmul.f32 %v11471_v41, %v13231_v39 }
 0x6dc   :  { %v2877_v51 = vpop.xlane.xlu0 %2876 }
 0x6dd   :  { %11478 = vrcp.f32 %v2877_v51  ;;  %8862 = vmatprep.mubr.msk.f32.mxu0 %vm2585_vm3, %v2948_v56 }
 0x6de   :  { %v11473_v43 = vpop.eup %11472  ;;  %3171 = vmatmul.mubr.f32.gmra.mxu0 %v2947_v26 }
 0x6df   :  { %v2951_v58 = vmul.f32 %v11473_v43, %v13242_v52  ;;  %v2950_v57 = vmul.f32 %v11473_v43, %v13240_v42 }
 0x6e0   :  { %v2881_v53 = vpop.xlane.xlu1 %2880 }
 0x6e1   :  { %11480 = vrcp.f32 %v2881_v53  ;;  %8863 = vmatprep.mubr.msk.f32.mxu0 %vm2585_vm3, %v2951_v58  ;;  %v13451_v58 = vld [vmem:[%s11921_s6 + $0x50] sm:$0xff]  ;;  %v13462_v53 = vld [vmem:[%s11921_s6 + $0x40] sm:$0xff] }
 0x6e2   :  { %v11475_v15 = vpop.eup %11474  ;;  %3176 = vmatmul.mubr.f32.gmra.mxu0 %v2950_v57 }
 0x6e3   :  { %v2954_v60 = vmul.f32 %v11475_v15, %v13251_v17  ;;  %v2953_v39 = vmul.f32 %v11475_v15, %v13249_v37 }
 0x6e4   :  { %v2885_v22 = vpop.xlane.xlu0 %2884 }
 0x6e5   :  { %11482 = vrcp.f32 %v2885_v22  ;;  %8864 = vmatprep.mubr.msk.f32.mxu0 %vm2585_vm3, %v2954_v60  ;;  %v13468_v60 = vld [vmem:[%s11921_s6 + $0x38] sm:$0xff]  ;;  %v13473_v22 = vld [vmem:[%s11921_s6 + $0x30] sm:$0xff] }
 0x6e6   :  { %v11477_v20 = vpop.eup %11476  ;;  %3181 = vmatmul.mubr.f32.gmra.mxu0 %v2953_v39 }
 0x6e7   :  { %v2957_v52 = vmul.f32 %v11477_v20, %v13260_v3  ;;  %v2956_v42 = vmul.f32 %v11477_v20, %v13258_v28 }
 0x6e8   :  { %v2889_v54 = vpop.xlane.xlu1 %2888 }
 0x6e9   :  { %11484 = vrcp.f32 %v2889_v54  ;;  %8865 = vmatprep.mubr.msk.f32.mxu0 %vm2585_vm3, %v2957_v52  ;;  %v13479_v52 = vld [vmem:[%s11921_s6 + $0x28] sm:$0xff]  ;;  %v13484_v54 = vld [vmem:[%s11921_s6 + $0x20] sm:$0xff] }
 0x6ea   :  { %v11479_v30 = vpop.eup %11478  ;;  %3186 = vmatmul.mubr.f32.gmra.mxu0 %v2956_v42 }
 0x6eb   :  { %v2960_v17 = vmul.f32 %v11479_v30, %v13269_v36  ;;  %v2959_v37 = vmul.f32 %v11479_v30, %v13267_v46 }
 0x6ec   :  { %v2893_v25 = vpop.xlane.xlu0 %2892 }
 0x6ed   :  { %11486 = vrcp.f32 %v2893_v25  ;;  %8866 = vmatprep.mubr.msk.f32.mxu0 %vm2585_vm3, %v2960_v17  ;;  %v13490_v17 = vld [vmem:[%s11921_s6 + $0x18] sm:$0xff]  ;;  %v13495_v25 = vld [vmem:[%s11921_s6 + $0x10] sm:$0xff] }
 0x6ee   :  { %v11481_v48 = vpop.eup %11480  ;;  %3191 = vmatmul.mubr.f32.gmra.mxu0 %v2959_v37 }
 0x6ef   :  { %v2963_v3 = vmul.f32 %v11481_v48, %v13278_v9  ;;  %v2962_v28 = vmul.f32 %v11481_v48, %v13276_v7 }
 0x6f0   :  { %v2897_v59 = vpop.xlane.xlu1 %2896 }
 0x6f1   :  { %11488 = vrcp.f32 %v2897_v59  ;;  %8867 = vmatprep.mubr.msk.f32.mxu0 %vm2585_vm3, %v2963_v3  ;;  %v13501_v3 = vld [vmem:[%s11921_s6 + $0x8] sm:$0xff]  ;;  %v13506_v59 = vld [vmem:[%s11921_s6] sm:$0xff] }
 0x6f2   :  { %v11483_v29 = vpop.eup %11482  ;;  %3196 = vmatmul.mubr.f32.gmra.mxu0 %v2962_v28 }
 0x6f3   :  { %v2966_v36 = vmul.f32 %v11483_v29, %v13287_v49  ;;  %v2965_v46 = vmul.f32 %v11483_v29, %v13285_v23 }
 0x6f4   :  { %v2901_v0 = vpop.xlane.xlu0 %2900 }
 0x6f5   :  { %11490 = vrcp.f32 %v2901_v0  ;;  %8868 = vmatprep.mubr.msk.f32.mxu0 %vm2585_vm3, %v2966_v36 }
 0x6f6   :  { %v11485_v47 = vpop.eup %11484  ;;  %3201 = vmatmul.mubr.f32.gmra.mxu0 %v2965_v46 }
 0x6f7   :  { %v2969_v9 = vmul.f32 %v11485_v47, %v13296_v6  ;;  %v2968_v7 = vmul.f32 %v11485_v47, %v13294_v10 }
 0x6f8   :  { %v2905_v14 = vpop.xlane.xlu1 %2904 }
 0x6f9   :  { %11492 = vrcp.f32 %v2905_v14  ;;  %8869 = vmatprep.mubr.msk.f32.mxu0 %vm2585_vm3, %v2969_v9 }
 0x6fa   :  { %v11487_v45 = vpop.eup %11486  ;;  %3206 = vmatmul.mubr.f32.gmra.mxu0 %v2968_v7 }
 0x6fb   :  { %v2972_v49 = vmul.f32 %v11487_v45, %v13305_v16  ;;  %v2971_v23 = vmul.f32 %v11487_v45, %v13303_v2 }
 0x6fc   :  { %v2909_v24 = vpop.xlane.xlu0 %2908 }
 0x6fd   :  { %11494 = vrcp.f32 %v2909_v24  ;;  %8870 = vmatprep.mubr.msk.f32.mxu0 %vm2585_vm3, %v2972_v49 }
 0x6fe   :  { %v11489_v32 = vpop.eup %11488  ;;  %3211 = vmatmul.mubr.f32.gmra.mxu0 %v2971_v23 }
 0x6ff   :  { %v2975_v6 = vmul.f32 %v11489_v32, %v13314_v4  ;;  %v2974_v10 = vmul.f32 %v11489_v32, %v13312_v50 }
 0x700   :  { %v2913_v62 = vpop.xlane.xlu1 %2912 }
 0x701   :  { %11496 = vrcp.f32 %v2913_v62  ;;  %8871 = vmatprep.mubr.msk.f32.mxu0 %vm2585_vm3, %v2975_v6 }
 0x702   :  { %v11491_v21 = vpop.eup %11490  ;;  %3216 = vmatmul.mubr.f32.gmra.mxu0 %v2974_v10 }
 0x703   :  { %v2978_v16 = vmul.f32 %v11491_v21, %v13323_v27  ;;  %v2977_v2 = vmul.f32 %v11491_v21, %v13321_v11 }
 0x704   :  { %v2917_v8 = vpop.xlane.xlu0 %2916 }
 0x705   :  { %11498 = vrcp.f32 %v2917_v8  ;;  %8872 = vmatprep.mubr.msk.f32.mxu0 %vm2585_vm3, %v2978_v16 }
 0x706   :  { %v11493_v5 = vpop.eup %11492  ;;  %3221 = vmatmul.mubr.f32.gmra.mxu0 %v2977_v2 }
 0x707   :  { %v2981_v4 = vmul.f32 %v11493_v5, %v13332_v55  ;;  %v2980_v50 = vmul.f32 %v11493_v5, %v13330_v18 }
 0x708   :  { %v2921_v1 = vpop.xlane.xlu1 %2920 }
 0x709   :  { %11500 = vrcp.f32 %v2921_v1  ;;  %8873 = vmatprep.mubr.msk.f32.mxu0 %vm2585_vm3, %v2981_v4 }
 0x70a   :  { %v11495_v63 = vpop.eup %11494  ;;  %3226 = vmatmul.mubr.f32.gmra.mxu0 %v2980_v50 }
 0x70b   :  { %v2984_v27 = vmul.f32 %v11495_v63, %v13339_v61  ;;  %v2983_v11 = vmul.f32 %v11495_v63, %v13337_v19 }
 0x70d   :  { %8874 = vmatprep.mubr.msk.f32.mxu0 %vm2585_vm3, %v2984_v27 }
 0x70e   :  { %v11497_v41 = vpop.eup %11496  ;;  %3231 = vmatmul.mubr.f32.gmra.mxu0 %v2983_v11 }
 0x70f   :  { %v2987_v56 = vmul.f32 %v11497_v41, %v13346_v31  ;;  %v2986_v55 = vmul.f32 %v11497_v41, %v13344_v44 }
 0x711   :  { %8875 = vmatprep.mubr.msk.f32.mxu0 %vm2585_vm3, %v2987_v56 }
 0x712   :  { %v11499_v18 = vpop.eup %11498  ;;  %3236 = vmatmul.mubr.f32.gmra.mxu0 %v2986_v55 }
 0x713   :  { %v2990_v26 = vmul.f32 %v11499_v18, %v13353_v34  ;;  %v2989_v51 = vmul.f32 %v11499_v18, %v13351_v12 }
 0x715   :  { %8876 = vmatprep.mubr.msk.f32.mxu0 %vm2585_vm3, %v2990_v26 }
 0x716   :  { %v11501_v19 = vpop.eup %11500  ;;  %3241 = vmatmul.mubr.f32.gmra.mxu0 %v2989_v51 }
 0x717   :  { %v2993_v61 = vmul.f32 %v11501_v19, %v13360_v13  ;;  %v2992_v31 = vmul.f32 %v11501_v19, %v13358_v38  ;;  %v13457_v13 = vld [vmem:[%s11921_s6 + $0x48] sm:$0xff] }
 0x719   :  { %8877 = vmatprep.mubr.msk.f32.mxu0 %vm2585_vm3, %v2993_v61  ;;  %v167_v61 = vld [vmem:[%s13530_s14 + $0x8] sm:$0xff] }
 0x71a   :  { %3246 = vmatmul.mubr.f32.gmra.mxu0 %v2992_v31  ;;  %8902 = vmatprep.mubr.msk.f32.mxu1 %vm2585_vm3, %v167_v61 }
 0x77e   :  { %v3132_v44 = vpop.f32.mrf.mxu0 }
 0x77f   :  { %10511 = vmatprep.mubr.msk.f32.mxu0 %vm2231_vm2, %v3132_v44 }
 0x780   :  { %v3134_v34 = vpop.f32.mrf.mxu0 }
 0x782   :  { %v3137_v43 = vpop.f32.mrf.mxu0 }
 0x783   :  { %10512 = vmatmul.mubr.msk.f32.vlgmr.msra.gmra.mxu0 %vm2231_vm2, %v3137_v43 }
 0x784   :  { %v3139_v12 = vpop.f32.mrf.mxu0  ;;  %10575 = vmatpush3.msra.mxu0 %v13377_v40 }
 0x785   :  { %10576 = vmatprep.subr.mxu0 %v13451_v58 }
 0x786   :  { %v3142_v38 = vpop.f32.mrf.mxu0  ;;  %10577 = vmatpush3.msra.mxu0 %v13451_v58 }
 0x787   :  { %10514 = vmatprep.mubr.msk.f32.mxu0 %vm2231_vm2, %v3142_v38  ;;  %10578 = vmatprep.subr.mxu0 %v13457_v13 }
 0x788   :  { %v3144_v57 = vpop.f32.mrf.mxu0  ;;  %10579 = vmatpush3.msra.mxu0 %v13457_v13 }
 0x789   :  { %10580 = vmatprep.subr.mxu0 %v13462_v53 }
 0x78a   :  { %v3147_v15 = vpop.f32.mrf.mxu0  ;;  %10581 = vmatpush3.msra.mxu0 %v13462_v53 }
 0x78b   :  { %10515 = vmatmul.mubr.msk.f32.gmra.mxu0 %vm2231_vm2, %v3147_v15  ;;  %10582 = vmatprep.subr.mxu0 %v13468_v60 }
 0x78c   :  { %v3149_v39 = vpop.f32.mrf.mxu0  ;;  %10583 = vmatpush3.msra.mxu0 %v13468_v60 }
 0x78d   :  { %10584 = vmatprep.subr.mxu0 %v13473_v22 }
 0x78e   :  { %v3152_v20 = vpop.f32.mrf.mxu0  ;;  %10585 = vmatpush3.msra.mxu0 %v13473_v22 }
 0x78f   :  { %10517 = vmatprep.mubr.msk.f32.mxu0 %vm2231_vm2, %v3152_v20  ;;  %10586 = vmatprep.subr.mxu0 %v13479_v52 }
 0x790   :  { %v3154_v42 = vpop.f32.mrf.mxu0  ;;  %10587 = vmatpush3.msra.mxu0 %v13479_v52 }
 0x791   :  { %10588 = vmatprep.subr.mxu0 %v13484_v54 }
 0x792   :  { %v3157_v30 = vpop.f32.mrf.mxu0  ;;  %10589 = vmatpush3.msra.mxu0 %v13484_v54 }
 0x793   :  { %10518 = vmatmul.mubr.msk.f32.gmra.mxu0 %vm2231_vm2, %v3157_v30  ;;  %10590 = vmatprep.subr.mxu0 %v13490_v17 }
 0x794   :  { %v3159_v37 = vpop.f32.mrf.mxu0  ;;  %10591 = vmatpush3.msra.mxu0 %v13490_v17 }
 0x795   :  { %10592 = vmatprep.subr.mxu0 %v13495_v25 }
 0x796   :  { %v3162_v48 = vpop.f32.mrf.mxu0  ;;  %10593 = vmatpush3.msra.mxu0 %v13495_v25 }
 0x797   :  { %10520 = vmatprep.mubr.msk.f32.mxu0 %vm2231_vm2, %v3162_v48  ;;  %10594 = vmatprep.subr.mxu0 %v13501_v3 }
 0x798   :  { %v3164_v28 = vpop.f32.mrf.mxu0  ;;  %10595 = vmatpush3.msra.mxu0 %v13501_v3 }
 0x799   :  { %10596 = vmatprep.subr.mxu0 %v13506_v59 }
 0x79a   :  { %v3167_v29 = vpop.f32.mrf.mxu0  ;;  %10597 = vmatpush3.msra.mxu0 %v13506_v59 }
 0x79b   :  { %10521 = vmatmul.mubr.msk.f32.gmra.mxu0 %vm2231_vm2, %v3167_v29  ;;  %v11692_v29 = vld [vmem:[%s12334_s17 + $0x78] sm:$0xff] }
 0x79c   :  { %v3169_v36 = vpop.f32.mrf.mxu0 }
 0x79e   :  { %v3172_v46 = vpop.f32.mrf.mxu0 }
 0x79f   :  { %10523 = vmatprep.mubr.msk.f32.mxu0 %vm2231_vm2, %v3172_v46 }
 0x7a0   :  { %v3174_v0 = vpop.f32.mrf.mxu0 }
 0x7a1   :  { %v11693_v0 = vld [vmem:[%s12334_s17 + $0x70] sm:$0xff] }
 0x7a2   :  { %v3177_v47 = vpop.f32.mrf.mxu0 }
 0x7a3   :  { %10524 = vmatmul.mubr.msk.f32.gmra.mxu0 %vm2231_vm2, %v3177_v47 }
 0x7a4   :  { %v3179_v9 = vpop.f32.mrf.mxu0 }
 0x7a5   :  { %v15766_v9 = vmov 0.0  }
 0x7a6   :  { %v3182_v7 = vpop.f32.mrf.mxu0 }
 0x7a7   :  { %10526 = vmatprep.mubr.msk.f32.mxu0 %vm2231_vm2, %v3182_v7  ;;  %v11694_v7 = vld [vmem:[%s12334_s17 + $0x68] sm:$0xff] }
 0x7a8   :  { %v3184_v14 = vpop.f32.mrf.mxu0 }
 0x7aa   :  { %v3187_v45 = vpop.f32.mrf.mxu0 }
 0x7ab   :  { %10527 = vmatmul.mubr.msk.f32.gmra.mxu0 %vm2231_vm2, %v3187_v45  ;;  %v11695_v45 = vld [vmem:[%s12334_s17 + $0x60] sm:$0xff] }
 0x7ac   :  { %v3189_v49 = vpop.f32.mrf.mxu0 }
 0x7ae   :  { %v3192_v23 = vpop.f32.mrf.mxu0 }
 0x7af   :  { %10529 = vmatprep.mubr.msk.f32.mxu0 %vm2231_vm2, %v3192_v23  ;;  %v11696_v23 = vld [vmem:[%s12334_s17 + $0x58] sm:$0xff] }
 0x7b0   :  { %v3194_v24 = vpop.f32.mrf.mxu0 }
 0x7b2   :  { %v3197_v32 = vpop.f32.mrf.mxu0 }
 0x7b3   :  { %10530 = vmatmul.mubr.msk.f32.gmra.mxu0 %vm2231_vm2, %v3197_v32  ;;  %v11697_v32 = vld [vmem:[%s12334_s17 + $0x50] sm:$0xff] }
 0x7b4   :  { %v3199_v6 = vpop.f32.mrf.mxu0 }
 0x7b6   :  { %v3202_v10 = vpop.f32.mrf.mxu0 }
 0x7b7   :  { %10532 = vmatprep.mubr.msk.f32.mxu0 %vm2231_vm2, %v3202_v10  ;;  %v11698_v10 = vld [vmem:[%s12334_s17 + $0x48] sm:$0xff] }
 0x7b8   :  { %v3204_v62 = vpop.f32.mrf.mxu0 }
 0x7ba   :  { %v3207_v21 = vpop.f32.mrf.mxu0 }
 0x7bb   :  { %10533 = vmatmul.mubr.msk.f32.gmra.mxu0 %vm2231_vm2, %v3207_v21 }
 0x7bc   :  { %v3209_v16 = vpop.f32.mrf.mxu0 }
 0x7bd   :  { %v11699_v16 = vld [vmem:[%s12334_s17 + $0x40] sm:$0xff] }
 0x7be   :  { %v3212_v2 = vpop.f32.mrf.mxu0 }
 0x7bf   :  { %10535 = vmatprep.mubr.msk.f32.mxu0 %vm2231_vm2, %v3212_v2 }
 0x7c0   :  { %v3214_v8 = vpop.f32.mrf.mxu0 }
 0x7c1   :  { %v11700_v8 = vld [vmem:[%s12334_s17 + $0x38] sm:$0xff] }
 0x7c2   :  { %v3217_v5 = vpop.f32.mrf.mxu0 }
 0x7c3   :  { %10536 = vmatmul.mubr.msk.f32.gmra.mxu0 %vm2231_vm2, %v3217_v5 }
 0x7c4   :  { %v3219_v4 = vpop.f32.mrf.mxu0 }
 0x7c6   :  { %v3222_v50 = vpop.f32.mrf.mxu0 }
 0x7c7   :  { %10538 = vmatprep.mubr.msk.f32.mxu0 %vm2231_vm2, %v3222_v50  ;;  %v11701_v50 = vld [vmem:[%s12334_s17 + $0x30] sm:$0xff] }
 0x7c8   :  { %v3224_v1 = vpop.f32.mrf.mxu0 }
 0x7ca   :  { %v3227_v63 = vpop.f32.mrf.mxu0 }
 0x7cb   :  { %10539 = vmatmul.mubr.msk.f32.gmra.mxu0 %vm2231_vm2, %v3227_v63 }
 0x7cc   :  { %v3229_v27 = vpop.f32.mrf.mxu0 }
 0x7cd   :  { %v11702_v27 = vld [vmem:[%s12334_s17 + $0x28] sm:$0xff] }
 0x7ce   :  { %v3232_v11 = vpop.f32.mrf.mxu0 }
 0x7cf   :  { %10541 = vmatprep.mubr.msk.f32.mxu0 %vm2231_vm2, %v3232_v11 }
 0x7d0   :  { %v3234_v41 = vpop.f32.mrf.mxu0 }
 0x7d1   :  { %v11703_v41 = vld [vmem:[%s12334_s17 + $0x20] sm:$0xff] }
 0x7d2   :  { %v3237_v56 = vpop.f32.mrf.mxu0 }
 0x7d3   :  { %10542 = vmatmul.mubr.msk.f32.gmra.mxu0 %vm2231_vm2, %v3237_v56 }
 0x7d4   :  { %v3239_v55 = vpop.f32.mrf.mxu0 }
 0x7d6   :  { %v3242_v18 = vpop.f32.mrf.mxu0 }
 0x7d7   :  { %10544 = vmatprep.mubr.msk.f32.mxu0 %vm2231_vm2, %v3242_v18  ;;  %v11704_v18 = vld [vmem:[%s12334_s17 + $0x18] sm:$0xff] }
 0x7d8   :  { %v3244_v26 = vpop.f32.mrf.mxu0 }
 0x7da   :  { %v3247_v51 = vpop.f32.mrf.mxu0 }
 0x7db   :  { %10545 = vmatmul.mubr.msk.f32.gmra.mxu0 %vm2231_vm2, %v3247_v51 }
 0x7dc   :  { %v3249_v19 = vpop.f32.mrf.mxu0 }
 0x7dd   :  { %v11705_v19 = vld [vmem:[%s12334_s17 + $0x10] sm:$0xff] }
 0x843   :  { %v13534_v31 = vpop.f32.mrf.mxu0 }
 0x845   :  { %v13536_v44 = vpop.f32.mrf.mxu0 }
 0x84b   :  { %v13538_v34 = vpop.f32.mrf.mxu0 }
 0x84c   :  { %v3511_v26 = vmul.f32 %v11704_v18, %v13538_v34  ;;  %v11707_v34 = vld [vmem:[%s12334_s17] sm:$0xff] }
 0x84d   :  { %v13540_v43 = vpop.f32.mrf.mxu0 }
 0x84e   :  { %v3510_v61 = vmul.f32 %v11705_v19, %v13540_v43  ;;  %v11708_v43 = vld [vmem:[%s12334_s17 + $0xb8] sm:$0xff] }
 0x853   :  { %v10519_v12 = vpop.f32.mrf.mxu0 }
 0x854   :  { %v3513_v11 = vmul.f32 %v11702_v27, %v10519_v12  ;;  %v11706_v12 = vld [vmem:[%s12334_s17 + $0x8] sm:$0xff] }
 0x855   :  { %v3409_v38 = vpop.f32.mrf.mxu0 }
 0x856   :  { %v3512_v56 = vmul.f32 %v11703_v41, %v3409_v38  ;;  %v3509_v38 = vmul.f32 %v11706_v12, %v13534_v31  ;;  %v11709_v31 = vld [vmem:[%s12334_s17 + $0xb0] sm:$0xff] }
 0x85b   :  { %v10522_v57 = vpop.f32.mrf.mxu0 }
 0x85c   :  { %v3515_v5 = vmul.f32 %v11700_v8, %v10522_v57  ;;  %v3617_v8 = vld [vmem:[%s13591_s19 + $0x20] sm:$0xff] }
 0x85d   :  { %v3419_v15 = vpop.f32.mrf.mxu0 }
 0x85e   :  { %v3514_v1 = vmul.f32 %v11701_v50, %v3419_v15  ;;  %v3508_v15 = vmul.f32 %v11707_v34, %v13536_v44  ;;  %v3614_v50 = vld [vmem:[%s13591_s19 + $0x8] sm:$0xff] }
 0x863   :  { %v10525_v39 = vpop.f32.mrf.mxu0 }
 0x864   :  { %v3517_v62 = vmul.f32 %v11698_v10, %v10525_v39  ;;  %v3622_v10 = vld [vmem:[%s13591_s19 + $0x48] sm:$0xff] }
 0x865   :  { %v3429_v20 = vpop.f32.mrf.mxu0 }
 0x866   :  { %v3516_v2 = vmul.f32 %v11699_v16, %v3429_v20  ;;  %v3619_v16 = vld [vmem:[%s13591_s19 + $0x30] sm:$0xff] }
 0x86b   :  { %v10528_v42 = vpop.f32.mrf.mxu0 }
 0x86c   :  { %v3519_v24 = vmul.f32 %v11696_v23, %v10528_v42  ;;  %v3624_v23 = vld [vmem:[%s13591_s19 + $0x58] sm:$0xff] }
 0x86d   :  { %v3439_v30 = vpop.f32.mrf.mxu0 }
 0x86e   :  { %v3518_v6 = vmul.f32 %v11697_v32, %v3439_v30  ;;  %v3623_v32 = vld [vmem:[%s13591_s19 + $0x50] sm:$0xff] }
 0x873   :  { %v10531_v37 = vpop.f32.mrf.mxu0 }
 0x874   :  { %v3521_v14 = vmul.f32 %v11694_v7, %v10531_v37  ;;  %v11710_v37 = vld [vmem:[%s12334_s17 + $0xa8] sm:$0xff] }
 0x875   :  { %v3449_v48 = vpop.f32.mrf.mxu0 }
 0x876   :  { %v3520_v49 = vmul.f32 %v11695_v45, %v3449_v48  ;;  %v11711_v48 = vld [vmem:[%s12334_s17 + $0xa0] sm:$0xff] }
 0x87b   :  { %v10534_v28 = vpop.f32.mrf.mxu0 }
 0x87c   :  { %v3523_v36 = vmul.f32 %v11692_v29, %v10534_v28  ;;  %v11712_v29 = vld [vmem:[%s12334_s17 + $0x98] sm:$0xff] }
 0x87d   :  { %v3459_v46 = vpop.f32.mrf.mxu0 }
 0x87e   :  { %v3522_v47 = vmul.f32 %v11693_v0, %v3459_v46  ;;  %3539 = vmatpush1.msra.mxu1 %v3523_v36  ;;  %v11713_v46 = vld [vmem:[%s12334_s17 + $0x90] sm:$0xff] }
 0x87f   :  { %3540 = vmatprep.subr.mxu1 %v15766_v9 }
 0x880   :  { %3541 = vmatpush1.msra.mxu1 %v3522_v47  ;;  %v11714_v47 = vld [vmem:[%s12334_s17 + $0x88] sm:$0xff] }
 0x881   :  { %3542 = vmatprep.subr.mxu1 %v15766_v9 }
 0x882   :  { %3543 = vmatpush1.msra.mxu1 %v3521_v14  ;;  %v11715_v14 = vld [vmem:[%s12334_s17 + $0x80] sm:$0xff] }
 0x883   :  { %3544 = vmatprep.subr.mxu1 %v15766_v9  ;;  %v13554_v21 = vpop.f32.mrf.mxu0 }
 0x884   :  { %3545 = vmatpush1.msra.mxu1 %v3520_v49  ;;  %v3525_v7 = vmul.f32 %v11714_v47, %v13554_v21  ;;  %v166_v49 = vld [vmem:[%s13530_s14] sm:$0xff]  ;;  %v3620_v21 = vld [vmem:[%s13591_s19 + $0x38] sm:$0xff] }
 0x885   :  { %3546 = vmatprep.subr.mxu1 %v15766_v9  ;;  %v13560_v4 = vpop.f32.mrf.mxu0  ;;  %v3911_v47 = vld [vmem:[%s13671_s2 + $0x40] sm:$0xff] }
 0x886   :  { %3547 = vmatpush1.msra.mxu1 %v3519_v24  ;;  %v3524_v45 = vmul.f32 %v11715_v14, %v13560_v4  ;;  %v169_v24 = vld [vmem:[%s13530_s14 + $0x18] sm:$0xff]  ;;  %v3615_v4 = vld [vmem:[%s13591_s19 + $0x10] sm:$0xff] }
 0x887   :  { %3548 = vmatprep.subr.mxu1 %v15766_v9  ;;  %v3909_v14 = vld [vmem:[%s13671_s2 + $0x30] sm:$0xff] }
 0x888   :  { %3549 = vmatpush1.msra.mxu1 %v3518_v6  ;;  %v168_v6 = vld [vmem:[%s13530_s14 + $0x10] sm:$0xff] }
 0x889   :  { %3550 = vmatprep.subr.mxu1 %v15766_v9 }
 0x88a   :  { %3551 = vmatpush1.msra.mxu1 %v3517_v62  ;;  %v3621_v62 = vld [vmem:[%s13591_s19 + $0x40] sm:$0xff] }
 0x88b   :  { %3552 = vmatprep.subr.mxu1 %v15766_v9  ;;  %v10540_v63 = vpop.f32.mrf.mxu0 }
 0x88c   :  { %3553 = vmatpush1.msra.mxu1 %v3516_v2  ;;  %v3527_v36 = vmul.f32 %v11712_v29, %v10540_v63  ;;  %v3618_v2 = vld [vmem:[%s13591_s19 + $0x28] sm:$0xff]  ;;  %v3915_v29 = vld [vmem:[%s13671_s2 + $0x60] sm:$0xff] }
 0x88d   :  { %3554 = vmatprep.subr.mxu1 %v15766_v9  ;;  %v3479_v55 = vpop.f32.mrf.mxu0 }
 0x88e   :  { %3555 = vmatpush1.msra.mxu1 %v3515_v5  ;;  %v3526_v0 = vmul.f32 %v11713_v46, %v3479_v55  ;;  %v3616_v5 = vld [vmem:[%s13591_s19 + $0x18] sm:$0xff]  ;;  %v3913_v46 = vld [vmem:[%s13671_s2 + $0x50] sm:$0xff] }
 0x88f   :  { %3556 = vmatprep.subr.mxu1 %v15766_v9 }
 0x890   :  { %3557 = vmatpush1.msra.mxu1 %v3514_v1  ;;  %v3613_v1 = vld [vmem:[%s13591_s19] sm:$0xff] }
 0x891   :  { %3558 = vmatprep.subr.mxu1 %v15766_v9 }
 0x892   :  { %3559 = vmatpush1.msra.mxu1 %v3513_v11 }
 0x893   :  { %3560 = vmatprep.subr.mxu1 %v15766_v9  ;;  %v10543_v51 = vpop.f32.mrf.mxu0 }
 0x894   :  { %3561 = vmatpush1.msra.mxu1 %v3512_v56  ;;  %v3529_v44 = vmul.f32 %v11710_v37, %v10543_v51  ;;  %v8904_v56 = vld [vmem:[%s13650_s24] ss:$0 sm:$0xff] }
 0x895   :  { %3562 = vmatprep.subr.mxu1 %v15766_v9  ;;  %v3489_v57 = vpop.f32.mrf.mxu0  ;;  %v3919_v37 = vld [vmem:[%s13671_s2 + $0x80] sm:$0xff] }
 0x896   :  { %3563 = vmatpush1.msra.mxu1 %v3511_v26  ;;  %v3528_v28 = vmul.f32 %v11711_v48, %v3489_v57  ;;  %v3917_v48 = vld [vmem:[%s13671_s2 + $0x70] sm:$0xff] }
 0x897   :  { %3564 = vmatprep.subr.mxu1 %v15766_v9 }
 0x898   :  { %3565 = vmatpush1.msra.mxu1 %v3510_v61 }
 0x899   :  { %3566 = vmatprep.subr.mxu1 %v15766_v9 }
 0x89a   :  { %3567 = vmatpush1.msra.mxu1 %v3509_v38 }
 0x89b   :  { %v10546_v39 = vpop.f32.mrf.mxu0  ;;  %3568 = vmatprep.subr.mxu1 %v15766_v9 }
 0x89c   :  { %v3531_v20 = vmul.f32 %v11708_v43, %v10546_v39  ;;  %3569 = vmatpush1.msra.mxu1 %v3508_v15  ;;  %v3925_v39 = vld [vmem:[%s13671_s2 + $0xb0] sm:$0xff]  ;;  %v3924_v43 = vld [vmem:[%s13671_s2 + $0xa8] sm:$0xff] }
 0x89d   :  { %v3499_v42 = vpop.f32.mrf.mxu0  ;;  %3586 = vmatprep.subr.mxu1 %v15766_v9 }
 0x89e   :  { %v3530_v30 = vmul.f32 %v11709_v31, %v3499_v42  ;;  %3587 = vmatpush2.msra.mxu1 %v3531_v20  ;;  %v3923_v20 = vld [vmem:[%s13671_s2 + $0xa0] sm:$0xff]  ;;  %v3922_v42 = vld [vmem:[%s13671_s2 + $0x98] sm:$0xff]  ;;  %v3921_v31 = vld [vmem:[%s13671_s2 + $0x90] sm:$0xff] }
 0x89f   :  { %3588 = vmatprep.subr.mxu1 %v15766_v9 }
 0x8a0   :  { %3589 = vmatpush2.msra.mxu1 %v3530_v30  ;;  %v3920_v30 = vld [vmem:[%s13671_s2 + $0x88] sm:$0xff] }
 0x8a1   :  { %3590 = vmatprep.subr.mxu1 %v15766_v9 }
 0x8a2   :  { %3591 = vmatpush2.msra.mxu1 %v3529_v44  ;;  %v3918_v44 = vld [vmem:[%s13671_s2 + $0x78] sm:$0xff] }
 0x8a3   :  { %3592 = vmatprep.subr.mxu1 %v15766_v9 }
 0x8a4   :  { %3593 = vmatpush2.msra.mxu1 %v3528_v28  ;;  %v3916_v28 = vld [vmem:[%s13671_s2 + $0x68] sm:$0xff] }
 0x8a5   :  { %3594 = vmatprep.subr.mxu1 %v15766_v9 }
 0x8a6   :  { %3595 = vmatpush2.msra.mxu1 %v3527_v36  ;;  %v3914_v36 = vld [vmem:[%s13671_s2 + $0x58] sm:$0xff] }
 0x8a7   :  { %3596 = vmatprep.subr.mxu1 %v15766_v9 }
 0x8a8   :  { %3597 = vmatpush2.msra.mxu1 %v3526_v0  ;;  %v3912_v0 = vld [vmem:[%s13671_s2 + $0x48] sm:$0xff] }
 0x8a9   :  { %3598 = vmatprep.subr.mxu1 %v15766_v9 }
 0x8aa   :  { %3599 = vmatpush2.msra.mxu1 %v3525_v7  ;;  %v3910_v7 = vld [vmem:[%s13671_s2 + $0x38] sm:$0xff] }
 0x8ab   :  { %3600 = vmatprep.subr.mxu1 %v15766_v9 }
 0x8ac   :  { %3601 = vmatpush2.msra.mxu1 %v3524_v45  ;;  %v3908_v45 = vld [vmem:[%s13671_s2 + $0x28] sm:$0xff] }
 0x8ad   :  { %3603 = vmatmul.mubr.f32.vlgmr.msra.gmra.mxu1 %v166_v49  ;;  %10547 = vmatprep.subr.mxu1 %v3624_v23  ;;  %v3907_v49 = vld [vmem:[%s13671_s2 + $0x20] sm:$0xff] }
 0x8ae   :  { %8903 = vmatprep.mubr.msk.f32.mxu1 %vm2585_vm3, %v169_v24  ;;  %10548 = vmatpush3.msra.mxu1 %v3624_v23  ;;  %v3906_v23 = vld [vmem:[%s13671_s2 + $0x18] sm:$0xff]  ;;  %v3905_v24 = vld [vmem:[%s13671_s2 + $0x10] sm:$0xff] }
 0x8af   :  { %10549 = vmatprep.subr.mxu1 %v3623_v32 }
 0x8b0   :  { %10550 = vmatpush3.msra.mxu1 %v3623_v32  ;;  %v3904_v32 = vld [vmem:[%s13671_s2 + $0x8] sm:$0xff] }
 0x8b1   :  { %3608 = vmatmul.mubr.f32.gmra.mxu1 %v168_v6  ;;  %10551 = vmatprep.subr.mxu1 %v3622_v10  ;;  %v3903_v6 = vld [vmem:[%s13671_s2] sm:$0xff] }
 0x8b2   :  { %10552 = vmatpush3.msra.mxu1 %v3622_v10  ;;  %v4073_v10 = vld [vmem:[%s13701_s10 + $0x78] sm:$0xff] }
 0x8b3   :  { %10553 = vmatprep.subr.mxu1 %v3621_v62 }
 0x8b4   :  { %10554 = vmatpush3.msra.mxu1 %v3621_v62  ;;  %v4072_v62 = vld [vmem:[%s13701_s10 + $0x70] sm:$0xff] }
 0x8b5   :  { %10555 = vmatprep.subr.mxu1 %v3620_v21 }
 0x8b6   :  { %10556 = vmatpush3.msra.mxu1 %v3620_v21  ;;  %v4071_v21 = vld [vmem:[%s13701_s10 + $0x68] sm:$0xff] }
 0x8b7   :  { %10557 = vmatprep.subr.mxu1 %v3619_v16 }
 0x8b8   :  { %10558 = vmatpush3.msra.mxu1 %v3619_v16  ;;  %v4069_v16 = vld [vmem:[%s13701_s10 + $0x58] sm:$0xff] }
 0x8b9   :  { %10559 = vmatprep.subr.mxu1 %v3618_v2 }
 0x8ba   :  { %10560 = vmatpush3.msra.mxu1 %v3618_v2  ;;  %v4068_v2 = vld [vmem:[%s13701_s10 + $0x50] sm:$0xff] }
 0x8bb   :  { %10561 = vmatprep.subr.mxu1 %v3617_v8 }
 0x8bc   :  { %10562 = vmatpush3.msra.mxu1 %v3617_v8 }
 0x8bd   :  { %10563 = vmatprep.subr.mxu1 %v3616_v5 }
 0x8be   :  { %10564 = vmatpush3.msra.mxu1 %v3616_v5 }
 0x8bf   :  { %10565 = vmatprep.subr.mxu1 %v3615_v4 }
 0x8c0   :  { %10566 = vmatpush3.msra.mxu1 %v3615_v4 }
 0x8c1   :  { %10567 = vmatprep.subr.mxu1 %v3614_v50 }
 0x8c2   :  { %10568 = vmatpush3.msra.mxu1 %v3614_v50 }
 0x8c3   :  { %10569 = vmatprep.subr.mxu1 %v3613_v1 }
 0x8c4   :  { %10570 = vmatpush3.msra.mxu1 %v3613_v1 }
 0x8c5   :  { %10601 = vmatprep.subr.mxu1 %v13377_v40 }
 0x96d   :  { %v3604_v63 = vpop.f32.mrf.mxu1 }
 0x96e   :  { %10571 = vmatprep.mubr.msk.f32.mxu1 %vm259_vm0, %v3604_v63 }
 0x96f   :  { %v3606_v27 = vpop.f32.mrf.mxu1 }
 0x971   :  { %v3609_v11 = vpop.f32.mrf.mxu1 }
 0x972   :  { %10572 = vmatmul.mubr.msk.f32.vlgmr.msra.gmra.mxu1 %vm259_vm0, %v3609_v11 }
 0x973   :  { %v3611_v41 = vpop.f32.mrf.mxu1  ;;  %10602 = vmatpush3.msra.mxu1 %v13377_v40 }
 0x974   :  { %10603 = vmatprep.subr.mxu1 %v13451_v58  ;;  %v8911_v41 = vld [vmem:[%s13718_s18] ss:$0 sm:$0xff] }
 0x975   :  { %10604 = vmatpush3.msra.mxu1 %v13451_v58 }
 0x976   :  { %10605 = vmatprep.subr.mxu1 %v13457_v13 }
 0x977   :  { %10606 = vmatpush3.msra.mxu1 %v13457_v13 }
 0x978   :  { %10607 = vmatprep.subr.mxu1 %v13462_v53 }
 0x979   :  { %10608 = vmatpush3.msra.mxu1 %v13462_v53 }
 0x97a   :  { %10609 = vmatprep.subr.mxu1 %v13468_v60 }
 0x97b   :  { %10610 = vmatpush3.msra.mxu1 %v13468_v60 }
 0x97c   :  { %10611 = vmatprep.subr.mxu1 %v13473_v22 }
 0x97d   :  { %10612 = vmatpush3.msra.mxu1 %v13473_v22 }
 0x97e   :  { %10613 = vmatprep.subr.mxu1 %v13479_v52 }
 0x97f   :  { %10614 = vmatpush3.msra.mxu1 %v13479_v52 }
 0x980   :  { %10615 = vmatprep.subr.mxu1 %v13484_v54 }
 0x981   :  { %10616 = vmatpush3.msra.mxu1 %v13484_v54 }
 0x982   :  { %10617 = vmatprep.subr.mxu1 %v13490_v17 }
 0x983   :  { %10618 = vmatpush3.msra.mxu1 %v13490_v17 }
 0x984   :  { %10619 = vmatprep.subr.mxu1 %v13495_v25 }
 0x985   :  { %10620 = vmatpush3.msra.mxu1 %v13495_v25 }
 0x986   :  { %10621 = vmatprep.subr.mxu1 %v13501_v3 }
 0x987   :  { %10622 = vmatpush3.msra.mxu1 %v13501_v3 }
 0x988   :  { %10623 = vmatprep.subr.mxu1 %v13506_v59 }
 0x989   :  { %10624 = vmatpush3.msra.mxu1 %v13506_v59 }
 0x98a   :  { %4095 = vmatprep.subr.mxu1 %v15766_v9 }
 0xa32   :  { %v10573_v55 = vpop.f32.mrf.mxu1 }
 0xa33   :  { %v3710_v18 = vadd.f32 %v10573_v55, %v8904_v56  ;;  %v8912_v55 = vld [vmem:[%s13723_s27] ss:$0 sm:$0xff] }
 0xa34   :  { %v3704_v26 = vpop.f32.mrf.mxu1 }
 0xa35   :  { %v3705_v51 = vadd.f32 %v8904_v56, %v3704_v26  ;;  %v3714_v61 = vadd.f32 %v3710_v18, %v11966_v33  ;;  %v3926_v33 = vld [vmem:[%s13671_s2 + $0xb8] sm:$0xff] }
 0xa36   :  { %3953 = vmatprep.subr.mxu0 %v3926_v33  ;;  %v3929_v33 = vlaneseq }
 0xa37   :  { %v3713_v19 = vadd.f32 %v3705_v51, %v11970_v35  ;;  %v13735_v51 = vld [vmem:[%s11921_s6 + $0x58] sm:$0xff] }
 0xa39   :  { %10598 = vmatprep.mubr.msk.f32.mxu0 %vm259_vm0, %v3713_v19 }
 0xa3a   :  { %10599 = vmatmul.mubr.msk.f32.vlgmr.msra.gmra.mxu0 %vm259_vm0, %v3714_v61 }
 0xa3b   :  { %4009 = vmatprep.mubr.f32.mxu0 %v15766_v9  ;;  %3954 = vmatpush1.msra.mxu0 %v3925_v39  ;;  %v13805_v39 = vshrl.u32 %v3929_v33, 7  ;;  %v11717_v33 = vld [vmem:[%s11921_s6 + $0x50] sm:$0xff] }
 0xa3c   :  { %3955 = vmatprep.subr.mxu0 %v3924_v43 }
 0xa3d   :  { %3956 = vmatpush1.msra.mxu0 %v3923_v20  ;;  %15767 = vst [vmem:[#allocation2_spill] sm:$0xff] %v13805_v39  ;;  %v13808_v43 = vsub.s32 0, %v13805_v39  ;;  %v3927_v20 = vld [vmem:[%s13803_s5] sm:$0x3] }
 0xa3e   :  { %3957 = vmatprep.subr.mxu0 %v3922_v42  ;;  %v13812_v42 = vsub.s32 1, %v13805_v39  ;;  %v11837_v39 = vld [vmem:[%s12931_s1 + $0x170] sm:$0xff] }
 0xa3f   :  { %3958 = vmatpush1.msra.mxu0 %v3921_v31  ;;  %15768 = vst [vmem:[#allocation3_spill] sm:$0xff] %v13808_v43  ;;  %v3932_v31 = vrot.slane %v3927_v20, %v13808_v43 }
 0xa40   :  { %3959 = vmatprep.subr.mxu0 %v3920_v30  ;;  %15769 = vst [vmem:[#allocation4_spill] sm:$0xff] %v13812_v42  ;;  %v3936_v30 = vrot.slane %v3927_v20, %v13812_v42  ;;  %v11718_v20 = vld [vmem:[%s11921_s6 + $0x48] sm:$0xff] }
 0xa41   :  { %3960 = vmatpush1.msra.mxu0 %v3919_v37 }
 0xa42   :  { %3961 = vmatprep.subr.mxu0 %v3918_v44 }
 0xa43   :  { %3962 = vmatpush1.msra.mxu0 %v3917_v48 }
 0xa44   :  { %3963 = vmatprep.subr.mxu0 %v3916_v28 }
 0xa45   :  { %3964 = vmatpush1.msra.mxu0 %v3915_v29 }
 0xa46   :  { %3965 = vmatprep.subr.mxu0 %v3914_v36 }
 0xa47   :  { %3966 = vmatpush1.msra.mxu0 %v3913_v46 }
 0xa48   :  { %3967 = vmatprep.subr.mxu0 %v3912_v0 }
 0xa49   :  { %3968 = vmatpush1.msra.mxu0 %v3911_v47 }
 0xa4a   :  { %3969 = vmatprep.subr.mxu0 %v3910_v7 }
 0xa4b   :  { %3970 = vmatpush1.msra.mxu0 %v3909_v14 }
 0xa4c   :  { %3971 = vmatprep.subr.mxu0 %v3908_v45 }
 0xa4d   :  { %3972 = vmatpush1.msra.mxu0 %v3907_v49 }
 0xa4e   :  { %3973 = vmatprep.subr.mxu0 %v3906_v23 }
 0xa4f   :  { %3974 = vmatpush1.msra.mxu0 %v3905_v24 }
 0xa50   :  { %3975 = vmatprep.subr.mxu0 %v3904_v32 }
 0xa51   :  { %3976 = vmatpush1.msra.mxu0 %v3903_v6 }
 0xa52   :  { %10628 = vmatprep.subr.mxu0 %v13377_v40  ;;  %v4070_v40 = vld [vmem:[%s13701_s10 + $0x60] sm:$0xff] }
 0xafa   :  { %v10600_v12 = vpop.f32.mrf.mxu0 }
 0xafb   :  { %v13658_v38 = vsub.f32 %v3714_v61, %v10600_v12  ;;  %v4080_v61 = vld [vmem:[%s13701_s10 + $0xb0] sm:$0xff]  ;;  %v4079_v12 = vld [vmem:[%s13701_s10 + $0xa8] sm:$0xff] }
 0xafc   :  { %v3789_v57 = vpop.f32.mrf.mxu0 }
 0xafd   :  { %v13660_v34 = vsub.f32 %v3713_v19, %v3789_v57  ;;  %v3801_v35 = vmul.f32 %v13658_v38, %v13658_v38  ;;  %v4077_v57 = vld [vmem:[%s13701_s10 + $0x98] sm:$0xff] }
 0xaff   :  { %v3800_v15 = vmul.f32 %v13660_v34, %v13660_v34 }
 0xb01   :  { %10625 = vmatprep.mubr.msk.f32.mxu1 %vm259_vm0, %v3800_v15  ;;  %v4075_v15 = vld [vmem:[%s13701_s10 + $0x88] sm:$0xff] }
 0xb02   :  { %10626 = vmatmul.mubr.msk.f32.vlgmr.msra.gmra.mxu1 %vm259_vm0, %v3801_v35  ;;  %v4074_v35 = vld [vmem:[%s13701_s10 + $0x80] sm:$0xff] }
 0xb03   :  { %4096 = vmatpush1.msra.mxu1 %v4073_v10 }
 0xb04   :  { %4097 = vmatprep.subr.mxu1 %v15766_v9 }
 0xb05   :  { %4098 = vmatpush1.msra.mxu1 %v4072_v62 }
 0xb06   :  { %4099 = vmatprep.subr.mxu1 %v15766_v9 }
 0xb07   :  { %4100 = vmatpush1.msra.mxu1 %v4071_v21 }
 0xb08   :  { %4101 = vmatprep.subr.mxu1 %v15766_v9 }
 0xb09   :  { %4102 = vmatpush1.msra.mxu1 %v4070_v40 }
 0xb0a   :  { %4103 = vmatprep.subr.mxu1 %v15766_v9 }
 0xb0b   :  { %4104 = vmatpush1.msra.mxu1 %v4069_v16 }
 0xb0c   :  { %4105 = vmatprep.subr.mxu1 %v15766_v9 }
 0xb0d   :  { %4106 = vmatpush1.msra.mxu1 %v4068_v2 }
 0xb0e   :  { %4107 = vmatprep.subr.mxu1 %v15766_v9 }
 0xbc2   :  { %v10627_v8 = vpop.f32.mrf.mxu1 }
 0xbc3   :  { %v3880_v5 = vadd.f32 1e-12, %v10627_v8 }
 0xbc4   :  { %v3874_v4 = vpop.f32.mrf.mxu1 }
 0xbc5   :  { %11502 = vrsqrt.f32 %v3880_v5  ;;  %v3875_v50 = vadd.f32 1e-12, %v3874_v4 }
 0xbc7   :  { %11504 = vrsqrt.f32 %v3875_v50 }
 0xbd2   :  { %v11503_v1 = vpop.eup %11502 }
 0xbd3   :  { %v3886_v27 = vmul.f32 %v11503_v1, %v13658_v38  ;;  %v4078_v38 = vld [vmem:[%s13701_s10 + $0xa0] sm:$0xff] }
 0xbd4   :  { %v11505_v63 = vpop.eup %11504 }
 0xbd5   :  { %v3885_v11 = vmul.f32 %v11505_v63, %v13660_v34  ;;  %v3894_v26 = vmul.f32 %v8911_v41, %v3886_v27  ;;  %v4076_v34 = vld [vmem:[%s13701_s10 + $0x90] sm:$0xff] }
 0xbd7   :  { %v3893_v56 = vmul.f32 %v8911_v41, %v3885_v11  ;;  %v13738_v19 = vadd.f32 %v8912_v55, %v3894_v26 }
 0xbd9   :  { %v13729_v18 = vadd.f32 %v8912_v55, %v3893_v56 }
 0xbdb   :  { %8913 = vmatmul.mubr.msk.f32.vlgmr.msra.gmra.mxu0 %vm259_vm0, %v13729_v18 }
 0xbdc   :  { %4015 = vmatprep.mubr.f32.mxu0 %v15766_v9  ;;  %10629 = vmatpush3.msra.mxu0 %v13735_v51 }
 0xbdd   :  { %10630 = vmatprep.subr.mxu0 %v13451_v58 }
 0xbde   :  { %10631 = vmatpush3.msra.mxu0 %v13451_v58  ;;  %v4067_v58 = vld [vmem:[%s13701_s10 + $0x48] sm:$0xff] }
 0xbdf   :  { %8914 = vmatmul.mubr.msk.f32.gmra.mxu0 %vm259_vm0, %v13738_v19  ;;  %10632 = vmatprep.subr.mxu0 %v13457_v13 }
 0xbe0   :  { %10633 = vmatpush3.msra.mxu0 %v13457_v13  ;;  %4108 = vmatpush1.msra.mxu1 %v4067_v58  ;;  %v4066_v13 = vld [vmem:[%s13701_s10 + $0x40] sm:$0xff] }
 0xbe1   :  { %10634 = vmatprep.subr.mxu0 %v13462_v53  ;;  %4109 = vmatprep.subr.mxu1 %v15766_v9 }
 0xbe2   :  { %10635 = vmatpush3.msra.mxu0 %v13462_v53  ;;  %4110 = vmatpush1.msra.mxu1 %v4066_v13  ;;  %v4065_v53 = vld [vmem:[%s13701_s10 + $0x38] sm:$0xff] }
 0xbe3   :  { %10636 = vmatprep.subr.mxu0 %v13468_v60  ;;  %4111 = vmatprep.subr.mxu1 %v15766_v9 }
 0xbe4   :  { %10637 = vmatpush3.msra.mxu0 %v13468_v60  ;;  %4112 = vmatpush1.msra.mxu1 %v4065_v53  ;;  %v4064_v60 = vld [vmem:[%s13701_s10 + $0x30] sm:$0xff] }
 0xbe5   :  { %10638 = vmatprep.subr.mxu0 %v13473_v22  ;;  %4113 = vmatprep.subr.mxu1 %v15766_v9 }
 0xbe6   :  { %10639 = vmatpush3.msra.mxu0 %v13473_v22  ;;  %4114 = vmatpush1.msra.mxu1 %v4064_v60  ;;  %v4063_v22 = vld [vmem:[%s13701_s10 + $0x28] sm:$0xff] }
 0xbe7   :  { %10640 = vmatprep.subr.mxu0 %v13479_v52  ;;  %4115 = vmatprep.subr.mxu1 %v15766_v9 }
 0xbe8   :  { %10641 = vmatpush3.msra.mxu0 %v13479_v52  ;;  %4116 = vmatpush1.msra.mxu1 %v4063_v22  ;;  %v4062_v52 = vld [vmem:[%s13701_s10 + $0x20] sm:$0xff] }
 0xbe9   :  { %10642 = vmatprep.subr.mxu0 %v13484_v54  ;;  %4117 = vmatprep.subr.mxu1 %v15766_v9 }
 0xbea   :  { %10643 = vmatpush3.msra.mxu0 %v13484_v54  ;;  %4118 = vmatpush1.msra.mxu1 %v4062_v52  ;;  %v4061_v54 = vld [vmem:[%s13701_s10 + $0x18] sm:$0xff] }
 0xbeb   :  { %10644 = vmatprep.subr.mxu0 %v13490_v17  ;;  %4119 = vmatprep.subr.mxu1 %v15766_v9 }
 0xbec   :  { %10645 = vmatpush3.msra.mxu0 %v13490_v17  ;;  %4120 = vmatpush1.msra.mxu1 %v4061_v54  ;;  %v4060_v17 = vld [vmem:[%s13701_s10 + $0x10] sm:$0xff] }
 0xbed   :  { %10646 = vmatprep.subr.mxu0 %v13495_v25  ;;  %4121 = vmatprep.subr.mxu1 %v15766_v9 }
 0xbee   :  { %10647 = vmatpush3.msra.mxu0 %v13495_v25  ;;  %4122 = vmatpush1.msra.mxu1 %v4060_v17  ;;  %v4059_v25 = vld [vmem:[%s13701_s10 + $0x8] sm:$0xff] }
 0xbef   :  { %10648 = vmatprep.subr.mxu0 %v13501_v3  ;;  %4123 = vmatprep.subr.mxu1 %v15766_v9 }
 0xbf0   :  { %10649 = vmatpush3.msra.mxu0 %v13501_v3  ;;  %4124 = vmatpush1.msra.mxu1 %v4059_v25  ;;  %v4058_v3 = vld [vmem:[%s13701_s10] sm:$0xff] }
 0xbf1   :  { %10650 = vmatprep.subr.mxu0 %v13506_v59  ;;  %4125 = vmatprep.subr.mxu1 %v15766_v9 }
 0xbf2   :  { %10651 = vmatpush3.msra.mxu0 %v13506_v59  ;;  %4126 = vmatpush1.msra.mxu1 %v4058_v3  ;;  %v4081_v59 = vld [vmem:[%s13701_s10 + $0xb8] sm:$0xff]  ;;  %v8915_v3 = vld [vmem:[%s13821_s16] ss:$0 sm:$0xff] }
 0xbf3   :  { %10655 = vmatprep.subr.mxu0 %v13735_v51  ;;  %4143 = vmatprep.subr.mxu1 %v15766_v9 }
 0xbf4   :  { %4144 = vmatpush2.msra.mxu1 %v4081_v59 }
 0xbf5   :  { %4145 = vmatprep.subr.mxu1 %v15766_v9 }
 0xbf6   :  { %4146 = vmatpush2.msra.mxu1 %v4080_v61 }
 0xbf7   :  { %4147 = vmatprep.subr.mxu1 %v15766_v9 }
 0xbf8   :  { %4148 = vmatpush2.msra.mxu1 %v4079_v12 }
 0xbf9   :  { %4149 = vmatprep.subr.mxu1 %v15766_v9 }
 0xbfa   :  { %4150 = vmatpush2.msra.mxu1 %v4078_v38 }
 0xbfb   :  { %4151 = vmatprep.subr.mxu1 %v15766_v9 }
 0xbfc   :  { %4152 = vmatpush2.msra.mxu1 %v4077_v57 }
 0xbfd   :  { %4153 = vmatprep.subr.mxu1 %v15766_v9 }
 0xbfe   :  { %4154 = vmatpush2.msra.mxu1 %v4076_v34 }
 0xbff   :  { %4155 = vmatprep.subr.mxu1 %v15766_v9 }
 0xc00   :  { %4156 = vmatpush2.msra.mxu1 %v4075_v15 }
 0xc01   :  { %4157 = vmatprep.subr.mxu1 %v15766_v9 }
 0xc02   :  { %4158 = vmatpush2.msra.mxu1 %v4074_v35 }
 0xc9b   :  { %v4011_v37 = vpop.f32.mrf.mxu0 }
 0xc9c   :  { %v4012_v44 = vadd.f32 %v4011_v37, %v3932_v31  ;;  %v11724_v37 = vld [vmem:[%s11921_s6 + $0x18] sm:$0xff] }
 0xc9d   :  { %v4013_v48 = vpop.f32.mrf.mxu0 }
 0xc9e   :  { %v4022_v28 = vmul.f32 %v4012_v44, %v4012_v44  ;;  %v4014_v29 = vadd.f32 %v4013_v48, %v3936_v30  ;;  %v11726_v48 = vld [vmem:[%s11921_s6 + $0x8] sm:$0xff] }
 0xc9f   :  { %v4017_v36 = vpop.f32.mrf.mxu0 }
 0xca0   :  { %v4026_v46 = vmul.f32 %v4022_v28, %v4012_v44  ;;  %v4023_v0 = vmul.f32 %v4014_v29, %v4014_v29  ;;  %v4018_v47 = vadd.f32 %v4017_v36, %v3932_v31  ;;  %v11720_v31 = vld [vmem:[%s11921_s6 + $0x38] sm:$0xff]  ;;  %v11727_v28 = vld [vmem:[%s11921_s6] sm:$0xff] }
 0xca1   :  { %v4019_v7 = vpop.f32.mrf.mxu0 }
 0xca2   :  { %v4030_v14 = vmul.f32 0.044715, %v4026_v46  ;;  %v4027_v45 = vmul.f32 %v4023_v0, %v4014_v29  ;;  %v4024_v49 = vmul.f32 %v4018_v47, %v4018_v47  ;;  %v4020_v23 = vadd.f32 %v4019_v7, %v3936_v30  ;;  %v11723_v30 = vld [vmem:[%s11921_s6 + $0x20] sm:$0xff] }
 0xca4   :  { %v4034_v24 = vadd.f32 %v4030_v14, %v4012_v44  ;;  %v4031_v32 = vmul.f32 0.044715, %v4027_v45  ;;  %v4028_v6 = vmul.f32 %v4024_v49, %v4018_v47  ;;  %v4025_v10 = vmul.f32 %v4020_v23, %v4020_v23  ;;  %v11728_v14 = vld [vmem:[%s11949_s13] sm:$0xff]  ;;  %v8959_v45 = vld [vmem:[%s11964_s25 + $0xb8] sm:$0xff]  ;;  %v8958_v49 = vld [vmem:[%s11964_s25 + $0xb0] sm:$0xff] }
 0xca5   :  { %10722 = vmatprep.subr.mxu1 %v8959_v45 }
 0xca6   :  { %v4038_v62 = vmul.f32 0.7978846, %v4034_v24  ;;  %v4035_v21 = vadd.f32 %v4031_v32, %v4014_v29  ;;  %v4032_v40 = vmul.f32 0.044715, %v4028_v6  ;;  %v4029_v16 = vmul.f32 %v4025_v10, %v4020_v23  ;;  %v8956_v24 = vld [vmem:[%s11964_s25 + $0xa0] sm:$0xff]  ;;  %v8955_v32 = vld [vmem:[%s11964_s25 + $0x98] sm:$0xff] }
 0xca7   :  { %v8954_v6 = vld [vmem:[%s11964_s25 + $0x90] sm:$0xff]  ;;  %v8953_v10 = vld [vmem:[%s11964_s25 + $0x88] sm:$0xff] }
 0xca8   :  { %11506 = vtanh.f32 %v4038_v62  ;;  %v4039_v2 = vmul.f32 0.7978846, %v4035_v21  ;;  %v4036_v8 = vadd.f32 %v4032_v40, %v4018_v47  ;;  %v4033_v5 = vmul.f32 0.044715, %v4029_v16  ;;  %v8952_v62 = vld [vmem:[%s11964_s25 + $0x80] sm:$0xff]  ;;  %v8951_v21 = vld [vmem:[%s11964_s25 + $0x78] sm:$0xff] }
 0xca9   :  { %v8950_v40 = vld [vmem:[%s11964_s25 + $0x70] sm:$0xff] }
 0xcaa   :  { %11508 = vtanh.f32 %v4039_v2  ;;  %v4040_v4 = vmul.f32 0.7978846, %v4036_v8  ;;  %v4037_v50 = vadd.f32 %v4033_v5, %v4020_v23 }
 0xcac   :  { %11510 = vtanh.f32 %v4040_v4  ;;  %v4041_v1 = vmul.f32 0.7978846, %v4037_v50  ;;  %v8922_v50 = vld [vmem:[%s13857_s28] ss:$0 sm:$0xff] }
 0xcae   :  { %11512 = vtanh.f32 %v4041_v1 }
 0xcb5   :  { %v11507_v63 = vpop.eup %11506 }
 0xcb6   :  { %v4046_v27 = vadd.f32 1.0, %v11507_v63 }
 0xcb7   :  { %v11509_v11 = vpop.eup %11508 }
 0xcb8   :  { %v4047_v41 = vadd.f32 1.0, %v11509_v11  ;;  %v4050_v55 = vmul.f32 0.5, %v4046_v27  ;;  %v8923_v27 = vld [vmem:[%s13862_s11] ss:$0 sm:$0xff] }
 0xcb9   :  { %v11511_v56 = vpop.eup %11510 }
 0xcba   :  { %v4051_v26 = vmul.f32 0.5, %v4047_v41  ;;  %v4048_v58 = vadd.f32 1.0, %v11511_v56  ;;  %v4054_v22 = vmul.f32 %v4050_v55, %v4012_v44  ;;  %v11725_v44 = vld [vmem:[%s11921_s6 + $0x10] sm:$0xff] }
 0xcbb   :  { %v11513_v13 = vpop.eup %11512 }
 0xcbc   :  { %v4055_v53 = vmul.f32 %v4051_v26, %v4014_v29  ;;  %v4049_v60 = vadd.f32 1.0, %v11513_v13  ;;  %v4052_v52 = vmul.f32 0.5, %v4048_v58  ;;  %v11729_v58 = vld [vmem:[%s11949_s13 + $0x8] sm:$0xff]  ;;  %v13877_v13 = vld [vmem:[%s12100_s8 + $0x58] sm:$0xff] }
 0xcbe   :  { %8916 = vmatprep.mubr.msk.f32.mxu1 %vm2585_vm3, %v4055_v53  ;;  %v4053_v54 = vmul.f32 0.5, %v4049_v60  ;;  %v4056_v25 = vmul.f32 %v4052_v52, %v4018_v47  ;;  %v11731_v53 = vld [vmem:[%s11949_s13 + $0x10] sm:$0xff]  ;;  %v13891_v52 = vld [vmem:[%s12100_s8 + $0x48] sm:$0xff] }
 0xcbf   :  { %4160 = vmatmul.mubr.f32.vlgmr.msra.gmra.mxu1 %v4054_v22  ;;  %v13884_v60 = vld [vmem:[%s12100_s8 + $0x50] sm:$0xff]  ;;  %v11733_v22 = vld [vmem:[%s11949_s13 + $0x18] sm:$0xff] }
 0xcc0   :  { %v4057_v17 = vmul.f32 %v4053_v54, %v4020_v23  ;;  %10723 = vmatpush3.msra.mxu1 %v8959_v45  ;;  %v8957_v23 = vld [vmem:[%s11964_s25 + $0xa8] sm:$0xff]  ;;  %v11735_v54 = vld [vmem:[%s11949_s13 + $0x20] sm:$0xff] }
 0xcc1   :  { %10724 = vmatprep.subr.mxu1 %v8958_v49  ;;  %v8948_v45 = vld [vmem:[%s11964_s25 + $0x60] sm:$0xff] }
 0xcc2   :  { %8917 = vmatprep.mubr.msk.f32.mxu1 %vm2585_vm3, %v4057_v17  ;;  %10725 = vmatpush3.msra.mxu1 %v8958_v49  ;;  %v13898_v17 = vld [vmem:[%s12100_s8 + $0x40] sm:$0xff]  ;;  %v9021_v49 = vld [vmem:[%s12037_s29 + $0xb8] sm:$0xff] }
 0xcc3   :  { %4165 = vmatmul.mubr.f32.gmra.mxu1 %v4056_v25  ;;  %10726 = vmatprep.subr.mxu1 %v8957_v23  ;;  %v11737_v25 = vld [vmem:[%s11949_s13 + $0x28] sm:$0xff] }
 0xcc4   :  { %10727 = vmatpush3.msra.mxu1 %v8957_v23 }
 0xcc5   :  { %10728 = vmatprep.subr.mxu1 %v8956_v24 }
 0xcc6   :  { %10729 = vmatpush3.msra.mxu1 %v8956_v24 }
 0xcc7   :  { %10730 = vmatprep.subr.mxu1 %v8955_v32 }
 0xcc8   :  { %10731 = vmatpush3.msra.mxu1 %v8955_v32  ;;  %v9020_v32 = vld [vmem:[%s12037_s29 + $0xb0] sm:$0xff] }
 0xcc9   :  { %10732 = vmatprep.subr.mxu1 %v8954_v6 }
 0xcca   :  { %10733 = vmatpush3.msra.mxu1 %v8954_v6 }
 0xccb   :  { %10734 = vmatprep.subr.mxu1 %v8953_v10 }
 0xccc   :  { %10735 = vmatpush3.msra.mxu1 %v8953_v10  ;;  %v9019_v10 = vld [vmem:[%s12037_s29 + $0xa8] sm:$0xff] }
 0xccd   :  { %10736 = vmatprep.subr.mxu1 %v8952_v62 }
 0xcce   :  { %10737 = vmatpush3.msra.mxu1 %v8952_v62 }
 0xccf   :  { %10738 = vmatprep.subr.mxu1 %v8951_v21 }
 0xcd0   :  { %10739 = vmatpush3.msra.mxu1 %v8951_v21  ;;  %v9018_v21 = vld [vmem:[%s12037_s29 + $0xa0] sm:$0xff] }
 0xcd1   :  { %10740 = vmatprep.subr.mxu1 %v8950_v40 }
 0xcd2   :  { %10741 = vmatpush3.msra.mxu1 %v8950_v40 }
 0xd7f   :  { %v4161_v59 = vpop.f32.mrf.mxu1 }
 0xd80   :  { %v4162_v61 = vadd.f32 %v8915_v3, %v4161_v59  ;;  %v11739_v59 = vld [vmem:[%s11949_s13 + $0x30] sm:$0xff] }
 0xd81   :  { %v4163_v12 = vpop.f32.mrf.mxu1 }
 0xd82   :  { %v4170_v38 = vadd.f32 %v4162_v61, %v13729_v18  ;;  %v11719_v18 = vld [vmem:[%s11921_s6 + $0x40] sm:$0xff]  ;;  %v13912_v61 = vld [vmem:[%s12100_s8 + $0x30] sm:$0xff]  ;;  %v11741_v12 = vld [vmem:[%s11949_s13 + $0x38] sm:$0xff] }
 0xd83   :  { %v4166_v57 = vpop.f32.mrf.mxu1 }
 0xd84   :  { %v4167_v34 = vadd.f32 %v8915_v3, %v4166_v57  ;;  %10652 = vmatprep.mubr.msk.f32.mxu0 %vm259_vm0, %v4170_v38  ;;  %v13905_v3 = vld [vmem:[%s12100_s8 + $0x38] sm:$0xff]  ;;  %v11743_v57 = vld [vmem:[%s11949_s13 + $0x40] sm:$0xff] }
 0xd85   :  { %v4168_v15 = vpop.f32.mrf.mxu1 }
 0xd86   :  { %v4171_v35 = vadd.f32 %v4167_v34, %v13738_v19  ;;  %v11721_v19 = vld [vmem:[%s11921_s6 + $0x30] sm:$0xff]  ;;  %v13926_v34 = vld [vmem:[%s12100_s8 + $0x20] sm:$0xff]  ;;  %v11745_v15 = vld [vmem:[%s11949_s13 + $0x48] sm:$0xff] }
 0xd88   :  { %10653 = vmatmul.mubr.msk.f32.vlgmr.msra.gmra.mxu0 %vm259_vm0, %v4171_v35 }
 0xd89   :  { %10656 = vmatpush3.msra.mxu0 %v13735_v51  ;;  %v11722_v51 = vld [vmem:[%s11921_s6 + $0x28] sm:$0xff] }
 0xd8a   :  { %10657 = vmatprep.subr.mxu0 %v11717_v33 }
 0xd8b   :  { %10658 = vmatpush3.msra.mxu0 %v11717_v33  ;;  %v11747_v33 = vld [vmem:[%s11949_s13 + $0x50] sm:$0xff] }
 0xd8c   :  { %10659 = vmatprep.subr.mxu0 %v11718_v20 }
 0xd8d   :  { %10660 = vmatpush3.msra.mxu0 %v11718_v20  ;;  %v13940_v20 = vld [vmem:[%s12100_s8 + $0x10] sm:$0xff] }
 0xd8e   :  { %10661 = vmatprep.subr.mxu0 %v11719_v18 }
 0xd8f   :  { %10662 = vmatpush3.msra.mxu0 %v11719_v18  ;;  %v11749_v18 = vld [vmem:[%s11949_s13 + $0x58] sm:$0xff] }
 0xd90   :  { %10663 = vmatprep.subr.mxu0 %v11720_v31 }
 0xd91   :  { %10664 = vmatpush3.msra.mxu0 %v11720_v31  ;;  %v13947_v31 = vld [vmem:[%s12100_s8 + $0x8] sm:$0xff] }
 0xd92   :  { %10665 = vmatprep.subr.mxu0 %v11721_v19 }
 0xd93   :  { %10666 = vmatpush3.msra.mxu0 %v11721_v19  ;;  %v11751_v19 = vld [vmem:[%s11949_s13 + $0x60] sm:$0xff] }
 0xd94   :  { %10667 = vmatprep.subr.mxu0 %v11722_v51 }
 0xd95   :  { %10668 = vmatpush3.msra.mxu0 %v11722_v51  ;;  %v13954_v51 = vld [vmem:[%s12100_s8] sm:$0xff] }
 0xd96   :  { %10669 = vmatprep.subr.mxu0 %v11723_v30 }
 0xd97   :  { %10670 = vmatpush3.msra.mxu0 %v11723_v30  ;;  %v11753_v30 = vld [vmem:[%s11949_s13 + $0x68] sm:$0xff] }
 0xd98   :  { %10671 = vmatprep.subr.mxu0 %v11724_v37 }
 0xd99   :  { %10672 = vmatpush3.msra.mxu0 %v11724_v37  ;;  %v11754_v37 = vld [vmem:[%s11949_s13 + $0x70] sm:$0xff] }
 0xd9a   :  { %10673 = vmatprep.subr.mxu0 %v11725_v44 }
 0xd9b   :  { %10674 = vmatpush3.msra.mxu0 %v11725_v44  ;;  %v11755_v44 = vld [vmem:[%s11949_s13 + $0x78] sm:$0xff] }
 0xd9c   :  { %10675 = vmatprep.subr.mxu0 %v11726_v48 }
 0xd9d   :  { %10676 = vmatpush3.msra.mxu0 %v11726_v48  ;;  %v11756_v48 = vld [vmem:[%s11949_s13 + $0x80] sm:$0xff] }
 0xd9e   :  { %10677 = vmatprep.subr.mxu0 %v11727_v28 }
 0xd9f   :  { %10678 = vmatpush3.msra.mxu0 %v11727_v28  ;;  %v11757_v28 = vld [vmem:[%s11949_s13 + $0x88] sm:$0xff] }
 0xe48   :  { %v10654_v29 = vpop.f32.mrf.mxu0 }
 0xe49   :  { %v4256_v36 = vsub.f32 %v4171_v35, %v10654_v29  ;;  %v13933_v35 = vld [vmem:[%s12100_s8 + $0x18] sm:$0xff]  ;;  %v11758_v29 = vld [vmem:[%s11949_s13 + $0x90] sm:$0xff] }
 0xe4a   :  { %v4246_v46 = vpop.f32.mrf.mxu0 }
 0xe4b   :  { %v4255_v0 = vsub.f32 %v4170_v38, %v4246_v46  ;;  %v4258_v7 = vmul.f32 %v4256_v36, %v4256_v36  ;;  %v13919_v38 = vld [vmem:[%s12100_s8 + $0x28] sm:$0xff]  ;;  %v11760_v46 = vld [vmem:[%s11949_s13 + $0xa0] sm:$0xff] }
 0xe4d   :  { %v4257_v47 = vmul.f32 %v4255_v0, %v4255_v0 }
 0xe4f   :  { %10679 = vmatprep.mubr.msk.f32.mxu0 %vm259_vm0, %v4257_v47  ;;  %v11762_v47 = vld [vmem:[%s11949_s13 + $0xb0] sm:$0xff] }
 0xe50   :  { %10680 = vmatmul.mubr.msk.f32.vlgmr.msra.gmra.mxu0 %vm259_vm0, %v4258_v7  ;;  %v11763_v7 = vld [vmem:[%s11949_s13 + $0xb8] sm:$0xff] }
 0xe51   :  { %10686 = vmatprep.mubr.msk.f32.mxu0 %vm446_vm1, %v11728_v14  ;;  %v8949_v14 = vld [vmem:[%s11964_s25 + $0x68] sm:$0xff] }
 0xe52   :  { %10742 = vmatprep.subr.mxu1 %v8949_v14 }
 0xe53   :  { %10743 = vmatpush3.msra.mxu1 %v8949_v14  ;;  %v9075_v14 = vld [vmem:[%s12094_s3 + $0x78] sm:$0xff] }
 0xe54   :  { %10744 = vmatprep.subr.mxu1 %v8948_v45 }
 0xe55   :  { %10745 = vmatpush3.msra.mxu1 %v8948_v45  ;;  %v9074_v45 = vld [vmem:[%s12094_s3 + $0x70] sm:$0xff] }
 0xe56   :  { %10842 = vmatprep.subr.mxu1 %v9021_v49 }
 0xf10   :  { %v10681_v16 = vpop.f32.mrf.mxu0 }
 0xf11   :  { %v4337_v2 = vadd.f32 1e-12, %v10681_v16  ;;  %v9017_v16 = vld [vmem:[%s12037_s29 + $0x98] sm:$0xff] }
 0xf12   :  { %v4331_v8 = vpop.f32.mrf.mxu0 }
 0xf13   :  { %11514 = vrsqrt.f32 %v4337_v2  ;;  %v4332_v5 = vadd.f32 1e-12, %v4331_v8  ;;  %v9016_v8 = vld [vmem:[%s12037_s29 + $0x90] sm:$0xff] }
 0xf15   :  { %11516 = vrsqrt.f32 %v4332_v5 }
 0xf20   :  { %v11515_v4 = vpop.eup %11514 }
 0xf21   :  { %v4343_v1 = vmul.f32 %v11515_v4, %v4256_v36  ;;  %v11759_v36 = vld [vmem:[%s11949_s13 + $0x98] sm:$0xff]  ;;  %v9015_v4 = vld [vmem:[%s12037_s29 + $0x88] sm:$0xff] }
 0xf22   :  { %v11517_v63 = vpop.eup %11516 }
 0xf23   :  { %v4351_v11 = vmul.f32 %v8922_v50, %v4343_v1  ;;  %v4342_v41 = vmul.f32 %v11517_v63, %v4255_v0  ;;  %v11761_v0 = vld [vmem:[%s11949_s13 + $0xa8] sm:$0xff]  ;;  %v9014_v1 = vld [vmem:[%s12037_s29 + $0x80] sm:$0xff] }
 0xf25   :  { %v13866_v56 = vadd.f32 %v8923_v27, %v4351_v11  ;;  %v4350_v55 = vmul.f32 %v8922_v50, %v4342_v41  ;;  %v9012_v41 = vld [vmem:[%s12037_s29 + $0x70] sm:$0xff] }
 0xf27   :  { %10682 = vmatprep.subr.mxu0 %v13866_v56  ;;  %v13869_v26 = vadd.f32 %v8923_v27, %v4350_v55  ;;  %v9013_v27 = vld [vmem:[%s12037_s29 + $0x78] sm:$0xff] }
 0xf28   :  { %10683 = vmatpush3.msra.mxu0 %v13866_v56 }
 0xf29   :  { %10684 = vmatprep.subr.mxu0 %v13869_v26 }
 0xf2a   :  { %10685 = vmatpush3.msra.mxu0 %v13869_v26 }
 0xf2b   :  { %10687 = vmatmul.mubr.msk.f32.vlgmr.msra.gmra.mxu0 %vm446_vm1, %v11729_v58  ;;  %10782 = vmatprep.subr.mxu0 %v13877_v13  ;;  %v9011_v58 = vld [vmem:[%s12037_s29 + $0x68] sm:$0xff] }
 0xf2c   :  { %10689 = vmatprep.mubr.msk.f32.mxu0 %vm446_vm1, %v11731_v53  ;;  %10783 = vmatpush3.msra.mxu0 %v13877_v13 }
 0xf2d   :  { %10784 = vmatprep.subr.mxu0 %v13884_v60 }
 0xf2e   :  { %10785 = vmatpush3.msra.mxu0 %v13884_v60 }
 0xf2f   :  { %10690 = vmatmul.mubr.msk.f32.gmra.mxu0 %vm446_vm1, %v11733_v22  ;;  %10786 = vmatprep.subr.mxu0 %v13891_v52  ;;  %v9010_v22 = vld [vmem:[%s12037_s29 + $0x60] sm:$0xff] }
 0xf30   :  { %10692 = vmatprep.mubr.msk.f32.mxu0 %vm446_vm1, %v11735_v54  ;;  %10787 = vmatpush3.msra.mxu0 %v13891_v52 }
 0xf31   :  { %10788 = vmatprep.subr.mxu0 %v13898_v17 }
 0xf32   :  { %10789 = vmatpush3.msra.mxu0 %v13898_v17 }
 0xf33   :  { %10693 = vmatmul.mubr.msk.f32.gmra.mxu0 %vm446_vm1, %v11737_v25  ;;  %10790 = vmatprep.subr.mxu0 %v13905_v3  ;;  %v9083_v25 = vld [vmem:[%s12094_s3 + $0xb8] sm:$0xff] }
 0xf34   :  { %10695 = vmatprep.mubr.msk.f32.mxu0 %vm446_vm1, %v11739_v59  ;;  %10791 = vmatpush3.msra.mxu0 %v13905_v3 }
 0xf35   :  { %10792 = vmatprep.subr.mxu0 %v13912_v61 }
 0xf36   :  { %10793 = vmatpush3.msra.mxu0 %v13912_v61 }
 0xf37   :  { %10696 = vmatmul.mubr.msk.f32.gmra.mxu0 %vm446_vm1, %v11741_v12  ;;  %10794 = vmatprep.subr.mxu0 %v13919_v38 }
 0xf38   :  { %10698 = vmatprep.mubr.msk.f32.mxu0 %vm446_vm1, %v11743_v57  ;;  %10795 = vmatpush3.msra.mxu0 %v13919_v38 }
 0xf39   :  { %10796 = vmatprep.subr.mxu0 %v13926_v34 }
 0xf3a   :  { %10797 = vmatpush3.msra.mxu0 %v13926_v34 }
 0xf3b   :  { %10699 = vmatmul.mubr.msk.f32.gmra.mxu0 %vm446_vm1, %v11745_v15  ;;  %10798 = vmatprep.subr.mxu0 %v13933_v35 }
 0xf3c   :  { %10701 = vmatprep.mubr.msk.f32.mxu0 %vm446_vm1, %v11747_v33  ;;  %10799 = vmatpush3.msra.mxu0 %v13933_v35 }
 0xf3d   :  { %10800 = vmatprep.subr.mxu0 %v13940_v20 }
 0xf3e   :  { %10801 = vmatpush3.msra.mxu0 %v13940_v20 }
 0xf3f   :  { %10702 = vmatmul.mubr.msk.f32.gmra.mxu0 %vm446_vm1, %v11749_v18  ;;  %10802 = vmatprep.subr.mxu0 %v13947_v31 }
 0xf40   :  { %10704 = vmatprep.mubr.msk.f32.mxu0 %vm446_vm1, %v11751_v19  ;;  %10803 = vmatpush3.msra.mxu0 %v13947_v31 }
 0xf41   :  { %10804 = vmatprep.subr.mxu0 %v13954_v51 }
 0xf42   :  { %10805 = vmatpush3.msra.mxu0 %v13954_v51 }
 0xf43   :  { %10705 = vmatmul.mubr.msk.f32.gmra.mxu0 %vm446_vm1, %v11753_v30  ;;  %10902 = vmatprep.subr.mxu0 %v13877_v13 }
 0xf44   :  { %10707 = vmatprep.mubr.msk.f32.mxu0 %vm446_vm1, %v11754_v37 }
 0xf47   :  { %10708 = vmatmul.mubr.msk.f32.gmra.mxu0 %vm446_vm1, %v11755_v44 }
 0xf48   :  { %10710 = vmatprep.mubr.msk.f32.mxu0 %vm446_vm1, %v11756_v48 }
 0xf4b   :  { %10711 = vmatmul.mubr.msk.f32.gmra.mxu0 %vm446_vm1, %v11757_v28  ;;  %v9082_v28 = vld [vmem:[%s12094_s3 + $0xb0] sm:$0xff] }
 0xf4c   :  { %10713 = vmatprep.mubr.msk.f32.mxu0 %vm446_vm1, %v11758_v29  ;;  %v9081_v29 = vld [vmem:[%s12094_s3 + $0xa8] sm:$0xff] }
 0xf4f   :  { %10714 = vmatmul.mubr.msk.f32.gmra.mxu0 %vm446_vm1, %v11759_v36  ;;  %v9080_v36 = vld [vmem:[%s12094_s3 + $0xa0] sm:$0xff] }
 0xf50   :  { %10716 = vmatprep.mubr.msk.f32.mxu0 %vm446_vm1, %v11760_v46  ;;  %v9079_v46 = vld [vmem:[%s12094_s3 + $0x98] sm:$0xff] }
 0xf53   :  { %10717 = vmatmul.mubr.msk.f32.gmra.mxu0 %vm446_vm1, %v11761_v0  ;;  %v9078_v0 = vld [vmem:[%s12094_s3 + $0x90] sm:$0xff] }
 0xf54   :  { %10719 = vmatprep.mubr.msk.f32.mxu0 %vm446_vm1, %v11762_v47  ;;  %v9077_v47 = vld [vmem:[%s12094_s3 + $0x88] sm:$0xff] }
 0xf57   :  { %10720 = vmatmul.mubr.msk.f32.gmra.mxu0 %vm446_vm1, %v11763_v7  ;;  %v9076_v7 = vld [vmem:[%s12094_s3 + $0x80] sm:$0xff] }
 0xfeb   :  { %v13984_v23 = vpop.f32.mrf.mxu0 }
 0xfed   :  { %v13986_v24 = vpop.f32.mrf.mxu0 }
 0xfee   :  { %10746 = vmatprep.mubr.msk.f32.mxu1 %vm259_vm0, %v13986_v24 }
 0xfef   :  { %v13991_v6 = vpop.f32.mrf.mxu0  ;;  %10747 = vmatmul.mubr.msk.f32.vlgmr.msra.gmra.mxu1 %vm259_vm0, %v13984_v23 }
 0xff0   :  { %10843 = vmatpush3.msra.mxu1 %v9021_v49  ;;  %v9073_v49 = vld [vmem:[%s12094_s3 + $0x68] sm:$0xff] }
 0xff1   :  { %v13996_v62 = vpop.f32.mrf.mxu0  ;;  %10844 = vmatprep.subr.mxu1 %v9020_v32 }
 0xff2   :  { %10749 = vmatprep.mubr.msk.f32.mxu1 %vm259_vm0, %v13996_v62  ;;  %10845 = vmatpush3.msra.mxu1 %v9020_v32  ;;  %v9072_v32 = vld [vmem:[%s12094_s3 + $0x60] sm:$0xff]  ;;  %s11907_s3 = smov 8  }
 0xff3   :  { %v14001_v40 = vpop.f32.mrf.mxu0  ;;  %10750 = vmatmul.mubr.msk.f32.gmra.mxu1 %vm259_vm0, %v13991_v6  ;;  %10846 = vmatprep.subr.mxu1 %v9019_v10 }
 0xff4   :  { %10847 = vmatpush3.msra.mxu1 %v9019_v10 }
 0xff5   :  { %v14006_v2 = vpop.f32.mrf.mxu0  ;;  %10848 = vmatprep.subr.mxu1 %v9018_v21 }
 0xff6   :  { %10752 = vmatprep.mubr.msk.f32.mxu1 %vm259_vm0, %v14006_v2  ;;  %10849 = vmatpush3.msra.mxu1 %v9018_v21 }
 0xff7   :  { %v14011_v5 = vpop.f32.mrf.mxu0  ;;  %10753 = vmatmul.mubr.msk.f32.gmra.mxu1 %vm259_vm0, %v14001_v40  ;;  %10850 = vmatprep.subr.mxu1 %v9017_v16 }
 0xff8   :  { %10851 = vmatpush3.msra.mxu1 %v9017_v16 }
 0xff9   :  { %v14016_v50 = vpop.f32.mrf.mxu0  ;;  %10852 = vmatprep.subr.mxu1 %v9016_v8 }
 0xffa   :  { %10755 = vmatprep.mubr.msk.f32.mxu1 %vm259_vm0, %v14016_v50  ;;  %10853 = vmatpush3.msra.mxu1 %v9016_v8 }
 0xffb   :  { %v14021_v63 = vpop.f32.mrf.mxu0  ;;  %10756 = vmatmul.mubr.msk.f32.gmra.mxu1 %vm259_vm0, %v14011_v5  ;;  %10854 = vmatprep.subr.mxu1 %v9015_v4 }
 0xffc   :  { %10855 = vmatpush3.msra.mxu1 %v9015_v4 }
 0xffd   :  { %v14026_v11 = vpop.f32.mrf.mxu0  ;;  %10856 = vmatprep.subr.mxu1 %v9014_v1 }
 0xffe   :  { %10758 = vmatprep.mubr.msk.f32.mxu1 %vm259_vm0, %v14026_v11  ;;  %10857 = vmatpush3.msra.mxu1 %v9014_v1 }
 0xfff   :  { %v14031_v55 = vpop.f32.mrf.mxu0  ;;  %10759 = vmatmul.mubr.msk.f32.gmra.mxu1 %vm259_vm0, %v14021_v63  ;;  %10858 = vmatprep.subr.mxu1 %v9013_v27 }
0x1000   :  { %10859 = vmatpush3.msra.mxu1 %v9013_v27 }
0x1001   :  { %v14036_v53 = vpop.f32.mrf.mxu0  ;;  %10860 = vmatprep.subr.mxu1 %v9012_v41 }
0x1002   :  { %10761 = vmatprep.mubr.msk.f32.mxu1 %vm259_vm0, %v14036_v53  ;;  %10861 = vmatpush3.msra.mxu1 %v9012_v41 }
0x1003   :  { %v14041_v54 = vpop.f32.mrf.mxu0  ;;  %10762 = vmatmul.mubr.msk.f32.gmra.mxu1 %vm259_vm0, %v14031_v55  ;;  %10862 = vmatprep.subr.mxu1 %v9011_v58 }
0x1004   :  { %10863 = vmatpush3.msra.mxu1 %v9011_v58 }
0x1005   :  { %v14046_v59 = vpop.f32.mrf.mxu0  ;;  %10864 = vmatprep.subr.mxu1 %v9010_v22 }
0x1006   :  { %10764 = vmatprep.mubr.msk.f32.mxu1 %vm259_vm0, %v14046_v59  ;;  %10865 = vmatpush3.msra.mxu1 %v9010_v22 }
0x1007   :  { %v14050_v12 = vpop.f32.mrf.mxu0  ;;  %10765 = vmatmul.mubr.msk.f32.gmra.mxu1 %vm259_vm0, %v14041_v54  ;;  %10962 = vmatprep.subr.mxu1 %v9083_v25 }
0x1009   :  { %v14054_v57 = vpop.f32.mrf.mxu0 }
0x100a   :  { %10767 = vmatprep.mubr.msk.f32.mxu1 %vm259_vm0, %v14054_v57 }
0x100b   :  { %v14058_v15 = vpop.f32.mrf.mxu0  ;;  %10768 = vmatmul.mubr.msk.f32.gmra.mxu1 %vm259_vm0, %v14050_v12 }
0x100d   :  { %v14062_v33 = vpop.f32.mrf.mxu0 }
0x100e   :  { %10770 = vmatprep.mubr.msk.f32.mxu1 %vm259_vm0, %v14062_v33 }
0x100f   :  { %v14066_v18 = vpop.f32.mrf.mxu0  ;;  %10771 = vmatmul.mubr.msk.f32.gmra.mxu1 %vm259_vm0, %v14058_v15 }
0x1011   :  { %v14070_v19 = vpop.f32.mrf.mxu0 }
0x1012   :  { %10773 = vmatprep.mubr.msk.f32.mxu1 %vm259_vm0, %v14070_v19 }
0x1013   :  { %v14074_v30 = vpop.f32.mrf.mxu0  ;;  %10774 = vmatmul.mubr.msk.f32.gmra.mxu1 %vm259_vm0, %v14066_v18 }
0x1015   :  { %v14078_v37 = vpop.f32.mrf.mxu0 }
0x1016   :  { %10776 = vmatprep.mubr.msk.f32.mxu1 %vm259_vm0, %v14078_v37 }
0x1017   :  { %v14082_v44 = vpop.f32.mrf.mxu0  ;;  %10777 = vmatmul.mubr.msk.f32.gmra.mxu1 %vm259_vm0, %v14074_v30 }
0x1019   :  { %v14086_v48 = vpop.f32.mrf.mxu0 }
0x101a   :  { %10779 = vmatprep.mubr.msk.f32.mxu1 %vm259_vm0, %v14086_v48 }
0x101b   :  { %10780 = vmatmul.mubr.msk.f32.gmra.mxu1 %vm259_vm0, %v14082_v44 }
0x101c   :  { %10866 = vmatprep.mubr.msk.f32.mxu1 %vm259_vm0, %v13986_v24 }
0x101f   :  { %10867 = vmatmul.mubr.msk.f32.vlgmr.msra.gmra.mxu1 %vm259_vm0, %v13984_v23 }
0x1020   :  { %10869 = vmatprep.mubr.msk.f32.mxu1 %vm259_vm0, %v13996_v62  ;;  %10963 = vmatpush3.msra.mxu1 %v9083_v25 }
0x1021   :  { %10964 = vmatprep.subr.mxu1 %v9082_v28 }
0x1022   :  { %10965 = vmatpush3.msra.mxu1 %v9082_v28 }
0x1023   :  { %10870 = vmatmul.mubr.msk.f32.gmra.mxu1 %vm259_vm0, %v13991_v6  ;;  %10966 = vmatprep.subr.mxu1 %v9081_v29 }
0x1024   :  { %10872 = vmatprep.mubr.msk.f32.mxu1 %vm259_vm0, %v14006_v2  ;;  %10967 = vmatpush3.msra.mxu1 %v9081_v29 }
0x1025   :  { %10968 = vmatprep.subr.mxu1 %v9080_v36 }
0x1026   :  { %10969 = vmatpush3.msra.mxu1 %v9080_v36 }
0x1027   :  { %10873 = vmatmul.mubr.msk.f32.gmra.mxu1 %vm259_vm0, %v14001_v40  ;;  %10970 = vmatprep.subr.mxu1 %v9079_v46 }
0x1028   :  { %10875 = vmatprep.mubr.msk.f32.mxu1 %vm259_vm0, %v14016_v50  ;;  %10971 = vmatpush3.msra.mxu1 %v9079_v46  ;;  %v14267_v46 = vld [vmem:[%s12334_s17 + $0x40] sm:$0xff] }
0x1029   :  { %10972 = vmatprep.subr.mxu1 %v9078_v0 }
0x102a   :  { %10973 = vmatpush3.msra.mxu1 %v9078_v0 }
0x102b   :  { %10876 = vmatmul.mubr.msk.f32.gmra.mxu1 %vm259_vm0, %v14011_v5  ;;  %10974 = vmatprep.subr.mxu1 %v9077_v47 }
0x102c   :  { %10878 = vmatprep.mubr.msk.f32.mxu1 %vm259_vm0, %v14026_v11  ;;  %10975 = vmatpush3.msra.mxu1 %v9077_v47  ;;  %v14272_v47 = vld [vmem:[%s12334_s17 + $0x48] sm:$0xff] }
0x102d   :  { %10976 = vmatprep.subr.mxu1 %v9076_v7 }
0x102e   :  { %10977 = vmatpush3.msra.mxu1 %v9076_v7 }
0x102f   :  { %10879 = vmatmul.mubr.msk.f32.gmra.mxu1 %vm259_vm0, %v14021_v63  ;;  %10978 = vmatprep.subr.mxu1 %v9075_v14 }
0x1030   :  { %10881 = vmatprep.mubr.msk.f32.mxu1 %vm259_vm0, %v14036_v53  ;;  %10979 = vmatpush3.msra.mxu1 %v9075_v14 }
0x1031   :  { %10980 = vmatprep.subr.mxu1 %v9074_v45 }
0x1032   :  { %10981 = vmatpush3.msra.mxu1 %v9074_v45 }
0x1033   :  { %10882 = vmatmul.mubr.msk.f32.gmra.mxu1 %vm259_vm0, %v14031_v55  ;;  %10982 = vmatprep.subr.mxu1 %v9073_v49 }
0x1034   :  { %10884 = vmatprep.mubr.msk.f32.mxu1 %vm259_vm0, %v14046_v59  ;;  %10983 = vmatpush3.msra.mxu1 %v9073_v49 }
0x1035   :  { %10984 = vmatprep.subr.mxu1 %v9072_v32 }
0x1036   :  { %10985 = vmatpush3.msra.mxu1 %v9072_v32 }
0x1037   :  { %10885 = vmatmul.mubr.msk.f32.gmra.mxu1 %vm259_vm0, %v14041_v54  ;;  %6222 = vmatprep.subr.mxu1 %v15766_v9 }
0x1038   :  { %10887 = vmatprep.mubr.msk.f32.mxu1 %vm259_vm0, %v14054_v57 }
0x103b   :  { %10888 = vmatmul.mubr.msk.f32.gmra.mxu1 %vm259_vm0, %v14050_v12 }
0x103c   :  { %10890 = vmatprep.mubr.msk.f32.mxu1 %vm259_vm0, %v14062_v33 }
0x103f   :  { %10891 = vmatmul.mubr.msk.f32.gmra.mxu1 %vm259_vm0, %v14058_v15 }
0x1040   :  { %10893 = vmatprep.mubr.msk.f32.mxu1 %vm259_vm0, %v14070_v19 }
0x1043   :  { %10894 = vmatmul.mubr.msk.f32.gmra.mxu1 %vm259_vm0, %v14066_v18 }
0x1044   :  { %10896 = vmatprep.mubr.msk.f32.mxu1 %vm259_vm0, %v14078_v37 }
0x1047   :  { %10897 = vmatmul.mubr.msk.f32.gmra.mxu1 %vm259_vm0, %v14074_v30 }
0x1048   :  { %10899 = vmatprep.mubr.msk.f32.mxu1 %vm259_vm0, %v14086_v48 }
0x104b   :  { %10900 = vmatmul.mubr.msk.f32.gmra.mxu1 %vm259_vm0, %v14082_v44 }
0x104c   :  { %10986 = vmatprep.mubr.msk.f32.mxu1 %vm259_vm0, %v13986_v24 }
0x104f   :  { %10987 = vmatmul.mubr.msk.f32.vlgmr.msra.gmra.mxu1 %vm259_vm0, %v13984_v23  ;;  %v14202_v23 = vld [vmem:[%s12329_s12 + $0x1] ss:$0 sm:$0xff] }
0x1050   :  { %10989 = vmatprep.mubr.msk.f32.mxu1 %vm259_vm0, %v13996_v62 }
0x1053   :  { %10990 = vmatmul.mubr.msk.f32.gmra.mxu1 %vm259_vm0, %v13991_v6 }
0x1054   :  { %10992 = vmatprep.mubr.msk.f32.mxu1 %vm259_vm0, %v14006_v2  ;;  %v14211_v2 = vld [vmem:[%s12334_s17 + $0x8] sm:$0xff] }
0x1057   :  { %10993 = vmatmul.mubr.msk.f32.gmra.mxu1 %vm259_vm0, %v14001_v40  ;;  %v14207_v40 = vld [vmem:[%s12334_s17] sm:$0xff] }
0x1058   :  { %10995 = vmatprep.mubr.msk.f32.mxu1 %vm259_vm0, %v14016_v50 }
0x105b   :  { %10996 = vmatmul.mubr.msk.f32.gmra.mxu1 %vm259_vm0, %v14011_v5 }
0x105c   :  { %10998 = vmatprep.mubr.msk.f32.mxu1 %vm259_vm0, %v14026_v11  ;;  %v14224_v11 = vld [vmem:[%s12334_s17 + $0x18] sm:$0xff] }
0x105f   :  { %10999 = vmatmul.mubr.msk.f32.gmra.mxu1 %vm259_vm0, %v14021_v63  ;;  %v14219_v63 = vld [vmem:[%s12334_s17 + $0x10] sm:$0xff] }
0x1060   :  { %11001 = vmatprep.mubr.msk.f32.mxu1 %vm259_vm0, %v14036_v53 }
0x1063   :  { %11002 = vmatmul.mubr.msk.f32.gmra.mxu1 %vm259_vm0, %v14031_v55 }
0x1064   :  { %11004 = vmatprep.mubr.msk.f32.mxu1 %vm259_vm0, %v14046_v59  ;;  %v14240_v59 = vld [vmem:[%s12334_s17 + $0x28] sm:$0xff] }
0x1067   :  { %11005 = vmatmul.mubr.msk.f32.gmra.mxu1 %vm259_vm0, %v14041_v54  ;;  %v14235_v54 = vld [vmem:[%s12334_s17 + $0x20] sm:$0xff] }
0x1068   :  { %11007 = vmatprep.mubr.msk.f32.mxu1 %vm259_vm0, %v14054_v57 }
0x106b   :  { %11008 = vmatmul.mubr.msk.f32.gmra.mxu1 %vm259_vm0, %v14050_v12 }
0x106c   :  { %11010 = vmatprep.mubr.msk.f32.mxu1 %vm259_vm0, %v14062_v33 }
0x106f   :  { %11011 = vmatmul.mubr.msk.f32.gmra.mxu1 %vm259_vm0, %v14058_v15 }
0x1070   :  { %11013 = vmatprep.mubr.msk.f32.mxu1 %vm259_vm0, %v14070_v19  ;;  %v14251_v19 = vld [vmem:[%s12334_s17 + $0x30] sm:$0xff] }
0x1073   :  { %11014 = vmatmul.mubr.msk.f32.gmra.mxu1 %vm259_vm0, %v14066_v18 }
0x1074   :  { %11016 = vmatprep.mubr.msk.f32.mxu1 %vm259_vm0, %v14078_v37  ;;  %v14256_v37 = vld [vmem:[%s12334_s17 + $0x38] sm:$0xff] }
0x1077   :  { %11017 = vmatmul.mubr.msk.f32.gmra.mxu1 %vm259_vm0, %v14074_v30 }
0x1078   :  { %11019 = vmatprep.mubr.msk.f32.mxu1 %vm259_vm0, %v14086_v48 }
0x107b   :  { %11020 = vmatmul.mubr.msk.f32.gmra.mxu1 %vm259_vm0, %v14082_v44 }
0x107c   :  { %6286 = vmatprep.mubr.f32.mxu1 %v15766_v9 }
0x10af   :  { %v10748_v24 = vpop.f32.mrf.mxu1 }
0x10b0   :  { %v4710_v6 = vadd.f32 %v10748_v24, %v14202_v23  ;;  %v14283_v24 = vld [vmem:[%s12334_s17 + $0x50] sm:$0xff] }
0x10b1   :  { %v4704_v10 = vpop.f32.mrf.mxu1 }
0x10b2   :  { %v4705_v62 = vadd.f32 %v14202_v23, %v4704_v10  ;;  %v4824_v8 = vmul.f32 %v14211_v2, %v4710_v6  ;;  %v14288_v10 = vld [vmem:[%s12334_s17 + $0x58] sm:$0xff] }
0x10b3   :  { %v10751_v21 = vpop.f32.mrf.mxu1 }
0x10b4   :  { %v4823_v16 = vmul.f32 %v14207_v40, %v4705_v62  ;;  %v4720_v5 = vadd.f32 %v10751_v21, %v14202_v23 }
0x10b5   :  { %v4714_v4 = vpop.f32.mrf.mxu1 }
0x10b6   :  { %v4715_v50 = vadd.f32 %v14202_v23, %v4714_v4  ;;  %10806 = vmatprep.mubr.msk.f32.mxu0 %vm259_vm0, %v4823_v16  ;;  %v4826_v41 = vmul.f32 %v14224_v11, %v4720_v5  ;;  %v14299_v4 = vld [vmem:[%s12334_s17 + $0x60] sm:$0xff] }
0x10b7   :  { %v10754_v1 = vpop.f32.mrf.mxu1  ;;  %10807 = vmatmul.mubr.msk.f32.vlgmr.msra.gmra.mxu0 %vm259_vm0, %v4824_v8 }
0x10b8   :  { %v4825_v27 = vmul.f32 %v14219_v63, %v4715_v50  ;;  %10903 = vmatpush3.msra.mxu0 %v13877_v13  ;;  %v4730_v55 = vadd.f32 %v10754_v1, %v14202_v23  ;;  %v14304_v1 = vld [vmem:[%s12334_s17 + $0x68] sm:$0xff] }
0x10b9   :  { %v4724_v58 = vpop.f32.mrf.mxu1  ;;  %10904 = vmatprep.subr.mxu0 %v13884_v60 }
0x10ba   :  { %v4725_v53 = vadd.f32 %v14202_v23, %v4724_v58  ;;  %10809 = vmatprep.mubr.msk.f32.mxu0 %vm259_vm0, %v4825_v27  ;;  %10905 = vmatpush3.msra.mxu0 %v13884_v60  ;;  %v4828_v12 = vmul.f32 %v14240_v59, %v4730_v55 }
0x10bb   :  { %v10757_v22 = vpop.f32.mrf.mxu1  ;;  %10810 = vmatmul.mubr.msk.f32.gmra.mxu0 %vm259_vm0, %v4826_v41  ;;  %10906 = vmatprep.subr.mxu0 %v13891_v52 }
0x10bc   :  { %v4827_v25 = vmul.f32 %v14235_v54, %v4725_v53  ;;  %10907 = vmatpush3.msra.mxu0 %v13891_v52  ;;  %v4740_v57 = vadd.f32 %v10757_v22, %v14202_v23  ;;  %v14315_v22 = vld [vmem:[%s12334_s17 + $0x70] sm:$0xff] }
0x10bd   :  { %v4734_v15 = vpop.f32.mrf.mxu1  ;;  %10908 = vmatprep.subr.mxu0 %v13898_v17 }
0x10be   :  { %v4735_v33 = vadd.f32 %v14202_v23, %v4734_v15  ;;  %10812 = vmatprep.mubr.msk.f32.mxu0 %vm259_vm0, %v4827_v25  ;;  %10909 = vmatpush3.msra.mxu0 %v13898_v17  ;;  %v4830_v44 = vmul.f32 %v14256_v37, %v4740_v57 }
0x10bf   :  { %v10760_v18 = vpop.f32.mrf.mxu1  ;;  %10813 = vmatmul.mubr.msk.f32.gmra.mxu0 %vm259_vm0, %v4828_v12  ;;  %10910 = vmatprep.subr.mxu0 %v13905_v3  ;;  %v14319_v12 = vld [vmem:[%s12334_s17 + $0x78] sm:$0xff] }
0x10c0   :  { %v4829_v30 = vmul.f32 %v14251_v19, %v4735_v33  ;;  %10911 = vmatpush3.msra.mxu0 %v13905_v3  ;;  %v4750_v48 = vadd.f32 %v10760_v18, %v14202_v23 }
0x10c1   :  { %v4744_v28 = vpop.f32.mrf.mxu1  ;;  %10912 = vmatprep.subr.mxu0 %v13912_v61 }
0x10c2   :  { %v4745_v29 = vadd.f32 %v14202_v23, %v4744_v28  ;;  %10815 = vmatprep.mubr.msk.f32.mxu0 %vm259_vm0, %v4829_v30  ;;  %10913 = vmatpush3.msra.mxu0 %v13912_v61  ;;  %v4832_v7 = vmul.f32 %v14272_v47, %v4750_v48  ;;  %v14331_v28 = vld [vmem:[%s12334_s17 + $0x88] sm:$0xff] }
0x10c3   :  { %v10763_v36 = vpop.f32.mrf.mxu1  ;;  %10816 = vmatmul.mubr.msk.f32.gmra.mxu0 %vm259_vm0, %v4830_v44  ;;  %10914 = vmatprep.subr.mxu0 %v13919_v38  ;;  %v14327_v44 = vld [vmem:[%s12334_s17 + $0x80] sm:$0xff] }
0x10c4   :  { %v4831_v0 = vmul.f32 %v14267_v46, %v4745_v29  ;;  %10915 = vmatpush3.msra.mxu0 %v13919_v38  ;;  %v4760_v14 = vadd.f32 %v10763_v36, %v14202_v23 }
0x10c5   :  { %v4754_v45 = vpop.f32.mrf.mxu1  ;;  %10916 = vmatprep.subr.mxu0 %v13926_v34 }
0x10c6   :  { %v4755_v49 = vadd.f32 %v14202_v23, %v4754_v45  ;;  %10818 = vmatprep.mubr.msk.f32.mxu0 %vm259_vm0, %v4831_v0  ;;  %10917 = vmatpush3.msra.mxu0 %v13926_v34  ;;  %v4834_v62 = vmul.f32 %v14288_v10, %v4760_v14  ;;  %v14339_v45 = vld [vmem:[%s12334_s17 + $0x90] sm:$0xff] }
0x10c7   :  { %v10766_v32 = vpop.f32.mrf.mxu1  ;;  %10819 = vmatmul.mubr.msk.f32.gmra.mxu0 %vm259_vm0, %v4832_v7  ;;  %10918 = vmatprep.subr.mxu0 %v13933_v35 }
0x10c8   :  { %v4833_v6 = vmul.f32 %v14283_v24, %v4755_v49  ;;  %10919 = vmatpush3.msra.mxu0 %v13933_v35  ;;  %v4770_v21 = vadd.f32 %v10766_v32, %v14202_v23  ;;  %v14343_v32 = vld [vmem:[%s12334_s17 + $0x98] sm:$0xff] }
0x10c9   :  { %v4764_v16 = vpop.f32.mrf.mxu1  ;;  %10920 = vmatprep.subr.mxu0 %v13940_v20 }
0x10ca   :  { %v4765_v8 = vadd.f32 %v14202_v23, %v4764_v16  ;;  %10821 = vmatprep.mubr.msk.f32.mxu0 %vm259_vm0, %v4833_v6  ;;  %10921 = vmatpush3.msra.mxu0 %v13940_v20  ;;  %v4836_v27 = vmul.f32 %v14304_v1, %v4770_v21 }
0x10cb   :  { %v10769_v5 = vpop.f32.mrf.mxu1  ;;  %10822 = vmatmul.mubr.msk.f32.gmra.mxu0 %vm259_vm0, %v4834_v62  ;;  %10922 = vmatprep.subr.mxu0 %v13947_v31 }
0x10cc   :  { %v4835_v50 = vmul.f32 %v14299_v4, %v4765_v8  ;;  %10923 = vmatpush3.msra.mxu0 %v13947_v31  ;;  %v4780_v41 = vadd.f32 %v10769_v5, %v14202_v23  ;;  %v14351_v5 = vld [vmem:[%s12334_s17 + $0xa0] sm:$0xff] }
0x10cd   :  { %v4774_v55 = vpop.f32.mrf.mxu1  ;;  %10924 = vmatprep.subr.mxu0 %v13954_v51 }
0x10ce   :  { %v4775_v58 = vadd.f32 %v14202_v23, %v4774_v55  ;;  %10824 = vmatprep.mubr.msk.f32.mxu0 %vm259_vm0, %v4835_v50  ;;  %10925 = vmatpush3.msra.mxu0 %v13954_v51  ;;  %v4838_v57 = vmul.f32 %v14319_v12, %v4780_v41 }
0x10cf   :  { %v10772_v53 = vpop.f32.mrf.mxu1  ;;  %10825 = vmatmul.mubr.msk.f32.gmra.mxu0 %vm259_vm0, %v4836_v27  ;;  %11022 = vmatprep.subr.mxu0 %v13877_v13  ;;  %v14355_v27 = vld [vmem:[%s12334_s17 + $0xa8] sm:$0xff] }
0x10d0   :  { %v4837_v25 = vmul.f32 %v14315_v22, %v4775_v58  ;;  %v4790_v15 = vadd.f32 %v10772_v53, %v14202_v23 }
0x10d1   :  { %v4784_v33 = vpop.f32.mrf.mxu1 }
0x10d2   :  { %v4785_v18 = vadd.f32 %v14202_v23, %v4784_v33  ;;  %10827 = vmatprep.mubr.msk.f32.mxu0 %vm259_vm0, %v4837_v25  ;;  %v4840_v29 = vmul.f32 %v14331_v28, %v4790_v15  ;;  %v14362_v25 = vld [vmem:[%s12481_s21 + $0x1] ss:$0 sm:$0xff]  ;;  %v14366_v15 = vld [vmem:[%s12334_s17 + $0xb0] sm:$0xff]  ;;  %s11908_s21 = smov 29  }
0x10d3   :  { %v10775_v30 = vpop.f32.mrf.mxu1  ;;  %10828 = vmatmul.mubr.msk.f32.gmra.mxu0 %vm259_vm0, %v4838_v57 }
0x10d4   :  { %v4839_v48 = vmul.f32 %v14327_v44, %v4785_v18  ;;  %v4800_v36 = vadd.f32 %v10775_v30, %v14202_v23  ;;  %v14370_v18 = vld [vmem:[%s12334_s17 + $0xb8] sm:$0xff] }
0x10d5   :  { %v4794_v0 = vpop.f32.mrf.mxu1 }
0x10d6   :  { %v4795_v7 = vadd.f32 %v14202_v23, %v4794_v0  ;;  %10830 = vmatprep.mubr.msk.f32.mxu0 %vm259_vm0, %v4839_v48  ;;  %v4842_v6 = vmul.f32 %v14343_v32, %v4800_v36 }
0x10d7   :  { %v10778_v14 = vpop.f32.mrf.mxu1  ;;  %10831 = vmatmul.mubr.msk.f32.gmra.mxu0 %vm259_vm0, %v4840_v29 }
0x10d8   :  { %v4841_v49 = vmul.f32 %v14339_v45, %v4795_v7  ;;  %v4810_v62 = vadd.f32 %v10778_v14, %v14202_v23 }
0x10d9   :  { %v4804_v21 = vpop.f32.mrf.mxu1 }
0x10da   :  { %v4805_v16 = vadd.f32 %v14202_v23, %v4804_v21  ;;  %10833 = vmatprep.mubr.msk.f32.mxu0 %vm259_vm0, %v4841_v49  ;;  %v4844_v41 = vmul.f32 %v14355_v27, %v4810_v62 }
0x10db   :  { %v10781_v8 = vpop.f32.mrf.mxu1  ;;  %10834 = vmatmul.mubr.msk.f32.gmra.mxu0 %vm259_vm0, %v4842_v6 }
0x10dc   :  { %v4843_v50 = vmul.f32 %v14351_v5, %v4805_v16  ;;  %v4820_v55 = vadd.f32 %v10781_v8, %v14202_v23 }
0x10dd   :  { %v4814_v58 = vpop.f32.mrf.mxu1 }
0x10de   :  { %v4815_v53 = vadd.f32 %v14202_v23, %v4814_v58  ;;  %10836 = vmatprep.mubr.msk.f32.mxu0 %vm259_vm0, %v4843_v50  ;;  %v4846_v30 = vmul.f32 %v14370_v18, %v4820_v55 }
0x10df   :  { %10837 = vmatmul.mubr.msk.f32.gmra.mxu0 %vm259_vm0, %v4844_v41  ;;  %v10868_v57 = vpop.f32.mrf.mxu1 }
0x10e0   :  { %v4845_v33 = vmul.f32 %v14366_v15, %v4815_v53  ;;  %v5197_v48 = vadd.f32 %v10868_v57, %v14362_v25 }
0x10e1   :  { %v5191_v29 = vpop.f32.mrf.mxu1 }
0x10e2   :  { %v5192_v23 = vadd.f32 %v14362_v25, %v5191_v29  ;;  %10839 = vmatprep.mubr.msk.f32.mxu0 %vm259_vm0, %v4845_v33  ;;  %v5311_v7 = vmul.f32 %v14211_v2, %v5197_v48 }
0x10e3   :  { %10840 = vmatmul.mubr.msk.f32.gmra.mxu0 %vm259_vm0, %v4846_v30  ;;  %v10871_v36 = vpop.f32.mrf.mxu1 }
0x10e4   :  { %v5310_v0 = vmul.f32 %v14207_v40, %v5192_v23  ;;  %v5207_v14 = vadd.f32 %v10871_v36, %v14362_v25 }
0x10e5   :  { %v5201_v49 = vpop.f32.mrf.mxu1 }
0x10e6   :  { %v5202_v6 = vadd.f32 %v14362_v25, %v5201_v49  ;;  %10926 = vmatprep.mubr.msk.f32.mxu0 %vm259_vm0, %v5310_v0  ;;  %v5313_v16 = vmul.f32 %v14224_v11, %v5207_v14 }
0x10e7   :  { %v10874_v62 = vpop.f32.mrf.mxu1  ;;  %10927 = vmatmul.mubr.msk.f32.vlgmr.msra.gmra.mxu0 %vm259_vm0, %v5311_v7 }
0x10e8   :  { %v5312_v21 = vmul.f32 %v14219_v63, %v5202_v6  ;;  %11023 = vmatpush3.msra.mxu0 %v13877_v13  ;;  %v5217_v8 = vadd.f32 %v10874_v62, %v14362_v25 }
0x10e9   :  { %v5211_v50 = vpop.f32.mrf.mxu1  ;;  %11024 = vmatprep.subr.mxu0 %v13884_v60 }
0x10ea   :  { %v5212_v41 = vadd.f32 %v14362_v25, %v5211_v50  ;;  %10929 = vmatprep.mubr.msk.f32.mxu0 %vm259_vm0, %v5312_v21  ;;  %11025 = vmatpush3.msra.mxu0 %v13884_v60  ;;  %v5315_v58 = vmul.f32 %v14240_v59, %v5217_v8 }
0x10eb   :  { %v10877_v55 = vpop.f32.mrf.mxu1  ;;  %10930 = vmatmul.mubr.msk.f32.gmra.mxu0 %vm259_vm0, %v5313_v16  ;;  %11026 = vmatprep.subr.mxu0 %v13891_v52 }
0x10ec   :  { %v5314_v13 = vmul.f32 %v14235_v54, %v5212_v41  ;;  %11027 = vmatpush3.msra.mxu0 %v13891_v52  ;;  %v5227_v53 = vadd.f32 %v10877_v55, %v14362_v25 }
0x10ed   :  { %v5221_v57 = vpop.f32.mrf.mxu1  ;;  %11028 = vmatprep.subr.mxu0 %v13898_v17 }
0x10ee   :  { %v5222_v33 = vadd.f32 %v14362_v25, %v5221_v57  ;;  %10932 = vmatprep.mubr.msk.f32.mxu0 %vm259_vm0, %v5314_v13  ;;  %11029 = vmatpush3.msra.mxu0 %v13898_v17  ;;  %v5317_v30 = vmul.f32 %v14256_v37, %v5227_v53 }
0x10ef   :  { %v10880_v60 = vpop.f32.mrf.mxu1  ;;  %10933 = vmatmul.mubr.msk.f32.gmra.mxu0 %vm259_vm0, %v5315_v58  ;;  %11030 = vmatprep.subr.mxu0 %v13905_v3 }
0x10f0   :  { %v5316_v52 = vmul.f32 %v14251_v19, %v5222_v33  ;;  %11031 = vmatpush3.msra.mxu0 %v13905_v3  ;;  %v5237_v48 = vadd.f32 %v10880_v60, %v14362_v25 }
0x10f1   :  { %v5231_v29 = vpop.f32.mrf.mxu1  ;;  %11032 = vmatprep.subr.mxu0 %v13912_v61 }
0x10f2   :  { %v5232_v23 = vadd.f32 %v14362_v25, %v5231_v29  ;;  %10935 = vmatprep.mubr.msk.f32.mxu0 %vm259_vm0, %v5316_v52  ;;  %11033 = vmatpush3.msra.mxu0 %v13912_v61  ;;  %v5319_v36 = vmul.f32 %v14272_v47, %v5237_v48 }
0x10f3   :  { %v10883_v17 = vpop.f32.mrf.mxu1  ;;  %10936 = vmatmul.mubr.msk.f32.gmra.mxu0 %vm259_vm0, %v5317_v30  ;;  %11034 = vmatprep.subr.mxu0 %v13919_v38 }
0x10f4   :  { %v5318_v3 = vmul.f32 %v14267_v46, %v5232_v23  ;;  %11035 = vmatpush3.msra.mxu0 %v13919_v38  ;;  %v5247_v0 = vadd.f32 %v10883_v17, %v14362_v25 }
0x10f5   :  { %v5241_v7 = vpop.f32.mrf.mxu1  ;;  %11036 = vmatprep.subr.mxu0 %v13926_v34 }
0x10f6   :  { %v5242_v14 = vadd.f32 %v14362_v25, %v5241_v7  ;;  %10938 = vmatprep.mubr.msk.f32.mxu0 %vm259_vm0, %v5318_v3  ;;  %11037 = vmatpush3.msra.mxu0 %v13926_v34  ;;  %v5321_v49 = vmul.f32 %v14288_v10, %v5247_v0 }
0x10f7   :  { %v10886_v61 = vpop.f32.mrf.mxu1  ;;  %10939 = vmatmul.mubr.msk.f32.gmra.mxu0 %vm259_vm0, %v5319_v36  ;;  %11038 = vmatprep.subr.mxu0 %v13933_v35 }
0x10f8   :  { %v5320_v38 = vmul.f32 %v14283_v24, %v5242_v14  ;;  %11039 = vmatpush3.msra.mxu0 %v13933_v35  ;;  %v5257_v6 = vadd.f32 %v10886_v61, %v14362_v25 }
0x10f9   :  { %v5251_v62 = vpop.f32.mrf.mxu1  ;;  %11040 = vmatprep.subr.mxu0 %v13940_v20 }
0x10fa   :  { %v5252_v21 = vadd.f32 %v14362_v25, %v5251_v62  ;;  %10941 = vmatprep.mubr.msk.f32.mxu0 %vm259_vm0, %v5320_v38  ;;  %11041 = vmatpush3.msra.mxu0 %v13940_v20  ;;  %v5323_v16 = vmul.f32 %v14304_v1, %v5257_v6  ;;  %v14467_v6 = vld [vmem:[%s12596_s26 + $0x1] ss:$0 sm:$0xff] }
0x10fb   :  { %v10889_v34 = vpop.f32.mrf.mxu1  ;;  %10942 = vmatmul.mubr.msk.f32.gmra.mxu0 %vm259_vm0, %v5321_v49  ;;  %11042 = vmatprep.subr.mxu0 %v13947_v31 }
0x10fc   :  { %v5322_v35 = vmul.f32 %v14299_v4, %v5252_v21  ;;  %11043 = vmatpush3.msra.mxu0 %v13947_v31  ;;  %v5267_v8 = vadd.f32 %v10889_v34, %v14362_v25 }
0x10fd   :  { %v5261_v50 = vpop.f32.mrf.mxu1  ;;  %11044 = vmatprep.subr.mxu0 %v13954_v51 }
0x10fe   :  { %v5262_v41 = vadd.f32 %v14362_v25, %v5261_v50  ;;  %10944 = vmatprep.mubr.msk.f32.mxu0 %vm259_vm0, %v5322_v35  ;;  %11045 = vmatpush3.msra.mxu0 %v13954_v51  ;;  %v5325_v55 = vmul.f32 %v14319_v12, %v5267_v8 }
0x10ff   :  { %v10892_v20 = vpop.f32.mrf.mxu1  ;;  %10945 = vmatmul.mubr.msk.f32.gmra.mxu0 %vm259_vm0, %v5323_v16  ;;  %6911 = vmatprep.subr.mxu0 %v15766_v9 }
0x1100   :  { %v5324_v31 = vmul.f32 %v14315_v22, %v5262_v41  ;;  %v5277_v13 = vadd.f32 %v10892_v20, %v14362_v25 }
0x1101   :  { %v5271_v58 = vpop.f32.mrf.mxu1 }
0x1102   :  { %v5272_v53 = vadd.f32 %v14362_v25, %v5271_v58  ;;  %10947 = vmatprep.mubr.msk.f32.mxu0 %vm259_vm0, %v5324_v31  ;;  %v5327_v33 = vmul.f32 %v14331_v28, %v5277_v13 }
0x1103   :  { %v10895_v57 = vpop.f32.mrf.mxu1  ;;  %10948 = vmatmul.mubr.msk.f32.gmra.mxu0 %vm259_vm0, %v5325_v55 }
0x1104   :  { %v5326_v51 = vmul.f32 %v14327_v44, %v5272_v53  ;;  %v5287_v60 = vadd.f32 %v10895_v57, %v14362_v25 }
0x1105   :  { %v5281_v52 = vpop.f32.mrf.mxu1 }
0x1106   :  { %v5282_v30 = vadd.f32 %v14362_v25, %v5281_v52  ;;  %10950 = vmatprep.mubr.msk.f32.mxu0 %vm259_vm0, %v5326_v51  ;;  %v5329_v23 = vmul.f32 %v14343_v32, %v5287_v60 }
0x1107   :  { %v10898_v48 = vpop.f32.mrf.mxu1  ;;  %10951 = vmatmul.mubr.msk.f32.gmra.mxu0 %vm259_vm0, %v5327_v33 }
0x1108   :  { %v5328_v29 = vmul.f32 %v14339_v45, %v5282_v30  ;;  %v5297_v17 = vadd.f32 %v10898_v48, %v14362_v25 }
0x1109   :  { %v5291_v3 = vpop.f32.mrf.mxu1 }
0x110a   :  { %v5292_v36 = vadd.f32 %v14362_v25, %v5291_v3  ;;  %10953 = vmatprep.mubr.msk.f32.mxu0 %vm259_vm0, %v5328_v29  ;;  %v5331_v14 = vmul.f32 %v14355_v27, %v5297_v17 }
0x110b   :  { %v10901_v0 = vpop.f32.mrf.mxu1  ;;  %10954 = vmatmul.mubr.msk.f32.gmra.mxu0 %vm259_vm0, %v5329_v23 }
0x110c   :  { %v5330_v7 = vmul.f32 %v14351_v5, %v5292_v36  ;;  %v5307_v61 = vadd.f32 %v10901_v0, %v14362_v25 }
0x110d   :  { %v5301_v38 = vpop.f32.mrf.mxu1 }
0x110e   :  { %v5302_v49 = vadd.f32 %v14362_v25, %v5301_v38  ;;  %10956 = vmatprep.mubr.msk.f32.mxu0 %vm259_vm0, %v5330_v7  ;;  %v5333_v34 = vmul.f32 %v14370_v18, %v5307_v61 }
0x110f   :  { %10957 = vmatmul.mubr.msk.f32.gmra.mxu0 %vm259_vm0, %v5331_v14  ;;  %v10988_v62 = vpop.f32.mrf.mxu1 }
0x1110   :  { %v5332_v21 = vmul.f32 %v14366_v15, %v5302_v49  ;;  %v5684_v35 = vadd.f32 %v10988_v62, %v14467_v6 }
0x1111   :  { %v5678_v16 = vpop.f32.mrf.mxu1 }
0x1112   :  { %v5679_v8 = vadd.f32 %v14467_v6, %v5678_v16  ;;  %10959 = vmatprep.mubr.msk.f32.mxu0 %vm259_vm0, %v5332_v21  ;;  %v5798_v41 = vmul.f32 %v14211_v2, %v5684_v35 }
0x1113   :  { %10960 = vmatmul.mubr.msk.f32.gmra.mxu0 %vm259_vm0, %v5333_v34  ;;  %v10991_v25 = vpop.f32.mrf.mxu1 }
0x1114   :  { %v5797_v50 = vmul.f32 %v14207_v40, %v5679_v8  ;;  %v5694_v20 = vadd.f32 %v10991_v25, %v14467_v6 }
0x1115   :  { %v5688_v31 = vpop.f32.mrf.mxu1 }
0x1116   :  { %v5689_v55 = vadd.f32 %v14467_v6, %v5688_v31  ;;  %11046 = vmatprep.mubr.msk.f32.mxu0 %vm259_vm0, %v5797_v50  ;;  %v5800_v53 = vmul.f32 %v14224_v11, %v5694_v20 }
0x1117   :  { %v10994_v13 = vpop.f32.mrf.mxu1  ;;  %11047 = vmatmul.mubr.msk.f32.vlgmr.msra.gmra.mxu0 %vm259_vm0, %v5798_v41 }
0x1118   :  { %v5799_v58 = vmul.f32 %v14219_v63, %v5689_v55  ;;  %v5704_v57 = vadd.f32 %v10994_v13, %v14467_v6 }
0x1119   :  { %v5698_v51 = vpop.f32.mrf.mxu1 }
0x111a   :  { %v5699_v40 = vadd.f32 %v14467_v6, %v5698_v51  ;;  %11049 = vmatprep.mubr.msk.f32.mxu0 %vm259_vm0, %v5799_v58  ;;  %v5802_v60 = vmul.f32 %v14240_v59, %v5704_v57 }
0x111b   :  { %v10997_v2 = vpop.f32.mrf.mxu1  ;;  %11050 = vmatmul.mubr.msk.f32.gmra.mxu0 %vm259_vm0, %v5800_v53 }
0x111c   :  { %v5801_v33 = vmul.f32 %v14235_v54, %v5699_v40  ;;  %v5714_v52 = vadd.f32 %v10997_v2, %v14467_v6 }
0x111d   :  { %v5708_v30 = vpop.f32.mrf.mxu1 }
0x111e   :  { %v5709_v63 = vadd.f32 %v14467_v6, %v5708_v30  ;;  %11052 = vmatprep.mubr.msk.f32.mxu0 %vm259_vm0, %v5801_v33  ;;  %v5804_v29 = vmul.f32 %v14256_v37, %v5714_v52 }
0x111f   :  { %v11000_v11 = vpop.f32.mrf.mxu1  ;;  %11053 = vmatmul.mubr.msk.f32.gmra.mxu0 %vm259_vm0, %v5802_v60 }
0x1120   :  { %v5803_v48 = vmul.f32 %v14251_v19, %v5709_v63  ;;  %v5724_v23 = vadd.f32 %v11000_v11, %v14467_v6 }
0x1121   :  { %v5718_v17 = vpop.f32.mrf.mxu1 }
0x1122   :  { %v5719_v54 = vadd.f32 %v14467_v6, %v5718_v17  ;;  %11055 = vmatprep.mubr.msk.f32.mxu0 %vm259_vm0, %v5803_v48  ;;  %v5806_v36 = vmul.f32 %v14272_v47, %v5724_v23 }
0x1123   :  { %v11003_v59 = vpop.f32.mrf.mxu1  ;;  %11056 = vmatmul.mubr.msk.f32.gmra.mxu0 %vm259_vm0, %v5804_v29 }
0x1124   :  { %v5805_v3 = vmul.f32 %v14267_v46, %v5719_v54  ;;  %v5734_v0 = vadd.f32 %v11003_v59, %v14467_v6 }
0x1125   :  { %v5728_v7 = vpop.f32.mrf.mxu1 }
0x1126   :  { %v5729_v19 = vadd.f32 %v14467_v6, %v5728_v7  ;;  %11058 = vmatprep.mubr.msk.f32.mxu0 %vm259_vm0, %v5805_v3  ;;  %v5808_v61 = vmul.f32 %v14288_v10, %v5734_v0 }
0x1127   :  { %v11006_v37 = vpop.f32.mrf.mxu1  ;;  %11059 = vmatmul.mubr.msk.f32.gmra.mxu0 %vm259_vm0, %v5806_v36 }
0x1128   :  { %v5807_v14 = vmul.f32 %v14283_v24, %v5729_v19  ;;  %v5744_v38 = vadd.f32 %v11006_v37, %v14467_v6 }
0x1129   :  { %v5738_v49 = vpop.f32.mrf.mxu1 }
0x112a   :  { %v5739_v46 = vadd.f32 %v14467_v6, %v5738_v49  ;;  %11061 = vmatprep.mubr.msk.f32.mxu0 %vm259_vm0, %v5807_v14  ;;  %v5810_v21 = vmul.f32 %v14304_v1, %v5744_v38 }
0x112b   :  { %v11009_v47 = vpop.f32.mrf.mxu1  ;;  %11062 = vmatmul.mubr.msk.f32.gmra.mxu0 %vm259_vm0, %v5808_v61 }
0x112c   :  { %v5809_v62 = vmul.f32 %v14299_v4, %v5739_v46  ;;  %v5754_v34 = vadd.f32 %v11009_v47, %v14467_v6 }
0x112d   :  { %v5748_v35 = vpop.f32.mrf.mxu1 }
0x112e   :  { %v5749_v24 = vadd.f32 %v14467_v6, %v5748_v35  ;;  %11064 = vmatprep.mubr.msk.f32.mxu0 %vm259_vm0, %v5809_v62  ;;  %v5812_v8 = vmul.f32 %v14319_v12, %v5754_v34 }
0x112f   :  { %v11012_v10 = vpop.f32.mrf.mxu1  ;;  %11065 = vmatmul.mubr.msk.f32.gmra.mxu0 %vm259_vm0, %v5810_v21 }
0x1130   :  { %v5811_v16 = vmul.f32 %v14315_v22, %v5749_v24  ;;  %v5764_v25 = vadd.f32 %v11012_v10, %v14467_v6 }
0x1131   :  { %v5758_v50 = vpop.f32.mrf.mxu1 }
0x1132   :  { %v5759_v4 = vadd.f32 %v14467_v6, %v5758_v50  ;;  %11067 = vmatprep.mubr.msk.f32.mxu0 %vm259_vm0, %v5811_v16  ;;  %v5814_v20 = vmul.f32 %v14331_v28, %v5764_v25 }
0x1133   :  { %v11015_v1 = vpop.f32.mrf.mxu1  ;;  %11068 = vmatmul.mubr.msk.f32.gmra.mxu0 %vm259_vm0, %v5812_v8 }
0x1134   :  { %v5813_v41 = vmul.f32 %v14327_v44, %v5759_v4  ;;  %v5774_v31 = vadd.f32 %v11015_v1, %v14467_v6 }
0x1135   :  { %v5768_v55 = vpop.f32.mrf.mxu1 }
0x1136   :  { %v5769_v22 = vadd.f32 %v14467_v6, %v5768_v55  ;;  %11070 = vmatprep.mubr.msk.f32.mxu0 %vm259_vm0, %v5813_v41  ;;  %v5816_v58 = vmul.f32 %v14343_v32, %v5774_v31 }
0x1137   :  { %v11018_v12 = vpop.f32.mrf.mxu1  ;;  %11071 = vmatmul.mubr.msk.f32.gmra.mxu0 %vm259_vm0, %v5814_v20 }
0x1138   :  { %v5815_v13 = vmul.f32 %v14339_v45, %v5769_v22  ;;  %v5784_v53 = vadd.f32 %v11018_v12, %v14467_v6 }
0x1139   :  { %v5778_v57 = vpop.f32.mrf.mxu1 }
0x113a   :  { %v5779_v44 = vadd.f32 %v14467_v6, %v5778_v57  ;;  %11073 = vmatprep.mubr.msk.f32.mxu0 %vm259_vm0, %v5815_v13  ;;  %v5818_v40 = vmul.f32 %v14355_v27, %v5784_v53 }
0x113b   :  { %v11021_v28 = vpop.f32.mrf.mxu1  ;;  %11074 = vmatmul.mubr.msk.f32.gmra.mxu0 %vm259_vm0, %v5816_v58 }
0x113c   :  { %v5817_v51 = vmul.f32 %v14351_v5, %v5779_v44  ;;  %v5794_v2 = vadd.f32 %v11021_v28, %v14467_v6 }
0x113d   :  { %v5788_v33 = vpop.f32.mrf.mxu1 }
0x113e   :  { %v5789_v45 = vadd.f32 %v14467_v6, %v5788_v33  ;;  %11076 = vmatprep.mubr.msk.f32.mxu0 %vm259_vm0, %v5817_v51  ;;  %v5820_v60 = vmul.f32 %v14370_v18, %v5794_v2 }
0x113f   :  { %11077 = vmatmul.mubr.msk.f32.gmra.mxu0 %vm259_vm0, %v5818_v40 }
0x1140   :  { %v5819_v32 = vmul.f32 %v14366_v15, %v5789_v45 }
0x1142   :  { %11079 = vmatprep.mubr.msk.f32.mxu0 %vm259_vm0, %v5819_v32 }
0x1143   :  { %11080 = vmatmul.mubr.msk.f32.gmra.mxu0 %vm259_vm0, %v5820_v60 }
0x1177   :  { %v14546_v5 = vpop.f32.mrf.mxu0 }
0x1179   :  { %v14548_v27 = vpop.f32.mrf.mxu0 }
0x117b   :  { %v14550_v52 = vpop.f32.mrf.mxu0 }
0x117d   :  { %v14552_v30 = vpop.f32.mrf.mxu0 }
0x117f   :  { %v14554_v6 = vpop.f32.mrf.mxu0 }
0x1181   :  { %v14556_v63 = vpop.f32.mrf.mxu0 }
0x1183   :  { %v14558_v11 = vpop.f32.mrf.mxu0 }
0x1185   :  { %v14560_v15 = vpop.f32.mrf.mxu0 }
0x1187   :  { %v14562_v18 = vpop.f32.mrf.mxu0 }
0x1189   :  { %v14564_v48 = vpop.f32.mrf.mxu0 }
0x118b   :  { %v14566_v29 = vpop.f32.mrf.mxu0 }
0x118d   :  { %v14568_v23 = vpop.f32.mrf.mxu0 }
0x118f   :  { %v14570_v17 = vpop.f32.mrf.mxu0 }
0x1191   :  { %v14572_v54 = vpop.f32.mrf.mxu0 }
0x1193   :  { %v14574_v59 = vpop.f32.mrf.mxu0 }
0x1195   :  { %v14576_v3 = vpop.f32.mrf.mxu0 }
0x1197   :  { %v14578_v36 = vpop.f32.mrf.mxu0 }
0x1199   :  { %v14580_v0 = vpop.f32.mrf.mxu0 }
0x119b   :  { %v14582_v7 = vpop.f32.mrf.mxu0 }
0x119d   :  { %v14584_v19 = vpop.f32.mrf.mxu0 }
0x119f   :  { %v14586_v37 = vpop.f32.mrf.mxu0 }
0x11a1   :  { %v14588_v14 = vpop.f32.mrf.mxu0 }
0x11a3   :  { %v14590_v61 = vpop.f32.mrf.mxu0 }
0x11a5   :  { %v14592_v38 = vpop.f32.mrf.mxu0 }
0x11a7   :  { %v14594_v49 = vpop.f32.mrf.mxu0 }
0x11a9   :  { %v14596_v46 = vpop.f32.mrf.mxu0 }
0x11ab   :  { %v10931_v47 = vpop.f32.mrf.mxu0 }
0x11ad   :  { %v14598_v62 = vpop.f32.mrf.mxu0 }
0x11af   :  { %v10934_v21 = vpop.f32.mrf.mxu0 }
0x11b1   :  { %v5492_v34 = vpop.f32.mrf.mxu0 }
0x11b3   :  { %v10937_v35 = vpop.f32.mrf.mxu0 }
0x11b5   :  { %v5502_v24 = vpop.f32.mrf.mxu0 }
0x11b7   :  { %v10940_v10 = vpop.f32.mrf.mxu0 }
0x11b9   :  { %v5512_v16 = vpop.f32.mrf.mxu0 }
0x11bb   :  { %v10943_v8 = vpop.f32.mrf.mxu0 }
0x11bd   :  { %v5522_v25 = vpop.f32.mrf.mxu0 }
0x11bf   :  { %v10946_v50 = vpop.f32.mrf.mxu0 }
0x11c1   :  { %v5532_v4 = vpop.f32.mrf.mxu0 }
0x11c3   :  { %v10949_v1 = vpop.f32.mrf.mxu0 }
0x11c4   :  { %9134 = vmatpush1.xpose.msk.msra.mxu1 %vm2231_vm2, %v10949_v1  ;;  %v11788_v1 = vld [vmem:[%s13368_s7] sm:$0xff] }
0x11c5   :  { %v5542_v41 = vpop.f32.mrf.mxu0  ;;  %6224 = vmatprep.subr.mxu1 %v15766_v9 }
0x11c7   :  { %v14602_v20 = vpop.f32.mrf.mxu0 }
0x11c8   :  { %9135 = vmatpush1.xpose.msk.msra.mxu1 %vm2231_vm2, %v5542_v41 }
0x11c9   :  { %v14605_v31 = vpop.f32.mrf.mxu0  ;;  %6226 = vmatprep.subr.mxu1 %v15766_v9 }
0x11cb   :  { %v14608_v55 = vpop.f32.mrf.mxu0 }
0x11cc   :  { %9136 = vmatpush1.xpose.msk.msra.mxu1 %vm2231_vm2, %v10946_v50 }
0x11cd   :  { %v14611_v22 = vpop.f32.mrf.mxu0  ;;  %6228 = vmatprep.subr.mxu1 %v15766_v9 }
0x11cf   :  { %v14614_v12 = vpop.f32.mrf.mxu0 }
0x11d0   :  { %9137 = vmatpush1.xpose.msk.msra.mxu1 %vm2231_vm2, %v5532_v4 }
0x11d1   :  { %v14617_v13 = vpop.f32.mrf.mxu0  ;;  %6230 = vmatprep.subr.mxu1 %v15766_v9 }
0x11d3   :  { %v10961_v58 = vpop.f32.mrf.mxu0 }
0x11d4   :  { %9138 = vmatpush1.xpose.msk.msra.mxu1 %vm2231_vm2, %v10943_v8 }
0x11d5   :  { %v14621_v53 = vpop.f32.mrf.mxu0  ;;  %6232 = vmatprep.subr.mxu1 %v15766_v9 }
0x11d7   :  { %v14624_v57 = vpop.f32.mrf.mxu0 }
0x11d8   :  { %9139 = vmatpush1.xpose.msk.msra.mxu1 %vm2231_vm2, %v5522_v25 }
0x11d9   :  { %v14627_v44 = vpop.f32.mrf.mxu0  ;;  %6234 = vmatprep.subr.mxu1 %v15766_v9 }
0x11db   :  { %v14630_v28 = vpop.f32.mrf.mxu0 }
0x11dc   :  { %9140 = vmatpush1.xpose.msk.msra.mxu1 %vm2231_vm2, %v10940_v10 }
0x11dd   :  { %v14633_v51 = vpop.f32.mrf.mxu0  ;;  %6236 = vmatprep.subr.mxu1 %v15766_v9 }
0x11df   :  { %v11054_v40 = vpop.f32.mrf.mxu0 }
0x11e0   :  { %9141 = vmatpush1.xpose.msk.msra.mxu1 %vm2231_vm2, %v5512_v16 }
0x11e1   :  { %v5979_v2 = vpop.f32.mrf.mxu0  ;;  %6238 = vmatprep.subr.mxu1 %v15766_v9 }
0x11e3   :  { %v11057_v33 = vpop.f32.mrf.mxu0 }
0x11e4   :  { %9142 = vmatpush1.xpose.msk.msra.mxu1 %vm2231_vm2, %v10937_v35 }
0x11e5   :  { %v5989_v45 = vpop.f32.mrf.mxu0  ;;  %6240 = vmatprep.subr.mxu1 %v15766_v9 }
0x11e7   :  { %v11060_v32 = vpop.f32.mrf.mxu0 }
0x11e8   :  { %9143 = vmatpush1.xpose.msk.msra.mxu1 %vm2231_vm2, %v5502_v24 }
0x11e9   :  { %v5999_v60 = vpop.f32.mrf.mxu0  ;;  %6242 = vmatprep.subr.mxu1 %v15766_v9 }
0x11eb   :  { %v11063_v10 = vpop.f32.mrf.mxu0 }
0x11ec   :  { %9144 = vmatpush1.xpose.msk.msra.mxu1 %vm2231_vm2, %v10934_v21 }
0x11ed   :  { %v6009_v8 = vpop.f32.mrf.mxu0  ;;  %6244 = vmatprep.subr.mxu1 %v15766_v9 }
0x11ef   :  { %v11066_v16 = vpop.f32.mrf.mxu0 }
0x11f0   :  { %9145 = vmatpush1.xpose.msk.msra.mxu1 %vm2231_vm2, %v5492_v34 }
0x11f1   :  { %v6019_v25 = vpop.f32.mrf.mxu0  ;;  %6246 = vmatprep.subr.mxu1 %v15766_v9 }
0x11f3   :  { %v11069_v35 = vpop.f32.mrf.mxu0 }
0x11f4   :  { %9146 = vmatpush1.xpose.msk.msra.mxu1 %vm2231_vm2, %v10931_v47  ;;  %6912 = vmatpush1.msra.mxu0 %v11069_v35 }
0x11f5   :  { %v6029_v24 = vpop.f32.mrf.mxu0  ;;  %6913 = vmatprep.subr.mxu0 %v15766_v9  ;;  %6248 = vmatprep.subr.mxu1 %v15766_v9 }
0x11f6   :  { %6914 = vmatpush1.msra.mxu0 %v6029_v24 }
0x11f7   :  { %6915 = vmatprep.subr.mxu0 %v15766_v9  ;;  %v14652_v21 = vpop.f32.mrf.mxu0 }
0x11f8   :  { %9147 = vmatpush1.xpose.msk.msra.mxu1 %vm2231_vm2, %v14598_v62  ;;  %6916 = vmatpush1.msra.mxu0 %v11066_v16  ;;  %v11801_v16 = vld [vmem:[%s12931_s1 + $0x50] sm:$0xff] }
0x11f9   :  { %6917 = vmatprep.subr.mxu0 %v15766_v9  ;;  %6250 = vmatprep.subr.mxu1 %v15766_v9  ;;  %v6039_v47 = vpop.f32.mrf.mxu0 }
0x11fa   :  { %6918 = vmatpush1.msra.mxu0 %v6019_v25 }
0x11fb   :  { %6919 = vmatprep.subr.mxu0 %v15766_v9  ;;  %v11075_v62 = vpop.f32.mrf.mxu0 }
0x11fc   :  { %9148 = vmatpush1.xpose.msk.msra.mxu1 %vm2231_vm2, %v14594_v49  ;;  %6920 = vmatpush1.msra.mxu0 %v11063_v10  ;;  %v11800_v10 = vld [vmem:[%s12931_s1 + $0x58] sm:$0xff] }
0x11fd   :  { %6921 = vmatprep.subr.mxu0 %v15766_v9  ;;  %6252 = vmatprep.subr.mxu1 %v15766_v9  ;;  %v6049_v49 = vpop.f32.mrf.mxu0 }
0x11fe   :  { %6922 = vmatpush1.msra.mxu0 %v6009_v8 }
0x11ff   :  { %6923 = vmatprep.subr.mxu0 %v15766_v9 }
0x1200   :  { %9149 = vmatpush1.xpose.msk.msra.mxu1 %vm2231_vm2, %v14596_v46  ;;  %6924 = vmatpush1.msra.mxu0 %v11060_v32  ;;  %v11078_v46 = vpop.f32.mrf.mxu0 }
0x1201   :  { %6925 = vmatprep.subr.mxu0 %v15766_v9  ;;  %6270 = vmatprep.subr.mxu1 %v15766_v9 }
0x1202   :  { %6926 = vmatpush1.msra.mxu0 %v5999_v60  ;;  %v6059_v34 = vpop.f32.mrf.mxu0 }
0x1203   :  { %6927 = vmatprep.subr.mxu0 %v15766_v9 }
0x1204   :  { %9150 = vmatpush2.xpose.msk.msra.mxu1 %vm2231_vm2, %v10961_v58  ;;  %6928 = vmatpush1.msra.mxu0 %v11057_v33  ;;  %v11081_v50 = vpop.f32.mrf.mxu0 }
0x1205   :  { %6929 = vmatprep.subr.mxu0 %v15766_v9  ;;  %6272 = vmatprep.subr.mxu1 %v15766_v9 }
0x1206   :  { %6930 = vmatpush1.msra.mxu0 %v5989_v45  ;;  %v6069_v4 = vpop.f32.mrf.mxu0 }
0x1207   :  { %6931 = vmatprep.subr.mxu0 %v15766_v9 }
0x1208   :  { %9151 = vmatpush2.xpose.msk.msra.mxu1 %vm2231_vm2, %v14621_v53  ;;  %6932 = vmatpush1.msra.mxu0 %v11054_v40  ;;  %v11799_v40 = vld [vmem:[%s12931_s1 + $0x40] sm:$0xff] }
0x1209   :  { %6933 = vmatprep.subr.mxu0 %v15766_v9  ;;  %6274 = vmatprep.subr.mxu1 %v15766_v9 }
0x120a   :  { %6934 = vmatpush1.msra.mxu0 %v5979_v2 }
0x120b   :  { %6935 = vmatprep.subr.mxu0 %v15766_v9 }
0x120c   :  { %9152 = vmatpush2.xpose.msk.msra.mxu1 %vm2231_vm2, %v14614_v12  ;;  %6936 = vmatpush1.msra.mxu0 %v14630_v28  ;;  %v11797_v12 = vld [vmem:[%s12931_s1 + $0x30] sm:$0xff]  ;;  %v11798_v28 = vld [vmem:[%s12931_s1 + $0x48] sm:$0xff] }
0x120d   :  { %6937 = vmatprep.subr.mxu0 %v15766_v9  ;;  %6276 = vmatprep.subr.mxu1 %v15766_v9 }
0x120e   :  { %6938 = vmatpush1.msra.mxu0 %v14633_v51 }
0x120f   :  { %6939 = vmatprep.subr.mxu0 %v15766_v9 }
0x1210   :  { %9153 = vmatpush2.xpose.msk.msra.mxu1 %vm2231_vm2, %v14617_v13  ;;  %6940 = vmatpush1.msra.mxu0 %v14624_v57 }
0x1211   :  { %6941 = vmatprep.subr.mxu0 %v15766_v9  ;;  %6278 = vmatprep.subr.mxu1 %v15766_v9 }
0x1212   :  { %6942 = vmatpush1.msra.mxu0 %v14627_v44 }
0x1213   :  { %6959 = vmatprep.subr.mxu0 %v15766_v9 }
0x1214   :  { %9154 = vmatpush2.xpose.msk.msra.mxu1 %vm2231_vm2, %v14608_v55  ;;  %6960 = vmatpush2.msra.mxu0 %v11081_v50  ;;  %v11796_v55 = vld [vmem:[%s12931_s1 + $0x38] sm:$0xff] }
0x1215   :  { %6961 = vmatprep.subr.mxu0 %v15766_v9  ;;  %6280 = vmatprep.subr.mxu1 %v15766_v9 }
0x1216   :  { %6962 = vmatpush2.msra.mxu0 %v6069_v4 }
0x1217   :  { %6963 = vmatprep.subr.mxu0 %v15766_v9 }
0x1218   :  { %9155 = vmatpush2.xpose.msk.msra.mxu1 %vm2231_vm2, %v14611_v22  ;;  %6964 = vmatpush2.msra.mxu0 %v11078_v46  ;;  %v11803_v46 = vld [vmem:[%s12931_s1 + $0x60] sm:$0xff] }
0x1219   :  { %6965 = vmatprep.subr.mxu0 %v15766_v9  ;;  %6282 = vmatprep.subr.mxu1 %v15766_v9 }
0x121a   :  { %6966 = vmatpush2.msra.mxu0 %v6059_v34 }
0x121b   :  { %6967 = vmatprep.subr.mxu0 %v15766_v9 }
0x121c   :  { %9156 = vmatpush2.xpose.msk.msra.mxu1 %vm2231_vm2, %v14602_v20  ;;  %6968 = vmatpush2.msra.mxu0 %v11075_v62  ;;  %v11802_v62 = vld [vmem:[%s12931_s1 + $0x68] sm:$0xff] }
0x121d   :  { %6969 = vmatprep.subr.mxu0 %v15766_v9  ;;  %6284 = vmatprep.subr.mxu1 %v15766_v9 }
0x121e   :  { %6970 = vmatpush2.msra.mxu0 %v6049_v49 }
0x121f   :  { %6971 = vmatprep.subr.mxu0 %v15766_v9 }
0x1220   :  { %9157 = vmatpush2.xpose.msk.msra.mxu1 %vm2231_vm2, %v14605_v31  ;;  %6972 = vmatpush2.msra.mxu0 %v14652_v21 }
0x1221   :  { %6973 = vmatprep.subr.mxu0 %v15766_v9  ;;  %7377 = vmatprep.subr.mxu1 %v15766_v9 }
0x1222   :  { %6974 = vmatpush2.msra.mxu0 %v6039_v47 }
0x1223   :  { %9158 = vmatmul.mubr.msk.f32.vlgmr.msra.gmra.mxu1 %vm2231_vm2, %v14548_v27  ;;  %11082 = vmatprep.subr.mxu0 %v11788_v1 }
0x1224   :  { %6292 = vmatprep.mubr.f32.mxu1 %v15766_v9 }
0x1227   :  { %9159 = vmatmul.mubr.msk.f32.gmra.mxu1 %vm2231_vm2, %v14546_v5  ;;  %v11789_v5 = vld [vmem:[%s13530_s14 + $0x8] sm:$0xff] }
0x1228   :  { %6298 = vmatprep.mubr.f32.mxu1 %v15766_v9 }
0x122b   :  { %9160 = vmatmul.mubr.msk.f32.gmra.mxu1 %vm2231_vm2, %v14552_v30  ;;  %v11790_v30 = vld [vmem:[%s12931_s1 + $0x8] sm:$0xff] }
0x122c   :  { %6304 = vmatprep.mubr.f32.mxu1 %v15766_v9 }
0x122f   :  { %9161 = vmatmul.mubr.msk.f32.gmra.mxu1 %vm2231_vm2, %v14550_v52 }
0x1230   :  { %6310 = vmatprep.mubr.f32.mxu1 %v15766_v9 }
0x1233   :  { %9162 = vmatmul.mubr.msk.f32.gmra.mxu1 %vm2231_vm2, %v14556_v63  ;;  %v11791_v63 = vld [vmem:[%s12931_s1] sm:$0xff] }
0x1234   :  { %6316 = vmatprep.mubr.f32.mxu1 %v15766_v9 }
0x1237   :  { %9163 = vmatmul.mubr.msk.f32.gmra.mxu1 %vm2231_vm2, %v14554_v6 }
0x1238   :  { %6322 = vmatprep.mubr.f32.mxu1 %v15766_v9 }
0x123b   :  { %9164 = vmatmul.mubr.msk.f32.gmra.mxu1 %vm2231_vm2, %v14560_v15 }
0x123c   :  { %6328 = vmatprep.mubr.f32.mxu1 %v15766_v9 }
0x123f   :  { %9165 = vmatmul.mubr.msk.f32.gmra.mxu1 %vm2231_vm2, %v14558_v11 }
0x1240   :  { %6334 = vmatprep.mubr.f32.mxu1 %v15766_v9 }
0x1243   :  { %9166 = vmatmul.mubr.msk.f32.gmra.mxu1 %vm2231_vm2, %v14564_v48 }
0x1244   :  { %6340 = vmatprep.mubr.f32.mxu1 %v15766_v9 }
0x1247   :  { %9167 = vmatmul.mubr.msk.f32.gmra.mxu1 %vm2231_vm2, %v14562_v18 }
0x1248   :  { %6346 = vmatprep.mubr.f32.mxu1 %v15766_v9 }
0x124b   :  { %9168 = vmatmul.mubr.msk.f32.gmra.mxu1 %vm2231_vm2, %v14568_v23  ;;  %v11792_v23 = vld [vmem:[%s12931_s1 + $0x18] sm:$0xff] }
0x124c   :  { %6352 = vmatprep.mubr.f32.mxu1 %v15766_v9 }
0x124f   :  { %9169 = vmatmul.mubr.msk.f32.gmra.mxu1 %vm2231_vm2, %v14566_v29 }
0x1250   :  { %6358 = vmatprep.mubr.f32.mxu1 %v15766_v9 }
0x1253   :  { %9170 = vmatmul.mubr.msk.f32.gmra.mxu1 %vm2231_vm2, %v14572_v54  ;;  %v11793_v54 = vld [vmem:[%s12931_s1 + $0x10] sm:$0xff] }
0x1254   :  { %6364 = vmatprep.mubr.f32.mxu1 %v15766_v9 }
0x1257   :  { %9171 = vmatmul.mubr.msk.f32.gmra.mxu1 %vm2231_vm2, %v14570_v17 }
0x1258   :  { %6370 = vmatprep.mubr.f32.mxu1 %v15766_v9 }
0x125b   :  { %9172 = vmatmul.mubr.msk.f32.gmra.mxu1 %vm2231_vm2, %v14576_v3 }
0x125c   :  { %6376 = vmatprep.mubr.f32.mxu1 %v15766_v9 }
0x125f   :  { %9173 = vmatmul.mubr.msk.f32.gmra.mxu1 %vm2231_vm2, %v14574_v59 }
0x1260   :  { %6382 = vmatprep.mubr.f32.mxu1 %v15766_v9 }
0x1263   :  { %9174 = vmatmul.mubr.msk.f32.gmra.mxu1 %vm2231_vm2, %v14580_v0 }
0x1264   :  { %6388 = vmatprep.mubr.f32.mxu1 %v15766_v9 }
0x1267   :  { %9175 = vmatmul.mubr.msk.f32.gmra.mxu1 %vm2231_vm2, %v14578_v36 }
0x1268   :  { %6394 = vmatprep.mubr.f32.mxu1 %v15766_v9 }
0x126b   :  { %9176 = vmatmul.mubr.msk.f32.gmra.mxu1 %vm2231_vm2, %v14584_v19  ;;  %v11794_v19 = vld [vmem:[%s12931_s1 + $0x28] sm:$0xff] }
0x126c   :  { %6400 = vmatprep.mubr.f32.mxu1 %v15766_v9 }
0x126f   :  { %9177 = vmatmul.mubr.msk.f32.gmra.mxu1 %vm2231_vm2, %v14582_v7 }
0x1270   :  { %6406 = vmatprep.mubr.f32.mxu1 %v15766_v9 }
0x1273   :  { %9178 = vmatmul.mubr.msk.f32.gmra.mxu1 %vm2231_vm2, %v14588_v14  ;;  %v11795_v14 = vld [vmem:[%s12931_s1 + $0x20] sm:$0xff] }
0x1274   :  { %6412 = vmatprep.mubr.f32.mxu1 %v15766_v9 }
0x1277   :  { %9179 = vmatmul.mubr.msk.f32.gmra.mxu1 %vm2231_vm2, %v14586_v37 }
0x1278   :  { %6418 = vmatprep.mubr.f32.mxu1 %v15766_v9 }
0x127b   :  { %9180 = vmatmul.mubr.msk.f32.gmra.mxu1 %vm2231_vm2, %v14592_v38 }
0x127c   :  { %6424 = vmatprep.mubr.f32.mxu1 %v15766_v9 }
0x127f   :  { %9181 = vmatmul.mubr.msk.f32.gmra.mxu1 %vm2231_vm2, %v14590_v61 }
0x1280   :  { %9230 = vmatprep.mubr.msk.f32.mxu1 %vm2585_vm3, %v11789_v5 }
0x12e3   :  { %v6288_v27 = vpop.f32.mrf.mxu1 }
0x12e4   :  { %v14788_v11 = vadd.f32 %v11791_v63, %v6288_v27  ;;  %v11804_v27 = vld [vmem:[%s12931_s1 + $0x78] sm:$0xff] }
0x12e5   :  { %v6290_v52 = vpop.f32.mrf.mxu1 }
0x12e6   :  { %v14785_v6 = vadd.f32 %v11790_v30, %v6290_v52  ;;  %v11805_v30 = vld [vmem:[%s12931_s1 + $0x70] sm:$0xff] }
0x12e7   :  { %v6294_v15 = vpop.f32.mrf.mxu1 }
0x12e8   :  { %v6431_v18 = vsel %vm2585_vm3, %v14785_v6, -inf  ;;  %v14797_v59 = vadd.f32 %v11793_v54, %v6294_v15 }
0x12e9   :  { %v6296_v48 = vpop.f32.mrf.mxu1  ;;  %v6432_v29 = vmax.f32 %v14788_v11, %v6431_v18 }
0x12ea   :  { %v14794_v17 = vadd.f32 %v11792_v23, %v6296_v48  ;;  %v11806_v23 = vld [vmem:[%s12931_s1 + $0x88] sm:$0xff] }
0x12eb   :  { %v6300_v3 = vpop.f32.mrf.mxu1  ;;  %6433 = vmax.xlane.f32.xlu0 %v6432_v29 }
0x12ec   :  { %v6435_v36 = vsel %vm2585_vm3, %v14794_v17, -inf  ;;  %v14806_v61 = vadd.f32 %v11795_v14, %v6300_v3  ;;  %v11807_v3 = vld [vmem:[%s12931_s1 + $0x80] sm:$0xff] }
0x12ed   :  { %v6302_v0 = vpop.f32.mrf.mxu1  ;;  %v6436_v7 = vmax.f32 %v14797_v59, %v6435_v36 }
0x12ee   :  { %v14803_v37 = vadd.f32 %v11794_v19, %v6302_v0 }
0x12ef   :  { %v6306_v38 = vpop.f32.mrf.mxu1  ;;  %6437 = vmax.xlane.f32.xlu1 %v6436_v7 }
0x12f0   :  { %v6439_v41 = vsel %vm2585_vm3, %v14803_v37, -inf  ;;  %v14815_v13 = vadd.f32 %v11797_v12, %v6306_v38  ;;  %v11808_v38 = vld [vmem:[%s12931_s1 + $0x98] sm:$0xff] }
0x12f1   :  { %v6308_v20 = vpop.f32.mrf.mxu1  ;;  %v6440_v31 = vmax.f32 %v14806_v61, %v6439_v41 }
0x12f2   :  { %v14812_v22 = vadd.f32 %v11796_v55, %v6308_v20  ;;  %v11809_v20 = vld [vmem:[%s12931_s1 + $0x90] sm:$0xff] }
0x12f3   :  { %v6312_v58 = vpop.f32.mrf.mxu1  ;;  %6441 = vmax.xlane.f32.xlu0 %v6440_v31 }
0x12f4   :  { %v6443_v53 = vsel %vm2585_vm3, %v14812_v22, -inf  ;;  %v14824_v2 = vadd.f32 %v11799_v40, %v6312_v58 }
0x12f5   :  { %v6314_v57 = vpop.f32.mrf.mxu1  ;;  %v6444_v44 = vmax.f32 %v14815_v13, %v6443_v53 }
0x12f6   :  { %v14821_v51 = vadd.f32 %v11798_v28, %v6314_v57  ;;  %v11810_v57 = vld [vmem:[%s12931_s1 + $0xa8] sm:$0xff]  ;;  %v11811_v28 = vld [vmem:[%s12931_s1 + $0xa0] sm:$0xff] }
0x12f7   :  { %v6318_v33 = vpop.f32.mrf.mxu1  ;;  %6445 = vmax.xlane.f32.xlu1 %v6444_v44 }
0x12f8   :  { %v6447_v45 = vsel %vm2585_vm3, %v14821_v51, -inf  ;;  %v14833_v25 = vadd.f32 %v11801_v16, %v6318_v33 }
0x12f9   :  { %v6320_v32 = vpop.f32.mrf.mxu1  ;;  %v6448_v60 = vmax.f32 %v14824_v2, %v6447_v45 }
0x12fa   :  { %v14830_v8 = vadd.f32 %v11800_v10, %v6320_v32  ;;  %v11812_v10 = vld [vmem:[%s12931_s1 + $0xb8] sm:$0xff] }
0x12fb   :  { %v6324_v35 = vpop.f32.mrf.mxu1  ;;  %6449 = vmax.xlane.f32.xlu0 %v6448_v60 }
0x12fc   :  { %v6451_v24 = vsel %vm2585_vm3, %v14830_v8, -inf  ;;  %v14842_v34 = vadd.f32 %v11803_v46, %v6324_v35  ;;  %v11813_v35 = vld [vmem:[%s12931_s1 + $0xb0] sm:$0xff] }
0x12fd   :  { %v6326_v21 = vpop.f32.mrf.mxu1  ;;  %v6452_v47 = vmax.f32 %v14833_v25, %v6451_v24 }
0x12fe   :  { %v14839_v49 = vadd.f32 %v11802_v62, %v6326_v21 }
0x12ff   :  { %v6330_v50 = vpop.f32.mrf.mxu1  ;;  %6453 = vmax.xlane.f32.xlu1 %v6452_v47 }
0x1300   :  { %v6455_v4 = vsel %vm2585_vm3, %v14839_v49, -inf  ;;  %v14851_v63 = vadd.f32 %v11805_v30, %v6330_v50  ;;  %v11814_v50 = vld [vmem:[%s12931_s1 + $0xc8] sm:$0xff] }
0x1301   :  { %v6332_v1 = vpop.f32.mrf.mxu1  ;;  %v6456_v5 = vmax.f32 %v14842_v34, %v6455_v4 }
0x1302   :  { %v14848_v52 = vadd.f32 %v11804_v27, %v6332_v1  ;;  %v11815_v1 = vld [vmem:[%s12931_s1 + $0xc0] sm:$0xff] }
0x1303   :  { %v6336_v15 = vpop.f32.mrf.mxu1  ;;  %6457 = vmax.xlane.f32.xlu0 %v6456_v5 }
0x1304   :  { %v6459_v18 = vsel %vm2585_vm3, %v14848_v52, -inf  ;;  %v14860_v36 = vadd.f32 %v11807_v3, %v6336_v15 }
0x1305   :  { %v6338_v48 = vpop.f32.mrf.mxu1  ;;  %v6460_v29 = vmax.f32 %v14851_v63, %v6459_v18 }
0x1306   :  { %v14857_v54 = vadd.f32 %v11806_v23, %v6338_v48  ;;  %v11816_v48 = vld [vmem:[%s12931_s1 + $0xd8] sm:$0xff]  ;;  %v11817_v23 = vld [vmem:[%s12931_s1 + $0xd0] sm:$0xff] }
0x1307   :  { %v6342_v0 = vpop.f32.mrf.mxu1  ;;  %6461 = vmax.xlane.f32.xlu1 %v6460_v29 }
0x1308   :  { %v6463_v7 = vsel %vm2585_vm3, %v14857_v54, -inf  ;;  %v14869_v31 = vadd.f32 %v11809_v20, %v6342_v0 }
0x1309   :  { %v6344_v19 = vpop.f32.mrf.mxu1  ;;  %v6464_v14 = vmax.f32 %v14860_v36, %v6463_v7 }
0x130a   :  { %v14866_v41 = vadd.f32 %v11808_v38, %v6344_v19  ;;  %v11818_v38 = vld [vmem:[%s12931_s1 + $0xe8] sm:$0xff] }
0x130b   :  { %v6348_v55 = vpop.f32.mrf.mxu1  ;;  %6465 = vmax.xlane.f32.xlu0 %v6464_v14 }
0x130c   :  { %v6467_v12 = vsel %vm2585_vm3, %v14866_v41, -inf  ;;  %v14878_v40 = vadd.f32 %v11811_v28, %v6348_v55  ;;  %v11819_v55 = vld [vmem:[%s12931_s1 + $0xe0] sm:$0xff] }
0x130d   :  { %v6350_v58 = vpop.f32.mrf.mxu1  ;;  %v6468_v53 = vmax.f32 %v14869_v31, %v6467_v12 }
0x130e   :  { %v14875_v44 = vadd.f32 %v11810_v57, %v6350_v58 }
0x130f   :  { %v6354_v33 = vpop.f32.mrf.mxu1  ;;  %6469 = vmax.xlane.f32.xlu1 %v6468_v53 }
0x1310   :  { %v6471_v45 = vsel %vm2585_vm3, %v14875_v44, -inf  ;;  %v14887_v24 = vadd.f32 %v11813_v35, %v6354_v33  ;;  %v11820_v33 = vld [vmem:[%s12931_s1 + $0xf8] sm:$0xff] }
0x1311   :  { %v6356_v32 = vpop.f32.mrf.mxu1  ;;  %v6472_v60 = vmax.f32 %v14878_v40, %v6471_v45 }
0x1312   :  { %v14884_v16 = vadd.f32 %v11812_v10, %v6356_v32  ;;  %v11821_v32 = vld [vmem:[%s12931_s1 + $0xf0] sm:$0xff] }
0x1313   :  { %v6360_v21 = vpop.f32.mrf.mxu1  ;;  %6473 = vmax.xlane.f32.xlu0 %v6472_v60 }
0x1314   :  { %v6475_v47 = vsel %vm2585_vm3, %v14884_v16, -inf  ;;  %v14896_v5 = vadd.f32 %v11815_v1, %v6360_v21 }
0x1315   :  { %v6362_v62 = vpop.f32.mrf.mxu1  ;;  %v6476_v46 = vmax.f32 %v14887_v24, %v6475_v47 }
0x1316   :  { %v14893_v4 = vadd.f32 %v11814_v50, %v6362_v62  ;;  %v11822_v62 = vld [vmem:[%s12931_s1 + $0x108] sm:$0xff]  ;;  %v11823_v50 = vld [vmem:[%s12931_s1 + $0x100] sm:$0xff] }
0x1317   :  { %v6366_v27 = vpop.f32.mrf.mxu1  ;;  %6477 = vmax.xlane.f32.xlu1 %v6476_v46 }
0x1318   :  { %v6479_v30 = vsel %vm2585_vm3, %v14893_v4, -inf  ;;  %v14905_v3 = vadd.f32 %v11817_v23, %v6366_v27 }
0x1319   :  { %v6368_v15 = vpop.f32.mrf.mxu1  ;;  %v6480_v18 = vmax.f32 %v14896_v5, %v6479_v30 }
0x131a   :  { %v14902_v29 = vadd.f32 %v11816_v48, %v6368_v15  ;;  %v11824_v48 = vld [vmem:[%s12931_s1 + $0x118] sm:$0xff] }
0x131b   :  { %v6372_v0 = vpop.f32.mrf.mxu1  ;;  %6481 = vmax.xlane.f32.xlu0 %v6480_v18 }
0x131c   :  { %v6483_v7 = vsel %vm2585_vm3, %v14902_v29, -inf  ;;  %v14914_v12 = vadd.f32 %v11819_v55, %v6372_v0  ;;  %v11825_v0 = vld [vmem:[%s12931_s1 + $0x110] sm:$0xff] }
0x131d   :  { %v6374_v19 = vpop.f32.mrf.mxu1  ;;  %v6484_v14 = vmax.f32 %v14905_v3, %v6483_v7 }
0x131e   :  { %v14911_v20 = vadd.f32 %v11818_v38, %v6374_v19 }
0x131f   :  { %v6378_v58 = vpop.f32.mrf.mxu1  ;;  %6485 = vmax.xlane.f32.xlu1 %v6484_v14 }
0x1320   :  { %v6487_v53 = vsel %vm2585_vm3, %v14911_v20, -inf  ;;  %v14923_v60 = vadd.f32 %v11821_v32, %v6378_v58  ;;  %v11826_v58 = vld [vmem:[%s12931_s1 + $0x128] sm:$0xff] }
0x1321   :  { %v6380_v57 = vpop.f32.mrf.mxu1  ;;  %v6488_v28 = vmax.f32 %v14914_v12, %v6487_v53 }
0x1322   :  { %v14920_v45 = vadd.f32 %v11820_v33, %v6380_v57  ;;  %v11827_v57 = vld [vmem:[%s12931_s1 + $0x120] sm:$0xff] }
0x1323   :  { %v6384_v10 = vpop.f32.mrf.mxu1  ;;  %6489 = vmax.xlane.f32.xlu0 %v6488_v28 }
0x1324   :  { %v6491_v35 = vsel %vm2585_vm3, %v14920_v45, -inf  ;;  %v14932_v1 = vadd.f32 %v11823_v50, %v6384_v10 }
0x1325   :  { %v6386_v21 = vpop.f32.mrf.mxu1  ;;  %v6492_v47 = vmax.f32 %v14923_v60, %v6491_v35 }
0x1326   :  { %v14929_v46 = vadd.f32 %v11822_v62, %v6386_v21  ;;  %v11828_v21 = vld [vmem:[%s12931_s1 + $0x138] sm:$0xff]  ;;  %v11829_v62 = vld [vmem:[%s12931_s1 + $0x130] sm:$0xff] }
0x1327   :  { %v6390_v27 = vpop.f32.mrf.mxu1  ;;  %6493 = vmax.xlane.f32.xlu1 %v6492_v47 }
0x1328   :  { %v6495_v30 = vsel %vm2585_vm3, %v14929_v46, -inf  ;;  %v14941_v7 = vadd.f32 %v11825_v0, %v6390_v27 }
0x1329   :  { %v6392_v15 = vpop.f32.mrf.mxu1  ;;  %v6496_v18 = vmax.f32 %v14932_v1, %v6495_v30 }
0x132a   :  { %v14938_v23 = vadd.f32 %v11824_v48, %v6392_v15  ;;  %v11830_v48 = vld [vmem:[%s12931_s1 + $0x148] sm:$0xff] }
0x132b   :  { %v6396_v19 = vpop.f32.mrf.mxu1  ;;  %6497 = vmax.xlane.f32.xlu0 %v6496_v18 }
0x132c   :  { %v6499_v14 = vsel %vm2585_vm3, %v14938_v23, -inf  ;;  %v14950_v28 = vadd.f32 %v11827_v57, %v6396_v19  ;;  %v11831_v19 = vld [vmem:[%s12931_s1 + $0x140] sm:$0xff] }
0x132d   :  { %v6398_v38 = vpop.f32.mrf.mxu1  ;;  %v6500_v55 = vmax.f32 %v14941_v7, %v6499_v14 }
0x132e   :  { %v14947_v53 = vadd.f32 %v11826_v58, %v6398_v38 }
0x132f   :  { %v6402_v33 = vpop.f32.mrf.mxu1  ;;  %6501 = vmax.xlane.f32.xlu1 %v6500_v55 }
0x1330   :  { %v6503_v32 = vsel %vm2585_vm3, %v14947_v53, -inf  ;;  %v14959_v50 = vadd.f32 %v11829_v62, %v6402_v33  ;;  %v11832_v33 = vld [vmem:[%s12931_s1 + $0x158] sm:$0xff] }
0x1331   :  { %v6404_v10 = vpop.f32.mrf.mxu1  ;;  %v6504_v35 = vmax.f32 %v14950_v28, %v6503_v32 }
0x1332   :  { %v14956_v47 = vadd.f32 %v11828_v21, %v6404_v10  ;;  %v11833_v10 = vld [vmem:[%s12931_s1 + $0x150] sm:$0xff] }
0x1333   :  { %v6408_v27 = vpop.f32.mrf.mxu1  ;;  %6505 = vmax.xlane.f32.xlu0 %v6504_v35 }
0x1334   :  { %v6507_v30 = vsel %vm2585_vm3, %v14956_v47, -inf  ;;  %v14968_v14 = vadd.f32 %v11831_v19, %v6408_v27 }
0x1335   :  { %v6410_v15 = vpop.f32.mrf.mxu1  ;;  %v6508_v18 = vmax.f32 %v14959_v50, %v6507_v30 }
0x1336   :  { %v14965_v0 = vadd.f32 %v11830_v48, %v6410_v15  ;;  %v11834_v15 = vld [vmem:[%s12931_s1 + $0x168] sm:$0xff]  ;;  %v11835_v48 = vld [vmem:[%s12931_s1 + $0x160] sm:$0xff] }
0x1337   :  { %v6414_v38 = vpop.f32.mrf.mxu1  ;;  %6509 = vmax.xlane.f32.xlu1 %v6508_v18 }
0x1338   :  { %v6511_v55 = vsel %vm2585_vm3, %v14965_v0, -inf  ;;  %v14977_v35 = vadd.f32 %v11833_v10, %v6414_v38 }
0x1339   :  { %v6416_v58 = vpop.f32.mrf.mxu1  ;;  %v6512_v57 = vmax.f32 %v14968_v14, %v6511_v55 }
0x133a   :  { %v14974_v32 = vadd.f32 %v11832_v33, %v6416_v58  ;;  %v11836_v33 = vld [vmem:[%s12931_s1 + $0x178] sm:$0xff] }
0x133b   :  { %v6420_v21 = vpop.f32.mrf.mxu1  ;;  %6513 = vmax.xlane.f32.xlu0 %v6512_v57 }
0x133c   :  { %v6515_v62 = vsel %vm2585_vm3, %v14974_v32, -inf  ;;  %v14986_v19 = vadd.f32 %v11835_v48, %v6420_v21 }
0x133d   :  { %v6422_v27 = vpop.f32.mrf.mxu1  ;;  %v6516_v30 = vmax.f32 %v14977_v35, %v6515_v62 }
0x133e   :  { %v14983_v18 = vadd.f32 %v11834_v15, %v6422_v27 }
0x133f   :  { %v6426_v55 = vpop.f32.mrf.mxu1  ;;  %6517 = vmax.xlane.f32.xlu1 %v6516_v30 }
0x1340   :  { %v6519_v38 = vsel %vm2585_vm3, %v14983_v18, -inf  ;;  %v14995_v42 = vadd.f32 %v11837_v39, %v6426_v55 }
0x1341   :  { %v6428_v58 = vpop.f32.mrf.mxu1  ;;  %v6520_v57 = vmax.f32 %v14986_v19, %v6519_v38 }
0x1342   :  { %v14992_v10 = vadd.f32 %v11836_v33, %v6428_v58 }
0x1343   :  { %6521 = vmax.xlane.f32.xlu0 %v6520_v57 }
0x1344   :  { %v6523_v62 = vsel %vm2585_vm3, %v14992_v10, -inf }
0x1345   :  { %v6524_v21 = vmax.f32 %v14995_v42, %v6523_v62 }
0x1347   :  { %6525 = vmax.xlane.f32.xlu0 %v6524_v21 }
0x1374   :  { %v6434_v27 = vpop.xlane.xlu0 %6433 }
0x1375   :  { %v6527_v30 = vsub.f32 %v14788_v11, %v6434_v27  ;;  %v6528_v15 = vsub.f32 %v14785_v6, %v6434_v27 }
0x1377   :  { %v6575_v48 = vmul.f32 1.442695, %v6527_v30  ;;  %v6577_v38 = vmul.f32 1.442695, %v6528_v15 }
0x1378   :  { %v6438_v43 = vpop.xlane.xlu1 %6437 }
0x1379   :  { %11518 = vpow2.f32 %v6575_v48  ;;  %v6529_v58 = vsub.f32 %v14797_v59, %v6438_v43  ;;  %v6530_v39 = vsub.f32 %v14794_v17, %v6438_v43 }
0x137a   :  { %11520 = vpow2.f32 %v6577_v38 }
0x137b   :  { %v6579_v55 = vmul.f32 1.442695, %v6529_v58  ;;  %v6581_v57 = vmul.f32 1.442695, %v6530_v39 }
0x137c   :  { %v6442_v33 = vpop.xlane.xlu0 %6441 }
0x137d   :  { %11522 = vpow2.f32 %v6579_v55  ;;  %v6531_v62 = vsub.f32 %v14806_v61, %v6442_v33  ;;  %v6532_v21 = vsub.f32 %v14803_v37, %v6442_v33 }
0x137e   :  { %11524 = vpow2.f32 %v6581_v57 }
0x137f   :  { %v6583_v11 = vmul.f32 1.442695, %v6531_v62  ;;  %v6585_v6 = vmul.f32 1.442695, %v6532_v21 }
0x1380   :  { %v6446_v27 = vpop.xlane.xlu1 %6445 }
0x1381   :  { %11526 = vpow2.f32 %v6583_v11  ;;  %v6533_v30 = vsub.f32 %v14815_v13, %v6446_v27  ;;  %v6534_v59 = vsub.f32 %v14812_v22, %v6446_v27 }
0x1382   :  { %11528 = vpow2.f32 %v6585_v6 }
0x1383   :  { %v6587_v43 = vmul.f32 1.442695, %v6533_v30  ;;  %v6589_v17 = vmul.f32 1.442695, %v6534_v59 }
0x1384   :  { %v6450_v15 = vpop.xlane.xlu0 %6449 }
0x1385   :  { %11530 = vpow2.f32 %v6587_v43  ;;  %v6535_v48 = vsub.f32 %v14824_v2, %v6450_v15  ;;  %v6536_v61 = vsub.f32 %v14821_v51, %v6450_v15 }
0x1386   :  { %v15010_v38 = vpop.eup %11518  ;;  %11532 = vpow2.f32 %v6589_v17 }
0x1387   :  { %v15012_v37 = vpop.eup %11520  ;;  %v6591_v58 = vmul.f32 1.442695, %v6535_v48  ;;  %v6593_v39 = vmul.f32 1.442695, %v6536_v61 }
0x1388   :  { %v6454_v55 = vpop.xlane.xlu1 %6453  ;;  %v6671_v22 = vsel %vm2585_vm3, %v15012_v37, 0.0 }
0x1389   :  { %11534 = vpow2.f32 %v6591_v58  ;;  %v6537_v13 = vsub.f32 %v14833_v25, %v6454_v55  ;;  %v6538_v57 = vsub.f32 %v14830_v8, %v6454_v55  ;;  %v6672_v2 = vadd.f32 %v15010_v38, %v6671_v22 }
0x138a   :  { %v15019_v33 = vpop.eup %11522  ;;  %11536 = vpow2.f32 %v6593_v39 }
0x138b   :  { %v15021_v51 = vpop.eup %11524  ;;  %v6595_v62 = vmul.f32 1.442695, %v6537_v13  ;;  %v6597_v21 = vmul.f32 1.442695, %v6538_v57  ;;  %6673 = vadd.xlane.f32.xlu1 %v6672_v2 }
0x138c   :  { %v6458_v11 = vpop.xlane.xlu0 %6457  ;;  %v6675_v6 = vsel %vm2585_vm3, %v15021_v51, 0.0 }
0x138d   :  { %11538 = vpow2.f32 %v6595_v62  ;;  %v6539_v27 = vsub.f32 %v14842_v34, %v6458_v11  ;;  %v6540_v25 = vsub.f32 %v14839_v49, %v6458_v11  ;;  %v6676_v8 = vadd.f32 %v15019_v33, %v6675_v6 }
0x138e   :  { %v15028_v30 = vpop.eup %11526  ;;  %11540 = vpow2.f32 %v6597_v21 }
0x138f   :  { %v15030_v59 = vpop.eup %11528  ;;  %v6599_v43 = vmul.f32 1.442695, %v6539_v27  ;;  %v6601_v17 = vmul.f32 1.442695, %v6540_v25  ;;  %6677 = vadd.xlane.f32.xlu1 %v6676_v8 }
0x1390   :  { %v6462_v15 = vpop.xlane.xlu1 %6461  ;;  %v6679_v48 = vsel %vm2585_vm3, %v15030_v59, 0.0 }
0x1391   :  { %11542 = vpow2.f32 %v6599_v43  ;;  %v6541_v61 = vsub.f32 %v14851_v63, %v6462_v15  ;;  %v6542_v34 = vsub.f32 %v14848_v52, %v6462_v15  ;;  %v6680_v49 = vadd.f32 %v15028_v30, %v6679_v48 }
0x1392   :  { %v15037_v58 = vpop.eup %11530  ;;  %11544 = vpow2.f32 %v6601_v17 }
0x1393   :  { %v15039_v39 = vpop.eup %11532  ;;  %v6603_v55 = vmul.f32 1.442695, %v6541_v61  ;;  %v6605_v22 = vmul.f32 1.442695, %v6542_v34  ;;  %6681 = vadd.xlane.f32.xlu0 %v6680_v49 }
0x1394   :  { %v6466_v13 = vpop.xlane.xlu0 %6465  ;;  %v6683_v57 = vsel %vm2585_vm3, %v15039_v39, 0.0 }
0x1395   :  { %11546 = vpow2.f32 %v6603_v55  ;;  %v6543_v2 = vsub.f32 %v14860_v36, %v6466_v13  ;;  %v6544_v63 = vsub.f32 %v14857_v54, %v6466_v13  ;;  %v6684_v52 = vadd.f32 %v15037_v58, %v6683_v57 }
0x1396   :  { %v15046_v62 = vpop.eup %11534  ;;  %11548 = vpow2.f32 %v6605_v22 }
0x1397   :  { %v15048_v21 = vpop.eup %11536  ;;  %v6607_v11 = vmul.f32 1.442695, %v6543_v2  ;;  %v6609_v6 = vmul.f32 1.442695, %v6544_v63  ;;  %6685 = vadd.xlane.f32.xlu1 %v6684_v52 }
0x1398   :  { %v6470_v27 = vpop.xlane.xlu1 %6469  ;;  %v6687_v25 = vsel %vm2585_vm3, %v15048_v21, 0.0 }
0x1399   :  { %11550 = vpow2.f32 %v6607_v11  ;;  %v6545_v8 = vsub.f32 %v14869_v31, %v6470_v27  ;;  %v6546_v36 = vsub.f32 %v14866_v41, %v6470_v27  ;;  %v6688_v54 = vadd.f32 %v15046_v62, %v6687_v25 }
0x139a   :  { %v15055_v43 = vpop.eup %11538  ;;  %11552 = vpow2.f32 %v6609_v6 }
0x139b   :  { %v15057_v17 = vpop.eup %11540  ;;  %v6611_v15 = vmul.f32 1.442695, %v6545_v8  ;;  %v6613_v48 = vmul.f32 1.442695, %v6546_v36  ;;  %6689 = vadd.xlane.f32.xlu0 %v6688_v54 }
0x139c   :  { %v6474_v61 = vpop.xlane.xlu0 %6473  ;;  %v6691_v34 = vsel %vm2585_vm3, %v15057_v17, 0.0 }
0x139d   :  { %11554 = vpow2.f32 %v6611_v15  ;;  %v6547_v49 = vsub.f32 %v14878_v40, %v6474_v61  ;;  %v6548_v31 = vsub.f32 %v14875_v44, %v6474_v61  ;;  %v6692_v41 = vadd.f32 %v15055_v43, %v6691_v34 }
0x139e   :  { %v15064_v55 = vpop.eup %11542  ;;  %11556 = vpow2.f32 %v6613_v48 }
0x139f   :  { %v15066_v22 = vpop.eup %11544  ;;  %v6615_v13 = vmul.f32 1.442695, %v6547_v49  ;;  %v6617_v57 = vmul.f32 1.442695, %v6548_v31  ;;  %6693 = vadd.xlane.f32.xlu1 %v6692_v41 }
0x13a0   :  { %v6478_v2 = vpop.xlane.xlu1 %6477  ;;  %v6695_v63 = vsel %vm2585_vm3, %v15066_v22, 0.0 }
0x13a1   :  { %11558 = vpow2.f32 %v6615_v13  ;;  %v6549_v52 = vsub.f32 %v14887_v24, %v6478_v2  ;;  %v6550_v40 = vsub.f32 %v14884_v16, %v6478_v2  ;;  %v6696_v44 = vadd.f32 %v15064_v55, %v6695_v63 }
0x13a2   :  { %v15073_v11 = vpop.eup %11546  ;;  %11560 = vpow2.f32 %v6617_v57 }
0x13a3   :  { %v15075_v6 = vpop.eup %11548  ;;  %v6619_v27 = vmul.f32 1.442695, %v6549_v52  ;;  %v6621_v25 = vmul.f32 1.442695, %v6550_v40  ;;  %6697 = vadd.xlane.f32.xlu0 %v6696_v44 }
0x13a4   :  { %v6482_v8 = vpop.xlane.xlu0 %6481  ;;  %v6699_v36 = vsel %vm2585_vm3, %v15075_v6, 0.0 }
0x13a5   :  { %11562 = vpow2.f32 %v6619_v27  ;;  %v6551_v54 = vsub.f32 %v14896_v5, %v6482_v8  ;;  %v6552_v24 = vsub.f32 %v14893_v4, %v6482_v8  ;;  %v6700_v16 = vadd.f32 %v15073_v11, %v6699_v36 }
0x13a6   :  { %v15082_v15 = vpop.eup %11550  ;;  %11564 = vpow2.f32 %v6621_v25 }
0x13a7   :  { %v15084_v48 = vpop.eup %11552  ;;  %v6623_v61 = vmul.f32 1.442695, %v6551_v54  ;;  %v6625_v34 = vmul.f32 1.442695, %v6552_v24  ;;  %6701 = vadd.xlane.f32.xlu1 %v6700_v16 }
0x13a8   :  { %v6486_v49 = vpop.xlane.xlu1 %6485  ;;  %v6703_v31 = vsel %vm2585_vm3, %v15084_v48, 0.0 }
0x13a9   :  { %11566 = vpow2.f32 %v6623_v61  ;;  %v6553_v41 = vsub.f32 %v14905_v3, %v6486_v49  ;;  %v6554_v5 = vsub.f32 %v14902_v29, %v6486_v49  ;;  %v6704_v4 = vadd.f32 %v15082_v15, %v6703_v31 }
0x13aa   :  { %v15091_v13 = vpop.eup %11554  ;;  %11568 = vpow2.f32 %v6625_v34 }
0x13ab   :  { %v15093_v57 = vpop.eup %11556  ;;  %v6627_v2 = vmul.f32 1.442695, %v6553_v41  ;;  %v6629_v63 = vmul.f32 1.442695, %v6554_v5  ;;  %6705 = vadd.xlane.f32.xlu0 %v6704_v4 }
0x13ac   :  { %v6490_v52 = vpop.xlane.xlu0 %6489  ;;  %v6707_v40 = vsel %vm2585_vm3, %v15093_v57, 0.0 }
0x13ad   :  { %11570 = vpow2.f32 %v6627_v2  ;;  %v6555_v44 = vsub.f32 %v14914_v12, %v6490_v52  ;;  %v6556_v3 = vsub.f32 %v14911_v20, %v6490_v52  ;;  %v6708_v29 = vadd.f32 %v15091_v13, %v6707_v40 }
0x13ae   :  { %v15100_v27 = vpop.eup %11558  ;;  %11572 = vpow2.f32 %v6629_v63 }
0x13af   :  { %v15102_v25 = vpop.eup %11560  ;;  %v6631_v8 = vmul.f32 1.442695, %v6555_v44  ;;  %v6633_v36 = vmul.f32 1.442695, %v6556_v3  ;;  %6709 = vadd.xlane.f32.xlu1 %v6708_v29 }
0x13b0   :  { %v6494_v54 = vpop.xlane.xlu1 %6493  ;;  %v6711_v24 = vsel %vm2585_vm3, %v15102_v25, 0.0 }
0x13b1   :  { %11574 = vpow2.f32 %v6631_v8  ;;  %v6557_v16 = vsub.f32 %v14923_v60, %v6494_v54  ;;  %v6558_v12 = vsub.f32 %v14920_v45, %v6494_v54  ;;  %v6712_v20 = vadd.f32 %v15100_v27, %v6711_v24 }
0x13b2   :  { %v15109_v61 = vpop.eup %11562  ;;  %11576 = vpow2.f32 %v6633_v36 }
0x13b3   :  { %v15111_v34 = vpop.eup %11564  ;;  %v6635_v49 = vmul.f32 1.442695, %v6557_v16  ;;  %v6637_v31 = vmul.f32 1.442695, %v6558_v12  ;;  %6713 = vadd.xlane.f32.xlu0 %v6712_v20 }
0x13b4   :  { %v6498_v41 = vpop.xlane.xlu0 %6497  ;;  %v6715_v5 = vsel %vm2585_vm3, %v15111_v34, 0.0 }
0x13b5   :  { %11578 = vpow2.f32 %v6635_v49  ;;  %v6559_v4 = vsub.f32 %v14932_v1, %v6498_v41  ;;  %v6560_v60 = vsub.f32 %v14929_v46, %v6498_v41  ;;  %v6716_v45 = vadd.f32 %v15109_v61, %v6715_v5 }
0x13b6   :  { %v15118_v2 = vpop.eup %11566  ;;  %11580 = vpow2.f32 %v6637_v31 }
0x13b7   :  { %v15120_v63 = vpop.eup %11568  ;;  %v6639_v52 = vmul.f32 1.442695, %v6559_v4  ;;  %v6641_v40 = vmul.f32 1.442695, %v6560_v60  ;;  %6717 = vadd.xlane.f32.xlu1 %v6716_v45 }
0x13b8   :  { %v6502_v44 = vpop.xlane.xlu1 %6501  ;;  %v6719_v3 = vsel %vm2585_vm3, %v15120_v63, 0.0 }
0x13b9   :  { %11582 = vpow2.f32 %v6639_v52  ;;  %v6561_v29 = vsub.f32 %v14941_v7, %v6502_v44  ;;  %v6562_v1 = vsub.f32 %v14938_v23, %v6502_v44  ;;  %v6720_v46 = vadd.f32 %v15118_v2, %v6719_v3 }
0x13ba   :  { %v15127_v8 = vpop.eup %11570  ;;  %11584 = vpow2.f32 %v6641_v40 }
0x13bb   :  { %v15129_v36 = vpop.eup %11572  ;;  %v6643_v54 = vmul.f32 1.442695, %v6561_v29  ;;  %v6645_v24 = vmul.f32 1.442695, %v6562_v1  ;;  %6721 = vadd.xlane.f32.xlu0 %v6720_v46 }
0x13bc   :  { %v6506_v16 = vpop.xlane.xlu0 %6505  ;;  %v6723_v12 = vsel %vm2585_vm3, %v15129_v36, 0.0 }
0x13bd   :  { %11586 = vpow2.f32 %v6643_v54  ;;  %v6563_v20 = vsub.f32 %v14950_v28, %v6506_v16  ;;  %v6564_v7 = vsub.f32 %v14947_v53, %v6506_v16  ;;  %v6724_v23 = vadd.f32 %v15127_v8, %v6723_v12 }
0x13be   :  { %v15136_v49 = vpop.eup %11574  ;;  %11588 = vpow2.f32 %v6645_v24 }
0x13bf   :  { %v15138_v31 = vpop.eup %11576  ;;  %v6647_v41 = vmul.f32 1.442695, %v6563_v20  ;;  %v6649_v5 = vmul.f32 1.442695, %v6564_v7  ;;  %6725 = vadd.xlane.f32.xlu1 %v6724_v23 }
0x13c0   :  { %v6510_v4 = vpop.xlane.xlu1 %6509  ;;  %v6727_v60 = vsel %vm2585_vm3, %v15138_v31, 0.0 }
0x13c1   :  { %11590 = vpow2.f32 %v6647_v41  ;;  %v6565_v45 = vsub.f32 %v14959_v50, %v6510_v4  ;;  %v6566_v28 = vsub.f32 %v14956_v47, %v6510_v4  ;;  %v6728_v53 = vadd.f32 %v15136_v49, %v6727_v60 }
0x13c2   :  { %v15145_v52 = vpop.eup %11578  ;;  %11592 = vpow2.f32 %v6649_v5 }
0x13c3   :  { %v15147_v40 = vpop.eup %11580  ;;  %v6651_v44 = vmul.f32 1.442695, %v6565_v45  ;;  %v6653_v3 = vmul.f32 1.442695, %v6566_v28  ;;  %6729 = vadd.xlane.f32.xlu0 %v6728_v53 }
0x13c4   :  { %v6514_v29 = vpop.xlane.xlu0 %6513  ;;  %v6731_v1 = vsel %vm2585_vm3, %v15147_v40, 0.0 }
0x13c5   :  { %11594 = vpow2.f32 %v6651_v44  ;;  %v6567_v46 = vsub.f32 %v14968_v14, %v6514_v29  ;;  %v6568_v50 = vsub.f32 %v14965_v0, %v6514_v29  ;;  %v6732_v47 = vadd.f32 %v15145_v52, %v6731_v1 }
0x13c6   :  { %v15154_v54 = vpop.eup %11582  ;;  %11596 = vpow2.f32 %v6653_v3 }
0x13c7   :  { %v15156_v24 = vpop.eup %11584  ;;  %v6655_v16 = vmul.f32 1.442695, %v6567_v46  ;;  %v6657_v12 = vmul.f32 1.442695, %v6568_v50  ;;  %6733 = vadd.xlane.f32.xlu1 %v6732_v47 }
0x13c8   :  { %v6518_v20 = vpop.xlane.xlu1 %6517  ;;  %v6735_v7 = vsel %vm2585_vm3, %v15156_v24, 0.0 }
0x13c9   :  { %11598 = vpow2.f32 %v6655_v16  ;;  %v6569_v23 = vsub.f32 %v14977_v35, %v6518_v20  ;;  %v6570_v14 = vsub.f32 %v14974_v32, %v6518_v20  ;;  %v6736_v0 = vadd.f32 %v15154_v54, %v6735_v7 }
0x13ca   :  { %v15163_v41 = vpop.eup %11586  ;;  %11600 = vpow2.f32 %v6657_v12 }
0x13cb   :  { %v15165_v5 = vpop.eup %11588  ;;  %v6659_v4 = vmul.f32 1.442695, %v6569_v23  ;;  %v6661_v60 = vmul.f32 1.442695, %v6570_v14  ;;  %6737 = vadd.xlane.f32.xlu0 %v6736_v0 }
0x13cc   :  { %v6522_v45 = vpop.xlane.xlu0 %6521  ;;  %v6739_v28 = vsel %vm2585_vm3, %v15165_v5, 0.0 }
0x13cd   :  { %11602 = vpow2.f32 %v6659_v4  ;;  %v6571_v53 = vsub.f32 %v14986_v19, %v6522_v45  ;;  %v6572_v35 = vsub.f32 %v14983_v18, %v6522_v45  ;;  %v6740_v32 = vadd.f32 %v15163_v41, %v6739_v28 }
0x13ce   :  { %v15172_v44 = vpop.eup %11590  ;;  %11604 = vpow2.f32 %v6661_v60 }
0x13cf   :  { %v15174_v3 = vpop.eup %11592  ;;  %v6663_v29 = vmul.f32 1.442695, %v6571_v53  ;;  %v6665_v1 = vmul.f32 1.442695, %v6572_v35  ;;  %6741 = vadd.xlane.f32.xlu1 %v6740_v32 }
0x13d0   :  { %v6526_v46 = vpop.xlane.xlu0 %6525  ;;  %v6743_v50 = vsel %vm2585_vm3, %v15174_v3, 0.0 }
0x13d1   :  { %11606 = vpow2.f32 %v6663_v29  ;;  %v6573_v47 = vsub.f32 %v14995_v42, %v6526_v46  ;;  %v6574_v19 = vsub.f32 %v14992_v10, %v6526_v46  ;;  %v6744_v18 = vadd.f32 %v15172_v44, %v6743_v50 }
0x13d2   :  { %v15181_v16 = vpop.eup %11594  ;;  %11608 = vpow2.f32 %v6665_v1 }
0x13d3   :  { %v15183_v12 = vpop.eup %11596  ;;  %v6667_v20 = vmul.f32 1.442695, %v6573_v47  ;;  %v6669_v7 = vmul.f32 1.442695, %v6574_v19  ;;  %6745 = vadd.xlane.f32.xlu0 %v6744_v18 }
0x13d4   :  { %v6747_v23 = vsel %vm2585_vm3, %v15183_v12, 0.0 }
0x13d5   :  { %11610 = vpow2.f32 %v6667_v20  ;;  %v6748_v14 = vadd.f32 %v15181_v16, %v6747_v23 }
0x13d6   :  { %v15188_v0 = vpop.eup %11598  ;;  %11612 = vpow2.f32 %v6669_v7 }
0x13d7   :  { %v15190_v42 = vpop.eup %11600  ;;  %6749 = vadd.xlane.f32.xlu1 %v6748_v14 }
0x13d8   :  { %v6751_v10 = vsel %vm2585_vm3, %v15190_v42, 0.0 }
0x13d9   :  { %v6752_v4 = vadd.f32 %v15188_v0, %v6751_v10 }
0x13da   :  { %v15195_v60 = vpop.eup %11602 }
0x13db   :  { %v15197_v45 = vpop.eup %11604  ;;  %6753 = vadd.xlane.f32.xlu0 %v6752_v4 }
0x13dc   :  { %v6755_v28 = vsel %vm2585_vm3, %v15197_v45, 0.0 }
0x13dd   :  { %v6756_v53 = vadd.f32 %v15195_v60, %v6755_v28 }
0x13de   :  { %v15202_v35 = vpop.eup %11606 }
0x13df   :  { %v15204_v32 = vpop.eup %11608  ;;  %6757 = vadd.xlane.f32.xlu1 %v6756_v53 }
0x13e0   :  { %v6759_v29 = vsel %vm2585_vm3, %v15204_v32, 0.0 }
0x13e1   :  { %v6760_v1 = vadd.f32 %v15202_v35, %v6759_v29 }
0x13e2   :  { %v15209_v46 = vpop.eup %11610 }
0x13e3   :  { %v15211_v50 = vpop.eup %11612  ;;  %6761 = vadd.xlane.f32.xlu0 %v6760_v1 }
0x13e4   :  { %v6763_v47 = vsel %vm2585_vm3, %v15211_v50, 0.0 }
0x13e5   :  { %v6764_v19 = vadd.f32 %v15209_v46, %v6763_v47  ;;  %v11838_v47 = vld [vmem:[%s13368_s7] sm:$0xff]  ;;  %s15690_s7 = sld [smem:[%s15757_s0 + %s11908_s21]]  }
0x13e7   :  { %6765 = vadd.xlane.f32.xlu1 %v6764_v19 }
0x1414   :  { %v6674_v18 = vpop.xlane.xlu1 %6673 }
0x1415   :  { %11614 = vrcp.f32 %v6674_v18  ;;  %v15223_v18 = vld [vmem:[%s11921_s6 + $0x58] sm:$0xff] }
0x1418   :  { %v6678_v20 = vpop.xlane.xlu1 %6677 }
0x1419   :  { %11616 = vrcp.f32 %v6678_v20 }
0x141c   :  { %v6682_v7 = vpop.xlane.xlu0 %6681 }
0x141d   :  { %11618 = vrcp.f32 %v6682_v7 }
0x1420   :  { %v6686_v23 = vpop.xlane.xlu1 %6685 }
0x1421   :  { %11620 = vrcp.f32 %v6686_v23 }
0x1422   :  { %v11615_v14 = vpop.eup %11614 }
0x1423   :  { %v6768_v10 = vmul.f32 %v11615_v14, %v15010_v38  ;;  %v6769_v4 = vmul.f32 %v11615_v14, %v15012_v37 }
0x1424   :  { %v6690_v28 = vpop.xlane.xlu0 %6689 }
0x1425   :  { %11622 = vrcp.f32 %v6690_v28  ;;  %9182 = vmatprep.mubr.msk.f32.mxu0 %vm2585_vm3, %v6769_v4 }
0x1426   :  { %v11617_v53 = vpop.eup %11616  ;;  %6976 = vmatmul.mubr.f32.vlgmr.msra.gmra.mxu0 %v6768_v10 }
0x1427   :  { %v6772_v29 = vmul.f32 %v11617_v53, %v15021_v51  ;;  %v6771_v1 = vmul.f32 %v11617_v53, %v15019_v33  ;;  %11083 = vmatpush3.msra.mxu0 %v11838_v47 }
0x1428   :  { %v6694_v19 = vpop.xlane.xlu1 %6693  ;;  %11147 = vmatprep.subr.mxu0 %v15223_v18 }
0x1429   :  { %11624 = vrcp.f32 %v6694_v19  ;;  %9183 = vmatprep.mubr.msk.f32.mxu0 %vm2585_vm3, %v6772_v29 }
0x142a   :  { %v11619_v38 = vpop.eup %11618  ;;  %6981 = vmatmul.mubr.f32.gmra.mxu0 %v6771_v1 }
0x142b   :  { %v6775_v37 = vmul.f32 %v11619_v38, %v15030_v59  ;;  %v6774_v20 = vmul.f32 %v11619_v38, %v15028_v30 }
0x142c   :  { %v6698_v7 = vpop.xlane.xlu0 %6697 }
0x142d   :  { %11626 = vrcp.f32 %v6698_v7  ;;  %9184 = vmatprep.mubr.msk.f32.mxu0 %vm2585_vm3, %v6775_v37 }
0x142e   :  { %v11621_v33 = vpop.eup %11620  ;;  %6986 = vmatmul.mubr.f32.gmra.mxu0 %v6774_v20 }
0x142f   :  { %v6778_v51 = vmul.f32 %v11621_v33, %v15039_v39  ;;  %v6777_v23 = vmul.f32 %v11621_v33, %v15037_v58 }
0x1430   :  { %v6702_v14 = vpop.xlane.xlu1 %6701 }
0x1431   :  { %11628 = vrcp.f32 %v6702_v14  ;;  %9185 = vmatprep.mubr.msk.f32.mxu0 %vm2585_vm3, %v6778_v51 }
0x1432   :  { %v11623_v10 = vpop.eup %11622  ;;  %6991 = vmatmul.mubr.f32.gmra.mxu0 %v6777_v23 }
0x1433   :  { %v6781_v59 = vmul.f32 %v11623_v10, %v15048_v21  ;;  %v6780_v30 = vmul.f32 %v11623_v10, %v15046_v62 }
0x1434   :  { %v6706_v4 = vpop.xlane.xlu0 %6705 }
0x1435   :  { %11630 = vrcp.f32 %v6706_v4  ;;  %9186 = vmatprep.mubr.msk.f32.mxu0 %vm2585_vm3, %v6781_v59 }
0x1436   :  { %v11625_v28 = vpop.eup %11624  ;;  %6996 = vmatmul.mubr.f32.gmra.mxu0 %v6780_v30 }
0x1437   :  { %v6784_v39 = vmul.f32 %v11625_v28, %v15057_v17  ;;  %v6783_v58 = vmul.f32 %v11625_v28, %v15055_v43 }
0x1438   :  { %v6710_v53 = vpop.xlane.xlu1 %6709 }
0x1439   :  { %11632 = vrcp.f32 %v6710_v53  ;;  %9187 = vmatprep.mubr.msk.f32.mxu0 %vm2585_vm3, %v6784_v39 }
0x143a   :  { %v11627_v29 = vpop.eup %11626  ;;  %7001 = vmatmul.mubr.f32.gmra.mxu0 %v6783_v58 }
0x143b   :  { %v6787_v21 = vmul.f32 %v11627_v29, %v15066_v22  ;;  %v6786_v62 = vmul.f32 %v11627_v29, %v15064_v55 }
0x143c   :  { %v6714_v1 = vpop.xlane.xlu0 %6713 }
0x143d   :  { %11634 = vrcp.f32 %v6714_v1  ;;  %9188 = vmatprep.mubr.msk.f32.mxu0 %vm2585_vm3, %v6787_v21 }
0x143e   :  { %v11629_v47 = vpop.eup %11628  ;;  %7006 = vmatmul.mubr.f32.gmra.mxu0 %v6786_v62 }
0x143f   :  { %v6790_v17 = vmul.f32 %v11629_v47, %v15075_v6  ;;  %v6789_v43 = vmul.f32 %v11629_v47, %v15073_v11 }
0x1440   :  { %v6718_v19 = vpop.xlane.xlu1 %6717 }
0x1441   :  { %11636 = vrcp.f32 %v6718_v19  ;;  %9189 = vmatprep.mubr.msk.f32.mxu0 %vm2585_vm3, %v6790_v17 }
0x1442   :  { %v11631_v38 = vpop.eup %11630  ;;  %7011 = vmatmul.mubr.f32.gmra.mxu0 %v6789_v43 }
0x1443   :  { %v6793_v22 = vmul.f32 %v11631_v38, %v15084_v48  ;;  %v6792_v55 = vmul.f32 %v11631_v38, %v15082_v15 }
0x1444   :  { %v6722_v37 = vpop.xlane.xlu0 %6721 }
0x1445   :  { %11638 = vrcp.f32 %v6722_v37  ;;  %9190 = vmatprep.mubr.msk.f32.mxu0 %vm2585_vm3, %v6793_v22 }
0x1446   :  { %v11633_v20 = vpop.eup %11632  ;;  %7016 = vmatmul.mubr.f32.gmra.mxu0 %v6792_v55 }
0x1447   :  { %v6796_v6 = vmul.f32 %v11633_v20, %v15093_v57  ;;  %v6795_v11 = vmul.f32 %v11633_v20, %v15091_v13 }
0x1448   :  { %v6726_v7 = vpop.xlane.xlu1 %6725 }
0x1449   :  { %11640 = vrcp.f32 %v6726_v7  ;;  %9191 = vmatprep.mubr.msk.f32.mxu0 %vm2585_vm3, %v6796_v6 }
0x144a   :  { %v11635_v33 = vpop.eup %11634  ;;  %7021 = vmatmul.mubr.f32.gmra.mxu0 %v6795_v11  ;;  %v15297_v11 = vld [vmem:[%s11921_s6 + $0x50] sm:$0xff] }
0x144b   :  { %v6799_v48 = vmul.f32 %v11635_v33, %v15102_v25  ;;  %v6798_v15 = vmul.f32 %v11635_v33, %v15100_v27  ;;  %v15308_v33 = vld [vmem:[%s11921_s6 + $0x40] sm:$0xff] }
0x144c   :  { %v6730_v51 = vpop.xlane.xlu0 %6729 }
0x144d   :  { %11642 = vrcp.f32 %v6730_v51  ;;  %9192 = vmatprep.mubr.msk.f32.mxu0 %vm2585_vm3, %v6799_v48 }
0x144e   :  { %v11637_v23 = vpop.eup %11636  ;;  %7026 = vmatmul.mubr.f32.gmra.mxu0 %v6798_v15  ;;  %v15314_v15 = vld [vmem:[%s11921_s6 + $0x38] sm:$0xff] }
0x144f   :  { %v6802_v57 = vmul.f32 %v11637_v23, %v15111_v34  ;;  %v6801_v13 = vmul.f32 %v11637_v23, %v15109_v61  ;;  %v15319_v23 = vld [vmem:[%s11921_s6 + $0x30] sm:$0xff] }
0x1450   :  { %v6734_v14 = vpop.xlane.xlu1 %6733 }
0x1451   :  { %11644 = vrcp.f32 %v6734_v14  ;;  %9193 = vmatprep.mubr.msk.f32.mxu0 %vm2585_vm3, %v6802_v57 }
0x1452   :  { %v11639_v10 = vpop.eup %11638  ;;  %7031 = vmatmul.mubr.f32.gmra.mxu0 %v6801_v13  ;;  %v15325_v13 = vld [vmem:[%s11921_s6 + $0x28] sm:$0xff] }
0x1453   :  { %v6805_v25 = vmul.f32 %v11639_v10, %v15120_v63  ;;  %v6804_v27 = vmul.f32 %v11639_v10, %v15118_v2  ;;  %v15330_v10 = vld [vmem:[%s11921_s6 + $0x20] sm:$0xff] }
0x1454   :  { %v6738_v59 = vpop.xlane.xlu0 %6737 }
0x1455   :  { %11646 = vrcp.f32 %v6738_v59  ;;  %9194 = vmatprep.mubr.msk.f32.mxu0 %vm2585_vm3, %v6805_v25 }
0x1456   :  { %v11641_v30 = vpop.eup %11640  ;;  %7036 = vmatmul.mubr.f32.gmra.mxu0 %v6804_v27  ;;  %v15336_v27 = vld [vmem:[%s11921_s6 + $0x18] sm:$0xff] }
0x1457   :  { %v6808_v34 = vmul.f32 %v11641_v30, %v15129_v36  ;;  %v6807_v61 = vmul.f32 %v11641_v30, %v15127_v8  ;;  %v15341_v30 = vld [vmem:[%s11921_s6 + $0x10] sm:$0xff] }
0x1458   :  { %v6742_v4 = vpop.xlane.xlu1 %6741 }
0x1459   :  { %11648 = vrcp.f32 %v6742_v4  ;;  %9195 = vmatprep.mubr.msk.f32.mxu0 %vm2585_vm3, %v6808_v34 }
0x145a   :  { %v11643_v28 = vpop.eup %11642  ;;  %7041 = vmatmul.mubr.f32.gmra.mxu0 %v6807_v61  ;;  %v15347_v61 = vld [vmem:[%s11921_s6 + $0x8] sm:$0xff] }
0x145b   :  { %v6811_v63 = vmul.f32 %v11643_v28, %v15138_v31  ;;  %v6810_v2 = vmul.f32 %v11643_v28, %v15136_v49  ;;  %v15352_v28 = vld [vmem:[%s11921_s6] sm:$0xff] }
0x145c   :  { %v6746_v39 = vpop.xlane.xlu0 %6745 }
0x145d   :  { %11650 = vrcp.f32 %v6746_v39  ;;  %9196 = vmatprep.mubr.msk.f32.mxu0 %vm2585_vm3, %v6811_v63 }
0x145e   :  { %v11645_v58 = vpop.eup %11644  ;;  %7046 = vmatmul.mubr.f32.gmra.mxu0 %v6810_v2 }
0x145f   :  { %v6814_v36 = vmul.f32 %v11645_v58, %v15147_v40  ;;  %v6813_v8 = vmul.f32 %v11645_v58, %v15145_v52 }
0x1460   :  { %v6750_v53 = vpop.xlane.xlu1 %6749 }
0x1461   :  { %11652 = vrcp.f32 %v6750_v53  ;;  %9197 = vmatprep.mubr.msk.f32.mxu0 %vm2585_vm3, %v6814_v36 }
0x1462   :  { %v11647_v29 = vpop.eup %11646  ;;  %7051 = vmatmul.mubr.f32.gmra.mxu0 %v6813_v8 }
0x1463   :  { %v6817_v31 = vmul.f32 %v11647_v29, %v15156_v24  ;;  %v6816_v49 = vmul.f32 %v11647_v29, %v15154_v54 }
0x1464   :  { %v6754_v21 = vpop.xlane.xlu0 %6753 }
0x1465   :  { %11654 = vrcp.f32 %v6754_v21  ;;  %9198 = vmatprep.mubr.msk.f32.mxu0 %vm2585_vm3, %v6817_v31 }
0x1466   :  { %v11649_v62 = vpop.eup %11648  ;;  %7056 = vmatmul.mubr.f32.gmra.mxu0 %v6816_v49 }
0x1467   :  { %v6820_v40 = vmul.f32 %v11649_v62, %v15165_v5  ;;  %v6819_v52 = vmul.f32 %v11649_v62, %v15163_v41 }
0x1468   :  { %v6758_v1 = vpop.xlane.xlu1 %6757 }
0x1469   :  { %11656 = vrcp.f32 %v6758_v1  ;;  %9199 = vmatprep.mubr.msk.f32.mxu0 %vm2585_vm3, %v6820_v40 }
0x146a   :  { %v11651_v47 = vpop.eup %11650  ;;  %7061 = vmatmul.mubr.f32.gmra.mxu0 %v6819_v52 }
0x146b   :  { %v6823_v24 = vmul.f32 %v11651_v47, %v15174_v3  ;;  %v6822_v54 = vmul.f32 %v11651_v47, %v15172_v44 }
0x146c   :  { %v6762_v17 = vpop.xlane.xlu0 %6761 }
0x146d   :  { %11658 = vrcp.f32 %v6762_v17  ;;  %9200 = vmatprep.mubr.msk.f32.mxu0 %vm2585_vm3, %v6823_v24 }
0x146e   :  { %v11653_v43 = vpop.eup %11652  ;;  %7066 = vmatmul.mubr.f32.gmra.mxu0 %v6822_v54 }
0x146f   :  { %v6826_v5 = vmul.f32 %v11653_v43, %v15183_v12  ;;  %v6825_v41 = vmul.f32 %v11653_v43, %v15181_v16 }
0x1470   :  { %v6766_v19 = vpop.xlane.xlu1 %6765 }
0x1471   :  { %11660 = vrcp.f32 %v6766_v19  ;;  %9201 = vmatprep.mubr.msk.f32.mxu0 %vm2585_vm3, %v6826_v5 }
0x1472   :  { %v11655_v38 = vpop.eup %11654  ;;  %7071 = vmatmul.mubr.f32.gmra.mxu0 %v6825_v41 }
0x1473   :  { %v6829_v3 = vmul.f32 %v11655_v38, %v15190_v42  ;;  %v6828_v44 = vmul.f32 %v11655_v38, %v15188_v0 }
0x1475   :  { %9202 = vmatprep.mubr.msk.f32.mxu0 %vm2585_vm3, %v6829_v3 }
0x1476   :  { %v11657_v22 = vpop.eup %11656  ;;  %7076 = vmatmul.mubr.f32.gmra.mxu0 %v6828_v44 }
0x1477   :  { %v6832_v55 = vmul.f32 %v11657_v22, %v15197_v45  ;;  %v6831_v12 = vmul.f32 %v11657_v22, %v15195_v60 }
0x1479   :  { %9203 = vmatprep.mubr.msk.f32.mxu0 %vm2585_vm3, %v6832_v55 }
0x147a   :  { %v11659_v16 = vpop.eup %11658  ;;  %7081 = vmatmul.mubr.f32.gmra.mxu0 %v6831_v12 }
0x147b   :  { %v6835_v37 = vmul.f32 %v11659_v16, %v15204_v32  ;;  %v6834_v20 = vmul.f32 %v11659_v16, %v15202_v35 }
0x147d   :  { %9204 = vmatprep.mubr.msk.f32.mxu0 %vm2585_vm3, %v6835_v37 }
0x147e   :  { %v11661_v0 = vpop.eup %11660  ;;  %7086 = vmatmul.mubr.f32.gmra.mxu0 %v6834_v20 }
0x147f   :  { %v6838_v42 = vmul.f32 %v11661_v0, %v15211_v50  ;;  %v6837_v45 = vmul.f32 %v11661_v0, %v15209_v46  ;;  %v15303_v50 = vld [vmem:[%s11921_s6 + $0x48] sm:$0xff] }
0x1481   :  { %9205 = vmatprep.mubr.msk.f32.mxu0 %vm2585_vm3, %v6838_v42 }
0x1482   :  { %7091 = vmatmul.mubr.f32.gmra.mxu0 %v6837_v45 }
0x14e6   :  { %v6977_v60 = vpop.f32.mrf.mxu0 }
0x14e7   :  { %11084 = vmatprep.mubr.msk.f32.mxu0 %vm2231_vm2, %v6977_v60 }
0x14e8   :  { %v6979_v32 = vpop.f32.mrf.mxu0 }
0x14ea   :  { %v6982_v6 = vpop.f32.mrf.mxu0 }
0x14eb   :  { %11085 = vmatmul.mubr.msk.f32.vlgmr.msra.gmra.mxu0 %vm2231_vm2, %v6982_v6 }
0x14ec   :  { %v6984_v35 = vpop.f32.mrf.mxu0  ;;  %11148 = vmatpush3.msra.mxu0 %v15223_v18 }
0x14ed   :  { %11149 = vmatprep.subr.mxu0 %v15297_v11 }
0x14ee   :  { %v6987_v46 = vpop.f32.mrf.mxu0  ;;  %11150 = vmatpush3.msra.mxu0 %v15297_v11 }
0x14ef   :  { %11087 = vmatprep.mubr.msk.f32.mxu0 %vm2231_vm2, %v6987_v46  ;;  %11151 = vmatprep.subr.mxu0 %v15303_v50 }
0x14f0   :  { %v6989_v7 = vpop.f32.mrf.mxu0  ;;  %11152 = vmatpush3.msra.mxu0 %v15303_v50 }
0x14f1   :  { %11153 = vmatprep.subr.mxu0 %v15308_v33 }
0x14f2   :  { %v6992_v48 = vpop.f32.mrf.mxu0  ;;  %11154 = vmatpush3.msra.mxu0 %v15308_v33 }
0x14f3   :  { %11088 = vmatmul.mubr.msk.f32.gmra.mxu0 %vm2231_vm2, %v6992_v48  ;;  %11155 = vmatprep.subr.mxu0 %v15314_v15 }
0x14f4   :  { %v6994_v51 = vpop.f32.mrf.mxu0  ;;  %11156 = vmatpush3.msra.mxu0 %v15314_v15 }
0x14f5   :  { %11157 = vmatprep.subr.mxu0 %v15319_v23 }
0x14f6   :  { %v6997_v57 = vpop.f32.mrf.mxu0  ;;  %11158 = vmatpush3.msra.mxu0 %v15319_v23 }
0x14f7   :  { %11090 = vmatprep.mubr.msk.f32.mxu0 %vm2231_vm2, %v6997_v57  ;;  %11159 = vmatprep.subr.mxu0 %v15325_v13 }
0x14f8   :  { %v6999_v14 = vpop.f32.mrf.mxu0  ;;  %11160 = vmatpush3.msra.mxu0 %v15325_v13 }
0x14f9   :  { %11161 = vmatprep.subr.mxu0 %v15330_v10 }
0x14fa   :  { %v7002_v25 = vpop.f32.mrf.mxu0  ;;  %11162 = vmatpush3.msra.mxu0 %v15330_v10 }
0x14fb   :  { %11091 = vmatmul.mubr.msk.f32.gmra.mxu0 %vm2231_vm2, %v7002_v25  ;;  %11163 = vmatprep.subr.mxu0 %v15336_v27 }
0x14fc   :  { %v7004_v59 = vpop.f32.mrf.mxu0  ;;  %11164 = vmatpush3.msra.mxu0 %v15336_v27 }
0x14fd   :  { %11165 = vmatprep.subr.mxu0 %v15341_v30 }
0x14fe   :  { %v7007_v34 = vpop.f32.mrf.mxu0  ;;  %11166 = vmatpush3.msra.mxu0 %v15341_v30 }
0x14ff   :  { %11093 = vmatprep.mubr.msk.f32.mxu0 %vm2231_vm2, %v7007_v34  ;;  %11167 = vmatprep.subr.mxu0 %v15347_v61 }
0x1500   :  { %v7009_v4 = vpop.f32.mrf.mxu0  ;;  %11168 = vmatpush3.msra.mxu0 %v15347_v61 }
0x1501   :  { %11169 = vmatprep.subr.mxu0 %v15352_v28 }
0x1502   :  { %v7012_v63 = vpop.f32.mrf.mxu0  ;;  %11170 = vmatpush3.msra.mxu0 %v15352_v28 }
0x1503   :  { %11094 = vmatmul.mubr.msk.f32.gmra.mxu0 %vm2231_vm2, %v7012_v63  ;;  %v11851_v63 = vld [vmem:[%s12334_s17 + $0x78] sm:$0xff] }
0x1504   :  { %v7014_v2 = vpop.f32.mrf.mxu0 }
0x1506   :  { %v7017_v39 = vpop.f32.mrf.mxu0 }
0x1507   :  { %11096 = vmatprep.mubr.msk.f32.mxu0 %vm2231_vm2, %v7017_v39 }
0x1508   :  { %v7019_v58 = vpop.f32.mrf.mxu0 }
0x1509   :  { %v11852_v58 = vld [vmem:[%s12334_s17 + $0x70] sm:$0xff] }
0x150a   :  { %v7022_v36 = vpop.f32.mrf.mxu0 }
0x150b   :  { %11097 = vmatmul.mubr.msk.f32.gmra.mxu0 %vm2231_vm2, %v7022_v36 }
0x150c   :  { %v7024_v8 = vpop.f32.mrf.mxu0 }
0x150d   :  { %v11853_v8 = vld [vmem:[%s12334_s17 + $0x68] sm:$0xff] }
0x150e   :  { %v7027_v53 = vpop.f32.mrf.mxu0 }
0x150f   :  { %11099 = vmatprep.mubr.msk.f32.mxu0 %vm2231_vm2, %v7027_v53 }
0x1510   :  { %v7029_v29 = vpop.f32.mrf.mxu0 }
0x1511   :  { %v11854_v29 = vld [vmem:[%s12334_s17 + $0x60] sm:$0xff] }
0x1512   :  { %v7032_v31 = vpop.f32.mrf.mxu0 }
0x1513   :  { %11100 = vmatmul.mubr.msk.f32.gmra.mxu0 %vm2231_vm2, %v7032_v31 }
0x1514   :  { %v7034_v49 = vpop.f32.mrf.mxu0 }
0x1515   :  { %v11855_v49 = vld [vmem:[%s12334_s17 + $0x58] sm:$0xff] }
0x1516   :  { %v7037_v21 = vpop.f32.mrf.mxu0 }
0x1517   :  { %11102 = vmatprep.mubr.msk.f32.mxu0 %vm2231_vm2, %v7037_v21 }
0x1518   :  { %v7039_v62 = vpop.f32.mrf.mxu0 }
0x1519   :  { %v11856_v62 = vld [vmem:[%s12334_s17 + $0x50] sm:$0xff] }
0x151a   :  { %v7042_v40 = vpop.f32.mrf.mxu0 }
0x151b   :  { %11103 = vmatmul.mubr.msk.f32.gmra.mxu0 %vm2231_vm2, %v7042_v40 }
0x151c   :  { %v7044_v52 = vpop.f32.mrf.mxu0 }
0x151d   :  { %v11857_v52 = vld [vmem:[%s12334_s17 + $0x48] sm:$0xff] }
0x151e   :  { %v7047_v1 = vpop.f32.mrf.mxu0 }
0x151f   :  { %11105 = vmatprep.mubr.msk.f32.mxu0 %vm2231_vm2, %v7047_v1 }
0x1520   :  { %v7049_v47 = vpop.f32.mrf.mxu0 }
0x1522   :  { %v7052_v24 = vpop.f32.mrf.mxu0 }
0x1523   :  { %11106 = vmatmul.mubr.msk.f32.gmra.mxu0 %vm2231_vm2, %v7052_v24  ;;  %v11858_v24 = vld [vmem:[%s12334_s17 + $0x40] sm:$0xff] }
0x1524   :  { %v7054_v54 = vpop.f32.mrf.mxu0 }
0x1526   :  { %v7057_v17 = vpop.f32.mrf.mxu0 }
0x1527   :  { %11108 = vmatprep.mubr.msk.f32.mxu0 %vm2231_vm2, %v7057_v17  ;;  %v11859_v17 = vld [vmem:[%s12334_s17 + $0x38] sm:$0xff] }
0x1528   :  { %v7059_v43 = vpop.f32.mrf.mxu0 }
0x152a   :  { %v7062_v5 = vpop.f32.mrf.mxu0 }
0x152b   :  { %11109 = vmatmul.mubr.msk.f32.gmra.mxu0 %vm2231_vm2, %v7062_v5 }
0x152c   :  { %v7064_v41 = vpop.f32.mrf.mxu0 }
0x152d   :  { %v11860_v41 = vld [vmem:[%s12334_s17 + $0x30] sm:$0xff] }
0x152e   :  { %v7067_v19 = vpop.f32.mrf.mxu0 }
0x152f   :  { %11111 = vmatprep.mubr.msk.f32.mxu0 %vm2231_vm2, %v7067_v19 }
0x1530   :  { %v7069_v38 = vpop.f32.mrf.mxu0 }
0x1532   :  { %v7072_v3 = vpop.f32.mrf.mxu0 }
0x1533   :  { %11112 = vmatmul.mubr.msk.f32.gmra.mxu0 %vm2231_vm2, %v7072_v3  ;;  %v11861_v3 = vld [vmem:[%s12334_s17 + $0x28] sm:$0xff] }
0x1534   :  { %v7074_v44 = vpop.f32.mrf.mxu0 }
0x1536   :  { %v7077_v22 = vpop.f32.mrf.mxu0 }
0x1537   :  { %11114 = vmatprep.mubr.msk.f32.mxu0 %vm2231_vm2, %v7077_v22  ;;  %v11862_v22 = vld [vmem:[%s12334_s17 + $0x20] sm:$0xff] }
0x1538   :  { %v7079_v55 = vpop.f32.mrf.mxu0 }
0x153a   :  { %v7082_v12 = vpop.f32.mrf.mxu0 }
0x153b   :  { %11115 = vmatmul.mubr.msk.f32.gmra.mxu0 %vm2231_vm2, %v7082_v12 }
0x153c   :  { %v7084_v16 = vpop.f32.mrf.mxu0 }
0x153d   :  { %v11863_v16 = vld [vmem:[%s12334_s17 + $0x18] sm:$0xff] }
0x153e   :  { %v7087_v37 = vpop.f32.mrf.mxu0 }
0x153f   :  { %11117 = vmatprep.mubr.msk.f32.mxu0 %vm2231_vm2, %v7087_v37 }
0x1540   :  { %v7089_v20 = vpop.f32.mrf.mxu0 }
0x1542   :  { %v7092_v0 = vpop.f32.mrf.mxu0 }
0x1543   :  { %11118 = vmatmul.mubr.msk.f32.gmra.mxu0 %vm2231_vm2, %v7092_v0  ;;  %v11864_v0 = vld [vmem:[%s12334_s17 + $0x10] sm:$0xff] }
0x1544   :  { %v7094_v42 = vpop.f32.mrf.mxu0 }
0x15ab   :  { %v15373_v45 = vpop.f32.mrf.mxu0 }
0x15ad   :  { %v15375_v60 = vpop.f32.mrf.mxu0 }
0x15b3   :  { %v15377_v32 = vpop.f32.mrf.mxu0 }
0x15b4   :  { %v7356_v37 = vmul.f32 %v11863_v16, %v15377_v32  ;;  %v11866_v32 = vld [vmem:[%s12334_s17] sm:$0xff] }
0x15b5   :  { %v15379_v6 = vpop.f32.mrf.mxu0 }
0x15b6   :  { %v7355_v42 = vmul.f32 %v11864_v0, %v15379_v6  ;;  %v11867_v6 = vld [vmem:[%s12334_s17 + $0xb8] sm:$0xff] }
0x15bb   :  { %v11092_v35 = vpop.f32.mrf.mxu0 }
0x15bc   :  { %v7358_v44 = vmul.f32 %v11861_v3, %v11092_v35  ;;  %v11865_v35 = vld [vmem:[%s12334_s17 + $0x8] sm:$0xff] }
0x15bd   :  { %v7254_v46 = vpop.f32.mrf.mxu0 }
0x15be   :  { %v7357_v55 = vmul.f32 %v11862_v22, %v7254_v46  ;;  %v7354_v46 = vmul.f32 %v11865_v35, %v15373_v45  ;;  %v11868_v45 = vld [vmem:[%s12334_s17 + $0xb0] sm:$0xff] }
0x15c3   :  { %v11095_v7 = vpop.f32.mrf.mxu0 }
0x15c4   :  { %v7360_v43 = vmul.f32 %v11859_v17, %v11095_v7  ;;  %v9236_v17 = vld [vmem:[%s13591_s19 + $0x80] sm:$0xff] }
0x15c5   :  { %v7264_v48 = vpop.f32.mrf.mxu0 }
0x15c6   :  { %v7359_v19 = vmul.f32 %v11860_v41, %v7264_v48  ;;  %v7353_v48 = vmul.f32 %v11866_v32, %v15375_v60  ;;  %v9233_v41 = vld [vmem:[%s13591_s19 + $0x68] sm:$0xff] }
0x15cb   :  { %v11098_v51 = vpop.f32.mrf.mxu0 }
0x15cc   :  { %v7362_v1 = vmul.f32 %v11857_v52, %v11098_v51  ;;  %v9240_v52 = vld [vmem:[%s13591_s19 + $0xa0] sm:$0xff] }
0x15cd   :  { %v7274_v57 = vpop.f32.mrf.mxu0 }
0x15ce   :  { %v7361_v54 = vmul.f32 %v11858_v24, %v7274_v57  ;;  %v9238_v24 = vld [vmem:[%s13591_s19 + $0x90] sm:$0xff] }
0x15d3   :  { %v11101_v14 = vpop.f32.mrf.mxu0 }
0x15d4   :  { %v7364_v21 = vmul.f32 %v11855_v49, %v11101_v14  ;;  %v9242_v49 = vld [vmem:[%s13591_s19 + $0xb0] sm:$0xff] }
0x15d5   :  { %v7284_v25 = vpop.f32.mrf.mxu0 }
0x15d6   :  { %v7363_v40 = vmul.f32 %v11856_v62, %v7284_v25  ;;  %v11876_v62 = vld [vmem:[%s13530_s14 + $0x18] sm:$0xff] }
0x15db   :  { %v11104_v59 = vpop.f32.mrf.mxu0 }
0x15dc   :  { %v7366_v53 = vmul.f32 %v11853_v8, %v11104_v59  ;;  %v11869_v59 = vld [vmem:[%s12334_s17 + $0xa8] sm:$0xff] }
0x15dd   :  { %v7294_v34 = vpop.f32.mrf.mxu0 }
0x15de   :  { %v7365_v31 = vmul.f32 %v11854_v29, %v7294_v34  ;;  %v11870_v34 = vld [vmem:[%s12334_s17 + $0xa0] sm:$0xff] }
0x15e3   :  { %v11107_v4 = vpop.f32.mrf.mxu0 }
0x15e4   :  { %v7368_v2 = vmul.f32 %v11851_v63, %v11107_v4  ;;  %v11871_v63 = vld [vmem:[%s12334_s17 + $0x98] sm:$0xff] }
0x15e5   :  { %v7304_v39 = vpop.f32.mrf.mxu0 }
0x15e6   :  { %v7367_v36 = vmul.f32 %v11852_v58, %v7304_v39  ;;  %7378 = vmatpush1.msra.mxu1 %v7368_v2  ;;  %v11872_v39 = vld [vmem:[%s12334_s17 + $0x90] sm:$0xff] }
0x15e7   :  { %7379 = vmatprep.subr.mxu1 %v15766_v9 }
0x15e8   :  { %7380 = vmatpush1.msra.mxu1 %v7367_v36  ;;  %v11873_v36 = vld [vmem:[%s12334_s17 + $0x88] sm:$0xff] }
0x15e9   :  { %7381 = vmatprep.subr.mxu1 %v15766_v9 }
0x15ea   :  { %7382 = vmatpush1.msra.mxu1 %v7366_v53  ;;  %v11874_v53 = vld [vmem:[%s12334_s17 + $0x80] sm:$0xff]  ;;  %s8605_s17 = sld [smem:[%s15757_s0 + %s11907_s3]]  }
0x15eb   :  { %7383 = vmatprep.subr.mxu1 %v15766_v9  ;;  %v15393_v47 = vpop.f32.mrf.mxu0 }
0x15ec   :  { %7384 = vmatpush1.msra.mxu1 %v7365_v31  ;;  %v7370_v8 = vmul.f32 %v11873_v36, %v15393_v47  ;;  %v9243_v31 = vld [vmem:[%s13591_s19 + $0xb8] sm:$0xff]  ;;  %v9264_v36 = vld [vmem:[%s13671_s2 + $0x100] sm:$0xff] }
0x15ed   :  { %7385 = vmatprep.subr.mxu1 %v15766_v9  ;;  %v15399_v5 = vpop.f32.mrf.mxu0  ;;  %v9239_v47 = vld [vmem:[%s13591_s19 + $0x98] sm:$0xff] }
0x15ee   :  { %7386 = vmatpush1.msra.mxu1 %v7364_v21  ;;  %v7369_v29 = vmul.f32 %v11874_v53, %v15399_v5  ;;  %v11875_v21 = vld [vmem:[%s13530_s14] sm:$0xff]  ;;  %v9234_v5 = vld [vmem:[%s13591_s19 + $0x70] sm:$0xff] }
0x15ef   :  { %7387 = vmatprep.subr.mxu1 %v15766_v9  ;;  %v9262_v53 = vld [vmem:[%s13671_s2 + $0xf0] sm:$0xff] }
0x15f0   :  { %7388 = vmatpush1.msra.mxu1 %v7363_v40  ;;  %v9241_v40 = vld [vmem:[%s13591_s19 + $0xa8] sm:$0xff] }
0x15f1   :  { %7389 = vmatprep.subr.mxu1 %v15766_v9 }
0x15f2   :  { %7390 = vmatpush1.msra.mxu1 %v7362_v1  ;;  %v11877_v1 = vld [vmem:[%s13530_s14 + $0x10] sm:$0xff]  ;;  %s11909_s14 = smov 28  }
0x15f3   :  { %7391 = vmatprep.subr.mxu1 %v15766_v9  ;;  %v11113_v38 = vpop.f32.mrf.mxu0 }
0x15f4   :  { %7392 = vmatpush1.msra.mxu1 %v7361_v54  ;;  %v7372_v2 = vmul.f32 %v11871_v63, %v11113_v38  ;;  %v9237_v54 = vld [vmem:[%s13591_s19 + $0x88] sm:$0xff]  ;;  %v9268_v63 = vld [vmem:[%s13671_s2 + $0x120] sm:$0xff] }
0x15f5   :  { %7393 = vmatprep.subr.mxu1 %v15766_v9  ;;  %v7324_v12 = vpop.f32.mrf.mxu0 }
0x15f6   :  { %7394 = vmatpush1.msra.mxu1 %v7360_v43  ;;  %v7371_v58 = vmul.f32 %v11872_v39, %v7324_v12  ;;  %v9235_v43 = vld [vmem:[%s13591_s19 + $0x78] sm:$0xff]  ;;  %v9266_v39 = vld [vmem:[%s13671_s2 + $0x110] sm:$0xff] }
0x15f7   :  { %7395 = vmatprep.subr.mxu1 %v15766_v9 }
0x15f8   :  { %7396 = vmatpush1.msra.mxu1 %v7359_v19  ;;  %v9232_v19 = vld [vmem:[%s13591_s19 + $0x60] sm:$0xff] }
0x15f9   :  { %7397 = vmatprep.subr.mxu1 %v15766_v9 }
0x15fa   :  { %7398 = vmatpush1.msra.mxu1 %v7358_v44 }
0x15fb   :  { %7399 = vmatprep.subr.mxu1 %v15766_v9  ;;  %v11116_v20 = vpop.f32.mrf.mxu0 }
0x15fc   :  { %7400 = vmatpush1.msra.mxu1 %v7357_v55  ;;  %v7374_v60 = vmul.f32 %v11869_v59, %v11116_v20  ;;  %v9245_v55 = vld [vmem:[%s13650_s24 + $0x1] ss:$0 sm:$0xff] }
0x15fd   :  { %7401 = vmatprep.subr.mxu1 %v15766_v9  ;;  %v7334_v7 = vpop.f32.mrf.mxu0  ;;  %v9272_v59 = vld [vmem:[%s13671_s2 + $0x140] sm:$0xff] }
0x15fe   :  { %7402 = vmatpush1.msra.mxu1 %v7356_v37  ;;  %v7373_v4 = vmul.f32 %v11870_v34, %v7334_v7  ;;  %v9270_v34 = vld [vmem:[%s13671_s2 + $0x130] sm:$0xff] }
0x15ff   :  { %7403 = vmatprep.subr.mxu1 %v15766_v9 }
0x1600   :  { %7404 = vmatpush1.msra.mxu1 %v7355_v42 }
0x1601   :  { %7405 = vmatprep.subr.mxu1 %v15766_v9 }
0x1602   :  { %7406 = vmatpush1.msra.mxu1 %v7354_v46 }
0x1603   :  { %v11119_v51 = vpop.f32.mrf.mxu0  ;;  %7407 = vmatprep.subr.mxu1 %v15766_v9 }
0x1604   :  { %v7376_v57 = vmul.f32 %v11867_v6, %v11119_v51  ;;  %7408 = vmatpush1.msra.mxu1 %v7353_v48  ;;  %v9279_v48 = vld [vmem:[%s13671_s2 + $0x178] sm:$0xff]  ;;  %v9278_v51 = vld [vmem:[%s13671_s2 + $0x170] sm:$0xff]  ;;  %v9277_v6 = vld [vmem:[%s13671_s2 + $0x168] sm:$0xff] }
0x1605   :  { %v7344_v14 = vpop.f32.mrf.mxu0  ;;  %7425 = vmatprep.subr.mxu1 %v15766_v9  ;;  %7798 = vmatprep.subr.mxu0 %v9279_v48  ;;  %v9285_v48 = vld [vmem:[%s13701_s10 + $0xd0] sm:$0xff] }
0x1606   :  { %v7375_v25 = vmul.f32 %v11868_v45, %v7344_v14  ;;  %7426 = vmatpush2.msra.mxu1 %v7376_v57  ;;  %v9276_v57 = vld [vmem:[%s13671_s2 + $0x160] sm:$0xff]  ;;  %v9275_v14 = vld [vmem:[%s13671_s2 + $0x158] sm:$0xff]  ;;  %v9274_v45 = vld [vmem:[%s13671_s2 + $0x150] sm:$0xff] }
0x1607   :  { %7427 = vmatprep.subr.mxu1 %v15766_v9 }
0x1608   :  { %7428 = vmatpush2.msra.mxu1 %v7375_v25  ;;  %v9273_v25 = vld [vmem:[%s13671_s2 + $0x148] sm:$0xff] }
0x1609   :  { %7429 = vmatprep.subr.mxu1 %v15766_v9 }
0x160a   :  { %7430 = vmatpush2.msra.mxu1 %v7374_v60  ;;  %v9271_v60 = vld [vmem:[%s13671_s2 + $0x138] sm:$0xff] }
0x160b   :  { %7431 = vmatprep.subr.mxu1 %v15766_v9 }
0x160c   :  { %7432 = vmatpush2.msra.mxu1 %v7373_v4  ;;  %v9269_v4 = vld [vmem:[%s13671_s2 + $0x128] sm:$0xff] }
0x160d   :  { %7433 = vmatprep.subr.mxu1 %v15766_v9 }
0x160e   :  { %7434 = vmatpush2.msra.mxu1 %v7372_v2  ;;  %v9267_v2 = vld [vmem:[%s13671_s2 + $0x118] sm:$0xff] }
0x160f   :  { %7435 = vmatprep.subr.mxu1 %v15766_v9 }
0x1610   :  { %7436 = vmatpush2.msra.mxu1 %v7371_v58  ;;  %v9265_v58 = vld [vmem:[%s13671_s2 + $0x108] sm:$0xff] }
0x1611   :  { %7437 = vmatprep.subr.mxu1 %v15766_v9 }
0x1612   :  { %7438 = vmatpush2.msra.mxu1 %v7370_v8  ;;  %v9263_v8 = vld [vmem:[%s13671_s2 + $0xf8] sm:$0xff] }
0x1613   :  { %7439 = vmatprep.subr.mxu1 %v15766_v9 }
0x1614   :  { %7440 = vmatpush2.msra.mxu1 %v7369_v29  ;;  %v9261_v29 = vld [vmem:[%s13671_s2 + $0xe8] sm:$0xff] }
0x1615   :  { %7442 = vmatmul.mubr.f32.vlgmr.msra.gmra.mxu1 %v11875_v21  ;;  %11120 = vmatprep.subr.mxu1 %v9243_v31  ;;  %v9258_v21 = vld [vmem:[%s13671_s2 + $0xd0] sm:$0xff] }
0x1616   :  { %9231 = vmatprep.mubr.msk.f32.mxu1 %vm2585_vm3, %v11876_v62  ;;  %11121 = vmatpush3.msra.mxu1 %v9243_v31  ;;  %v9260_v31 = vld [vmem:[%s13671_s2 + $0xe0] sm:$0xff]  ;;  %v9257_v62 = vld [vmem:[%s13671_s2 + $0xc8] sm:$0xff] }
0x1617   :  { %11122 = vmatprep.subr.mxu1 %v9242_v49 }
0x1618   :  { %11123 = vmatpush3.msra.mxu1 %v9242_v49  ;;  %v9259_v49 = vld [vmem:[%s13671_s2 + $0xd8] sm:$0xff] }
0x1619   :  { %7447 = vmatmul.mubr.f32.gmra.mxu1 %v11877_v1  ;;  %11124 = vmatprep.subr.mxu1 %v9241_v40  ;;  %v9297_v1 = vld [vmem:[%s13701_s10 + $0x130] sm:$0xff] }
0x161a   :  { %11125 = vmatpush3.msra.mxu1 %v9241_v40  ;;  %v9256_v40 = vld [vmem:[%s13671_s2 + $0xc0] sm:$0xff]  ;;  %s8625_s2 = sld [smem:[%s15757_s0 + %s11909_s14]]  }
0x161b   :  { %11126 = vmatprep.subr.mxu1 %v9240_v52 }
0x161c   :  { %11127 = vmatpush3.msra.mxu1 %v9240_v52  ;;  %v9298_v52 = vld [vmem:[%s13701_s10 + $0x138] sm:$0xff] }
0x161d   :  { %11128 = vmatprep.subr.mxu1 %v9239_v47 }
0x161e   :  { %11129 = vmatpush3.msra.mxu1 %v9239_v47  ;;  %v9296_v47 = vld [vmem:[%s13701_s10 + $0x128] sm:$0xff] }
0x161f   :  { %11130 = vmatprep.subr.mxu1 %v9238_v24 }
0x1620   :  { %11131 = vmatpush3.msra.mxu1 %v9238_v24  ;;  %v9295_v24 = vld [vmem:[%s13701_s10 + $0x120] sm:$0xff] }
0x1621   :  { %11132 = vmatprep.subr.mxu1 %v9237_v54 }
0x1622   :  { %11133 = vmatpush3.msra.mxu1 %v9237_v54  ;;  %v9294_v54 = vld [vmem:[%s13701_s10 + $0x118] sm:$0xff] }
0x1623   :  { %11134 = vmatprep.subr.mxu1 %v9236_v17 }
0x1624   :  { %11135 = vmatpush3.msra.mxu1 %v9236_v17  ;;  %v9293_v17 = vld [vmem:[%s13701_s10 + $0x110] sm:$0xff] }
0x1625   :  { %11136 = vmatprep.subr.mxu1 %v9235_v43 }
0x1626   :  { %11137 = vmatpush3.msra.mxu1 %v9235_v43 }
0x1627   :  { %11138 = vmatprep.subr.mxu1 %v9234_v5 }
0x1628   :  { %11139 = vmatpush3.msra.mxu1 %v9234_v5 }
0x1629   :  { %11140 = vmatprep.subr.mxu1 %v9233_v41 }
0x162a   :  { %11141 = vmatpush3.msra.mxu1 %v9233_v41 }
0x162b   :  { %11142 = vmatprep.subr.mxu1 %v9232_v19 }
0x162c   :  { %11143 = vmatpush3.msra.mxu1 %v9232_v19 }
0x162d   :  { %11174 = vmatprep.subr.mxu1 %v15223_v18 }
0x16d5   :  { %v7443_v38 = vpop.f32.mrf.mxu1 }
0x16d6   :  { %11144 = vmatprep.mubr.msk.f32.mxu1 %vm259_vm0, %v7443_v38 }
0x16d7   :  { %v7445_v3 = vpop.f32.mrf.mxu1 }
0x16d9   :  { %v7448_v44 = vpop.f32.mrf.mxu1 }
0x16da   :  { %11145 = vmatmul.mubr.msk.f32.vlgmr.msra.gmra.mxu1 %vm259_vm0, %v7448_v44 }
0x16db   :  { %v7450_v22 = vpop.f32.mrf.mxu1  ;;  %11175 = vmatpush3.msra.mxu1 %v15223_v18 }
0x16dc   :  { %11176 = vmatprep.subr.mxu1 %v15297_v11  ;;  %v9254_v22 = vld [vmem:[%s13718_s18 + $0x1] ss:$0 sm:$0xff] }
0x16dd   :  { %11177 = vmatpush3.msra.mxu1 %v15297_v11 }
0x16de   :  { %11178 = vmatprep.subr.mxu1 %v15303_v50 }
0x16df   :  { %11179 = vmatpush3.msra.mxu1 %v15303_v50 }
0x16e0   :  { %11180 = vmatprep.subr.mxu1 %v15308_v33 }
0x16e1   :  { %11181 = vmatpush3.msra.mxu1 %v15308_v33 }
0x16e2   :  { %11182 = vmatprep.subr.mxu1 %v15314_v15 }
0x16e3   :  { %11183 = vmatpush3.msra.mxu1 %v15314_v15 }
0x16e4   :  { %11184 = vmatprep.subr.mxu1 %v15319_v23 }
0x16e5   :  { %11185 = vmatpush3.msra.mxu1 %v15319_v23 }
0x16e6   :  { %11186 = vmatprep.subr.mxu1 %v15325_v13 }
0x16e7   :  { %11187 = vmatpush3.msra.mxu1 %v15325_v13 }
0x16e8   :  { %11188 = vmatprep.subr.mxu1 %v15330_v10 }
0x16e9   :  { %11189 = vmatpush3.msra.mxu1 %v15330_v10 }
0x16ea   :  { %11190 = vmatprep.subr.mxu1 %v15336_v27 }
0x16eb   :  { %11191 = vmatpush3.msra.mxu1 %v15336_v27 }
0x16ec   :  { %11192 = vmatprep.subr.mxu1 %v15341_v30 }
0x16ed   :  { %11193 = vmatpush3.msra.mxu1 %v15341_v30 }
0x16ee   :  { %11194 = vmatprep.subr.mxu1 %v15347_v61 }
0x16ef   :  { %11195 = vmatpush3.msra.mxu1 %v15347_v61 }
0x16f0   :  { %11196 = vmatprep.subr.mxu1 %v15352_v28 }
0x16f1   :  { %11197 = vmatpush3.msra.mxu1 %v15352_v28 }
0x16f2   :  { %7942 = vmatprep.subr.mxu1 %v15766_v9 }
0x179a   :  { %v11146_v12 = vpop.f32.mrf.mxu1 }
0x179b   :  { %v7551_v16 = vadd.f32 %v11146_v12, %v9245_v55  ;;  %v9255_v12 = vld [vmem:[%s13723_s27 + $0x1] ss:$0 sm:$0xff] }
0x179c   :  { %v7545_v37 = vpop.f32.mrf.mxu1 }
0x179d   :  { %v7546_v20 = vadd.f32 %v9245_v55, %v7545_v37  ;;  %v7555_v42 = vadd.f32 %v7551_v16, %v13866_v56 }
0x179f   :  { %v7554_v0 = vadd.f32 %v7546_v20, %v13869_v26  ;;  %v15544_v20 = vld [vmem:[%s11921_s6 + $0x58] sm:$0xff]  ;;  %s11906_s6 = smov 27  }
0x17a0   :  { %s15653_s29 = sld [smem:[%s15757_s0 + %s11906_s6]]  }
0x17a1   :  { %11171 = vmatprep.mubr.msk.f32.mxu0 %vm259_vm0, %v7554_v0 }
0x17a2   :  { %11172 = vmatmul.mubr.msk.f32.vlgmr.msra.gmra.mxu0 %vm259_vm0, %v7555_v42 }
0x17a3   :  { %7854 = vmatprep.mubr.f32.mxu0 %v15766_v9  ;;  %7799 = vmatpush1.msra.mxu0 %v9278_v51  ;;  %v9284_v51 = vld [vmem:[%s13701_s10 + $0xc8] sm:$0xff] }
0x17a4   :  { %7800 = vmatprep.subr.mxu0 %v9277_v6  ;;  %v9283_v6 = vld [vmem:[%s13701_s10 + $0xc0] sm:$0xff] }
0x17a5   :  { %7801 = vmatpush1.msra.mxu0 %v9276_v57  ;;  %v9306_v57 = vld [vmem:[%s13701_s10 + $0x178] sm:$0xff] }
0x17a6   :  { %7802 = vmatprep.subr.mxu0 %v9275_v14  ;;  %v9305_v14 = vld [vmem:[%s13701_s10 + $0x170] sm:$0xff] }
0x17a7   :  { %7803 = vmatpush1.msra.mxu0 %v9274_v45  ;;  %v9304_v45 = vld [vmem:[%s13701_s10 + $0x168] sm:$0xff] }
0x17a8   :  { %7804 = vmatprep.subr.mxu0 %v9273_v25  ;;  %v9303_v25 = vld [vmem:[%s13701_s10 + $0x160] sm:$0xff] }
0x17a9   :  { %7805 = vmatpush1.msra.mxu0 %v9272_v59  ;;  %v9302_v59 = vld [vmem:[%s13701_s10 + $0x158] sm:$0xff] }
0x17aa   :  { %7806 = vmatprep.subr.mxu0 %v9271_v60  ;;  %v9301_v60 = vld [vmem:[%s13701_s10 + $0x150] sm:$0xff] }
0x17ab   :  { %7807 = vmatpush1.msra.mxu0 %v9270_v34  ;;  %v9300_v34 = vld [vmem:[%s13701_s10 + $0x148] sm:$0xff] }
0x17ac   :  { %7808 = vmatprep.subr.mxu0 %v9269_v4  ;;  %v9299_v4 = vld [vmem:[%s13701_s10 + $0x140] sm:$0xff] }
0x17ad   :  { %7809 = vmatpush1.msra.mxu0 %v9268_v63  ;;  %v9280_v63 = vld [vmem:[%s13803_s5 + $0x2] sm:$0x3] }
0x17ae   :  { %7810 = vmatprep.subr.mxu0 %v9267_v2  ;;  %v15770_v2 = vld [vmem:[#allocation3_spill] sm:$0xff] }
0x17af   :  { %7811 = vmatpush1.msra.mxu0 %v9266_v39  ;;  %v7777_v39 = vrot.slane %v9280_v63, %v15770_v2 }
0x17b0   :  { %7812 = vmatprep.subr.mxu0 %v9265_v58  ;;  %v15771_v58 = vld [vmem:[#allocation4_spill] sm:$0xff] }
0x17b1   :  { %7813 = vmatpush1.msra.mxu0 %v9264_v36  ;;  %v7781_v36 = vrot.slane %v9280_v63, %v15771_v58  ;;  %v9308_v63 = vld [vmem:[%s13821_s16 + $0x1] ss:$0 sm:$0xff] }
0x17b2   :  { %7814 = vmatprep.subr.mxu0 %v9263_v8 }
0x17b3   :  { %7815 = vmatpush1.msra.mxu0 %v9262_v53 }
0x17b4   :  { %7816 = vmatprep.subr.mxu0 %v9261_v29 }
0x17b5   :  { %7817 = vmatpush1.msra.mxu0 %v9260_v31 }
0x17b6   :  { %7818 = vmatprep.subr.mxu0 %v9259_v49 }
0x17b7   :  { %7819 = vmatpush1.msra.mxu0 %v9258_v21 }
0x17b8   :  { %7820 = vmatprep.subr.mxu0 %v9257_v62 }
0x17b9   :  { %7821 = vmatpush1.msra.mxu0 %v9256_v40 }
0x17ba   :  { %11201 = vmatprep.subr.mxu0 %v15223_v18 }
0x1862   :  { %v11173_v35 = vpop.f32.mrf.mxu0 }
0x1863   :  { %v15487_v46 = vsub.f32 %v7555_v42, %v11173_v35  ;;  %v9292_v42 = vld [vmem:[%s13701_s10 + $0x108] sm:$0xff]  ;;  %v9291_v35 = vld [vmem:[%s13701_s10 + $0x100] sm:$0xff] }
0x1864   :  { %v7632_v7 = vpop.f32.mrf.mxu0 }
0x1865   :  { %v15489_v32 = vsub.f32 %v7554_v0, %v7632_v7  ;;  %v7644_v56 = vmul.f32 %v15487_v46, %v15487_v46  ;;  %v9289_v7 = vld [vmem:[%s13701_s10 + $0xf0] sm:$0xff] }
0x1867   :  { %v7643_v26 = vmul.f32 %v15489_v32, %v15489_v32 }
0x1869   :  { %11198 = vmatprep.mubr.msk.f32.mxu1 %vm259_vm0, %v7643_v26  ;;  %v9287_v26 = vld [vmem:[%s13701_s10 + $0xe0] sm:$0xff] }
0x186a   :  { %11199 = vmatmul.mubr.msk.f32.vlgmr.msra.gmra.mxu1 %vm259_vm0, %v7644_v56  ;;  %v9286_v56 = vld [vmem:[%s13701_s10 + $0xd8] sm:$0xff] }
0x186b   :  { %7943 = vmatpush1.msra.mxu1 %v9298_v52 }
0x186c   :  { %7944 = vmatprep.subr.mxu1 %v15766_v9 }
0x186d   :  { %7945 = vmatpush1.msra.mxu1 %v9297_v1 }
0x186e   :  { %7946 = vmatprep.subr.mxu1 %v15766_v9 }
0x186f   :  { %7947 = vmatpush1.msra.mxu1 %v9296_v47 }
0x1870   :  { %7948 = vmatprep.subr.mxu1 %v15766_v9 }
0x1871   :  { %7949 = vmatpush1.msra.mxu1 %v9295_v24 }
0x1872   :  { %7950 = vmatprep.subr.mxu1 %v15766_v9 }
0x1873   :  { %7951 = vmatpush1.msra.mxu1 %v9294_v54 }
0x1874   :  { %7952 = vmatprep.subr.mxu1 %v15766_v9 }
0x1875   :  { %7953 = vmatpush1.msra.mxu1 %v9293_v17 }
0x1876   :  { %7954 = vmatprep.subr.mxu1 %v15766_v9 }
0x1877   :  { %7955 = vmatpush1.msra.mxu1 %v9292_v42 }
0x1878   :  { %7956 = vmatprep.subr.mxu1 %v15766_v9 }
0x1879   :  { %7957 = vmatpush1.msra.mxu1 %v9291_v35 }
0x187a   :  { %7958 = vmatprep.subr.mxu1 %v15766_v9 }
0x192a   :  { %v11200_v18 = vpop.f32.mrf.mxu1 }
0x192b   :  { %v7723_v43 = vadd.f32 1e-12, %v11200_v18 }
0x192c   :  { %v7717_v5 = vpop.f32.mrf.mxu1 }
0x192d   :  { %11662 = vrsqrt.f32 %v7723_v43  ;;  %v7718_v41 = vadd.f32 1e-12, %v7717_v5 }
0x192f   :  { %11664 = vrsqrt.f32 %v7718_v41 }
0x193a   :  { %v11663_v19 = vpop.eup %11662 }
0x193b   :  { %v7729_v3 = vmul.f32 %v11663_v19, %v15487_v46  ;;  %v9290_v46 = vld [vmem:[%s13701_s10 + $0xf8] sm:$0xff] }
0x193c   :  { %v11665_v38 = vpop.eup %11664  ;;  %7959 = vmatpush1.msra.mxu1 %v9290_v46 }
0x193d   :  { %v7728_v44 = vmul.f32 %v11665_v38, %v15489_v32  ;;  %v7737_v37 = vmul.f32 %v9254_v22, %v7729_v3  ;;  %7960 = vmatprep.subr.mxu1 %v15766_v9  ;;  %v9288_v32 = vld [vmem:[%s13701_s10 + $0xe8] sm:$0xff]  ;;  %s11910_s10 = smov 30  }
0x193e   :  { %7961 = vmatpush1.msra.mxu1 %v9289_v7  ;;  %s8627_s5 = sld [smem:[%s15757_s0 + %s11910_s10]]  }
0x193f   :  { %v7736_v55 = vmul.f32 %v9254_v22, %v7728_v44  ;;  %v15547_v0 = vadd.f32 %v9255_v12, %v7737_v37  ;;  %7962 = vmatprep.subr.mxu1 %v15766_v9 }
0x1940   :  { %7963 = vmatpush1.msra.mxu1 %v9288_v32 }
0x1941   :  { %v15538_v16 = vadd.f32 %v9255_v12, %v7736_v55  ;;  %7964 = vmatprep.subr.mxu1 %v15766_v9 }
0x1942   :  { %7965 = vmatpush1.msra.mxu1 %v9287_v26 }
0x1943   :  { %9281 = vmatmul.mubr.msk.f32.vlgmr.msra.gmra.mxu0 %vm259_vm0, %v15538_v16  ;;  %7966 = vmatprep.subr.mxu1 %v15766_v9 }
0x1944   :  { %7860 = vmatprep.mubr.f32.mxu0 %v15766_v9  ;;  %11202 = vmatpush3.msra.mxu0 %v15544_v20 }
0x1945   :  { %11203 = vmatprep.subr.mxu0 %v15297_v11  ;;  %7967 = vmatpush1.msra.mxu1 %v9286_v56 }
0x1946   :  { %11204 = vmatpush3.msra.mxu0 %v15297_v11  ;;  %7968 = vmatprep.subr.mxu1 %v15766_v9 }
0x1947   :  { %9282 = vmatmul.mubr.msk.f32.gmra.mxu0 %vm259_vm0, %v15547_v0  ;;  %11205 = vmatprep.subr.mxu0 %v15303_v50 }
0x1948   :  { %11206 = vmatpush3.msra.mxu0 %v15303_v50  ;;  %7969 = vmatpush1.msra.mxu1 %v9285_v48 }
0x1949   :  { %11207 = vmatprep.subr.mxu0 %v15308_v33  ;;  %7970 = vmatprep.subr.mxu1 %v15766_v9 }
0x194a   :  { %11208 = vmatpush3.msra.mxu0 %v15308_v33  ;;  %7971 = vmatpush1.msra.mxu1 %v9284_v51 }
0x194b   :  { %11209 = vmatprep.subr.mxu0 %v15314_v15  ;;  %7972 = vmatprep.subr.mxu1 %v15766_v9 }
0x194c   :  { %11210 = vmatpush3.msra.mxu0 %v15314_v15  ;;  %7973 = vmatpush1.msra.mxu1 %v9283_v6 }
0x194d   :  { %11211 = vmatprep.subr.mxu0 %v15319_v23  ;;  %7990 = vmatprep.subr.mxu1 %v15766_v9 }
0x194e   :  { %11212 = vmatpush3.msra.mxu0 %v15319_v23  ;;  %7991 = vmatpush2.msra.mxu1 %v9306_v57 }
0x194f   :  { %11213 = vmatprep.subr.mxu0 %v15325_v13  ;;  %7992 = vmatprep.subr.mxu1 %v15766_v9 }
0x1950   :  { %11214 = vmatpush3.msra.mxu0 %v15325_v13  ;;  %7993 = vmatpush2.msra.mxu1 %v9305_v14 }
0x1951   :  { %11215 = vmatprep.subr.mxu0 %v15330_v10  ;;  %7994 = vmatprep.subr.mxu1 %v15766_v9 }
0x1952   :  { %11216 = vmatpush3.msra.mxu0 %v15330_v10  ;;  %7995 = vmatpush2.msra.mxu1 %v9304_v45 }
0x1953   :  { %11217 = vmatprep.subr.mxu0 %v15336_v27  ;;  %7996 = vmatprep.subr.mxu1 %v15766_v9 }
0x1954   :  { %11218 = vmatpush3.msra.mxu0 %v15336_v27  ;;  %7997 = vmatpush2.msra.mxu1 %v9303_v25 }
0x1955   :  { %11219 = vmatprep.subr.mxu0 %v15341_v30  ;;  %7998 = vmatprep.subr.mxu1 %v15766_v9 }
0x1956   :  { %11220 = vmatpush3.msra.mxu0 %v15341_v30  ;;  %7999 = vmatpush2.msra.mxu1 %v9302_v59 }
0x1957   :  { %11221 = vmatprep.subr.mxu0 %v15347_v61  ;;  %8000 = vmatprep.subr.mxu1 %v15766_v9 }
0x1958   :  { %11222 = vmatpush3.msra.mxu0 %v15347_v61  ;;  %8001 = vmatpush2.msra.mxu1 %v9301_v60 }
0x1959   :  { %11223 = vmatprep.subr.mxu0 %v15352_v28  ;;  %8002 = vmatprep.subr.mxu1 %v15766_v9 }
0x195a   :  { %11224 = vmatpush3.msra.mxu0 %v15352_v28  ;;  %8003 = vmatpush2.msra.mxu1 %v9300_v34 }
0x195b   :  { %11228 = vmatprep.subr.mxu0 %v15544_v20  ;;  %8004 = vmatprep.subr.mxu1 %v15766_v9 }
0x195c   :  { %8005 = vmatpush2.msra.mxu1 %v9299_v4 }
0x195d   :  { %11255 = vmatprep.subr.mxu1 %v15766_v9 }
0x1a03   :  { %v7856_v8 = vpop.f32.mrf.mxu0 }
0x1a04   :  { %v7857_v53 = vadd.f32 %v7856_v8, %v7777_v39 }
0x1a05   :  { %v7858_v29 = vpop.f32.mrf.mxu0 }
0x1a06   :  { %v7867_v31 = vmul.f32 %v7857_v53, %v7857_v53  ;;  %v7859_v49 = vadd.f32 %v7858_v29, %v7781_v36 }
0x1a07   :  { %v7862_v21 = vpop.f32.mrf.mxu0 }
0x1a08   :  { %v7871_v62 = vmul.f32 %v7867_v31, %v7857_v53  ;;  %v7868_v40 = vmul.f32 %v7859_v49, %v7859_v49  ;;  %v7863_v52 = vadd.f32 %v7862_v21, %v7777_v39 }
0x1a09   :  { %v7864_v1 = vpop.f32.mrf.mxu0 }
0x1a0a   :  { %v7875_v47 = vmul.f32 0.044715, %v7871_v62  ;;  %v7872_v24 = vmul.f32 %v7868_v40, %v7859_v49  ;;  %v7869_v54 = vmul.f32 %v7863_v52, %v7863_v52  ;;  %v7865_v17 = vadd.f32 %v7864_v1, %v7781_v36  ;;  %v8286_v62 = vld [vmem:[%s15653_s29 + $0x18] sm:$0xff]  ;;  %v8285_v40 = vld [vmem:[%s15653_s29 + $0x10] sm:$0xff] }
0x1a0c   :  { %v7879_v18 = vadd.f32 %v7875_v47, %v7857_v53  ;;  %v7876_v43 = vmul.f32 0.044715, %v7872_v24  ;;  %v7873_v5 = vmul.f32 %v7869_v54, %v7863_v52  ;;  %v7870_v41 = vmul.f32 %v7865_v17, %v7865_v17 }
0x1a0e   :  { %v7883_v19 = vmul.f32 0.7978846, %v7879_v18  ;;  %v7880_v38 = vadd.f32 %v7876_v43, %v7859_v49  ;;  %v7877_v3 = vmul.f32 0.044715, %v7873_v5  ;;  %v7874_v44 = vmul.f32 %v7870_v41, %v7865_v17  ;;  %v9317_v18 = vld [vmem:[%s13857_s28 + $0x1] ss:$0 sm:$0xff] }
0x1a0f   :  { %v9318_v41 = vld [vmem:[%s13862_s11 + $0x1] ss:$0 sm:$0xff] }
0x1a10   :  { %11666 = vtanh.f32 %v7883_v19  ;;  %v7884_v22 = vmul.f32 0.7978846, %v7880_v38  ;;  %v7881_v55 = vadd.f32 %v7877_v3, %v7863_v52  ;;  %v7878_v12 = vmul.f32 0.044715, %v7874_v44 }
0x1a12   :  { %11668 = vtanh.f32 %v7884_v22  ;;  %v7885_v37 = vmul.f32 0.7978846, %v7881_v55  ;;  %v7882_v42 = vadd.f32 %v7878_v12, %v7865_v17  ;;  %v8209_v55 = vld [vmem:[%s8605_s17] sm:$0x3] }
0x1a13   :  { %v8283_v12 = vld [vmem:[%s15653_s29] sm:$0xff] }
0x1a14   :  { %11670 = vtanh.f32 %v7885_v37  ;;  %v7886_v35 = vmul.f32 0.7978846, %v7882_v42  ;;  %v8410_v37 = vld [vmem:[%s15690_s7 + $0x110] sm:$0xff]  ;;  %v8409_v42 = vld [vmem:[%s15690_s7 + $0x108] sm:$0xff] }
0x1a16   :  { %11672 = vtanh.f32 %v7886_v35  ;;  %v8407_v35 = vld [vmem:[%s15690_s7 + $0xf8] sm:$0xff] }
0x1a1d   :  { %v11667_v46 = vpop.eup %11666 }
0x1a1e   :  { %v7891_v7 = vadd.f32 1.0, %v11667_v46  ;;  %v8406_v46 = vld [vmem:[%s15690_s7 + $0xf0] sm:$0xff] }
0x1a1f   :  { %v11669_v32 = vpop.eup %11668 }
0x1a20   :  { %v7892_v26 = vadd.f32 1.0, %v11669_v32  ;;  %v7895_v48 = vmul.f32 0.5, %v7891_v7  ;;  %v8404_v7 = vld [vmem:[%s15690_s7 + $0xe0] sm:$0xff]  ;;  %v8403_v32 = vld [vmem:[%s15690_s7 + $0xd8] sm:$0xff] }
0x1a21   :  { %v11671_v56 = vpop.eup %11670 }
0x1a22   :  { %v7896_v51 = vmul.f32 0.5, %v7892_v26  ;;  %v7893_v6 = vadd.f32 1.0, %v11671_v56  ;;  %v7899_v25 = vmul.f32 %v7895_v48, %v7857_v53  ;;  %v8401_v26 = vld [vmem:[%s15690_s7 + $0xc8] sm:$0xff]  ;;  %v8411_v56 = vld [vmem:[%s15690_s7 + $0x118] sm:$0xff] }
0x1a23   :  { %v11673_v57 = vpop.eup %11672 }
0x1a24   :  { %v7900_v14 = vmul.f32 %v7896_v51, %v7859_v49  ;;  %v7894_v45 = vadd.f32 1.0, %v11673_v57  ;;  %v7897_v59 = vmul.f32 0.5, %v7893_v6  ;;  %v8408_v51 = vld [vmem:[%s15690_s7 + $0x100] sm:$0xff]  ;;  %v8405_v57 = vld [vmem:[%s15690_s7 + $0xe8] sm:$0xff] }
0x1a26   :  { %9309 = vmatprep.mubr.msk.f32.mxu1 %vm2585_vm3, %v7900_v14  ;;  %v7898_v60 = vmul.f32 0.5, %v7894_v45  ;;  %v7901_v4 = vmul.f32 %v7897_v59, %v7863_v52  ;;  %v8284_v52 = vld [vmem:[%s15653_s29 + $0x8] sm:$0xff]  ;;  %v8400_v14 = vld [vmem:[%s15690_s7 + $0xc0] sm:$0xff]  ;;  %v8402_v45 = vld [vmem:[%s15690_s7 + $0xd0] sm:$0xff] }
0x1a27   :  { %8007 = vmatmul.mubr.f32.vlgmr.msra.gmra.mxu1 %v7899_v25  ;;  %v8398_v25 = vld [vmem:[%s15690_s7 + $0xb0] sm:$0xff]  ;;  %v8397_v59 = vld [vmem:[%s15690_s7 + $0xa8] sm:$0xff] }
0x1a28   :  { %v7902_v34 = vmul.f32 %v7898_v60, %v7865_v17  ;;  %v8399_v60 = vld [vmem:[%s15690_s7 + $0xb8] sm:$0xff] }
0x1a2a   :  { %9310 = vmatprep.mubr.msk.f32.mxu1 %vm2585_vm3, %v7902_v34  ;;  %v8395_v34 = vld [vmem:[%s15690_s7 + $0x98] sm:$0xff] }
0x1a2b   :  { %8012 = vmatmul.mubr.f32.gmra.mxu1 %v7901_v4  ;;  %v8394_v4 = vld [vmem:[%s15690_s7 + $0x90] sm:$0xff] }
0x1a2c   :  { %11259 = vmatprep.mubr.msk.f32.mxu1 %vm11905_vm4, %v15766_v9 }
0x1ae7   :  { %v8008_v39 = vpop.f32.mrf.mxu1 }
0x1ae8   :  { %v8009_v36 = vadd.f32 %v9308_v63, %v8008_v39  ;;  %v8391_v39 = vld [vmem:[%s15690_s7 + $0x78] sm:$0xff] }
0x1ae9   :  { %v8010_v8 = vpop.f32.mrf.mxu1 }
0x1aea   :  { %v8017_v29 = vadd.f32 %v8009_v36, %v15538_v16  ;;  %v8289_v16 = vld [vmem:[%s15653_s29 + $0x30] sm:$0xff]  ;;  %v8396_v36 = vld [vmem:[%s15690_s7 + $0xa0] sm:$0xff]  ;;  %v8389_v8 = vld [vmem:[%s15690_s7 + $0x68] sm:$0xff] }
0x1aeb   :  { %v8013_v31 = vpop.f32.mrf.mxu1 }
0x1aec   :  { %v8014_v49 = vadd.f32 %v9308_v63, %v8013_v31  ;;  %11225 = vmatprep.mubr.msk.f32.mxu0 %vm259_vm0, %v8017_v29  ;;  %v8392_v63 = vld [vmem:[%s15690_s7 + $0x80] sm:$0xff]  ;;  %v8393_v31 = vld [vmem:[%s15690_s7 + $0x88] sm:$0xff] }
0x1aed   :  { %v8015_v53 = vpop.f32.mrf.mxu1 }
0x1aee   :  { %v8018_v21 = vadd.f32 %v8014_v49, %v15547_v0  ;;  %v8287_v0 = vld [vmem:[%s15653_s29 + $0x20] sm:$0xff]  ;;  %v8386_v49 = vld [vmem:[%s15690_s7 + $0x50] sm:$0xff] }
0x1aef   :  { %v8390_v53 = vld [vmem:[%s15690_s7 + $0x70] sm:$0xff] }
0x1af0   :  { %11226 = vmatmul.mubr.msk.f32.vlgmr.msra.gmra.mxu0 %vm259_vm0, %v8018_v21 }
0x1af1   :  { %11229 = vmatpush3.msra.mxu0 %v15544_v20  ;;  %v8288_v20 = vld [vmem:[%s15653_s29 + $0x28] sm:$0xff] }
0x1af2   :  { %11230 = vmatprep.subr.mxu0 %v15297_v11 }
0x1af3   :  { %11231 = vmatpush3.msra.mxu0 %v15297_v11 }
0x1af4   :  { %11232 = vmatprep.subr.mxu0 %v15303_v50 }
0x1af5   :  { %11233 = vmatpush3.msra.mxu0 %v15303_v50 }
0x1af6   :  { %11234 = vmatprep.subr.mxu0 %v15308_v33 }
0x1af7   :  { %11235 = vmatpush3.msra.mxu0 %v15308_v33 }
0x1af8   :  { %11236 = vmatprep.subr.mxu0 %v15314_v15 }
0x1af9   :  { %11237 = vmatpush3.msra.mxu0 %v15314_v15 }
0x1afa   :  { %11238 = vmatprep.subr.mxu0 %v15319_v23 }
0x1afb   :  { %11239 = vmatpush3.msra.mxu0 %v15319_v23 }
0x1afc   :  { %11240 = vmatprep.subr.mxu0 %v15325_v13 }
0x1afd   :  { %11241 = vmatpush3.msra.mxu0 %v15325_v13 }
0x1afe   :  { %11242 = vmatprep.subr.mxu0 %v15330_v10 }
0x1aff   :  { %11243 = vmatpush3.msra.mxu0 %v15330_v10  ;;  %v8294_v10 = vld [vmem:[%s15653_s29 + $0x58] sm:$0xff] }
0x1b00   :  { %11244 = vmatprep.subr.mxu0 %v15336_v27 }
0x1b01   :  { %11245 = vmatpush3.msra.mxu0 %v15336_v27  ;;  %v8293_v27 = vld [vmem:[%s15653_s29 + $0x50] sm:$0xff] }
0x1b02   :  { %11246 = vmatprep.subr.mxu0 %v15341_v30 }
0x1b03   :  { %11247 = vmatpush3.msra.mxu0 %v15341_v30  ;;  %v8292_v30 = vld [vmem:[%s15653_s29 + $0x48] sm:$0xff] }
0x1b04   :  { %11248 = vmatprep.subr.mxu0 %v15347_v61 }
0x1b05   :  { %11249 = vmatpush3.msra.mxu0 %v15347_v61  ;;  %v8291_v61 = vld [vmem:[%s15653_s29 + $0x40] sm:$0xff] }
0x1b06   :  { %11250 = vmatprep.subr.mxu0 %v15352_v28 }
0x1b07   :  { %11251 = vmatpush3.msra.mxu0 %v15352_v28  ;;  %v8290_v28 = vld [vmem:[%s15653_s29 + $0x38] sm:$0xff] }
0x1b08   :  { %11262 = vmatprep.subr.mxu0 %v15766_v9 }
0x1bb0   :  { %v11227_v11 = vpop.f32.mrf.mxu0 }
0x1bb1   :  { %v8105_v50 = vsub.f32 %v8018_v21, %v11227_v11  ;;  %v8385_v21 = vld [vmem:[%s15690_s7 + $0x48] sm:$0xff]  ;;  %v8383_v11 = vld [vmem:[%s15690_s7 + $0x38] sm:$0xff] }
0x1bb2   :  { %v8095_v33 = vpop.f32.mrf.mxu0 }
0x1bb3   :  { %v8104_v15 = vsub.f32 %v8017_v29, %v8095_v33  ;;  %v8107_v13 = vmul.f32 %v8105_v50, %v8105_v50  ;;  %v8388_v29 = vld [vmem:[%s15690_s7 + $0x60] sm:$0xff]  ;;  %v8382_v33 = vld [vmem:[%s15690_s7 + $0x30] sm:$0xff] }
0x1bb5   :  { %v8106_v23 = vmul.f32 %v8104_v15, %v8104_v15 }
0x1bb7   :  { %11252 = vmatprep.mubr.msk.f32.mxu0 %vm259_vm0, %v8106_v23  ;;  %v8384_v23 = vld [vmem:[%s15690_s7 + $0x40] sm:$0xff] }
0x1bb8   :  { %11253 = vmatmul.mubr.msk.f32.vlgmr.msra.gmra.mxu0 %vm259_vm0, %v8107_v13  ;;  %v8379_v13 = vld [vmem:[%s15690_s7 + $0x18] sm:$0xff] }
0x1bb9   :  { %11286 = vmatprep.mubr.msk.f32.mxu0 %vm11905_vm4, %v15766_v9  ;;  %11263 = vmatpush3.msra.mxu0 %v8294_v10  ;;  %v8377_v10 = vld [vmem:[%s15690_s7 + $0x8] sm:$0xff] }
0x1bba   :  { %11264 = vmatprep.subr.mxu0 %v15766_v9 }
0x1bbb   :  { %11265 = vmatpush3.msra.mxu0 %v8293_v27  ;;  %v8381_v27 = vld [vmem:[%s15690_s7 + $0x28] sm:$0xff] }
0x1bbc   :  { %11266 = vmatprep.subr.mxu0 %v15766_v9 }
0x1bbd   :  { %11267 = vmatpush3.msra.mxu0 %v8292_v30  ;;  %v8376_v30 = vld [vmem:[%s15690_s7] sm:$0xff] }
0x1bbe   :  { %11268 = vmatprep.subr.mxu0 %v15766_v9 }
0x1bbf   :  { %11269 = vmatpush3.msra.mxu0 %v8291_v61  ;;  %v8378_v61 = vld [vmem:[%s15690_s7 + $0x10] sm:$0xff] }
0x1bc0   :  { %11270 = vmatprep.subr.mxu0 %v15766_v9 }
0x1bc1   :  { %11271 = vmatpush3.msra.mxu0 %v8290_v28  ;;  %v9320_v28 = vld [vmem:[%s8625_s2] ss:$0 sm:$0xff] }
0x1bc2   :  { %11272 = vmatprep.subr.mxu0 %v15766_v9 }
0x1bc3   :  { %11273 = vmatpush3.msra.mxu0 %v8289_v16 }
0x1bc4   :  { %11274 = vmatprep.subr.mxu0 %v15766_v9 }
0x1bc5   :  { %11275 = vmatpush3.msra.mxu0 %v8288_v20 }
0x1bc6   :  { %11276 = vmatprep.subr.mxu0 %v15766_v9 }
0x1bc7   :  { %11277 = vmatpush3.msra.mxu0 %v8287_v0 }
0x1bc8   :  { %11278 = vmatprep.subr.mxu0 %v15766_v9 }
0x1bc9   :  { %11279 = vmatpush3.msra.mxu0 %v8286_v62 }
0x1bca   :  { %11280 = vmatprep.subr.mxu0 %v15766_v9 }
0x1bcb   :  { %11281 = vmatpush3.msra.mxu0 %v8285_v40 }
0x1bcc   :  { %11282 = vmatprep.subr.mxu0 %v15766_v9 }
0x1bcd   :  { %11283 = vmatpush3.msra.mxu0 %v8284_v52  ;;  %v15772_v52 = vld [vmem:[#allocation2_spill] sm:$0xff] }
0x1bce   :  { %11284 = vmatprep.subr.mxu0 %v15766_v9 }
0x1bcf   :  { %11285 = vmatpush3.msra.mxu0 %v8283_v12 }
0x1bd0   :  { %11289 = vmatprep.subr.mxu0 %v15766_v9 }
0x1c78   :  { %v11254_v1 = vpop.f32.mrf.mxu0 }
0x1c79   :  { %v8186_v47 = vadd.f32 1e-12, %v11254_v1  ;;  %v8424_v1 = vsub.s32 2, %v15772_v52 }
0x1c7a   :  { %v8180_v24 = vpop.f32.mrf.mxu0 }
0x1c7b   :  { %11674 = vrsqrt.f32 %v8186_v47  ;;  %v8181_v54 = vadd.f32 1e-12, %v8180_v24  ;;  %v8412_v47 = vld [vmem:[%s8627_s5] sm:$0x7] }
0x1c7c   :  { %v8417_v24 = vrot.slane %v8412_v47, %v15770_v2 }
0x1c7d   :  { %11676 = vrsqrt.f32 %v8181_v54  ;;  %v8421_v54 = vrot.slane %v8412_v47, %v15771_v58 }
0x1c88   :  { %v11675_v17 = vpop.eup %11674 }
0x1c89   :  { %v8192_v43 = vmul.f32 %v11675_v17, %v8105_v50  ;;  %v8387_v50 = vld [vmem:[%s15690_s7 + $0x58] sm:$0xff] }
0x1c8a   :  { %v11677_v5 = vpop.eup %11676 }
0x1c8b   :  { %v8200_v19 = vmul.f32 %v9317_v18, %v8192_v43  ;;  %v8191_v38 = vmul.f32 %v11677_v5, %v8104_v15  ;;  %v8380_v15 = vld [vmem:[%s15690_s7 + $0x20] sm:$0xff] }
0x1c8d   :  { %v8208_v3 = vadd.f32 %v9318_v41, %v8200_v19  ;;  %v8199_v44 = vmul.f32 %v9317_v18, %v8191_v38  ;;  %v8425_v18 = vrot.slane %v8412_v47, %v8424_v1 }
0x1c8f   :  { %11256 = vmatpush3.msra.mxu1 %v8208_v3  ;;  %v8207_v22 = vadd.f32 %v9318_v41, %v8199_v44 }
0x1c90   :  { %11257 = vmatprep.subr.mxu1 %v15766_v9 }
0x1c91   :  { %11258 = vmatpush3.msra.mxu1 %v8207_v22 }
0x1c92   :  { %11260 = vmatmul.mubr.msk.f32.vlgmr.msra.gmra.mxu1 %vm446_vm1, %v8209_v55  ;;  %8440 = vmatprep.subr.mxu1 %v8410_v37 }
0x1c93   :  { %8496 = vmatprep.mubr.f32.mxu1 %v15766_v9  ;;  %8441 = vmatpush1.msra.mxu1 %v8409_v42 }
0x1c94   :  { %8442 = vmatprep.subr.mxu1 %v8407_v35 }
0x1c95   :  { %8443 = vmatpush1.msra.mxu1 %v8406_v46 }
0x1c96   :  { %8444 = vmatprep.subr.mxu1 %v8404_v7 }
0x1c97   :  { %8445 = vmatpush1.msra.mxu1 %v8403_v32 }
0x1c98   :  { %8446 = vmatprep.subr.mxu1 %v8401_v26 }
0x1c99   :  { %8447 = vmatpush1.msra.mxu1 %v8400_v14 }
0x1c9a   :  { %8448 = vmatprep.subr.mxu1 %v8398_v25 }
0x1c9b   :  { %8449 = vmatpush1.msra.mxu1 %v8397_v59 }
0x1c9c   :  { %8450 = vmatprep.subr.mxu1 %v8395_v34 }
0x1c9d   :  { %8451 = vmatpush1.msra.mxu1 %v8394_v4 }
0x1c9e   :  { %8452 = vmatprep.subr.mxu1 %v8392_v63 }
0x1c9f   :  { %8453 = vmatpush1.msra.mxu1 %v8391_v39 }
0x1ca0   :  { %8454 = vmatprep.subr.mxu1 %v8389_v8 }
0x1ca1   :  { %8455 = vmatpush1.msra.mxu1 %v8388_v29 }
0x1ca2   :  { %8456 = vmatprep.subr.mxu1 %v8386_v49 }
0x1ca3   :  { %8457 = vmatpush1.msra.mxu1 %v8385_v21 }
0x1ca4   :  { %8458 = vmatprep.subr.mxu1 %v8383_v11 }
0x1ca5   :  { %8459 = vmatpush1.msra.mxu1 %v8382_v33 }
0x1ca6   :  { %8460 = vmatprep.subr.mxu1 %v8380_v15 }
0x1ca7   :  { %8461 = vmatpush1.msra.mxu1 %v8379_v13 }
0x1ca8   :  { %8462 = vmatprep.subr.mxu1 %v8377_v10 }
0x1ca9   :  { %8463 = vmatpush1.msra.mxu1 %v8376_v30 }
0x1d52   :  { %v8279_v48 = vpop.f32.mrf.mxu1 }
0x1d53   :  { %11287 = vmatmul.mubr.msk.f32.vlgmr.msra.gmra.mxu0 %vm259_vm0, %v8279_v48 }
0x1d54   :  { %v11261_v6 = vpop.f32.mrf.mxu1  ;;  %11290 = vmatpush3.msra.mxu0 %v8411_v56  ;;  %11313 = vmatprep.mubr.msk.f32.mxu0 %vm11905_vm4, %v15766_v9 }
0x1d55   :  { %11291 = vmatprep.subr.mxu0 %v15766_v9 }
0x1d56   :  { %11292 = vmatpush3.msra.mxu0 %v8408_v51 }
0x1d57   :  { %11293 = vmatprep.subr.mxu0 %v15766_v9 }
0x1d58   :  { %11294 = vmatpush3.msra.mxu0 %v8405_v57 }
0x1d59   :  { %11295 = vmatprep.subr.mxu0 %v15766_v9 }
0x1d5a   :  { %11296 = vmatpush3.msra.mxu0 %v8402_v45 }
0x1d5b   :  { %11297 = vmatprep.subr.mxu0 %v15766_v9 }
0x1d5c   :  { %11298 = vmatpush3.msra.mxu0 %v8399_v60 }
0x1d5d   :  { %11299 = vmatprep.subr.mxu0 %v15766_v9 }
0x1d5e   :  { %11300 = vmatpush3.msra.mxu0 %v8396_v36 }
0x1d5f   :  { %11301 = vmatprep.subr.mxu0 %v15766_v9 }
0x1d60   :  { %11302 = vmatpush3.msra.mxu0 %v8393_v31 }
0x1d61   :  { %11303 = vmatprep.subr.mxu0 %v15766_v9 }
0x1d62   :  { %11304 = vmatpush3.msra.mxu0 %v8390_v53 }
0x1d63   :  { %11305 = vmatprep.subr.mxu0 %v15766_v9 }
0x1d64   :  { %11306 = vmatpush3.msra.mxu0 %v8387_v50 }
0x1d65   :  { %11307 = vmatprep.subr.mxu0 %v15766_v9 }
0x1d66   :  { %11308 = vmatpush3.msra.mxu0 %v8384_v23 }
0x1d67   :  { %11309 = vmatprep.subr.mxu0 %v15766_v9 }
0x1d68   :  { %11310 = vmatpush3.msra.mxu0 %v8381_v27 }
0x1d69   :  { %11311 = vmatprep.subr.mxu0 %v15766_v9  ;;  %v11911_v9 = vmov 1983009808  }
0x1d6a   :  { %11312 = vmatpush3.msra.mxu0 %v8378_v61  ;;  %v8578_v40 = vunpack.c.l.s4 %v11911_v9 }
0x1d6c   :  { %v8579_v17 = vunpack.c.0.s8 %v8578_v40 }
0x1d6e   :  { %v8582_v44 = vsub.s32 %v8579_v17, %v15772_v52 }
0x1e13   :  { %v8371_v16 = vpop.f32.mrf.mxu0 }
0x1e14   :  { %v8372_v20 = vadd.f32 %v9320_v28, %v8371_v16 }
0x1e15   :  { %v11288_v0 = vpop.f32.mrf.mxu0 }
0x1e16   :  { %11678 = vtanh.f32 %v8372_v20 }
0x1e23   :  { %v11679_v62 = vpop.eup %11678 }
0x1e24   :  { %9322 = vmatmul.mubr.msk.f32.vlgmr.msra.gmra.mxu1 %vm259_vm0, %v11679_v62  ;;  %11314 = vmatmul.mubr.msk.f32.vlgmr.msra.gmra.mxu0 %vm259_vm0, %v11679_v62 }
0x1ee4   :  { %v8498_v43 = vpop.f32.mrf.mxu1  ;;  %v8569_v5 = vpop.f32.mrf.mxu0 }
0x1ee5   :  { %v8499_v38 = vadd.f32 %v8498_v43, %v8417_v24  ;;  %v8570_v22 = vadd.f32 %v8569_v5, %v8425_v18 }
0x1ee6   :  { %v8500_v41 = vpop.f32.mrf.mxu1  ;;  %v11315_v19 = vpop.f32.mrf.mxu0 }
0x1ee7   :  { %v8501_v3 = vadd.f32 %v8500_v41, %v8421_v54  ;;  %v8590_v12 = vrot.slane %v8570_v22, %v8582_v44 }
0x1ee9   :  { %v8576_v55 = vcombine.low %v8499_v38, %v8501_v3 }
0x1eeb   :  { %v8583_v2 = vrot.slane %v8576_v55, %v8582_v44 }
0x1eed   :  { %v8591_v58 = vcombine.low %v8583_v2, %v8590_v12 }
0x1eef   :  { %8593 = vst [vmem:[%s8628_s22] sm:$0x3f] %v8591_v58 }

</bundles_post_ra>
